<compile_context>
chip_gen: v5e
topology: v5e:2x2
jax: 0.10.0
libtpu: 0.0.40
codegen_flags: <defaults>
</compile_context>

<pallas_src>
import functools

import jax
import jax.numpy as jnp
from jax.experimental import pallas as pl
from jax.experimental.pallas import tpu as pltpu

GATE_PAD = 128  # expert axis of the gate padded to one full lane width


def _moe_fnn_kernel(x_ref, w_in_ref, b1_ref, expand_ref, w2_ref, b2_ref,
                    gamma_ref, beta_ref, out_ref, imp_ref,
                    *, num_experts, fused_hid, n_valid_tokens, ln_eps):
    i = pl.program_id(0)
    tile_t = x_ref.shape[0]

    x = x_ref[...]                                    # (T, D) f32 (kept for residual)
    xb = x.astype(jnp.bfloat16)

    # ---- single fused input matmul: x @ [W1_cat | Wg] -> (T, E*H + 128) ----
    hz = jnp.dot(xb, w_in_ref[...], preferred_element_type=jnp.float32)

    # ---- gating: softmax over experts in f32 (expert axis padded to 128 lanes) ----
    logits = hz[:, fused_hid:]                        # lane-aligned slice, (T, 128)
    lane = jax.lax.broadcasted_iota(jnp.int32, logits.shape, 1)
    logits = jnp.where(lane < num_experts, logits, -1e30)
    m = jnp.max(logits, axis=-1, keepdims=True)
    p = jnp.exp(logits - m)
    gates = p * pl.reciprocal(jnp.sum(p, axis=-1, keepdims=True), approx=True)   # (T, 128)
    gates_b = gates.astype(jnp.bfloat16)

    # ---- expert hidden: ReLU(x@W1 + b1), gated by broadcast gates ----
    h = jnp.maximum(hz[:, :fused_hid] + b1_ref[...], 0.0)                         # (T, E*H)
    # broadcast gates to the fused hidden axis with a small 0/1 matmul (MXU, no relayout)
    gates_exp = jnp.dot(gates_b, expand_ref[...], preferred_element_type=jnp.float32)
    hg = (h * gates_exp).astype(jnp.bfloat16)

    # ---- output projection + gated second bias ----
    y = jnp.dot(hg, w2_ref[...], preferred_element_type=jnp.float32)              # (T, D)
    y = y + jnp.dot(gates, b2_ref[...], preferred_element_type=jnp.float32)       # sum_e g_e * b2_e

    # ---- dropout (eval mode => identity), residual, LayerNorm in f32 ----
    z = y + x
    mu = jnp.mean(z, axis=-1, keepdims=True)
    var = jnp.mean((z - mu) ** 2, axis=-1, keepdims=True)
    z_hat = (z - mu) * jax.lax.rsqrt(var + ln_eps)
    out_ref[...] = z_hat * gamma_ref[...] + beta_ref[...]

    # ---- per-tile importance partial sums (mask padded token rows) ----
    row = jax.lax.broadcasted_iota(jnp.int32, gates.shape, 0)
    valid = (i * tile_t + row) < n_valid_tokens
    gsum = jnp.sum(jnp.where(valid, gates, 0.0), axis=0, keepdims=True)           # (1, 128)
    imp_ref[...] = jnp.broadcast_to(gsum, imp_ref.shape)                          # (8, 128)


def prepare_params(params):
    """One-time fusion / padding / bf16 cast of the MoEFNN parameters (hoisted out of forward)."""
    wg, w1, b1, w2, b2 = params["wg"], params["w1"], params["b1"], params["w2"], params["b2"]
    gamma, beta = params["gamma"], params["beta"]
    D, E = wg.shape
    _, _, H = w1.shape
    assert E <= GATE_PAD
    # TODO(synk): for D or E*H not multiples of 128, add zero-padding of the fused axes
    # (and mask the LN reduction); the demo shapes are lane-dense so we just assert.
    assert D % 128 == 0 and (E * H) % 128 == 0

    wg_pad = jnp.zeros((D, GATE_PAD), jnp.float32).at[:, :E].set(wg)
    w1_cat = jnp.transpose(w1, (1, 0, 2)).reshape(D, E * H)                       # (D, E*H)
    w_in = jnp.concatenate([w1_cat, wg_pad], axis=1).astype(jnp.bfloat16)         # (D, E*H+128)

    expert_of_col = jnp.arange(E * H, dtype=jnp.int32) // H                       # (E*H,)
    expand = (jnp.arange(GATE_PAD, dtype=jnp.int32)[:, None]
              == expert_of_col[None, :]).astype(jnp.bfloat16)                     # (128, E*H)

    b1_cat = b1.reshape(1, E * H).astype(jnp.float32)
    w2_cat = w2.reshape(E * H, D).astype(jnp.bfloat16)
    b2_pad = jnp.zeros((GATE_PAD, D), jnp.float32).at[:E].set(b2.reshape(E, D))
    return {
        "w_in": w_in, "expand": expand, "b1": b1_cat,
        "w2": w2_cat, "b2": b2_pad, "gamma": gamma, "beta": beta,
        "num_experts": E, "d_in": D, "d_hid": H,
    }


def moe_fnn_forward(x, prep, *, token_tile=256, ln_eps=1e-5):
    """x: (B, S, D) float32. Returns (out (B, S, D) float32, aux_loss scalar)."""
    B, S, D = x.shape
    E, H = prep["num_experts"], prep["d_hid"]
    assert D == prep["d_in"]
    EH = E * H
    N = B * S
    n_tiles = pl.cdiv(N, token_tile)
    n_pad = n_tiles * token_tile

    x2 = x.reshape(N, D)
    if n_pad != N:
        x2 = jnp.pad(x2, ((0, n_pad - N), (0, 0)))

    kernel = functools.partial(
        _moe_fnn_kernel, num_experts=E, fused_hid=EH, n_valid_tokens=N, ln_eps=ln_eps)

    out2, imp_part = pl.pallas_call(
        kernel,
        out_shape=(jax.ShapeDtypeStruct((n_pad, D), jnp.float32),
                   jax.ShapeDtypeStruct((n_tiles * 8, GATE_PAD), jnp.float32)),
        grid_spec=pltpu.PrefetchScalarGridSpec(
            num_scalar_prefetch=0,
            grid=(n_tiles,),
            in_specs=[
                pl.BlockSpec((token_tile, D), lambda i: (i, 0)),        # x tile (f32)
                pl.BlockSpec((D, EH + GATE_PAD), lambda i: (0, 0)),     # fused [W1 | Wg] (bf16)
                pl.BlockSpec((1, EH), lambda i: (0, 0)),                # fused b1 (f32)
                pl.BlockSpec((GATE_PAD, EH), lambda i: (0, 0)),         # gate->hidden expand (bf16)
                pl.BlockSpec((EH, D), lambda i: (0, 0)),                # fused W2 (bf16)
                pl.BlockSpec((GATE_PAD, D), lambda i: (0, 0)),          # padded b2 (f32)
                pl.BlockSpec((1, D), lambda i: (0, 0)),                 # LN gamma
                pl.BlockSpec((1, D), lambda i: (0, 0)),                 # LN beta
            ],
            out_specs=[
                pl.BlockSpec((token_tile, D), lambda i: (i, 0)),        # output tile
                pl.BlockSpec((8, GATE_PAD), lambda i: (i, 0)),          # per-tile importance
            ],
        ),
        compiler_params=pltpu.CompilerParams(
            dimension_semantics=("parallel",),
            vmem_limit_bytes=32 * 1024 * 1024),
    )(x2, prep["w_in"], prep["b1"], prep["expand"],
      prep["w2"], prep["b2"], prep["gamma"], prep["beta"])

    out = out2[:N].reshape(B, S, D)

    # tiny scalar epilogue in plain JAX: cv^2 load-balance loss over summed importance
    importance = imp_part.reshape(n_tiles, 8, GATE_PAD)[:, 0, :E].sum(axis=0)     # (E,)
    if E > 1:
        loss = jnp.var(importance, ddof=1) / (jnp.mean(importance) ** 2 + 1e-10)
    else:
        loss = jnp.float32(0.0)
    return out, loss


def init_params(key, d_in, num_experts, d_hid):
    ks = jax.random.split(key, 5)
    scale = 0.02
    return {
        "wg": scale * jax.random.normal(ks[0], (d_in, num_experts), jnp.float32),
        "w1": scale * jax.random.normal(ks[1], (num_experts, d_in, d_hid), jnp.float32),
        "b1": jnp.zeros((num_experts, 1, d_hid), jnp.float32),
        "w2": scale * jax.random.normal(ks[2], (num_experts, d_hid, d_in), jnp.float32),
        "b2": jnp.zeros((num_experts, 1, d_in), jnp.float32),
        "gamma": jnp.ones((1, d_in), jnp.float32),
        "beta": jnp.zeros((1, d_in), jnp.float32),
    }


if __name__ == "__main__":
    # TODO(synk): dropout implemented in eval mode (identity); train-mode RNG dropout omitted.
    B, S, D = 2, 200, 128       # batch, seq, d_in (lane-dense D; N=400 exercises tile padding)
    E, H = 4, 256               # num_experts, d_hid
    key = jax.random.PRNGKey(0)
    kx, kp = jax.random.split(key)
    x = jax.random.normal(kx, (B, S, D), jnp.float32)
    params = init_params(kp, D, E, H)
    prep = prepare_params(params)           # one-time weight fusion / padding / bf16 cast

    out, loss = moe_fnn_forward(x, prep, token_tile=256)
    jax.block_until_ready(out)
    jax.block_until_ready(loss)
    assert out.shape == (B, S, D)
    assert jnp.isfinite(out).all() and jnp.isfinite(loss)
    print("KERNEL_OK")
</pallas_src>

<mosaic_0001>
module attributes {stable_mosaic.version = 11 : i64} {
  func.func @_moe_fnn_kernel(%arg0: i32, %arg1: memref<256x128xf32, #tpu.memory_space<vmem>>, %arg2: memref<128x1152xbf16, #tpu.memory_space<vmem>>, %arg3: memref<1x1024xf32, #tpu.memory_space<vmem>>, %arg4: memref<128x1024xbf16, #tpu.memory_space<vmem>>, %arg5: memref<1024x128xbf16, #tpu.memory_space<vmem>>, %arg6: memref<128x128xf32, #tpu.memory_space<vmem>>, %arg7: memref<1x128xf32, #tpu.memory_space<vmem>>, %arg8: memref<1x128xf32, #tpu.memory_space<vmem>>, %arg9: memref<256x128xf32, #tpu.memory_space<vmem>>, %arg10: memref<8x128xf32, #tpu.memory_space<vmem>>) attributes {dimension_semantics = [#tpu.dimension_semantics<parallel>], iteration_bounds = array<i64: 2>, scalar_prefetch = 0 : i64, scratch_operands = 0 : i64, tpu.core_type = #tpu.core_type<tc>, window_params = [{transform_indices = @transform_0, window_bounds = array<i64: 256, 128>}, {pipeline_mode = #tpu.pipeline_mode<synchronous>, transform_indices = @transform_1, window_bounds = array<i64: 128, 1152>}, {pipeline_mode = #tpu.pipeline_mode<synchronous>, transform_indices = @transform_2, window_bounds = array<i64: 1, 1024>}, {pipeline_mode = #tpu.pipeline_mode<synchronous>, transform_indices = @transform_3, window_bounds = array<i64: 128, 1024>}, {pipeline_mode = #tpu.pipeline_mode<synchronous>, transform_indices = @transform_4, window_bounds = array<i64: 1024, 128>}, {pipeline_mode = #tpu.pipeline_mode<synchronous>, transform_indices = @transform_5, window_bounds = array<i64: 128, 128>}, {pipeline_mode = #tpu.pipeline_mode<synchronous>, transform_indices = @transform_6, window_bounds = array<i64: 1, 128>}, {pipeline_mode = #tpu.pipeline_mode<synchronous>, transform_indices = @transform_7, window_bounds = array<i64: 1, 128>}, {transform_indices = @transform_8, window_bounds = array<i64: 256, 128>}, {transform_indices = @transform_9, window_bounds = array<i64: 8, 128>}]} {
    %c0 = arith.constant 0 : index
    %c0_0 = arith.constant 0 : index
    %0 = vector.load %arg1[%c0, %c0_0] : memref<256x128xf32, #tpu.memory_space<vmem>>, vector<256x128xf32>
    %1 = arith.truncf %0 : vector<256x128xf32> to vector<256x128xbf16>
    %c0_1 = arith.constant 0 : index
    %c0_2 = arith.constant 0 : index
    %2 = vector.load %arg2[%c0_1, %c0_2] : memref<128x1152xbf16, #tpu.memory_space<vmem>>, vector<128x1152xbf16>
    %cst = arith.constant dense<0.000000e+00> : vector<256x1152xf32>
    %3 = tpu.matmul %1, %2, %cst {dimension_numbers = #tpu.dot_dimension_numbers<[1], [0], [0], [1], [0, 0, 1, 1], [], []>} : vector<256x128xbf16>, vector<128x1152xbf16>, vector<256x1152xf32> -> vector<256x1152xf32>
    %4 = vector.extract_strided_slice %3 {offsets = [0, 1024], sizes = [256, 128], strides = [1, 1]} : vector<256x1152xf32> to vector<256x128xf32>
    %5 = tpu.iota {dimensions = array<i32: 1>} : vector<256x128xi32>
    %c4_i32 = arith.constant 4 : i32
    %6 = vector.broadcast %c4_i32 : i32 to vector<256x128xi32>
    %7 = arith.cmpi slt, %5, %6 : vector<256x128xi32>
    %cst_3 = arith.constant -1.000000e+30 : f32
    %8 = vector.broadcast %cst_3 : f32 to vector<256x128xf32>
    %9 = arith.select %7, %4, %8 : vector<256x128xi1>, vector<256x128xf32>
    %cst_4 = arith.constant dense<0xFF800000> : vector<256xf32>
    %10 = vector.multi_reduction <maximumf>, %9, %cst_4 [1] : vector<256x128xf32> to vector<256xf32>
    %11 = vector.shape_cast %10 : vector<256xf32> to vector<256x1xf32>
    %12 = vector.broadcast %11 : vector<256x1xf32> to vector<256x128xf32>
    %13 = arith.subf %9, %12 : vector<256x128xf32>
    %14 = math.exp %13 : vector<256x128xf32>
    %cst_5 = arith.constant dense<0.000000e+00> : vector<256xf32>
    %15 = vector.multi_reduction <add>, %14, %cst_5 [1] : vector<256x128xf32> to vector<256xf32>
    %16 = vector.shape_cast %15 : vector<256xf32> to vector<256x1xf32>
    %17 = tpu.reciprocal %16 {approx = true} : vector<256x1xf32> -> vector<256x1xf32>
    %18 = vector.broadcast %17 : vector<256x1xf32> to vector<256x128xf32>
    %19 = arith.mulf %14, %18 : vector<256x128xf32>
    %20 = arith.truncf %19 : vector<256x128xf32> to vector<256x128xbf16>
    %21 = vector.extract_strided_slice %3 {offsets = [0, 0], sizes = [256, 1024], strides = [1, 1]} : vector<256x1152xf32> to vector<256x1024xf32>
    %c0_6 = arith.constant 0 : index
    %c0_7 = arith.constant 0 : index
    %22 = vector.load %arg3[%c0_6, %c0_7] : memref<1x1024xf32, #tpu.memory_space<vmem>>, vector<1x1024xf32>
    %23 = vector.broadcast %22 : vector<1x1024xf32> to vector<256x1024xf32>
    %24 = arith.addf %21, %23 : vector<256x1024xf32>
    %cst_8 = arith.constant 0.000000e+00 : f32
    %25 = vector.broadcast %cst_8 : f32 to vector<256x1024xf32>
    %26 = arith.maximumf %24, %25 : vector<256x1024xf32>
    %c0_9 = arith.constant 0 : index
    %c0_10 = arith.constant 0 : index
    %27 = vector.load %arg4[%c0_9, %c0_10] : memref<128x1024xbf16, #tpu.memory_space<vmem>>, vector<128x1024xbf16>
    %cst_11 = arith.constant dense<0.000000e+00> : vector<256x1024xf32>
    %28 = tpu.matmul %20, %27, %cst_11 {dimension_numbers = #tpu.dot_dimension_numbers<[1], [0], [0], [1], [0, 0, 1, 1], [], []>} : vector<256x128xbf16>, vector<128x1024xbf16>, vector<256x1024xf32> -> vector<256x1024xf32>
    %29 = arith.mulf %26, %28 : vector<256x1024xf32>
    %30 = arith.truncf %29 : vector<256x1024xf32> to vector<256x1024xbf16>
    %c0_12 = arith.constant 0 : index
    %c0_13 = arith.constant 0 : index
    %31 = vector.load %arg5[%c0_12, %c0_13] : memref<1024x128xbf16, #tpu.memory_space<vmem>>, vector<1024x128xbf16>
    %cst_14 = arith.constant dense<0.000000e+00> : vector<256x128xf32>
    %32 = tpu.matmul %30, %31, %cst_14 {dimension_numbers = #tpu.dot_dimension_numbers<[1], [0], [0], [1], [0, 0, 1, 1], [], []>} : vector<256x1024xbf16>, vector<1024x128xbf16>, vector<256x128xf32> -> vector<256x128xf32>
    %c0_15 = arith.constant 0 : index
    %c0_16 = arith.constant 0 : index
    %33 = vector.load %arg6[%c0_15, %c0_16] : memref<128x128xf32, #tpu.memory_space<vmem>>, vector<128x128xf32>
    %cst_17 = arith.constant dense<0.000000e+00> : vector<256x128xf32>
    %34 = tpu.matmul %19, %33, %cst_17 {dimension_numbers = #tpu.dot_dimension_numbers<[1], [0], [0], [1], [0, 0, 1, 1], [], []>} : vector<256x128xf32>, vector<128x128xf32>, vector<256x128xf32> -> vector<256x128xf32>
    %35 = arith.addf %32, %34 : vector<256x128xf32>
    %36 = arith.addf %35, %0 : vector<256x128xf32>
    %cst_18 = arith.constant dense<0.000000e+00> : vector<256xf32>
    %37 = vector.multi_reduction <add>, %36, %cst_18 [1] : vector<256x128xf32> to vector<256xf32>
    %38 = vector.shape_cast %37 : vector<256xf32> to vector<256x1xf32>
    %cst_19 = arith.constant 1.280000e+02 : f32
    %39 = vector.broadcast %cst_19 : f32 to vector<256x1xf32>
    %40 = arith.divf %38, %39 : vector<256x1xf32>
    %41 = vector.broadcast %40 : vector<256x1xf32> to vector<256x128xf32>
    %42 = arith.subf %36, %41 : vector<256x128xf32>
    %43 = arith.mulf %42, %42 : vector<256x128xf32>
    %cst_20 = arith.constant dense<0.000000e+00> : vector<256xf32>
    %44 = vector.multi_reduction <add>, %43, %cst_20 [1] : vector<256x128xf32> to vector<256xf32>
    %45 = vector.shape_cast %44 : vector<256xf32> to vector<256x1xf32>
    %cst_21 = arith.constant 1.280000e+02 : f32
    %46 = vector.broadcast %cst_21 : f32 to vector<256x1xf32>
    %47 = arith.divf %45, %46 : vector<256x1xf32>
    %48 = vector.broadcast %40 : vector<256x1xf32> to vector<256x128xf32>
    %49 = arith.subf %36, %48 : vector<256x128xf32>
    %cst_22 = arith.constant 9.99999974E-6 : f32
    %50 = vector.broadcast %cst_22 : f32 to vector<256x1xf32>
    %51 = arith.addf %47, %50 : vector<256x1xf32>
    %52 = math.rsqrt %51 : vector<256x1xf32>
    %53 = vector.broadcast %52 : vector<256x1xf32> to vector<256x128xf32>
    %54 = arith.mulf %49, %53 : vector<256x128xf32>
    %c0_23 = arith.constant 0 : index
    %c0_24 = arith.constant 0 : index
    %55 = vector.load %arg7[%c0_23, %c0_24] : memref<1x128xf32, #tpu.memory_space<vmem>>, vector<1x128xf32>
    %56 = vector.broadcast %55 : vector<1x128xf32> to vector<256x128xf32>
    %57 = arith.mulf %54, %56 : vector<256x128xf32>
    %c0_25 = arith.constant 0 : index
    %c0_26 = arith.constant 0 : index
    %58 = vector.load %arg8[%c0_25, %c0_26] : memref<1x128xf32, #tpu.memory_space<vmem>>, vector<1x128xf32>
    %59 = vector.broadcast %58 : vector<1x128xf32> to vector<256x128xf32>
    %60 = arith.addf %57, %59 : vector<256x128xf32>
    %c0_27 = arith.constant 0 : index
    %c0_28 = arith.constant 0 : index
    %61 = vector.load %arg9[%c0_27, %c0_28] : memref<256x128xf32, #tpu.memory_space<vmem>>, vector<256x128xf32>
    tpu.vector_store %arg9[%c0_27, %c0_28], %60 {strides = array<i32>} : memref<256x128xf32, #tpu.memory_space<vmem>>, vector<256x128xf32>,
    %62 = tpu.iota {dimensions = array<i32: 0>} : vector<256x128xi32>
    %c256_i32 = arith.constant 256 : i32
    %63 = arith.muli %arg0, %c256_i32 : i32
    %64 = vector.broadcast %63 : i32 to vector<256x128xi32>
    %65 = arith.addi %64, %62 : vector<256x128xi32>
    %c400_i32 = arith.constant 400 : i32
    %66 = vector.broadcast %c400_i32 : i32 to vector<256x128xi32>
    %67 = arith.cmpi slt, %65, %66 : vector<256x128xi32>
    %cst_29 = arith.constant 0.000000e+00 : f32
    %68 = vector.broadcast %cst_29 : f32 to vector<256x128xf32>
    %69 = arith.select %67, %19, %68 : vector<256x128xi1>, vector<256x128xf32>
    %cst_30 = arith.constant dense<0.000000e+00> : vector<128xf32>
    %70 = vector.multi_reduction <add>, %69, %cst_30 [0] : vector<256x128xf32> to vector<128xf32>
    %71 = vector.shape_cast %70 : vector<128xf32> to vector<1x128xf32>
    %72 = vector.shape_cast %71 : vector<1x128xf32> to vector<1x128xf32>
    %73 = vector.broadcast %72 : vector<1x128xf32> to vector<8x128xf32>
    %c0_31 = arith.constant 0 : index
    %c0_32 = arith.constant 0 : index
    %74 = vector.load %arg10[%c0_31, %c0_32] : memref<8x128xf32, #tpu.memory_space<vmem>>, vector<8x128xf32>
    tpu.vector_store %arg10[%c0_31, %c0_32], %73 {strides = array<i32>} : memref<8x128xf32, #tpu.memory_space<vmem>>, vector<8x128xf32>,
    return
  }
  func.func @transform_0(%arg0: i32) -> (i32, i32) {
    %c0_i32 = arith.constant 0 : i32
    %c0_i32_0 = arith.constant 0 : i32
    return %arg0, %c0_i32 : i32, i32
  }
  func.func @transform_1(%arg0: i32) -> (i32, i32) {
    %c0_i32 = arith.constant 0 : i32
    %c0_i32_0 = arith.constant 0 : i32
    %c0_i32_1 = arith.constant 0 : i32
    return %c0_i32, %c0_i32_0 : i32, i32
  }
  func.func @transform_2(%arg0: i32) -> (i32, i32) {
    %c0_i32 = arith.constant 0 : i32
    %c0_i32_0 = arith.constant 0 : i32
    %c0_i32_1 = arith.constant 0 : i32
    return %c0_i32, %c0_i32_0 : i32, i32
  }
  func.func @transform_3(%arg0: i32) -> (i32, i32) {
    %c0_i32 = arith.constant 0 : i32
    %c0_i32_0 = arith.constant 0 : i32
    %c0_i32_1 = arith.constant 0 : i32
    return %c0_i32, %c0_i32_0 : i32, i32
  }
  func.func @transform_4(%arg0: i32) -> (i32, i32) {
    %c0_i32 = arith.constant 0 : i32
    %c0_i32_0 = arith.constant 0 : i32
    %c0_i32_1 = arith.constant 0 : i32
    return %c0_i32, %c0_i32_0 : i32, i32
  }
  func.func @transform_5(%arg0: i32) -> (i32, i32) {
    %c0_i32 = arith.constant 0 : i32
    %c0_i32_0 = arith.constant 0 : i32
    %c0_i32_1 = arith.constant 0 : i32
    return %c0_i32, %c0_i32_0 : i32, i32
  }
  func.func @transform_6(%arg0: i32) -> (i32, i32) {
    %c0_i32 = arith.constant 0 : i32
    %c0_i32_0 = arith.constant 0 : i32
    %c0_i32_1 = arith.constant 0 : i32
    return %c0_i32, %c0_i32_0 : i32, i32
  }
  func.func @transform_7(%arg0: i32) -> (i32, i32) {
    %c0_i32 = arith.constant 0 : i32
    %c0_i32_0 = arith.constant 0 : i32
    %c0_i32_1 = arith.constant 0 : i32
    return %c0_i32, %c0_i32_0 : i32, i32
  }
  func.func @transform_8(%arg0: i32) -> (i32, i32) {
    %c0_i32 = arith.constant 0 : i32
    %c0_i32_0 = arith.constant 0 : i32
    return %arg0, %c0_i32 : i32, i32
  }
  func.func @transform_9(%arg0: i32) -> (i32, i32) {
    %c0_i32 = arith.constant 0 : i32
    %c0_i32_0 = arith.constant 0 : i32
    return %arg0, %c0_i32 : i32, i32
  }
}

</mosaic_0001>

<bundles_post_ra>
// kernel: tpu_custom_call.1
= control target key start
LH: loop header
LB: loop body
LE: loop exit
PB: predicated region body
PF: predicated region fallthrough
CT: control target
= control target key end

     0   :  { %s12488_s0 = inlined_call_operand.hbm [shape: f32[512,128], index: 0, kind: input, shape index: {}]   ;;  %s12489_s1 = inlined_call_operand.hbm [shape: bf16[128,1152], index: 1, kind: input, shape index: {}]   ;;  %s12490_s2 = inlined_call_operand.hbm [shape: f32[1,1024], index: 2, kind: input, shape index: {}]   ;;  %s12491_s3 = inlined_call_operand.hbm [shape: bf16[128,1024], index: 3, kind: input, shape index: {}]   ;;  %s12492_s4 = inlined_call_operand.hbm [shape: bf16[1024,128], index: 4, kind: input, shape index: {}]   ;;  %s12493_s5 = inlined_call_operand.hbm [shape: f32[128,128], index: 5, kind: input, shape index: {}]   ;;  %s12494_s6 = inlined_call_operand.vmem [shape: f32[1,128], index: 6, kind: input, shape index: {}]   ;;  %s12495_s7 = inlined_call_operand.vmem [shape: f32[1,128], index: 7, kind: input, shape index: {}]   ;;  %s12496_s8 = inlined_call_operand.hbm [shape: f32[512,128], index: 8, kind: output, shape index: {0}]   ;;  %s12497_s9 = inlined_call_operand.hbm [shape: f32[16,128], index: 9, kind: output, shape index: {1}]  }
   0x1   :  { %12765 = sst [smem:[#allocation307_spill]] %s12489_s1 }
   0x2   :  { %12766 = sst [smem:[#allocation308_spill]] %s12490_s2 }
   0x3   :  { %12767 = sst [smem:[#allocation309_spill]] %s12491_s3 }
   0x4   :  { %15 = vsyncpa [#allocation3], 0 }
   0x5   :  { %17 = vsyncpa [#allocation3 + $0x1], 0 }
   0x6   :  { %18 = vsyncpa [#allocation6], 0 }
   0x7   :  { %19 = vsyncpa [#allocation9], 0 }
   0x8   :  { %20 = vsyncpa [#allocation12], 0 }
   0x9   :  { %21 = vsyncpa [#allocation4], 0 }
   0xa   :  { %23 = vsyncpa [#allocation4 + $0x1], 0 }
   0xb   :  { %24 = vsyncpa [#allocation15], 0 }
   0xc   :  { %26 = vsyncpa [#allocation15 + $0x1], 0  ;;  %s8335_s30 = smov 0   ;;  %s8337_s10 = smov 0  }
   0xd   :  { %s8339_s11 = smov 0   ;;  %s8341_s12 = smov 0  }
   0xe LB: > { %s12768_s1 = sld [smem:[#allocation307_spill]]  ;;  %s8359_s16 = sadd.s32 4294967295, %s8267_s12   ;;  %s8267_s12 = sphi %s8341_s12, %s13898_s12   ;;  %s8263_s11 = sphi %s8339_s11, %s13897_s11   ;;  %s8259_s10 = sphi %s8337_s10, %s13896_s10   ;;  %s8255_s30 = sphi %s8335_s30, %s13895_s30  }
   0xf   : > { %p6588_p0 = scmp.ge.s32.totalorder %s8267_s12, 1  ;;  %p53_p1 = scmp.eq.s32.totalorder %s8359_s16, 0 }
  0x10   : > { %p262_p2 = scmp.lt.s32.totalorder %s8267_s12, 3  ;;  %s8269_s18 = smov [#allocation5]  }
  0x11   : > { %s275_s19 = sshll.u32 %s8269_s18, 4  ;;  %s12770_s3 = sld [smem:[#allocation309_spill]]  ;;  %s276_s19 = int_to_ptr.vmem [resolvable:$true] %s275_s19 }
  0x12   : > { %p8364_p3 = pnand %p6588_p0, %p262_p2  ;;  %s8270_s24 = smov [#allocation8]  }
  0x13   : > { %s301_s25 = sshll.u32 %s8270_s24, 4  ;;  %s8271_s26 = smov 576   ;;  %s302_s25 = int_to_ptr.vmem [resolvable:$true] %s301_s25 }
  0x14   : > { %s273_s15 = sshll.u32 %s12768_s1, 4  ;;  %p7659_p4 = pneg %p8364_p3  ;;  %s274_s15 = int_to_ptr.hbm [resolvable:$true] %s273_s15 }
  0x15   : > { %s8272_s27 = smov 36   ;;  %s8273_s28 = smov 512  }
  0x16   : > { %p8376_p6 = pnand %p7659_p4, %p53_p1  ;;  %s8274_s29 = smov 32  }
  0x17   : > { %s299_s22 = sshll.u32 %s12770_s3, 4  ;;  %s12772_s2 = sld [smem:[#allocation308_spill]]  ;;  %s300_s22 = int_to_ptr.hbm [resolvable:$true] %s299_s22 }
  0x18   : > { %7662 = dma.hbm_to_vmem [thread:$0]  (!%p8376_p6), %s274_s15, 9216, %s276_s19, [#allocation6], %s8271_s26, %s8271_s26, %s8272_s27  }
  0x19   : > { %7668 = dma.hbm_to_vmem [thread:$0]  (!%p8376_p6), %s300_s22, 8192, %s302_s25, [#allocation9], %s8273_s28, %s8273_s28, %s8274_s29  }
  0x1a   : > { %s8275_s20 = smov [#allocation7]   ;;  %s313_s3 = sshll.u32 %s12492_s4, 4  ;;  %s314_s3 = int_to_ptr.hbm [resolvable:$true] %s313_s3 }
  0x1b   : > { %s290_s21 = sshll.u32 %s8275_s20, 4  ;;  %s8276_s15 = smov [#allocation10]   ;;  %s291_s21 = int_to_ptr.vmem [resolvable:$true] %s290_s21 }
  0x1c   : > { %s315_s19 = sshll.u32 %s8276_s15, 4  ;;  %s8277_s22 = smov 64   ;;  %s316_s19 = int_to_ptr.vmem [resolvable:$true] %s315_s19 }
  0x1d   : > { %s288_s18 = sshll.u32 %s12772_s2, 4  ;;  %s8278_s25 = smov 4   ;;  %s289_s18 = int_to_ptr.hbm [resolvable:$true] %s288_s18 }
  0x1e   : > { %7665 = dma.hbm_to_vmem [thread:$0]  (!%p8376_p6), %s289_s18, 128, %s291_s21, [#allocation6]  }
  0x1f   : > { %7671 = dma.hbm_to_vmem [thread:$0]  (!%p8376_p6), %s314_s3, 8192, %s316_s19, [#allocation9], %s8277_s22, %s8277_s22, %s8278_s25  }
  0x20   : > { %s327_s27 = sshll.u32 %s12493_s5, 4  ;;  %s8279_s28 = smov [#allocation11]   ;;  %s328_s27 = int_to_ptr.hbm [resolvable:$true] %s327_s27 }
  0x21   : > { %s329_s29 = sshll.u32 %s8279_s28, 4  ;;  %s12498_s13 = smov 128   ;;  %s330_s29 = int_to_ptr.vmem [resolvable:$true] %s329_s29 }
  0x22   : > { %s12499_s14 = smov 8   ;;  %s6587_s3 = sadd.s32 4294967294, %s8267_s12  }
  0x23   : > { %7674 = dma.hbm_to_vmem [thread:$0]  (!%p8376_p6), %s328_s27, 2048, %s330_s29, [#allocation12], %s12498_s13, %s12498_s13, %s12499_s14  }
  0x24   : > { %s8404_s18 = sadd.s32 1, %s8267_s12   ;;  %s39_s20 = sadd.s32 1, %s8263_s11 }
  0x25   : > { %s36_s21 = ssub.s32 %s8267_s12, %s8404_s18  ;;  %p46_p7 = scmp.ne.s32.totalorder %s8263_s11, %s8259_s10 }
  0x26   : > { %p37_p8 = scmp.eq.s32.totalorder %s36_s21, 0  ;;  %p47_p9 = scmp.eq.s32.totalorder %s8267_s12, 0 }
  0x27   : > { %p52_p10 = scmp.ne.s32.totalorder %s8259_s10, %s8255_s30  ;;  %p223_p11 = scmp.eq.s32.totalorder %s8359_s16, 1 }
  0x28   : > { %s8416_s24 = scalar_select %p37_p8, %s8263_s11, %s39_s20  }
  0x29   : > { %p8420_p12 = por %p53_p1, %p52_p10  ;;  %p8424_p13 = por %p223_p11, %p46_p7 }
  0x2a   : > { %p229_p0 = scmp.eq.s32.totalorder %s6587_s3, 1  ;;  %p48_p2 = por %p47_p9, %p46_p7 }
  0x2b   : > { %s349_s19 = sand.u32 1, %s8263_s11   ;;  %p7691_p6 = scmp.lt.s32.totalorder %s8267_s12, 2 }
  0x2c   : > { %p8429_p4 = por %p229_p0, %p52_p10  ;;  %s6595_s25 = sshll.u32 %s349_s19, 8 }
  0x2d   : > { %s7415_s1 = sshll.u32 %s8267_s12, 8  ;;  %s353_s20 = scalar_lea.vmem [#allocation2], %s6595_s25 }
  0x2e   : > { %s358_s28 = scalar_lea.hbm %s12488_s0, %s7415_s1  ;;  %s361_s21 = sshll.u32 %s353_s20, 4  ;;  %s362_s21 = int_to_ptr.vmem [resolvable:$true] %s361_s21 }
  0x2f   : > { %s359_s29 = sshll.u32 %s358_s28, 4  ;;  %p8438_p8 = pnand %p7691_p6, %p48_p2  ;;  %s360_s29 = int_to_ptr.hbm [resolvable:$true] %s359_s29 }
  0x30   : > { %s350_s13 = scalar_lea.sflag [#allocation3], %s349_s19  ;;  %s8127_s14 = sshra.s32 %s360_s29, 4  ;;  %s8128_s14 = int_to_ptr.hbm [resolvable:$true] %s8127_s14 }
  0x31   : > { %s8129_s2 = scalar_lea.hbm %s8128_s14, 256  ;;  %p8131_p9 = pneg %p8438_p8 }
  0x32   : > { %p8130_p7 = scmp.ne.s32.totalorder %s8128_s14, %s8129_s2  ;;  %s8134_s25 = scalar_lea.hbm %s12488_s0, 512 }
  0x33   : > { %p8135_p0 = scmp.lt.s32.totalorder %s8128_s14, %s12488_s0  ;;  %p8136_p2 = scmp.lt.s32.totalorder %s8134_s25, %s8129_s2 }
  0x34   : > { %p8132_p10 = pnand %p8131_p9, %p8130_p7 }
  0x35   : > { %p8137_p6 = por %p8136_p2, %p8135_p0 }
  0x36   : > { %p8133_p11 = pneg %p8132_p10 }
  0x38   : > { %p8138_p5 = pnand %p8137_p6, %p8133_p11 }
  0x3a   : > { %8141 = shalt.err (!%p8138_p5)
}
  0x3b   : > { %s12777_s19 = smov 8   ;;  %s12778_s20 = smov 128  }
  0x3c   : > { %7678 = dma.hbm_to_vmem [thread:$0]  (!%p8438_p8), %s360_s29, 4096, %s362_s21, %s350_s13, %s12778_s20, %s12778_s20, %s12777_s19  }
  0x3d   : > { %373 = sbr.rel (%p8364_p3) target bundleno = 2750 (0xabe), region = 52 }
  0x42   : > { %s8458_s1 = sand.u32 1, %s8259_s10  }
  0x43   : > { %s6599_s2 = sshll.u32 %s8458_s1, 8  ;;  %s376_s14 = scalar_lea.sflag [#allocation3], %s8458_s1 }
  0x44   : > { %s8464_s26 = scalar_lea.vmem [#allocation2], %s6599_s2 }
  0x45   : > { %8230 = dma.done.wait (%p8420_p12), %s376_s14, 4096  }
  0x46   : > { %8232 = vsyncadd (%p8420_p12), %s376_s14, 4294963200 }
  0x47   : > { %8234 = dma.done.wait (%p53_p1), [#allocation6], 9344  }
  0x48   : > { %8236 = vsyncadd (%p53_p1), [#allocation6], 4294957952 }
  0x49   : > { %8238 = dma.done.wait (%p53_p1), [#allocation9], 16384  }
  0x4a   : > { %8240 = vsyncadd (%p53_p1), [#allocation9], 4294950912 }
  0x4b   : > { %8242 = dma.done.wait (%p53_p1), [#allocation12], 2048  }
  0x4c   : > { %8244 = vsyncadd (%p53_p1), [#allocation12], 4294965248  ;;  %v6861_v0 = vld [vmem:[#allocation5 + $0x1f8] sm:$0xf]  ;;  %v7483_v1 = vld [vmem:[#allocation5 + $0x218] sm:$0xf0] }
  0x4d   : > { %v6825_v2 = vld [vmem:[#allocation5 + $0x1b0] sm:$0xf]  ;;  %v6862_v3 = vor.u32 %v7483_v1, %v6861_v0  ;;  %v7474_v4 = vld [vmem:[#allocation5 + $0x1d0] sm:$0xf0]  ;;  %v6789_v6 = vld [vmem:[#allocation5 + $0x168] sm:$0xf] }
  0x4e   : > { %v6826_v5 = vor.u32 %v7474_v4, %v6825_v2  ;;  %v7465_v7 = vld [vmem:[#allocation5 + $0x188] sm:$0xf0]  ;;  %v6753_v9 = vld [vmem:[#allocation5 + $0x120] sm:$0xf]  ;;  %v7456_v10 = vld [vmem:[#allocation5 + $0x140] sm:$0xf0] }
  0x4f   : > { %943 = vmatpush.bf16.msra.mxu0 %v6862_v3  ;;  %7617 = vmatpush.bf16.msra.mxu2 %v6862_v3  ;;  %v6790_v8 = vor.u32 %v7465_v7, %v6789_v6  ;;  %v6754_v11 = vor.u32 %v7456_v10, %v6753_v9  ;;  %v6717_v12 = vld [vmem:[#allocation5 + $0xd8] sm:$0xf]  ;;  %v7447_v13 = vld [vmem:[#allocation5 + $0xf8] sm:$0xf0]  ;;  %v6681_v15 = vld [vmem:[#allocation5 + $0x90] sm:$0xf] }
  0x50   : > { %v6718_v14 = vor.u32 %v7447_v13, %v6717_v12  ;;  %v7438_v16 = vld [vmem:[#allocation5 + $0xb0] sm:$0xf0]  ;;  %v6645_v18 = vld [vmem:[#allocation5 + $0x48] sm:$0xf]  ;;  %v7429_v19 = vld [vmem:[#allocation5 + $0x68] sm:$0xf0] }
  0x51   : > { %v6682_v17 = vor.u32 %v7438_v16, %v6681_v15  ;;  %v6646_v20 = vor.u32 %v7429_v19, %v6645_v18  ;;  %v6609_v21 = vld [vmem:[#allocation5] sm:$0xf]  ;;  %v7420_v22 = vld [vmem:[#allocation5 + $0x20] sm:$0xf0]  ;;  %v6877_v23 = vld [vmem:[#allocation5 + $0x208] sm:$0xf] }
  0x52   : > { %v7485_v24 = vld [vmem:[#allocation5 + $0x228] sm:$0xf0]  ;;  %v6610_v25 = vor.u32 %v7420_v22, %v6609_v21  ;;  %v447_v26 = vld [vmem:[%s8464_s26] sm:$0xff]  ;;  %v6805_v33 = vld [vmem:[#allocation5 + $0x178] sm:$0xf]  ;;  %s7407_s17 = sshll.u32 %s8359_s16, 8 }
  0x53   : > { %944 = vmatpush.bf16.msra.mxu0 %v6826_v5  ;;  %7618 = vmatpush.bf16.msra.mxu2 %v6826_v5  ;;  %v448_v27 = vld [vmem:[%s8464_s26 + $0x8] sm:$0xff]  ;;  %v6878_v28 = vor.u32 %v7485_v24, %v6877_v23  ;;  %v6841_v29 = vld [vmem:[#allocation5 + $0x1c0] sm:$0xf]  ;;  %v7476_v30 = vld [vmem:[#allocation5 + $0x1e0] sm:$0xf0]  ;;  %s6606_s13 = sshll.u32 %s8458_s1, 3 }
  0x54   : > { %v8484_v31 = vpack.c.bf16 %v448_v27, %v447_v26  ;;  %v6842_v32 = vor.u32 %v7476_v30, %v6841_v29  ;;  %v7467_v34 = vld [vmem:[#allocation5 + $0x198] sm:$0xf0]  ;;  %v449_v36 = vld [vmem:[%s8464_s26 + $0x10] sm:$0xff]  ;;  %v451_v42 = vld [vmem:[%s8464_s26 + $0x20] sm:$0xff]  ;;  %s10433_s23 = scalar_lea.vmem [#allocation14], %s6606_s13  ;;  %s12173_s27 = scalar_lea.vmem [#allocation13], %s6599_s2 }
  0x55   : > { %v6806_v35 = vor.u32 %v7467_v34, %v6805_v33  ;;  %v450_v37 = vld [vmem:[%s8464_s26 + $0x18] sm:$0xff]  ;;  %v6769_v39 = vld [vmem:[#allocation5 + $0x130] sm:$0xf]  ;;  %v7458_v40 = vld [vmem:[#allocation5 + $0x150] sm:$0xf0]  ;;  %s7412_s28 = sshll.u32 %s8359_s16, 3 }
  0x56   : > { %v8489_v38 = vpack.c.bf16 %v450_v37, %v449_v36  ;;  %v6770_v41 = vor.u32 %v7458_v40, %v6769_v39  ;;  %v452_v43 = vld [vmem:[%s8464_s26 + $0x28] sm:$0xff]  ;;  %v453_v48 = vld [vmem:[%s8464_s26 + $0x30] sm:$0xff]  ;;  %v454_v49 = vld [vmem:[%s8464_s26 + $0x38] sm:$0xff]  ;;  %s6431_s2 = scalar_lea.hbm %s12497_s9, %s7412_s28  ;;  %s6433_s14 = sshll.u32 %s10433_s23, 4  ;;  %s6434_s14 = int_to_ptr.vmem [resolvable:$true] %s6433_s14 }
  0x57   : > { %945 = vmatpush.bf16.msra.mxu0 %v6790_v8  ;;  %7619 = vmatpush.bf16.msra.mxu2 %v6790_v8  ;;  %v8494_v44 = vpack.c.bf16 %v452_v43, %v451_v42  ;;  %v6733_v45 = vld [vmem:[#allocation5 + $0xe8] sm:$0xf]  ;;  %v7449_v46 = vld [vmem:[#allocation5 + $0x108] sm:$0xf0]  ;;  %v8499_v50 = vpack.c.bf16 %v454_v49, %v453_v48  ;;  %v6697_v51 = vld [vmem:[#allocation5 + $0xa0] sm:$0xf] }
  0x58   : > { %v6734_v47 = vor.u32 %v7449_v46, %v6733_v45  ;;  %v7440_v52 = vld [vmem:[#allocation5 + $0xc0] sm:$0xf0]  ;;  %v456_v55 = vld [vmem:[%s8464_s26 + $0x48] sm:$0xff]  ;;  %v6661_v57 = vld [vmem:[#allocation5 + $0x58] sm:$0xf]  ;;  %s6404_s13 = scalar_lea.sflag [#allocation15], %s8458_s1 }
  0x59   : > { %v6698_v53 = vor.u32 %v7440_v52, %v6697_v51  ;;  %v455_v54 = vld [vmem:[%s8464_s26 + $0x40] sm:$0xff]  ;;  %v7431_v58 = vld [vmem:[#allocation5 + $0x78] sm:$0xf0]  ;;  %v7470_v62 = vld [vmem:[#allocation5 + $0x1b4] sm:$0xf]  ;;  %s8177_s25 = scalar_lea.hbm %s12497_s9, 16 }
  0x5a   : > { %v8504_v56 = vpack.c.bf16 %v456_v55, %v455_v54  ;;  %v7479_v59 = vld [vmem:[#allocation5 + $0x1fc] sm:$0xf]  ;;  %v6662_v60 = vor.u32 %v7431_v58, %v6661_v57  ;;  %v6863_v61 = vld [vmem:[#allocation5 + $0x21c] sm:$0xf0]  ;;  %v6827_v63 = vld [vmem:[#allocation5 + $0x1d4] sm:$0xf0] }
  0x5b   : > { %946 = vmatpush.bf16.msra.mxu0 %v6754_v11  ;;  %7620 = vmatpush.bf16.msra.mxu2 %v6754_v11  ;;  %v6866_v0 = vor.u32 %v7479_v59, %v6863_v61  ;;  %v6830_v1 = vor.u32 %v7470_v62, %v6827_v63  ;;  %v7461_v2 = vld [vmem:[#allocation5 + $0x16c] sm:$0xf]  ;;  %v6791_v3 = vld [vmem:[#allocation5 + $0x18c] sm:$0xf0]  ;;  %v458_v6 = vld [vmem:[%s8464_s26 + $0x58] sm:$0xff] }
  0x5c   : > { %v6794_v4 = vor.u32 %v7461_v2, %v6791_v3  ;;  %v457_v5 = vld [vmem:[%s8464_s26 + $0x50] sm:$0xff]  ;;  %v7452_v8 = vld [vmem:[#allocation5 + $0x124] sm:$0xf]  ;;  %v6755_v9 = vld [vmem:[#allocation5 + $0x144] sm:$0xf0] }
  0x5d   : > { %7625 = vmatpush.bf16.msra.mxu3 %v6866_v0  ;;  %1032 = vmatpush.bf16.msra.mxu1 %v6866_v0  ;;  %v8509_v7 = vpack.c.bf16 %v458_v6, %v457_v5  ;;  %v6625_v10 = vld [vmem:[#allocation5 + $0x10] sm:$0xf]  ;;  %v7422_v11 = vld [vmem:[#allocation5 + $0x30] sm:$0xf0]  ;;  %v6758_v12 = vor.u32 %v7452_v8, %v6755_v9  ;;  %v7443_v13 = vld [vmem:[#allocation5 + $0xdc] sm:$0xf] }
  0x5e   : > { %v6719_v15 = vld [vmem:[#allocation5 + $0xfc] sm:$0xf0]  ;;  %v6683_v18 = vld [vmem:[#allocation5 + $0xb4] sm:$0xf0]  ;;  %v460_v21 = vld [vmem:[%s8464_s26 + $0x68] sm:$0xff] }
  0x5f   : > { %947 = vmatpush.bf16.msra.mxu0 %v6718_v14  ;;  %7621 = vmatpush.bf16.msra.mxu2 %v6718_v14  ;;  %v6626_v14 = vor.u32 %v7422_v11, %v6625_v10  ;;  %v6722_v16 = vor.u32 %v7443_v13, %v6719_v15  ;;  %v7425_v22 = vld [vmem:[#allocation5 + $0x4c] sm:$0xf]  ;;  %v6647_v23 = vld [vmem:[#allocation5 + $0x6c] sm:$0xf0]  ;;  %v7416_v26 = vld [vmem:[#allocation5 + $0x4] sm:$0xf] }
  0x60   : > { %v6611_v27 = vld [vmem:[#allocation5 + $0x24] sm:$0xf0]  ;;  %v7487_v29 = vld [vmem:[#allocation5 + $0x238] sm:$0xf0]  ;;  %v463_v33 = vld [vmem:[%s8464_s26 + $0x80] sm:$0xff] }
  0x61   : > { %7626 = vmatpush.bf16.msra.mxu3 %v6830_v1  ;;  %1033 = vmatpush.bf16.msra.mxu1 %v6830_v1  ;;  %v6614_v30 = vor.u32 %v7416_v26, %v6611_v27  ;;  %v464_v34 = vld [vmem:[%s8464_s26 + $0x88] sm:$0xff]  ;;  %v461_v36 = vld [vmem:[%s8464_s26 + $0x70] sm:$0xff]  ;;  %v462_v37 = vld [vmem:[%s8464_s26 + $0x78] sm:$0xff] }
  0x62   : > { %v8526_v39 = vpack.c.bf16 %v462_v37, %v461_v36  ;;  %v465_v40 = vld [vmem:[%s8464_s26 + $0x90] sm:$0xff]  ;;  %v467_v48 = vld [vmem:[%s8464_s26 + $0xa0] sm:$0xff]  ;;  %v468_v49 = vld [vmem:[%s8464_s26 + $0xa8] sm:$0xff] }
  0x63   : > { %948 = vmatpush.bf16.msra.mxu0 %v6682_v17  ;;  %7622 = vmatpush.bf16.msra.mxu2 %v6682_v17  ;;  %v7434_v17 = vld [vmem:[#allocation5 + $0x94] sm:$0xf]  ;;  %v6857_v45 = vld [vmem:[#allocation5 + $0x1d0] sm:$0xf]  ;;  %v8541_v51 = vpack.c.bf16 %v468_v49, %v467_v48  ;;  %v470_v55 = vld [vmem:[%s8464_s26 + $0xb8] sm:$0xff] }
  0x64   : > { %v6686_v19 = vor.u32 %v7434_v17, %v6683_v18  ;;  %v7478_v46 = vld [vmem:[#allocation5 + $0x1f0] sm:$0xf0]  ;;  %v7469_v61 = vld [vmem:[#allocation5 + $0x1a8] sm:$0xf0]  ;;  %v471_v63 = vld [vmem:[%s8464_s26 + $0xc0] sm:$0xff] }
  0x65   : > { %7627 = vmatpush.bf16.msra.mxu3 %v6794_v4  ;;  %1034 = vmatpush.bf16.msra.mxu1 %v6794_v4  ;;  %v469_v54 = vld [vmem:[%s8464_s26 + $0xb0] sm:$0xff]  ;;  %v472_v0 = vld [vmem:[%s8464_s26 + $0xc8] sm:$0xff]  ;;  %v474_v5 = vld [vmem:[%s8464_s26 + $0xd8] sm:$0xff] }
  0x66   : > { %v8553_v57 = vpack.c.bf16 %v470_v55, %v469_v54  ;;  %v8565_v1 = vpack.c.bf16 %v472_v0, %v471_v63  ;;  %v473_v4 = vld [vmem:[%s8464_s26 + $0xd0] sm:$0xff]  ;;  %v6785_v10 = vld [vmem:[#allocation5 + $0x140] sm:$0xf]  ;;  %v7460_v11 = vld [vmem:[#allocation5 + $0x160] sm:$0xf0] }
  0x67   : > { %949 = vmatpush.bf16.msra.mxu0 %v6646_v20  ;;  %7623 = vmatpush.bf16.msra.mxu2 %v6646_v20  ;;  %v459_v20 = vld [vmem:[%s8464_s26 + $0x60] sm:$0xff]  ;;  %v8577_v6 = vpack.c.bf16 %v474_v5, %v473_v4  ;;  %v7471_v26 = vld [vmem:[#allocation5 + $0x1bc] sm:$0xf]  ;;  %v6799_v36 = vld [vmem:[#allocation5 + $0x194] sm:$0xf0] }
  0x68   : > { %v8514_v24 = vpack.c.bf16 %v460_v21, %v459_v20  ;;  %v475_v13 = vld [vmem:[%s8464_s26 + $0xe0] sm:$0xff]  ;;  %v6871_v20 = vld [vmem:[#allocation5 + $0x224] sm:$0xf0]  ;;  %v6763_v48 = vld [vmem:[#allocation5 + $0x14c] sm:$0xf0] }
  0x69   : > { %7628 = vmatpush.bf16.msra.mxu3 %v6758_v12  ;;  %1035 = vmatpush.bf16.msra.mxu1 %v6758_v12  ;;  %v6786_v12 = vor.u32 %v7460_v11, %v6785_v10  ;;  %v7484_v17 = vld [vmem:[#allocation5 + $0x220] sm:$0xf0]  ;;  %v477_v54 = vld [vmem:[%s8464_s26 + $0xf0] sm:$0xff]  ;;  %v478_v55 = vld [vmem:[%s8464_s26 + $0xf8] sm:$0xff] }
  0x6a   : > { %v7480_v18 = vld [vmem:[#allocation5 + $0x204] sm:$0xf]  ;;  %v6727_v4 = vld [vmem:[#allocation5 + $0x104] sm:$0xf0]  ;;  %v6689_v11 = vld [vmem:[#allocation5 + $0x98] sm:$0xf] }
  0x6b   : > { %950 = vmatpush.bf16.msra.mxu0 %v6610_v25  ;;  %7624 = vmatpush.bf16.msra.mxu2 %v6610_v25  ;;  %v6650_v25 = vor.u32 %v7425_v22, %v6647_v23  ;;  %v6874_v22 = vor.u32 %v7480_v18, %v6871_v20  ;;  %v6833_v23 = vld [vmem:[#allocation5 + $0x1b8] sm:$0xf]  ;;  %v7444_v63 = vld [vmem:[#allocation5 + $0xe4] sm:$0xf]  ;;  %v6653_v18 = vld [vmem:[#allocation5 + $0x50] sm:$0xf] }
  0x6c   : > { %v6730_v10 = vor.u32 %v7444_v63, %v6727_v4  ;;  %v7426_v20 = vld [vmem:[#allocation5 + $0x54] sm:$0xf]  ;;  %v6713_v4 = vld [vmem:[#allocation5 + $0xb0] sm:$0xf] }
  0x6d   : > { %7629 = vmatpush.bf16.msra.mxu3 %v6722_v16  ;;  %1036 = vmatpush.bf16.msra.mxu1 %v6722_v16  ;;  %v6869_v16 = vld [vmem:[#allocation5 + $0x200] sm:$0xf] }
  0x6e   : > { %951 = vmatmul.bf16.vlgmr.msra.gmra.mxu0 %v8484_v31 }
  0x6f   : > { %1299 = vmatpush.bf16.msrb.mxu0 %v6878_v28  ;;  %v6893_v28 = vld [vmem:[#allocation5 + $0x218] sm:$0xf] }
  0x71   : > { %7630 = vmatpush.bf16.msra.mxu3 %v6686_v19  ;;  %1037 = vmatpush.bf16.msra.mxu1 %v6686_v19  ;;  %v6870_v19 = vor.u32 %v7484_v17, %v6869_v16  ;;  %v6691_v16 = vld [vmem:[#allocation5 + $0xbc] sm:$0xf0] }
  0x73   : > { %1300 = vmatpush.bf16.msrb.mxu0 %v6842_v32  ;;  %v6894_v32 = vor.u32 %v7487_v29, %v6893_v28  ;;  %1121 = vmatpush.bf16.msrb.mxu2 %v6870_v19  ;;  %v6835_v28 = vld [vmem:[#allocation5 + $0x1dc] sm:$0xf0]  ;;  %v7430_v19 = vld [vmem:[#allocation5 + $0x70] sm:$0xf0] }
  0x74   : > { %v6838_v29 = vor.u32 %v7471_v26, %v6835_v28  ;;  %v7421_v28 = vld [vmem:[#allocation5 + $0x28] sm:$0xf0] }
  0x75   : > { %7631 = vmatpush.bf16.msra.mxu3 %v6650_v25  ;;  %1038 = vmatpush.bf16.msra.mxu1 %v6650_v25  ;;  %v7475_v25 = vld [vmem:[#allocation5 + $0x1d8] sm:$0xf0] }
  0x76   : > { %v6834_v27 = vor.u32 %v7475_v25, %v6833_v23  ;;  %v6655_v23 = vld [vmem:[#allocation5 + $0x74] sm:$0xf0] }
  0x77   : > { %1301 = vmatpush.bf16.msrb.mxu0 %v6806_v35  ;;  %v8519_v35 = vpack.c.bf16 %v464_v34, %v463_v33  ;;  %v7462_v33 = vld [vmem:[#allocation5 + $0x174] sm:$0xf]  ;;  %v6658_v26 = vor.u32 %v7426_v20, %v6655_v23 }
  0x78   : > { %1122 = vmatpush.bf16.msrb.mxu2 %v6834_v27  ;;  %v6617_v27 = vld [vmem:[#allocation5 + $0x8] sm:$0xf] }
  0x79   : > { %7632 = vmatpush.bf16.msra.mxu3 %v6614_v30  ;;  %1039 = vmatpush.bf16.msra.mxu1 %v6614_v30  ;;  %v6797_v30 = vld [vmem:[#allocation5 + $0x170] sm:$0xf] }
  0x7a   : > { %991 = vmatmul.bf16.vlgmr.msra.gmra.mxu2 %v8519_v35 }
  0x7b   : > { %1302 = vmatpush.bf16.msrb.mxu0 %v6770_v41  ;;  %v466_v41 = vld [vmem:[%s8464_s26 + $0x98] sm:$0xff] }
  0x7c   : > { %1080 = vmatmul.bf16.vlgmr.msra.gmra.mxu3 %v8519_v35  ;;  %1040 = vmatmul.bf16.vlgmr.msra.gmra.mxu1 %v8484_v31  ;;  %v8531_v42 = vpack.c.bf16 %v466_v41, %v465_v40  ;;  %v6802_v40 = vor.u32 %v7462_v33, %v6799_v36  ;;  %v6761_v41 = vld [vmem:[#allocation5 + $0x128] sm:$0xf]  ;;  %v6618_v33 = vor.u32 %v7421_v28, %v6617_v27  ;;  %v6619_v36 = vld [vmem:[#allocation5 + $0x2c] sm:$0xf0] }
  0x7d   : > { %1210 = vmatpush.bf16.msrb.mxu3 %v6874_v22  ;;  %v6654_v22 = vor.u32 %v7430_v19, %v6653_v18  ;;  %v6677_v28 = vld [vmem:[#allocation5 + $0x68] sm:$0xf] }
  0x7e   : > { %956 = vmatmul.bf16.gmra.mxu0 %v8489_v38 }
  0x7f   : > { %1303 = vmatpush.bf16.msrb.mxu0 %v6734_v47  ;;  %v6858_v47 = vor.u32 %v7478_v46, %v6857_v45  ;;  %v7457_v45 = vld [vmem:[#allocation5 + $0x148] sm:$0xf0] }
  0x80   : > { %v7453_v46 = vld [vmem:[#allocation5 + $0x12c] sm:$0xf] }
  0x81   : > { %1211 = vmatpush.bf16.msrb.mxu3 %v6838_v29  ;;  %v6766_v49 = vor.u32 %v7453_v46, %v6763_v48  ;;  %v7417_v29 = vld [vmem:[#allocation5 + $0xc] sm:$0xf] }
  0x83   : > { %1304 = vmatpush.bf16.msrb.mxu0 %v6698_v53 }
  0x85   : > { %1212 = vmatpush.bf16.msrb.mxu3 %v6802_v40  ;;  %v6622_v40 = vor.u32 %v7417_v29, %v6619_v36  ;;  %v7433_v29 = vld [vmem:[#allocation5 + $0x88] sm:$0xf0] }
  0x87   : > { %1305 = vmatpush.bf16.msrb.mxu0 %v6662_v60  ;;  %v6821_v60 = vld [vmem:[#allocation5 + $0x188] sm:$0xf] }
  0x88   : > { %v6822_v62 = vor.u32 %v7469_v61, %v6821_v60  ;;  %v8601_v60 = vpack.c.bf16 %v478_v55, %v477_v54  ;;  %v6725_v61 = vld [vmem:[#allocation5 + $0xe0] sm:$0xf] }
  0x89   : > { %1213 = vmatpush.bf16.msrb.mxu3 %v6766_v49 }
  0x8a   : > { %996 = vmatmul.bf16.gmra.mxu2 %v8531_v42 }
  0x8b   : > { %1306 = vmatpush.bf16.msrb.mxu0 %v6626_v14  ;;  %v476_v14 = vld [vmem:[%s8464_s26 + $0xe8] sm:$0xff] }
  0x8c   : > { %1085 = vmatmul.bf16.gmra.mxu3 %v8531_v42  ;;  %1045 = vmatmul.bf16.gmra.mxu1 %v8489_v38  ;;  %v8589_v15 = vpack.c.bf16 %v476_v14, %v475_v13  ;;  %v7435_v13 = vld [vmem:[#allocation5 + $0x9c] sm:$0xf] }
  0x8d   : > { %1214 = vmatpush.bf16.msrb.mxu3 %v6730_v10  ;;  %v6694_v17 = vor.u32 %v7435_v13, %v6691_v16  ;;  %v7442_v10 = vld [vmem:[#allocation5 + $0xd0] sm:$0xf0] }
  0x8e   : > { %961 = vmatmul.bf16.gmra.mxu0 %v8494_v44 }
  0x8f   : > { %1655 = vmatpush.bf16.msra.mxu0 %v6894_v32  ;;  %v7466_v32 = vld [vmem:[#allocation5 + $0x190] sm:$0xf0] }
  0x90   : > { %v6798_v34 = vor.u32 %v7466_v32, %v6797_v30  ;;  %v6749_v30 = vld [vmem:[#allocation5 + $0xf8] sm:$0xf]  ;;  %v7451_v32 = vld [vmem:[#allocation5 + $0x118] sm:$0xf0] }
  0x91   : > { %1215 = vmatpush.bf16.msrb.mxu3 %v6694_v17 }
  0x92   : > { %1123 = vmatpush.bf16.msrb.mxu2 %v6798_v34  ;;  %v6750_v34 = vor.u32 %v7451_v32, %v6749_v30  ;;  %v6678_v30 = vor.u32 %v7433_v29, %v6677_v28 }
  0x93   : > { %1656 = vmatpush.bf16.msra.mxu0 %v6858_v47  ;;  %v6762_v47 = vor.u32 %v7457_v45, %v6761_v41 }
  0x95   : > { %1216 = vmatpush.bf16.msrb.mxu3 %v6658_v26 }
  0x96   : > { %1124 = vmatpush.bf16.msrb.mxu2 %v6762_v47 }
  0x97   : > { %1657 = vmatpush.bf16.msra.mxu0 %v6822_v62  ;;  %v7448_v62 = vld [vmem:[#allocation5 + $0x100] sm:$0xf0] }
  0x98   : > { %v6726_v0 = vor.u32 %v7448_v62, %v6725_v61 }
  0x99   : > { %1217 = vmatpush.bf16.msrb.mxu3 %v6622_v40 }
  0x9a   : > { %1001 = vmatmul.bf16.gmra.mxu2 %v8541_v51 }
  0x9b   : > { %1658 = vmatpush.bf16.msra.mxu0 %v6786_v12  ;;  %1125 = vmatpush.bf16.msrb.mxu2 %v6726_v0  ;;  %v7439_v12 = vld [vmem:[#allocation5 + $0xb8] sm:$0xf0] }
  0x9c   : > { %1090 = vmatmul.bf16.gmra.mxu3 %v8541_v51  ;;  %1050 = vmatmul.bf16.gmra.mxu1 %v8494_v44  ;;  %v6690_v14 = vor.u32 %v7439_v12, %v6689_v11  ;;  %v6714_v11 = vor.u32 %v7442_v10, %v6713_v4 }
  0x9e   : > { %966 = vmatmul.bf16.gmra.mxu0 %v8499_v50 }
  0x9f   : > { %1126 = vmatpush.bf16.msrb.mxu2 %v6690_v14  ;;  %1659 = vmatpush.bf16.msra.mxu0 %v6750_v34 }
  0xa3   : > { %1127 = vmatpush.bf16.msrb.mxu2 %v6654_v22  ;;  %1660 = vmatpush.bf16.msra.mxu0 %v6714_v11 }
  0xa7   : > { %1128 = vmatpush.bf16.msrb.mxu2 %v6618_v33  ;;  %1661 = vmatpush.bf16.msra.mxu0 %v6678_v30 }
  0xaa   : > { %1006 = vmatmul.bf16.gmra.mxu2 %v8553_v57 }
  0xac   : > { %1095 = vmatmul.bf16.gmra.mxu3 %v8553_v57  ;;  %1055 = vmatmul.bf16.gmra.mxu1 %v8499_v50 }
  0xae   : > { %971 = vmatmul.bf16.gmra.mxu0 %v8504_v56 }
  0xba   : > { %1011 = vmatmul.bf16.gmra.mxu2 %v8565_v1 }
  0xbc   : > { %1100 = vmatmul.bf16.gmra.mxu3 %v8565_v1  ;;  %1060 = vmatmul.bf16.gmra.mxu1 %v8504_v56 }
  0xbe   : > { %976 = vmatmul.bf16.gmra.mxu0 %v8509_v7 }
  0xca   : > { %1016 = vmatmul.bf16.gmra.mxu2 %v8577_v6 }
  0xcc   : > { %1105 = vmatmul.bf16.gmra.mxu3 %v8577_v6  ;;  %1065 = vmatmul.bf16.gmra.mxu1 %v8509_v7 }
  0xce   : > { %981 = vmatmul.bf16.gmra.mxu0 %v8514_v24 }
  0xda   : > { %1021 = vmatmul.bf16.gmra.mxu2 %v8589_v15 }
  0xdc   : > { %1110 = vmatmul.bf16.gmra.mxu3 %v8589_v15  ;;  %1070 = vmatmul.bf16.gmra.mxu1 %v8514_v24 }
  0xde   : > { %986 = vmatmul.bf16.gmra.mxu0 %v8526_v39 }
  0xea   : > { %1026 = vmatmul.bf16.gmra.mxu2 %v8601_v60 }
  0xeb   : > { %v8536_v43 = vpop.f32.mrf.mxu0 }
  0xec   : > { %1115 = vmatmul.bf16.gmra.mxu3 %v8601_v60  ;;  %1075 = vmatmul.bf16.gmra.mxu1 %v8526_v39 }
  0xee   : > { %1307 = vmatmul.bf16.vlgmr.msrb.gmra.mxu0 %v8484_v31 }
  0xf3   : > { %v8543_v52 = vpop.f32.mrf.mxu0 }
  0xfa   : > { %1129 = vmatmul.bf16.vlgmr.msrb.gmra.mxu2 %v8484_v31 }
  0xfb   : > { %v8548_v53 = vpop.f32.mrf.mxu0 }
  0xfc   : > { %1218 = vmatmul.bf16.vlgmr.msrb.gmra.mxu3 %v8484_v31 }
  0xfd   : > { %v8615_v45 = vpop.f32.mrf.mxu2 }
  0xfe   : > { %1312 = vmatmul.bf16.gmra.mxu0 %v8489_v38  ;;  %12787 = vst [vmem:[#allocation30_spill] sm:$0xff] %v8615_v45 }
  0xff   : > { %v8617_v46 = vpop.f32.mrf.mxu3 }
 0x100   : > { %12788 = vst [vmem:[#allocation31_spill] sm:$0xff] %v8617_v46  ;;  %v7482_v46 = vld [vmem:[#allocation5 + $0x214] sm:$0xf] }
 0x103   : > { %v8555_v58 = vpop.f32.mrf.mxu0 }
 0x105   : > { %v8622_v48 = vpop.f32.mrf.mxu2 }
 0x106   : > { %12790 = vst [vmem:[#allocation33_spill] sm:$0xff] %v8622_v48  ;;  %v7486_v48 = vld [vmem:[#allocation5 + $0x230] sm:$0xf0] }
 0x107   : > { %v8624_v49 = vpop.f32.mrf.mxu3 }
 0x108   : > { %12791 = vst [vmem:[#allocation34_spill] sm:$0xff] %v8624_v49 }
 0x10a   : > { %1134 = vmatmul.bf16.gmra.mxu2 %v8489_v38 }
 0x10b   : > { %v8560_v59 = vpop.f32.mrf.mxu0 }
 0x10c   : > { %1223 = vmatmul.bf16.gmra.mxu3 %v8489_v38 }
 0x10d   : > { %v8630_v55 = vpop.f32.mrf.mxu2 }
 0x10e   : > { %1317 = vmatmul.bf16.gmra.mxu0 %v8494_v44  ;;  %12793 = vst [vmem:[#allocation36_spill] sm:$0xff] %v8630_v55  ;;  %v6879_v55 = vld [vmem:[#allocation5 + $0x22c] sm:$0xf0] }
 0x10f   : > { %v8632_v61 = vpop.f32.mrf.mxu3 }
 0x110   : > { %12794 = vst [vmem:[#allocation37_spill] sm:$0xff] %v8632_v61  ;;  %v7481_v61 = vld [vmem:[#allocation5 + $0x20c] sm:$0xf] }
 0x111   : > { %v6882_v49 = vor.u32 %v7481_v61, %v6879_v55  ;;  %v7477_v61 = vld [vmem:[#allocation5 + $0x1e8] sm:$0xf0] }
 0x113   : > { %v8567_v2 = vpop.f32.mrf.mxu0  ;;  %1388 = vmatpush.bf16.msrb.mxu1 %v6882_v49 }
 0x115   : > { %v8637_v63 = vpop.f32.mrf.mxu2 }
 0x116   : > { %12796 = vst [vmem:[#allocation39_spill] sm:$0xff] %v8637_v63 }
 0x117   : > { %v8639_v0 = vpop.f32.mrf.mxu3 }
 0x118   : > { %12797 = vst [vmem:[#allocation40_spill] sm:$0xff] %v8639_v0 }
 0x11a   : > { %1139 = vmatmul.bf16.gmra.mxu2 %v8494_v44 }
 0x11b   : > { %v8572_v3 = vpop.f32.mrf.mxu0 }
 0x11c   : > { %12779 = vst [vmem:[#allocation22_spill] sm:$0xff] %v8572_v3  ;;  %1228 = vmatmul.bf16.gmra.mxu3 %v8494_v44 }
 0x11d   : > { %v8645_v13 = vpop.f32.mrf.mxu2 }
 0x11e   : > { %1322 = vmatmul.bf16.gmra.mxu0 %v8499_v50  ;;  %12799 = vst [vmem:[#allocation42_spill] sm:$0xff] %v8645_v13 }
 0x11f   : > { %v8647_v14 = vpop.f32.mrf.mxu3 }
 0x120   : > { %12800 = vst [vmem:[#allocation43_spill] sm:$0xff] %v8647_v14 }
 0x123   : > { %v8579_v8 = vpop.f32.mrf.mxu0 }
 0x124   : > { %12780 = vst [vmem:[#allocation23_spill] sm:$0xff] %v8579_v8  ;;  %v7097_v8 = vld [vmem:[#allocation8 + $0x188] sm:$0xf] }
 0x125   : > { %v8652_v17 = vpop.f32.mrf.mxu2 }
 0x126   : > { %12802 = vst [vmem:[#allocation45_spill] sm:$0xff] %v8652_v17 }
 0x127   : > { %v8654_v18 = vpop.f32.mrf.mxu3 }
 0x128   : > { %12803 = vst [vmem:[#allocation46_spill] sm:$0xff] %v8654_v18 }
 0x12a   : > { %1144 = vmatmul.bf16.gmra.mxu2 %v8499_v50 }
 0x12b   : > { %v8584_v9 = vpop.f32.mrf.mxu0 }
 0x12c   : > { %12781 = vst [vmem:[#allocation24_spill] sm:$0xff] %v8584_v9  ;;  %1233 = vmatmul.bf16.gmra.mxu3 %v8499_v50  ;;  %v7131_v9 = vld [vmem:[#allocation8 + $0x1e8] sm:$0xf0] }
 0x12d   : > { %v8660_v20 = vpop.f32.mrf.mxu2 }
 0x12e   : > { %1327 = vmatmul.bf16.gmra.mxu0 %v8504_v56  ;;  %12805 = vst [vmem:[#allocation48_spill] sm:$0xff] %v8660_v20 }
 0x12f   : > { %v8662_v22 = vpop.f32.mrf.mxu3 }
 0x130   : > { %12806 = vst [vmem:[#allocation49_spill] sm:$0xff] %v8662_v22 }
 0x133   : > { %v8591_v21 = vpop.f32.mrf.mxu0 }
 0x134   : > { %12782 = vst [vmem:[#allocation25_spill] sm:$0xff] %v8591_v21 }
 0x135   : > { %v8667_v26 = vpop.f32.mrf.mxu2 }
 0x136   : > { %12808 = vst [vmem:[#allocation51_spill] sm:$0xff] %v8667_v26 }
 0x137   : > { %v8669_v27 = vpop.f32.mrf.mxu3 }
 0x138   : > { %12809 = vst [vmem:[#allocation52_spill] sm:$0xff] %v8669_v27 }
 0x13a   : > { %1149 = vmatmul.bf16.gmra.mxu2 %v8504_v56 }
 0x13b   : > { %v8596_v37 = vpop.f32.mrf.mxu0 }
 0x13c   : > { %12783 = vst [vmem:[#allocation26_spill] sm:$0xff] %v8596_v37  ;;  %1238 = vmatmul.bf16.gmra.mxu3 %v8504_v56  ;;  %v7464_v37 = vld [vmem:[#allocation5 + $0x184] sm:$0xf] }
 0x13d   : > { %v8675_v33 = vpop.f32.mrf.mxu2 }
 0x13e   : > { %1332 = vmatmul.bf16.gmra.mxu0 %v8509_v7  ;;  %12811 = vst [vmem:[#allocation54_spill] sm:$0xff] %v8675_v33 }
 0x13f   : > { %v8677_v34 = vpop.f32.mrf.mxu3 }
 0x140   : > { %12812 = vst [vmem:[#allocation55_spill] sm:$0xff] %v8677_v34 }
 0x143   : > { %v8603_v5 = vpop.f32.mrf.mxu0 }
 0x144   : > { %12784 = vst [vmem:[#allocation27_spill] sm:$0xff] %v8603_v5  ;;  %v7473_v5 = vld [vmem:[#allocation5 + $0x1cc] sm:$0xf] }
 0x145   : > { %v8682_v40 = vpop.f32.mrf.mxu2 }
 0x146   : > { %12814 = vst [vmem:[#allocation57_spill] sm:$0xff] %v8682_v40 }
 0x147   : > { %v8684_v4 = vpop.f32.mrf.mxu3 }
 0x148   : > { %12815 = vst [vmem:[#allocation58_spill] sm:$0xff] %v8684_v4 }
 0x14a   : > { %1154 = vmatmul.bf16.gmra.mxu2 %v8509_v7 }
 0x14b   : > { %v8608_v25 = vpop.f32.mrf.mxu0 }
 0x14c   : > { %12785 = vst [vmem:[#allocation28_spill] sm:$0xff] %v8608_v25  ;;  %1243 = vmatmul.bf16.gmra.mxu3 %v8509_v7  ;;  %v6843_v25 = vld [vmem:[#allocation5 + $0x1e4] sm:$0xf0] }
 0x14d   : > { %v8690_v11 = vpop.f32.mrf.mxu2 }
 0x14e   : > { %1337 = vmatmul.bf16.gmra.mxu0 %v8514_v24  ;;  %12817 = vst [vmem:[#allocation60_spill] sm:$0xff] %v8690_v11 }
 0x14f   : > { %v8692_v28 = vpop.f32.mrf.mxu3 }
 0x150   : > { %12818 = vst [vmem:[#allocation61_spill] sm:$0xff] %v8692_v28 }
 0x153   : > { %v8611_v41 = vpop.f32.mrf.mxu0 }
 0x154   : > { %12786 = vst [vmem:[#allocation29_spill] sm:$0xff] %v8611_v41  ;;  %v7472_v41 = vld [vmem:[#allocation5 + $0x1c4] sm:$0xf] }
 0x155   : > { %v8697_v30 = vpop.f32.mrf.mxu2  ;;  %v6846_v55 = vor.u32 %v7472_v41, %v6843_v25  ;;  %v6815_v25 = vld [vmem:[#allocation5 + $0x1a4] sm:$0xf0] }
 0x156   : > { %12820 = vst [vmem:[#allocation63_spill] sm:$0xff] %v8697_v30  ;;  %v6818_v41 = vor.u32 %v7464_v37, %v6815_v25  ;;  %v7445_v37 = vld [vmem:[#allocation5 + $0xec] sm:$0xf]  ;;  %v7450_v25 = vld [vmem:[#allocation5 + $0x110] sm:$0xf0] }
 0x157   : > { %1389 = vmatpush.bf16.msrb.mxu1 %v6846_v55  ;;  %v7455_v55 = vld [vmem:[#allocation5 + $0x13c] sm:$0xf] }
 0x15a   : > { %1159 = vmatmul.bf16.gmra.mxu2 %v8514_v24 }
 0x15b   : > { %v8619_v47 = vpop.f32.mrf.mxu0 }
 0x15c   : > { %12789 = vst [vmem:[#allocation32_spill] sm:$0xff] %v8619_v47  ;;  %1248 = vmatmul.bf16.gmra.mxu3 %v8514_v24  ;;  %v6887_v47 = vld [vmem:[#allocation5 + $0x234] sm:$0xf0] }
 0x15e   : > { %1342 = vmatmul.bf16.gmra.mxu0 %v8526_v39 }
 0x163   : > { %v8626_v54 = vpop.f32.mrf.mxu0 }
 0x164   : > { %12792 = vst [vmem:[#allocation35_spill] sm:$0xff] %v8626_v54 }
 0x16a   : > { %1164 = vmatmul.bf16.gmra.mxu2 %v8526_v39 }
 0x16b   : > { %v8634_v62 = vpop.f32.mrf.mxu0 }
 0x16c   : > { %12795 = vst [vmem:[#allocation38_spill] sm:$0xff] %v8634_v62  ;;  %1253 = vmatmul.bf16.gmra.mxu3 %v8526_v39 }
 0x16e   : > { %1347 = vmatmul.bf16.gmra.mxu0 %v8519_v35 }
 0x173   : > { %v8641_v12 = vpop.f32.mrf.mxu0 }
 0x174   : > { %12798 = vst [vmem:[#allocation41_spill] sm:$0xff] %v8641_v12 }
 0x17a   : > { %1169 = vmatmul.bf16.gmra.mxu2 %v8519_v35 }
 0x17b   : > { %v8649_v16 = vpop.f32.mrf.mxu0 }
 0x17c   : > { %12801 = vst [vmem:[#allocation44_spill] sm:$0xff] %v8649_v16  ;;  %v8705_v16 = vpop.f32.mrf.mxu2  ;;  %1258 = vmatmul.bf16.gmra.mxu3 %v8519_v35 }
 0x17d   : > { %12823 = vst [vmem:[#allocation66_spill] sm:$0xff] %v8705_v16 }
 0x17e   : > { %1352 = vmatmul.bf16.gmra.mxu0 %v8531_v42 }
 0x183   : > { %v8656_v19 = vpop.f32.mrf.mxu0 }
 0x184   : > { %12804 = vst [vmem:[#allocation47_spill] sm:$0xff] %v8656_v19  ;;  %v8712_v62 = vpop.f32.mrf.mxu2 }
 0x185   : > { %12826 = vst [vmem:[#allocation69_spill] sm:$0xff] %v8712_v62 }
 0x18a   : > { %1174 = vmatmul.bf16.gmra.mxu2 %v8531_v42 }
 0x18b   : > { %v8664_v23 = vpop.f32.mrf.mxu0 }
 0x18c   : > { %12807 = vst [vmem:[#allocation50_spill] sm:$0xff] %v8664_v23  ;;  %v7424_v23 = vld [vmem:[#allocation5 + $0x40] sm:$0xf0] }
 0x18e   : > { %1357 = vmatmul.bf16.gmra.mxu0 %v8541_v51 }
 0x193   : > { %v8671_v32 = vpop.f32.mrf.mxu0 }
 0x194   : > { %12810 = vst [vmem:[#allocation53_spill] sm:$0xff] %v8671_v32  ;;  %v6641_v32 = vld [vmem:[#allocation5 + $0x20] sm:$0xf] }
 0x195   : > { %v6642_v19 = vor.u32 %v7424_v23, %v6641_v32 }
 0x197   : > { %1662 = vmatpush.bf16.msra.mxu0 %v6642_v19  ;;  %v8720_v19 = vpop.f32.mrf.mxu2 }
 0x198   : > { %12829 = vst [vmem:[#allocation72_spill] sm:$0xff] %v8720_v19 }
 0x19a   : > { %1179 = vmatmul.bf16.gmra.mxu2 %v8541_v51 }
 0x19b   : > { %v8679_v36 = vpop.f32.mrf.mxu0 }
 0x19c   : > { %12813 = vst [vmem:[#allocation56_spill] sm:$0xff] %v8679_v36  ;;  %v8699_v36 = vpop.f32.mrf.mxu3  ;;  %1263 = vmatmul.bf16.gmra.mxu3 %v8531_v42 }
 0x19d   : > { %12821 = vst [vmem:[#allocation64_spill] sm:$0xff] %v8699_v36 }
 0x19e   : > { %1362 = vmatmul.bf16.gmra.mxu0 %v8553_v57 }
 0x1a3   : > { %v8686_v10 = vpop.f32.mrf.mxu0 }
 0x1a4   : > { %12816 = vst [vmem:[#allocation59_spill] sm:$0xff] %v8686_v10  ;;  %v8707_v12 = vpop.f32.mrf.mxu3 }
 0x1a5   : > { %12824 = vst [vmem:[#allocation67_spill] sm:$0xff] %v8707_v12 }
 0x1ab   : > { %v8694_v29 = vpop.f32.mrf.mxu0 }
 0x1ac   : > { %12819 = vst [vmem:[#allocation62_spill] sm:$0xff] %v8694_v29  ;;  %v8714_v36 = vpop.f32.mrf.mxu3  ;;  %1268 = vmatmul.bf16.gmra.mxu3 %v8541_v51 }
 0x1ad   : > { %12827 = vst [vmem:[#allocation70_spill] sm:$0xff] %v8714_v36 }
 0x1ae   : > { %1367 = vmatmul.bf16.gmra.mxu0 %v8565_v1 }
 0x1b3   : > { %v8701_v10 = vpop.f32.mrf.mxu0 }
 0x1b4   : > { %12822 = vst [vmem:[#allocation65_spill] sm:$0xff] %v8701_v10  ;;  %v8722_v32 = vpop.f32.mrf.mxu3 }
 0x1b5   : > { %12830 = vst [vmem:[#allocation73_spill] sm:$0xff] %v8722_v32 }
 0x1bb   : > { %v8709_v29 = vpop.f32.mrf.mxu0 }
 0x1bc   : > { %12825 = vst [vmem:[#allocation68_spill] sm:$0xff] %v8709_v29  ;;  %v8727_v29 = vpop.f32.mrf.mxu2  ;;  %v8729_v12 = vpop.f32.mrf.mxu3  ;;  %1184 = vmatmul.bf16.gmra.mxu2 %v8553_v57  ;;  %1273 = vmatmul.bf16.gmra.mxu3 %v8553_v57 }
 0x1bd   : > { %12832 = vst [vmem:[#allocation75_spill] sm:$0xff] %v8727_v29 }
 0x1be   : > { %1372 = vmatmul.bf16.gmra.mxu0 %v8577_v6  ;;  %12833 = vst [vmem:[#allocation76_spill] sm:$0xff] %v8729_v12 }
 0x1c3   : > { %v8716_v23 = vpop.f32.mrf.mxu0 }
 0x1c4   : > { %12828 = vst [vmem:[#allocation71_spill] sm:$0xff] %v8716_v23  ;;  %v8735_v23 = vpop.f32.mrf.mxu2  ;;  %v8737_v36 = vpop.f32.mrf.mxu3 }
 0x1cb   : > { %v8724_v10 = vpop.f32.mrf.mxu0 }
 0x1cc   : > { %12831 = vst [vmem:[#allocation74_spill] sm:$0xff] %v8724_v10  ;;  %v8742_v10 = vpop.f32.mrf.mxu2  ;;  %v8744_v32 = vpop.f32.mrf.mxu3  ;;  %1189 = vmatmul.bf16.gmra.mxu2 %v8565_v1  ;;  %1278 = vmatmul.bf16.gmra.mxu3 %v8565_v1 }
 0x1ce   : > { %1377 = vmatmul.bf16.gmra.mxu0 %v8589_v15 }
 0x1d3   : > { %v8731_v62 = vpop.f32.mrf.mxu0 }
 0x1d4   : > { %12834 = vst [vmem:[#allocation77_spill] sm:$0xff] %v8731_v62  ;;  %v8750_v62 = vpop.f32.mrf.mxu2  ;;  %v8752_v12 = vpop.f32.mrf.mxu3 }
 0x1db   : > { %v8739_v19 = vpop.f32.mrf.mxu0 }
 0x1dc   : > { %12835 = vst [vmem:[#allocation78_spill] sm:$0xff] %v8739_v19  ;;  %v8757_v19 = vpop.f32.mrf.mxu2  ;;  %v8759_v30 = vpop.f32.mrf.mxu3  ;;  %1194 = vmatmul.bf16.gmra.mxu2 %v8577_v6  ;;  %1283 = vmatmul.bf16.gmra.mxu3 %v8577_v6 }
 0x1de   : > { %1382 = vmatmul.bf16.gmra.mxu0 %v8601_v60 }
 0x1e3   : > { %v8746_v29 = vpop.f32.mrf.mxu0 }
 0x1e4   : > { %12836 = vst [vmem:[#allocation79_spill] sm:$0xff] %v8746_v29  ;;  %v8765_v29 = vpop.f32.mrf.mxu2  ;;  %v8767_v11 = vpop.f32.mrf.mxu3 }
 0x1eb   : > { %v8754_v16 = vpop.f32.mrf.mxu0 }
 0x1ec   : > { %12837 = vst [vmem:[#allocation80_spill] sm:$0xff] %v8754_v16  ;;  %v8772_v16 = vpop.f32.mrf.mxu2  ;;  %v8774_v40 = vpop.f32.mrf.mxu3  ;;  %1199 = vmatmul.bf16.gmra.mxu2 %v8589_v15  ;;  %1288 = vmatmul.bf16.gmra.mxu3 %v8589_v15 }
 0x1ed   : > { %12840 = vst [vmem:[#allocation83_spill] sm:$0xff] %v8772_v16  ;;  %v7533_v16 = vld [vmem:[#allocation8 + $0x164] sm:$0xf0] }
 0x1ee   : > { %1663 = vmatmul.bf16.vlgmr.msra.gmra.mxu0 %v8484_v31 }
 0x1f3   : > { %v8761_v28 = vpop.f32.mrf.mxu0 }
 0x1f4   : > { %12838 = vst [vmem:[#allocation81_spill] sm:$0xff] %v8761_v28  ;;  %v8780_v28 = vpop.f32.mrf.mxu2  ;;  %v8782_v33 = vpop.f32.mrf.mxu3 }
 0x1f5   : > { %12842 = vst [vmem:[#allocation85_spill] sm:$0xff] %v8780_v28 }
 0x1f6   : > { %12843 = vst [vmem:[#allocation86_spill] sm:$0xff] %v8782_v33 }
 0x1fb   : > { %v8769_v4 = vpop.f32.mrf.mxu0 }
 0x1fc   : > { %12839 = vst [vmem:[#allocation82_spill] sm:$0xff] %v8769_v4  ;;  %v8787_v4 = vpop.f32.mrf.mxu2  ;;  %v8789_v26 = vpop.f32.mrf.mxu3  ;;  %1204 = vmatmul.bf16.gmra.mxu2 %v8601_v60  ;;  %1293 = vmatmul.bf16.gmra.mxu3 %v8601_v60 }
 0x1fd   : > { %12845 = vst [vmem:[#allocation88_spill] sm:$0xff] %v8787_v4 }
 0x1fe   : > { %1668 = vmatmul.bf16.gmra.mxu0 %v8489_v38  ;;  %12846 = vst [vmem:[#allocation89_spill] sm:$0xff] %v8789_v26  ;;  %v7091_v26 = vld [vmem:[#allocation8 + $0x1a0] sm:$0xf0] }
 0x203   : > { %v8776_v34 = vpop.f32.mrf.mxu0 }
 0x204   : > { %12841 = vst [vmem:[#allocation84_spill] sm:$0xff] %v8776_v34  ;;  %v8795_v34 = vpop.f32.mrf.mxu2  ;;  %v8797_v20 = vpop.f32.mrf.mxu3 }
 0x205   : > { %12848 = vst [vmem:[#allocation91_spill] sm:$0xff] %v8795_v34 }
 0x206   : > { %12849 = vst [vmem:[#allocation92_spill] sm:$0xff] %v8797_v20 }
 0x20b   : > { %v8784_v27 = vpop.f32.mrf.mxu0 }
 0x20c   : > { %12844 = vst [vmem:[#allocation87_spill] sm:$0xff] %v8784_v27  ;;  %v8802_v27 = vpop.f32.mrf.mxu2  ;;  %v8804_v17 = vpop.f32.mrf.mxu3 }
 0x20d   : > { %12851 = vst [vmem:[#allocation94_spill] sm:$0xff] %v8802_v27 }
 0x20e   : > { %1673 = vmatmul.bf16.gmra.mxu0 %v8494_v44  ;;  %12852 = vst [vmem:[#allocation95_spill] sm:$0xff] %v8804_v17 }
 0x213   : > { %v8791_v22 = vpop.f32.mrf.mxu0 }
 0x214   : > { %12847 = vst [vmem:[#allocation90_spill] sm:$0xff] %v8791_v22  ;;  %v8810_v22 = vpop.f32.mrf.mxu2  ;;  %v8812_v13 = vpop.f32.mrf.mxu3 }
 0x215   : > { %12854 = vst [vmem:[#allocation97_spill] sm:$0xff] %v8810_v22 }
 0x216   : > { %12855 = vst [vmem:[#allocation98_spill] sm:$0xff] %v8812_v13 }
 0x21b   : > { %v8799_v18 = vpop.f32.mrf.mxu0 }
 0x21c   : > { %12850 = vst [vmem:[#allocation93_spill] sm:$0xff] %v8799_v18  ;;  %v8817_v18 = vpop.f32.mrf.mxu2  ;;  %v8819_v63 = vpop.f32.mrf.mxu3 }
 0x21d   : > { %12857 = vst [vmem:[#allocation100_spill] sm:$0xff] %v8817_v18  ;;  %v6849_v18 = vld [vmem:[#allocation5 + $0x1c8] sm:$0xf] }
 0x21e   : > { %1678 = vmatmul.bf16.gmra.mxu0 %v8499_v50  ;;  %12858 = vst [vmem:[#allocation101_spill] sm:$0xff] %v8819_v63  ;;  %v6850_v22 = vor.u32 %v7477_v61, %v6849_v18  ;;  %v7454_v18 = vld [vmem:[#allocation5 + $0x134] sm:$0xf]  ;;  %v6771_v61 = vld [vmem:[#allocation5 + $0x154] sm:$0xf0] }
 0x223   : > { %v8806_v14 = vpop.f32.mrf.mxu0 }
 0x224   : > { %12853 = vst [vmem:[#allocation96_spill] sm:$0xff] %v8806_v14  ;;  %v6885_v14 = vld [vmem:[#allocation5 + $0x210] sm:$0xf]  ;;  %v8825_v63 = vpop.f32.mrf.mxu2  ;;  %v8827_v13 = vpop.f32.mrf.mxu3 }
 0x225   : > { %v6886_v54 = vor.u32 %v7486_v48, %v6885_v14  ;;  %12860 = vst [vmem:[#allocation103_spill] sm:$0xff] %v8825_v63  ;;  %v7468_v14 = vld [vmem:[#allocation5 + $0x1a0] sm:$0xf0] }
 0x226   : > { %12861 = vst [vmem:[#allocation104_spill] sm:$0xff] %v8827_v13  ;;  %v6777_v13 = vld [vmem:[#allocation5 + $0x138] sm:$0xf] }
 0x227   : > { %1477 = vmatpush.bf16.msra.mxu2 %v6886_v54  ;;  %v6813_v54 = vld [vmem:[#allocation5 + $0x180] sm:$0xf] }
 0x228   : > { %v6814_v63 = vor.u32 %v7468_v14, %v6813_v54  ;;  %v6741_v14 = vld [vmem:[#allocation5 + $0xf0] sm:$0xf] }
 0x22b   : > { %v8814_v0 = vpop.f32.mrf.mxu0  ;;  %1478 = vmatpush.bf16.msra.mxu2 %v6850_v22  ;;  %v7459_v22 = vld [vmem:[#allocation5 + $0x158] sm:$0xf0] }
 0x22c   : > { %12856 = vst [vmem:[#allocation99_spill] sm:$0xff] %v8814_v0  ;;  %v6890_v0 = vor.u32 %v7482_v46, %v6887_v47  ;;  %v7463_v46 = vld [vmem:[#allocation5 + $0x17c] sm:$0xf]  ;;  %v6807_v47 = vld [vmem:[#allocation5 + $0x19c] sm:$0xf0] }
 0x22d   : > { %v6810_v49 = vor.u32 %v7463_v46, %v6807_v47  ;;  %v6779_v46 = vld [vmem:[#allocation5 + $0x15c] sm:$0xf0]  ;;  %v8834_v47 = vpop.f32.mrf.mxu3 }
 0x22e   : > { %1683 = vmatmul.bf16.gmra.mxu0 %v8504_v56  ;;  %1566 = vmatpush.bf16.msra.mxu3 %v6890_v0  ;;  %12864 = vst [vmem:[#allocation107_spill] sm:$0xff] %v8834_v47  ;;  %v6782_v54 = vor.u32 %v7455_v55, %v6779_v46  ;;  %v6705_v55 = vld [vmem:[#allocation5 + $0xa8] sm:$0xf]  ;;  %v7428_v47 = vld [vmem:[#allocation5 + $0x64] sm:$0xf] }
 0x22f   : > { %1390 = vmatpush.bf16.msrb.mxu1 %v6810_v49  ;;  %1479 = vmatpush.bf16.msra.mxu2 %v6814_v63  ;;  %v6735_v63 = vld [vmem:[#allocation5 + $0x10c] sm:$0xf0] }
 0x230   : > { %v6738_v49 = vor.u32 %v7445_v37, %v6735_v63  ;;  %v7437_v37 = vld [vmem:[#allocation5 + $0xac] sm:$0xf] }
 0x233   : > { %v8821_v45 = vpop.f32.mrf.mxu0 }
 0x234   : > { %12859 = vst [vmem:[#allocation102_spill] sm:$0xff] %v8821_v45  ;;  %v6851_v45 = vld [vmem:[#allocation5 + $0x1ec] sm:$0xf0] }
 0x235   : > { %v6854_v48 = vor.u32 %v7473_v5, %v6851_v45  ;;  %v8831_v5 = vpop.f32.mrf.mxu2  ;;  %v6774_v45 = vor.u32 %v7454_v18, %v6771_v61  ;;  %v6742_v18 = vor.u32 %v7450_v25, %v6741_v14  ;;  %v6743_v61 = vld [vmem:[#allocation5 + $0x114] sm:$0xf0]  ;;  %v6663_v25 = vld [vmem:[#allocation5 + $0x7c] sm:$0xf0] }
 0x236   : > { %12863 = vst [vmem:[#allocation106_spill] sm:$0xff] %v8831_v5  ;;  %v8842_v5 = vpop.f32.mrf.mxu3 }
 0x237   : > { %1567 = vmatpush.bf16.msra.mxu3 %v6854_v48  ;;  %v6778_v48 = vor.u32 %v7459_v22, %v6777_v13  ;;  %1391 = vmatpush.bf16.msrb.mxu1 %v6774_v45  ;;  %v7436_v45 = vld [vmem:[#allocation5 + $0xa4] sm:$0xf]  ;;  %v6699_v22 = vld [vmem:[#allocation5 + $0xc4] sm:$0xf0]  ;;  %12867 = vst [vmem:[#allocation110_spill] sm:$0xff] %v8842_v5 }
 0x238   : > { %v6702_v46 = vor.u32 %v7436_v45, %v6699_v22  ;;  %v6671_v45 = vld [vmem:[#allocation5 + $0x84] sm:$0xf0] }
 0x239   : > { %1480 = vmatpush.bf16.msra.mxu2 %v6778_v48  ;;  %v6674_v22 = vor.u32 %v7428_v47, %v6671_v45 }
 0x23b   : > { %v8829_v0 = vpop.f32.mrf.mxu0  ;;  %1568 = vmatpush.bf16.msra.mxu3 %v6818_v41  ;;  %v7446_v41 = vld [vmem:[#allocation5 + $0xf4] sm:$0xf]  ;;  %1392 = vmatpush.bf16.msrb.mxu1 %v6738_v49  ;;  %v7427_v49 = vld [vmem:[#allocation5 + $0x5c] sm:$0xf] }
 0x23c   : > { %12862 = vst [vmem:[#allocation105_spill] sm:$0xff] %v8829_v0  ;;  %v6746_v13 = vor.u32 %v7446_v41, %v6743_v61  ;;  %v6666_v41 = vor.u32 %v7427_v49, %v6663_v25  ;;  %v7432_v61 = vld [vmem:[#allocation5 + $0x80] sm:$0xf0]  ;;  %v7419_v49 = vld [vmem:[#allocation5 + $0x1c] sm:$0xf] }
 0x23d   : > { %1481 = vmatpush.bf16.msra.mxu2 %v6742_v18  ;;  %v8840_v48 = vpop.f32.mrf.mxu2  ;;  %v6669_v18 = vld [vmem:[#allocation5 + $0x60] sm:$0xf] }
 0x23e   : > { %1688 = vmatmul.bf16.gmra.mxu0 %v8509_v7  ;;  %12866 = vst [vmem:[#allocation109_spill] sm:$0xff] %v8840_v48  ;;  %v6670_v48 = vor.u32 %v7432_v61, %v6669_v18  ;;  %v8851_v18 = vpop.f32.mrf.mxu3 }
 0x23f   : > { %1569 = vmatpush.bf16.msra.mxu3 %v6782_v54  ;;  %v7441_v54 = vld [vmem:[#allocation5 + $0xc8] sm:$0xf0]  ;;  %1393 = vmatpush.bf16.msrb.mxu1 %v6702_v46  ;;  %v6627_v46 = vld [vmem:[#allocation5 + $0x34] sm:$0xf0]  ;;  %12870 = vst [vmem:[#allocation113_spill] sm:$0xff] %v8851_v18 }
 0x240   : > { %v6706_v63 = vor.u32 %v7441_v54, %v6705_v55  ;;  %v8846_v55 = vpop.f32.mrf.mxu1  ;;  %v7418_v54 = vld [vmem:[#allocation5 + $0x14] sm:$0xf] }
 0x242   : > { %1482 = vmatpush.bf16.msra.mxu2 %v6706_v63  ;;  %v6630_v63 = vor.u32 %v7418_v54, %v6627_v46 }
 0x243   : > { %v8836_v0 = vpop.f32.mrf.mxu0  ;;  %1570 = vmatpush.bf16.msra.mxu3 %v6746_v13  ;;  %1394 = vmatpush.bf16.msrb.mxu1 %v6666_v41 }
 0x244   : > { %12865 = vst [vmem:[#allocation108_spill] sm:$0xff] %v8836_v0  ;;  %v6707_v0 = vld [vmem:[#allocation5 + $0xcc] sm:$0xf0] }
 0x245   : > { %v6710_v14 = vor.u32 %v7437_v37, %v6707_v0  ;;  %v6633_v0 = vld [vmem:[#allocation5 + $0x18] sm:$0xf]  ;;  %v8848_v37 = vpop.f32.mrf.mxu2 }
 0x246   : > { %1483 = vmatpush.bf16.msra.mxu2 %v6670_v48  ;;  %12869 = vst [vmem:[#allocation112_spill] sm:$0xff] %v8848_v37  ;;  %v8862_v45 = vpop.f32.mrf.mxu3 }
 0x247   : > { %1571 = vmatpush.bf16.msra.mxu3 %v6710_v14  ;;  %v7423_v14 = vld [vmem:[#allocation5 + $0x38] sm:$0xf0]  ;;  %1395 = vmatpush.bf16.msrb.mxu1 %v6630_v63  ;;  %12873 = vst [vmem:[#allocation116_spill] sm:$0xff] %v8862_v45 }
 0x248   : > { %v6634_v25 = vor.u32 %v7423_v14, %v6633_v0  ;;  %v8858_v41 = vpop.f32.mrf.mxu1  ;;  %v12500_v0 = vlaneseq }
 0x24a   : > { %1484 = vmatpush.bf16.msra.mxu2 %v6634_v25  ;;  %1396 = vmatmul.bf16.vlgmr.msrb.gmra.mxu1 %v8484_v31 }
 0x24b   : > { %v8844_v13 = vpop.f32.mrf.mxu0  ;;  %1572 = vmatpush.bf16.msra.mxu3 %v6674_v22 }
 0x24c   : > { %12868 = vst [vmem:[#allocation111_spill] sm:$0xff] %v8844_v13  ;;  %v6635_v13 = vld [vmem:[#allocation5 + $0x3c] sm:$0xf0] }
 0x24d   : > { %v6638_v47 = vor.u32 %v7419_v49, %v6635_v13  ;;  %1485 = vmatmul.bf16.vlgmr.msra.gmra.mxu2 %v8484_v31  ;;  %v8860_v61 = vpop.f32.mrf.mxu2 }
 0x24e   : > { %1693 = vmatmul.bf16.gmra.mxu0 %v8514_v24  ;;  %12872 = vst [vmem:[#allocation115_spill] sm:$0xff] %v8860_v61  ;;  %v8871_v46 = vpop.f32.mrf.mxu3 }
 0x24f   : > { %1573 = vmatpush.bf16.msra.mxu3 %v6638_v47  ;;  %12876 = vst [vmem:[#allocation119_spill] sm:$0xff] %v8871_v46 }
 0x250   : > { %v8866_v54 = vpop.f32.mrf.mxu1 }
 0x252   : > { %1574 = vmatmul.bf16.vlgmr.msra.gmra.mxu3 %v8484_v31  ;;  %v8878_v31 = vand.u32 127, %v12500_v0 }
 0x253   : > { %v8853_v48 = vpop.f32.mrf.mxu0 }
 0x254   : > { %12871 = vst [vmem:[#allocation114_spill] sm:$0xff] %v8853_v48  ;;  %vm1746_vm0 = vcmp.lt.s32.totalorder %v8878_v31, 4 }
 0x255   : > { %v8868_v13 = vpop.f32.mrf.mxu2 }
 0x256   : > { %12875 = vst [vmem:[#allocation118_spill] sm:$0xff] %v8868_v13  ;;  %v8885_v25 = vpop.f32.mrf.mxu3 }
 0x257   : > { %12879 = vst [vmem:[#allocation122_spill] sm:$0xff] %v8885_v25 }
 0x258   : > { %v8881_v14 = vpop.f32.mrf.mxu1 }
 0x25a   : > { %1401 = vmatmul.bf16.gmra.mxu1 %v8489_v38 }
 0x25b   : > { %v8864_v22 = vpop.f32.mrf.mxu0 }
 0x25c   : > { %12874 = vst [vmem:[#allocation117_spill] sm:$0xff] %v8864_v22 }
 0x25d   : > { %1490 = vmatmul.bf16.gmra.mxu2 %v8489_v38  ;;  %v8883_v49 = vpop.f32.mrf.mxu2 }
 0x25e   : > { %1698 = vmatmul.bf16.gmra.mxu0 %v8526_v39  ;;  %12878 = vst [vmem:[#allocation121_spill] sm:$0xff] %v8883_v49 }
 0x260   : > { %v8893_v22 = vpop.f32.mrf.mxu1 }
 0x262   : > { %1579 = vmatmul.bf16.gmra.mxu3 %v8489_v38  ;;  %v8898_v38 = vpop.f32.mrf.mxu3 }
 0x263   : > { %v8873_v63 = vpop.f32.mrf.mxu0  ;;  %12881 = vst [vmem:[#allocation124_spill] sm:$0xff] %v8898_v38 }
 0x264   : > { %12877 = vst [vmem:[#allocation120_spill] sm:$0xff] %v8873_v63 }
 0x265   : > { %v8895_v0 = vpop.f32.mrf.mxu2 }
 0x266   : > { %12880 = vst [vmem:[#allocation123_spill] sm:$0xff] %v8895_v0 }
 0x26a   : > { %1406 = vmatmul.bf16.gmra.mxu1 %v8494_v44  ;;  %v8912_v49 = vpop.f32.mrf.mxu3 }
 0x26b   : > { %v1664_v47 = vpop.f32.mrf.mxu0  ;;  %12883 = vst [vmem:[#allocation126_spill] sm:$0xff] %v8912_v49 }
 0x26c   : > { %v8890_v63 = vsel %vm1746_vm0, %v1664_v47, -1e+30  ;;  %v8908_v47 = vpop.f32.mrf.mxu1 }
 0x26d   : > { %1779 = vmax.xlane.f32.xlu0 %v8890_v63  ;;  %1495 = vmatmul.bf16.gmra.mxu2 %v8494_v44  ;;  %v8910_v0 = vpop.f32.mrf.mxu2 }
 0x26e   : > { %1703 = vmatmul.bf16.gmra.mxu0 %v8519_v35  ;;  %12882 = vst [vmem:[#allocation125_spill] sm:$0xff] %v8910_v0 }
 0x272   : > { %1584 = vmatmul.bf16.gmra.mxu3 %v8494_v44  ;;  %v8924_v44 = vpop.f32.mrf.mxu3 }
 0x273   : > { %v1666_v48 = vpop.f32.mrf.mxu0  ;;  %12886 = vst [vmem:[#allocation129_spill] sm:$0xff] %v8924_v44 }
 0x274   : > { %v8903_v25 = vsel %vm1746_vm0, %v1666_v48, -1e+30  ;;  %v8919_v48 = vpop.f32.mrf.mxu1 }
 0x275   : > { %1781 = vmax.xlane.f32.xlu0 %v8903_v25  ;;  %12884 = vst [vmem:[#allocation127_spill] sm:$0xff] %v8919_v48  ;;  %v8921_v46 = vpop.f32.mrf.mxu2 }
 0x276   : > { %12885 = vst [vmem:[#allocation128_spill] sm:$0xff] %v8921_v46 }
 0x27a   : > { %1411 = vmatmul.bf16.gmra.mxu1 %v8499_v50  ;;  %v8938_v49 = vpop.f32.mrf.mxu3 }
 0x27b   : > { %v1669_v38 = vpop.f32.mrf.mxu0  ;;  %12889 = vst [vmem:[#allocation132_spill] sm:$0xff] %v8938_v49 }
 0x27c   : > { %v8916_v13 = vsel %vm1746_vm0, %v1669_v38, -1e+30  ;;  %v8934_v38 = vpop.f32.mrf.mxu1 }
 0x27d   : > { %1783 = vmax.xlane.f32.xlu1 %v8916_v13  ;;  %1500 = vmatmul.bf16.gmra.mxu2 %v8499_v50  ;;  %12887 = vst [vmem:[#allocation130_spill] sm:$0xff] %v8934_v38  ;;  %v8936_v46 = vpop.f32.mrf.mxu2  ;;  %v7536_v38 = vld [vmem:[#allocation8 + $0x184] sm:$0xf] }
 0x27e   : > { %1708 = vmatmul.bf16.gmra.mxu0 %v8531_v42  ;;  %12888 = vst [vmem:[#allocation131_spill] sm:$0xff] %v8936_v46 }
 0x282   : > { %1589 = vmatmul.bf16.gmra.mxu3 %v8499_v50  ;;  %v8950_v50 = vpop.f32.mrf.mxu3 }
 0x283   : > { %v1671_v61 = vpop.f32.mrf.mxu0  ;;  %12892 = vst [vmem:[#allocation135_spill] sm:$0xff] %v8950_v50 }
 0x284   : > { %v8929_v0 = vsel %vm1746_vm0, %v1671_v61, -1e+30  ;;  %v8945_v61 = vpop.f32.mrf.mxu1 }
 0x285   : > { %1785 = vmax.xlane.f32.xlu1 %v8929_v0  ;;  %12890 = vst [vmem:[#allocation133_spill] sm:$0xff] %v8945_v61  ;;  %v8947_v37 = vpop.f32.mrf.mxu2 }
 0x286   : > { %12891 = vst [vmem:[#allocation134_spill] sm:$0xff] %v8947_v37 }
 0x28a   : > { %1416 = vmatmul.bf16.gmra.mxu1 %v8504_v56  ;;  %v8964_v49 = vpop.f32.mrf.mxu3 }
 0x28b   : > { %v1674_v44 = vpop.f32.mrf.mxu0  ;;  %12895 = vst [vmem:[#allocation138_spill] sm:$0xff] %v8964_v49 }
 0x28c   : > { %v8942_v45 = vsel %vm1746_vm0, %v1674_v44, -1e+30  ;;  %v8960_v44 = vpop.f32.mrf.mxu1 }
 0x28d   : > { %1787 = vmax.xlane.f32.xlu2 %v8942_v45  ;;  %1505 = vmatmul.bf16.gmra.mxu2 %v8504_v56  ;;  %12893 = vst [vmem:[#allocation136_spill] sm:$0xff] %v8960_v44  ;;  %v8962_v37 = vpop.f32.mrf.mxu2 }
 0x28e   : > { %1713 = vmatmul.bf16.gmra.mxu0 %v8541_v51  ;;  %12894 = vst [vmem:[#allocation137_spill] sm:$0xff] %v8962_v37 }
 0x292   : > { %1594 = vmatmul.bf16.gmra.mxu3 %v8504_v56  ;;  %v8976_v56 = vpop.f32.mrf.mxu3 }
 0x293   : > { %v1676_v18 = vpop.f32.mrf.mxu0  ;;  %12898 = vst [vmem:[#allocation141_spill] sm:$0xff] %v8976_v56 }
 0x294   : > { %v8955_v46 = vsel %vm1746_vm0, %v1676_v18, -1e+30  ;;  %v8971_v18 = vpop.f32.mrf.mxu1 }
 0x295   : > { %1789 = vmax.xlane.f32.xlu2 %v8955_v46  ;;  %12896 = vst [vmem:[#allocation139_spill] sm:$0xff] %v8971_v18  ;;  %v8973_v27 = vpop.f32.mrf.mxu2 }
 0x296   : > { %12897 = vst [vmem:[#allocation140_spill] sm:$0xff] %v8973_v27 }
 0x29a   : > { %1421 = vmatmul.bf16.gmra.mxu1 %v8509_v7  ;;  %v8990_v49 = vpop.f32.mrf.mxu3 }
 0x29b   : > { %v1679_v50 = vpop.f32.mrf.mxu0  ;;  %12901 = vst [vmem:[#allocation144_spill] sm:$0xff] %v8990_v49 }
 0x29c   : > { %v8968_v5 = vsel %vm1746_vm0, %v1679_v50, -1e+30  ;;  %v8986_v50 = vpop.f32.mrf.mxu1 }
 0x29d   : > { %1791 = vmax.xlane.f32.xlu0 %v8968_v5  ;;  %1510 = vmatmul.bf16.gmra.mxu2 %v8509_v7  ;;  %12899 = vst [vmem:[#allocation142_spill] sm:$0xff] %v8986_v50  ;;  %v8988_v27 = vpop.f32.mrf.mxu2 }
 0x29e   : > { %1718 = vmatmul.bf16.gmra.mxu0 %v8553_v57  ;;  %12900 = vst [vmem:[#allocation143_spill] sm:$0xff] %v8988_v27 }
 0x2a2   : > { %1599 = vmatmul.bf16.gmra.mxu3 %v8509_v7  ;;  %v9002_v7 = vpop.f32.mrf.mxu3 }
 0x2a3   : > { %v1681_v44 = vpop.f32.mrf.mxu0  ;;  %12904 = vst [vmem:[#allocation147_spill] sm:$0xff] %v9002_v7 }
 0x2a4   : > { %v8981_v37 = vsel %vm1746_vm0, %v1681_v44, -1e+30  ;;  %v8997_v44 = vpop.f32.mrf.mxu1 }
 0x2a5   : > { %1793 = vmax.xlane.f32.xlu1 %v8981_v37  ;;  %12902 = vst [vmem:[#allocation145_spill] sm:$0xff] %v8997_v44  ;;  %v8999_v17 = vpop.f32.mrf.mxu2 }
 0x2a6   : > { %12903 = vst [vmem:[#allocation146_spill] sm:$0xff] %v8999_v17 }
 0x2aa   : > { %1426 = vmatmul.bf16.gmra.mxu1 %v8514_v24  ;;  %v9011_v49 = vpop.f32.mrf.mxu3 }
 0x2ab   : > { %v1684_v56 = vpop.f32.mrf.mxu0  ;;  %12907 = vst [vmem:[#allocation150_spill] sm:$0xff] %v9011_v49 }
 0x2ac   : > { %v8994_v18 = vsel %vm1746_vm0, %v1684_v56, -1e+30  ;;  %v9007_v27 = vpop.f32.mrf.mxu1 }
 0x2ad   : > { %1795 = vmax.xlane.f32.xlu1 %v8994_v18  ;;  %1515 = vmatmul.bf16.gmra.mxu2 %v8514_v24  ;;  %12905 = vst [vmem:[#allocation148_spill] sm:$0xff] %v9007_v27  ;;  %v9009_v56 = vpop.f32.mrf.mxu2 }
 0x2ae   : > { %1723 = vmatmul.bf16.gmra.mxu0 %v8565_v1  ;;  %12906 = vst [vmem:[#allocation149_spill] sm:$0xff] %v9009_v56 }
 0x2b2   : > { %1604 = vmatmul.bf16.gmra.mxu3 %v8514_v24  ;;  %v9018_v17 = vpop.f32.mrf.mxu3 }
 0x2b3   : > { %12910 = vst [vmem:[#allocation153_spill] sm:$0xff] %v9018_v17 }
 0x2b4   : > { %v9013_v50 = vpop.f32.mrf.mxu1 }
 0x2b5   : > { %12908 = vst [vmem:[#allocation151_spill] sm:$0xff] %v9013_v50  ;;  %v9015_v44 = vpop.f32.mrf.mxu2 }
 0x2b6   : > { %12909 = vst [vmem:[#allocation152_spill] sm:$0xff] %v9015_v44 }
 0x2ba   : > { %1431 = vmatmul.bf16.gmra.mxu1 %v8526_v39  ;;  %v9027_v56 = vpop.f32.mrf.mxu3 }
 0x2bb   : > { %12913 = vst [vmem:[#allocation156_spill] sm:$0xff] %v9027_v56  ;;  %v1686_v56 = vpop.f32.mrf.mxu0 }
 0x2bc   : > { %v9025_v7 = vpop.f32.mrf.mxu1 }
 0x2bd   : > { %1520 = vmatmul.bf16.gmra.mxu2 %v8526_v39  ;;  %v9023_v24 = vpop.f32.mrf.mxu2  ;;  %12912 = vst [vmem:[#allocation155_spill] sm:$0xff] %v9025_v7 }
 0x2be   : > { %1728 = vmatmul.bf16.gmra.mxu0 %v8577_v6  ;;  %12911 = vst [vmem:[#allocation154_spill] sm:$0xff] %v9023_v24 }
 0x2c2   : > { %1609 = vmatmul.bf16.gmra.mxu3 %v8526_v39  ;;  %v9032_v44 = vpop.f32.mrf.mxu3 }
 0x2c3   : > { %12915 = vst [vmem:[#allocation158_spill] sm:$0xff] %v9032_v44 }
 0x2c5   : > { %v9029_v49 = vpop.f32.mrf.mxu2 }
 0x2c6   : > { %12914 = vst [vmem:[#allocation157_spill] sm:$0xff] %v9029_v49 }
 0x2c7   : > { %v9034_v50 = vpop.f32.mrf.mxu1 }
 0x2c8   : > { %12916 = vst [vmem:[#allocation159_spill] sm:$0xff] %v9034_v50 }
 0x2ca   : > { %1436 = vmatmul.bf16.gmra.mxu1 %v8519_v35 }
 0x2cd   : > { %1525 = vmatmul.bf16.gmra.mxu2 %v8519_v35 }
 0x2ce   : > { %1733 = vmatmul.bf16.gmra.mxu0 %v8589_v15 }
 0x2cf   : > { %v9043_v17 = vpop.f32.mrf.mxu1 }
 0x2d0   : > { %v9039_v39 = vpop.f32.mrf.mxu2  ;;  %12919 = vst [vmem:[#allocation162_spill] sm:$0xff] %v9043_v17 }
 0x2d1   : > { %12917 = vst [vmem:[#allocation160_spill] sm:$0xff] %v9039_v39 }
 0x2d2   : > { %1614 = vmatmul.bf16.gmra.mxu3 %v8519_v35  ;;  %v1689_v35 = vpop.f32.mrf.mxu0 }
 0x2d5   : > { %v9041_v24 = vpop.f32.mrf.mxu3 }
 0x2d6   : > { %12918 = vst [vmem:[#allocation161_spill] sm:$0xff] %v9041_v24 }
 0x2d7   : > { %v9051_v27 = vpop.f32.mrf.mxu1 }
 0x2d8   : > { %v9046_v49 = vpop.f32.mrf.mxu2  ;;  %12922 = vst [vmem:[#allocation165_spill] sm:$0xff] %v9051_v27 }
 0x2d9   : > { %12920 = vst [vmem:[#allocation163_spill] sm:$0xff] %v9046_v49 }
 0x2da   : > { %1441 = vmatmul.bf16.gmra.mxu1 %v8531_v42  ;;  %v1691_v27 = vpop.f32.mrf.mxu0 }
 0x2dd   : > { %v9048_v7 = vpop.f32.mrf.mxu3  ;;  %1530 = vmatmul.bf16.gmra.mxu2 %v8531_v42 }
 0x2de   : > { %1738 = vmatmul.bf16.gmra.mxu0 %v8601_v60  ;;  %12921 = vst [vmem:[#allocation164_spill] sm:$0xff] %v9048_v7 }
 0x2df   : > { %v9061_v24 = vpop.f32.mrf.mxu1 }
 0x2e0   : > { %v1780_v44 = vpop.xlane.xlu0 %1779  ;;  %v9056_v17 = vpop.f32.mrf.mxu2  ;;  %12925 = vst [vmem:[#allocation168_spill] sm:$0xff] %v9061_v24 }
 0x2e1   : > { %v1843_v50 = vsub.f32 %v8890_v63, %v1780_v44  ;;  %12923 = vst [vmem:[#allocation166_spill] sm:$0xff] %v9056_v17 }
 0x2e2   : > { %1619 = vmatmul.bf16.gmra.mxu3 %v8531_v42 }
 0x2e3   : > { %v1875_v21 = vmul.f32 1.442695, %v1843_v50 }
 0x2e5   : > { %7748 = vpow2.f32 %v1875_v21  ;;  %v9058_v49 = vpop.f32.mrf.mxu3 }
 0x2e6   : > { %12924 = vst [vmem:[#allocation167_spill] sm:$0xff] %v9058_v49 }
 0x2e7   : > { %v9071_v34 = vpop.f32.mrf.mxu1 }
 0x2e8   : > { %v1782_v39 = vpop.xlane.xlu0 %1781  ;;  %v9066_v44 = vpop.f32.mrf.mxu2  ;;  %12928 = vst [vmem:[#allocation171_spill] sm:$0xff] %v9071_v34 }
 0x2e9   : > { %v1844_v7 = vsub.f32 %v8903_v25, %v1782_v39  ;;  %12926 = vst [vmem:[#allocation169_spill] sm:$0xff] %v9066_v44  ;;  %v9077_v39 = vsel %vm1746_vm0, %v1686_v56, -1e+30  ;;  %v9091_v56 = vsel %vm1746_vm0, %v1689_v35, -1e+30  ;;  %v1694_v44 = vpop.f32.mrf.mxu0 }
 0x2ea   : > { %1446 = vmatmul.bf16.gmra.mxu1 %v8541_v51 }
 0x2eb   : > { %v9063_v63 = vpop.eup %7748  ;;  %v1877_v50 = vmul.f32 1.442695, %v1844_v7 }
 0x2ec   : > { %1939 = vadd.xlane.f32.xlu2 %v9063_v63 }
 0x2ed   : > { %7750 = vpow2.f32 %v1877_v50  ;;  %v9068_v42 = vpop.f32.mrf.mxu3  ;;  %1535 = vmatmul.bf16.gmra.mxu2 %v8541_v51 }
 0x2ee   : > { %12927 = vst [vmem:[#allocation170_spill] sm:$0xff] %v9068_v42 }
 0x2f0   : > { %v1784_v21 = vpop.xlane.xlu1 %1783 }
 0x2f1   : > { %v1845_v17 = vsub.f32 %v8916_v13, %v1784_v21  ;;  %v9084_v13 = vpop.f32.mrf.mxu2  ;;  %v9093_v21 = vpop.f32.mrf.mxu1 }
 0x2f2   : > { %1624 = vmatmul.bf16.gmra.mxu3 %v8541_v51  ;;  %12929 = vst [vmem:[#allocation172_spill] sm:$0xff] %v9084_v13 }
 0x2f3   : > { %v9073_v49 = vpop.eup %7750  ;;  %v1879_v25 = vmul.f32 1.442695, %v1845_v17  ;;  %12931 = vst [vmem:[#allocation174_spill] sm:$0xff] %v9093_v21 }
 0x2f4   : > { %1941 = vadd.xlane.f32.xlu0 %v9073_v49  ;;  %1797 = vmax.xlane.f32.xlu2 %v9077_v39 }
 0x2f5   : > { %7752 = vpow2.f32 %v1879_v25  ;;  %v9086_v50 = vpop.f32.mrf.mxu3 }
 0x2f6   : > { %12930 = vst [vmem:[#allocation173_spill] sm:$0xff] %v9086_v50 }
 0x2f8   : > { %v1786_v7 = vpop.xlane.xlu1 %1785 }
 0x2f9   : > { %v1846_v17 = vsub.f32 %v8929_v0, %v1786_v7  ;;  %v9099_v51 = vpop.f32.mrf.mxu2  ;;  %v9104_v35 = vpop.f32.mrf.mxu1 }
 0x2fa   : > { %12932 = vst [vmem:[#allocation175_spill] sm:$0xff] %v9099_v51  ;;  %1451 = vmatmul.bf16.gmra.mxu1 %v8553_v57 }
 0x2fb   : > { %v9095_v34 = vpop.eup %7752  ;;  %v1881_v25 = vmul.f32 1.442695, %v1846_v17  ;;  %12934 = vst [vmem:[#allocation177_spill] sm:$0xff] %v9104_v35  ;;  %v9110_v17 = vsel %vm1746_vm0, %v1691_v27, -1e+30 }
 0x2fc   : > { %1943 = vadd.xlane.f32.xlu0 %v9095_v34  ;;  %1799 = vmax.xlane.f32.xlu2 %v9091_v56  ;;  %v9124_v35 = vsel %vm1746_vm0, %v1694_v44, -1e+30 }
 0x2fd   : > { %7754 = vpow2.f32 %v1881_v25  ;;  %v9101_v50 = vpop.f32.mrf.mxu3  ;;  %v1696_v25 = vpop.f32.mrf.mxu0  ;;  %1540 = vmatmul.bf16.gmra.mxu2 %v8553_v57 }
 0x2fe   : > { %12933 = vst [vmem:[#allocation176_spill] sm:$0xff] %v9101_v50  ;;  %v9143_v20 = vsel %vm1746_vm0, %v1696_v25, -1e+30 }
 0x300   : > { %v1788_v13 = vpop.xlane.xlu2 %1787 }
 0x301   : > { %v1847_v0 = vsub.f32 %v8942_v45, %v1788_v13  ;;  %v9117_v45 = vpop.f32.mrf.mxu2  ;;  %v9126_v51 = vpop.f32.mrf.mxu1 }
 0x302   : > { %1629 = vmatmul.bf16.gmra.mxu3 %v8553_v57  ;;  %12935 = vst [vmem:[#allocation178_spill] sm:$0xff] %v9117_v45  ;;  %v7121_v57 = vld [vmem:[#allocation8 + $0x1c0] sm:$0xf] }
 0x303   : > { %v9106_v7 = vpop.eup %7754  ;;  %v1883_v21 = vmul.f32 1.442695, %v1847_v0  ;;  %12937 = vst [vmem:[#allocation180_spill] sm:$0xff] %v9126_v51  ;;  %v7548_v45 = vld [vmem:[#allocation8 + $0x1dc] sm:$0xf0] }
 0x304   : > { %1945 = vadd.xlane.f32.xlu1 %v9106_v7  ;;  %1801 = vmax.xlane.f32.xlu0 %v9110_v17 }
 0x305   : > { %7756 = vpow2.f32 %v1883_v21  ;;  %v9119_v0 = vpop.f32.mrf.mxu3  ;;  %v1699_v24 = vpop.f32.mrf.mxu0 }
 0x306   : > { %12936 = vst [vmem:[#allocation179_spill] sm:$0xff] %v9119_v0  ;;  %v7122_v0 = vor.u32 %v7548_v45, %v7121_v57  ;;  %v9157_v57 = vsel %vm1746_vm0, %v1699_v24, -1e+30  ;;  %v7545_v24 = vld [vmem:[#allocation8 + $0x1cc] sm:$0xf] }
 0x308   : > { %v1790_v13 = vpop.xlane.xlu2 %1789  ;;  %2997 = vmatpush.bf16.msra.mxu1 %v7122_v0 }
 0x309   : > { %v1848_v27 = vsub.f32 %v8955_v46, %v1790_v13  ;;  %v9132_v42 = vpop.f32.mrf.mxu2  ;;  %v9137_v51 = vpop.f32.mrf.mxu1 }
 0x30a   : > { %12938 = vst [vmem:[#allocation181_spill] sm:$0xff] %v9132_v42  ;;  %1456 = vmatmul.bf16.gmra.mxu1 %v8565_v1  ;;  %v7123_v42 = vld [vmem:[#allocation8 + $0x1e0] sm:$0xf0] }
 0x30b   : > { %v9128_v50 = vpop.eup %7756  ;;  %v1885_v21 = vmul.f32 1.442695, %v1848_v27  ;;  %12940 = vst [vmem:[#allocation183_spill] sm:$0xff] %v9137_v51 }
 0x30c   : > { %1947 = vadd.xlane.f32.xlu1 %v9128_v50  ;;  %1803 = vmax.xlane.f32.xlu0 %v9124_v35 }
 0x30d   : > { %7758 = vpow2.f32 %v1885_v21  ;;  %v9134_v44 = vpop.f32.mrf.mxu3  ;;  %1545 = vmatmul.bf16.gmra.mxu2 %v8565_v1 }
 0x30e   : > { %12939 = vst [vmem:[#allocation182_spill] sm:$0xff] %v9134_v44  ;;  %v7549_v44 = vld [vmem:[#allocation8 + $0x1e4] sm:$0xf0] }
 0x310   : > { %v1792_v46 = vpop.xlane.xlu0 %1791 }
 0x311   : > { %v1849_v13 = vsub.f32 %v8968_v5, %v1792_v46  ;;  %v1701_v5 = vpop.f32.mrf.mxu0  ;;  %v9150_v45 = vpop.f32.mrf.mxu2 }
 0x312   : > { %1634 = vmatmul.bf16.gmra.mxu3 %v8565_v1  ;;  %12941 = vst [vmem:[#allocation184_spill] sm:$0xff] %v9150_v45  ;;  %v9159_v46 = vpop.f32.mrf.mxu1  ;;  %v7089_v1 = vld [vmem:[#allocation8 + $0x180] sm:$0xf] }
 0x313   : > { %v9139_v27 = vpop.eup %7758  ;;  %v1887_v61 = vmul.f32 1.442695, %v1849_v13  ;;  %12943 = vst [vmem:[#allocation186_spill] sm:$0xff] %v9159_v46  ;;  %v7540_v45 = vld [vmem:[#allocation8 + $0x19c] sm:$0xf0] }
 0x314   : > { %1949 = vadd.xlane.f32.xlu2 %v9139_v27  ;;  %1805 = vmax.xlane.f32.xlu1 %v9143_v20  ;;  %v7090_v51 = vor.u32 %v7540_v45, %v7089_v1  ;;  %v7541_v45 = vld [vmem:[#allocation8 + $0x1a4] sm:$0xf0]  ;;  %v7099_v1 = vld [vmem:[#allocation8 + $0x1a8] sm:$0xf0] }
 0x315   : > { %7760 = vpow2.f32 %v1887_v61  ;;  %v9152_v21 = vpop.f32.mrf.mxu3 }
 0x316   : > { %12942 = vst [vmem:[#allocation185_spill] sm:$0xff] %v9152_v21  ;;  %v7544_v21 = vld [vmem:[#allocation8 + $0x1c4] sm:$0xf]  ;;  %2998 = vmatpush.bf16.msra.mxu1 %v7090_v51  ;;  %v7532_v51 = vld [vmem:[#allocation8 + $0x15c] sm:$0xf0] }
 0x318   : > { %v1794_v0 = vpop.xlane.xlu1 %1793 }
 0x319   : > { %v1850_v25 = vsub.f32 %v8981_v37, %v1794_v0  ;;  %v7129_v37 = vld [vmem:[#allocation8 + $0x1c8] sm:$0xf]  ;;  %v7126_v0 = vor.u32 %v7544_v21, %v7123_v42  ;;  %v9165_v4 = vpop.f32.mrf.mxu2  ;;  %v9172_v21 = vsel %vm1746_vm0, %v1701_v5, -1e+30 }
 0x31a   : > { %12944 = vst [vmem:[#allocation187_spill] sm:$0xff] %v9165_v4  ;;  %v7130_v46 = vor.u32 %v7549_v44, %v7129_v37  ;;  %v9174_v4 = vpop.f32.mrf.mxu1  ;;  %v1704_v44 = vpop.f32.mrf.mxu0  ;;  %v7094_v37 = vor.u32 %v7536_v38, %v7091_v26  ;;  %1461 = vmatmul.bf16.gmra.mxu1 %v8577_v6  ;;  %v7065_v5 = vld [vmem:[#allocation8 + $0x148] sm:$0xf] }
 0x31b   : > { %v9161_v13 = vpop.eup %7760  ;;  %v1889_v61 = vmul.f32 1.442695, %v1850_v25  ;;  %v7134_v25 = vor.u32 %v7545_v24, %v7131_v9  ;;  %3086 = vmatpush.bf16.msrb.mxu2 %v7126_v0  ;;  %12946 = vst [vmem:[#allocation189_spill] sm:$0xff] %v9174_v4  ;;  %v7057_v9 = vld [vmem:[#allocation8 + $0x140] sm:$0xf]  ;;  %v7098_v24 = vor.u32 %v7541_v45, %v7097_v8  ;;  %v7066_v26 = vor.u32 %v7533_v16, %v7065_v5 }
 0x31c   : > { %1951 = vadd.xlane.f32.xlu2 %v9161_v13  ;;  %1807 = vmax.xlane.f32.xlu1 %v9157_v57  ;;  %v7059_v0 = vld [vmem:[#allocation8 + $0x160] sm:$0xf0]  ;;  %v7524_v5 = vld [vmem:[#allocation8 + $0x11c] sm:$0xf0]  ;;  %v7001_v4 = vld [vmem:[#allocation8 + $0xc8] sm:$0xf] }
 0x31d   : > { %7762 = vpow2.f32 %v1889_v61  ;;  %v9167_v48 = vpop.f32.mrf.mxu3  ;;  %v7537_v61 = vld [vmem:[#allocation8 + $0x18c] sm:$0xf]  ;;  %3175 = vmatpush.bf16.msrb.mxu3 %v7130_v46  ;;  %3264 = vmatpush.bf16.msrb.mxu0 %v7134_v25 }
 0x31e   : > { %12945 = vst [vmem:[#allocation188_spill] sm:$0xff] %v9167_v48  ;;  %v7528_v48 = vld [vmem:[#allocation8 + $0x144] sm:$0xf]  ;;  %v7529_v46 = vld [vmem:[#allocation8 + $0x14c] sm:$0xf]  ;;  %1550 = vmatmul.bf16.gmra.mxu2 %v8577_v6 }
 0x31f   : > { %v7067_v25 = vld [vmem:[#allocation8 + $0x168] sm:$0xf0]  ;;  %3087 = vmatpush.bf16.msrb.mxu2 %v7094_v37  ;;  %v7062_v8 = vor.u32 %v7528_v48, %v7059_v0 }
 0x320   : > { %v1796_v28 = vpop.xlane.xlu1 %1795  ;;  %v7070_v45 = vor.u32 %v7529_v46, %v7067_v25  ;;  %v7520_v46 = vld [vmem:[#allocation8 + $0x104] sm:$0xf] }
 0x321   : > { %v1851_v42 = vsub.f32 %v8994_v18, %v1796_v28  ;;  %v7102_v28 = vor.u32 %v7537_v61, %v7099_v1  ;;  %v7058_v18 = vor.u32 %v7532_v51, %v7057_v9  ;;  %3176 = vmatpush.bf16.msrb.mxu3 %v7098_v24  ;;  %v9183_v38 = vpop.f32.mrf.mxu2  ;;  %v9189_v1 = vsel %vm1746_vm0, %v1704_v44, -1e+30 }
 0x322   : > { %1639 = vmatmul.bf16.gmra.mxu3 %v8577_v6  ;;  %12947 = vst [vmem:[#allocation190_spill] sm:$0xff] %v9183_v38  ;;  %v1706_v16 = vpop.f32.mrf.mxu0  ;;  %v6995_v38 = vld [vmem:[#allocation8 + $0xe0] sm:$0xf0] }
 0x323   : > { %v9176_v33 = vpop.eup %7762  ;;  %v1891_v3 = vmul.f32 1.442695, %v1851_v42  ;;  %3265 = vmatpush.bf16.msrb.mxu0 %v7102_v28  ;;  %2999 = vmatpush.bf16.msra.mxu1 %v7058_v18  ;;  %v9203_v9 = vsel %vm1746_vm0, %v1706_v16, -1e+30  ;;  %v7025_v18 = vld [vmem:[#allocation8 + $0x100] sm:$0xf] }
 0x324   : > { %1953 = vadd.xlane.f32.xlu0 %v9176_v33  ;;  %1809 = vmax.xlane.f32.xlu2 %v9172_v21  ;;  %v7026_v25 = vor.u32 %v7524_v5, %v7025_v18  ;;  %v7512_v18 = vld [vmem:[#allocation8 + $0xc4] sm:$0xf] }
 0x325   : > { %7764 = vpow2.f32 %v1891_v3  ;;  %v9185_v61 = vpop.f32.mrf.mxu3  ;;  %v9191_v3 = vpop.f32.mrf.mxu1  ;;  %3088 = vmatpush.bf16.msrb.mxu2 %v7062_v8  ;;  %3177 = vmatpush.bf16.msrb.mxu3 %v7066_v26  ;;  %v7027_v8 = vld [vmem:[#allocation8 + $0x120] sm:$0xf0]  ;;  %v7033_v26 = vld [vmem:[#allocation8 + $0x108] sm:$0xf] }
 0x326   : > { %12948 = vst [vmem:[#allocation191_spill] sm:$0xff] %v9185_v61  ;;  %v7030_v16 = vor.u32 %v7520_v46, %v7027_v8  ;;  %v6998_v46 = vor.u32 %v7512_v18, %v6995_v38  ;;  %v7517_v8 = vld [vmem:[#allocation8 + $0xe4] sm:$0xf0] }
 0x327   : > { %12949 = vst [vmem:[#allocation192_spill] sm:$0xff] %v9191_v3  ;;  %3266 = vmatpush.bf16.msrb.mxu0 %v7070_v45  ;;  %3000 = vmatpush.bf16.msra.mxu1 %v7026_v25  ;;  %v6993_v3 = vld [vmem:[#allocation8 + $0xc0] sm:$0xf]  ;;  %v7003_v25 = vld [vmem:[#allocation8 + $0xe8] sm:$0xf0] }
 0x329   : > { %v9197_v48 = vpop.f32.mrf.mxu2  ;;  %3089 = vmatpush.bf16.msrb.mxu2 %v7030_v16  ;;  %v7504_v16 = vld [vmem:[#allocation8 + $0x84] sm:$0xf] }
 0x32a   : > { %12950 = vst [vmem:[#allocation193_spill] sm:$0xff] %v9197_v48  ;;  %1466 = vmatmul.bf16.gmra.mxu1 %v8589_v15  ;;  %v1709_v44 = vpop.f32.mrf.mxu0 }
 0x32b   : > { %v9193_v6 = vpop.eup %7764  ;;  %v9217_v0 = vsel %vm1746_vm0, %v1709_v44, -1e+30 }
 0x32c   : > { %1955 = vadd.xlane.f32.xlu0 %v9193_v6  ;;  %1811 = vmax.xlane.f32.xlu2 %v9189_v1 }
 0x32d   : > { %v9199_v42 = vpop.f32.mrf.mxu3  ;;  %v9205_v51 = vpop.f32.mrf.mxu1  ;;  %3090 = vmatpush.bf16.msrb.mxu2 %v6998_v46  ;;  %v7500_v46 = vld [vmem:[#allocation8 + $0x5c] sm:$0xf0] }
 0x32e   : > { %12951 = vst [vmem:[#allocation194_spill] sm:$0xff] %v9199_v42  ;;  %1555 = vmatmul.bf16.gmra.mxu2 %v8589_v15  ;;  %v7516_v42 = vld [vmem:[#allocation8 + $0xdc] sm:$0xf0] }
 0x32f   : > { %12952 = vst [vmem:[#allocation195_spill] sm:$0xff] %v9205_v51  ;;  %v7521_v51 = vld [vmem:[#allocation8 + $0x10c] sm:$0xf]  ;;  %v6994_v5 = vor.u32 %v7516_v42, %v6993_v3  ;;  %v6963_v42 = vld [vmem:[#allocation8 + $0xa0] sm:$0xf0] }
 0x330   : > { %v6966_v18 = vor.u32 %v7504_v16, %v6963_v42  ;;  %v7497_v42 = vld [vmem:[#allocation8 + $0x4c] sm:$0xf] }
 0x331   : > { %v9211_v37 = vpop.f32.mrf.mxu2  ;;  %3001 = vmatpush.bf16.msra.mxu1 %v6994_v5  ;;  %v7505_v5 = vld [vmem:[#allocation8 + $0x8c] sm:$0xf] }
 0x332   : > { %1644 = vmatmul.bf16.gmra.mxu3 %v8589_v15  ;;  %12953 = vst [vmem:[#allocation196_spill] sm:$0xff] %v9211_v37  ;;  %v7525_v15 = vld [vmem:[#allocation8 + $0x124] sm:$0xf0]  ;;  %3091 = vmatpush.bf16.msrb.mxu2 %v6966_v18  ;;  %v6899_v18 = vld [vmem:[#allocation8 + $0x20] sm:$0xf0] }
 0x333   : > { %v7034_v37 = vor.u32 %v7525_v15, %v7033_v26  ;;  %v7513_v26 = vld [vmem:[#allocation8 + $0xcc] sm:$0xf]  ;;  %v7002_v15 = vor.u32 %v7517_v8, %v7001_v4 }
 0x334   : > { %1813 = vmax.xlane.f32.xlu0 %v9203_v9  ;;  %v6971_v8 = vld [vmem:[#allocation8 + $0xa8] sm:$0xf0] }
 0x335   : > { %v9213_v24 = vpop.f32.mrf.mxu3  ;;  %v9219_v28 = vpop.f32.mrf.mxu1  ;;  %3178 = vmatpush.bf16.msrb.mxu3 %v7034_v37  ;;  %v6961_v37 = vld [vmem:[#allocation8 + $0x80] sm:$0xf] }
 0x336   : > { %12954 = vst [vmem:[#allocation197_spill] sm:$0xff] %v9213_v24  ;;  %v7035_v24 = vld [vmem:[#allocation8 + $0x128] sm:$0xf0] }
 0x337   : > { %12955 = vst [vmem:[#allocation198_spill] sm:$0xff] %v9219_v28  ;;  %v7038_v44 = vor.u32 %v7521_v51, %v7035_v24  ;;  %v7006_v51 = vor.u32 %v7513_v26, %v7003_v25  ;;  %v7508_v24 = vld [vmem:[#allocation8 + $0x9c] sm:$0xf0] }
 0x338   : > { %v6962_v3 = vor.u32 %v7508_v24, %v6961_v37  ;;  %v6929_v25 = vld [vmem:[#allocation8 + $0x40] sm:$0xf]  ;;  %v7496_v37 = vld [vmem:[#allocation8 + $0x44] sm:$0xf] }
 0x339   : > { %v9222_v45 = vpop.f32.mrf.mxu2  ;;  %3267 = vmatpush.bf16.msrb.mxu0 %v7038_v44  ;;  %3179 = vmatpush.bf16.msrb.mxu3 %v7002_v15  ;;  %v6969_v44 = vld [vmem:[#allocation8 + $0x88] sm:$0xf]  ;;  %v6930_v15 = vor.u32 %v7500_v46, %v6929_v25  ;;  %v6931_v24 = vld [vmem:[#allocation8 + $0x60] sm:$0xf0] }
 0x33a   : > { %12956 = vst [vmem:[#allocation199_spill] sm:$0xff] %v9222_v45  ;;  %1471 = vmatmul.bf16.gmra.mxu1 %v8601_v60 }
 0x33b   : > { %3002 = vmatpush.bf16.msra.mxu1 %v6962_v3  ;;  %v6897_v3 = vld [vmem:[#allocation8] sm:$0xf] }
 0x33c   : > { %1815 = vmax.xlane.f32.xlu0 %v9217_v0 }
 0x33d   : > { %v9224_v48 = vpop.f32.mrf.mxu3  ;;  %v9226_v28 = vpop.f32.mrf.mxu1  ;;  %3268 = vmatpush.bf16.msrb.mxu0 %v7006_v51  ;;  %v6937_v51 = vld [vmem:[#allocation8 + $0x48] sm:$0xf] }
 0x33e   : > { %12957 = vst [vmem:[#allocation200_spill] sm:$0xff] %v9224_v48  ;;  %1560 = vmatmul.bf16.gmra.mxu2 %v8601_v60  ;;  %v7489_v48 = vld [vmem:[#allocation8 + $0xc] sm:$0xf] }
 0x33f   : > { %12958 = vst [vmem:[#allocation201_spill] sm:$0xff] %v9226_v28  ;;  %v7509_v28 = vld [vmem:[#allocation8 + $0xa4] sm:$0xf0]  ;;  %3003 = vmatpush.bf16.msra.mxu1 %v6930_v15  ;;  %v6907_v15 = vld [vmem:[#allocation8 + $0x28] sm:$0xf0] }
 0x340   : > { %v6970_v4 = vor.u32 %v7509_v28, %v6969_v44  ;;  %v6934_v28 = vor.u32 %v7496_v37, %v6931_v24  ;;  %v6939_v44 = vld [vmem:[#allocation8 + $0x68] sm:$0xf0]  ;;  %v6910_v24 = vor.u32 %v7489_v48, %v6907_v15  ;;  %v1711_v15 = vpop.f32.mrf.mxu0 }
 0x341   : > { %v9231_v38 = vpop.f32.mrf.mxu2 }
 0x342   : > { %1649 = vmatmul.bf16.gmra.mxu3 %v8601_v60  ;;  %12959 = vst [vmem:[#allocation202_spill] sm:$0xff] %v9231_v38  ;;  %v6974_v60 = vor.u32 %v7505_v5, %v6971_v8  ;;  %v7501_v38 = vld [vmem:[#allocation8 + $0x64] sm:$0xf0]  ;;  %v7492_v5 = vld [vmem:[#allocation8 + $0x1c] sm:$0xf0]  ;;  %3092 = vmatpush.bf16.msrb.mxu2 %v6934_v28 }
 0x343   : > { %3180 = vmatpush.bf16.msrb.mxu3 %v6970_v4  ;;  %v6938_v16 = vor.u32 %v7501_v38, %v6937_v51  ;;  %v6898_v8 = vor.u32 %v7492_v5, %v6897_v3  ;;  %v6905_v4 = vld [vmem:[#allocation8 + $0x8] sm:$0xf] }
 0x344   : > { %3269 = vmatpush.bf16.msrb.mxu0 %v6974_v60  ;;  %v7493_v60 = vld [vmem:[#allocation8 + $0x24] sm:$0xf0] }
 0x345   : > { %v9233_v45 = vpop.f32.mrf.mxu3  ;;  %v9235_v26 = vpop.f32.mrf.mxu1  ;;  %3004 = vmatpush.bf16.msra.mxu1 %v6898_v8  ;;  %v6906_v38 = vor.u32 %v7493_v60, %v6905_v4 }
 0x346   : > { %12960 = vst [vmem:[#allocation203_spill] sm:$0xff] %v9233_v45  ;;  %v6942_v45 = vor.u32 %v7497_v42, %v6939_v44 }
 0x347   : > { %12961 = vst [vmem:[#allocation204_spill] sm:$0xff] %v9235_v26  ;;  %3181 = vmatpush.bf16.msrb.mxu3 %v6938_v16  ;;  %v7488_v26 = vld [vmem:[#allocation8 + $0x4] sm:$0xf] }
 0x348   : > { %3270 = vmatpush.bf16.msrb.mxu0 %v6942_v45  ;;  %v6902_v46 = vor.u32 %v7488_v26, %v6899_v18 }
 0x349   : > { %v9237_v25 = vpop.f32.mrf.mxu2 }
 0x34a   : > { %12962 = vst [vmem:[#allocation205_spill] sm:$0xff] %v9237_v25  ;;  %3093 = vmatpush.bf16.msrb.mxu2 %v6902_v46 }
 0x34b   : > { %3182 = vmatpush.bf16.msrb.mxu3 %v6906_v38 }
 0x34c   : > { %3271 = vmatpush.bf16.msrb.mxu0 %v6910_v24 }
 0x34d   : > { %v9239_v37 = vpop.f32.mrf.mxu3  ;;  %v9241_v51 = vpop.f32.mrf.mxu1 }
 0x34e   : > { %12963 = vst [vmem:[#allocation206_spill] sm:$0xff] %v9239_v37 }
 0x34f   : > { %12964 = vst [vmem:[#allocation207_spill] sm:$0xff] %v9241_v51 }
 0x351   : > { %v9243_v28 = vpop.f32.mrf.mxu2 }
 0x352   : > { %12965 = vst [vmem:[#allocation208_spill] sm:$0xff] %v9243_v28 }
 0x355   : > { %v9245_v16 = vpop.f32.mrf.mxu3  ;;  %v9247_v45 = vpop.f32.mrf.mxu1 }
 0x356   : > { %12966 = vst [vmem:[#allocation209_spill] sm:$0xff] %v9245_v16 }
 0x357   : > { %12967 = vst [vmem:[#allocation210_spill] sm:$0xff] %v9247_v45 }
 0x359   : > { %v9249_v42 = vpop.f32.mrf.mxu2 }
 0x35a   : > { %12968 = vst [vmem:[#allocation211_spill] sm:$0xff] %v9249_v42 }
 0x35d   : > { %v9251_v44 = vpop.f32.mrf.mxu3  ;;  %v9253_v3 = vpop.f32.mrf.mxu1 }
 0x35e   : > { %12969 = vst [vmem:[#allocation212_spill] sm:$0xff] %v9251_v44 }
 0x35f   : > { %v1940_v26 = vpop.xlane.xlu2 %1939  ;;  %12970 = vst [vmem:[#allocation213_spill] sm:$0xff] %v9253_v3 }
 0x360   : > { %7766 = vrcp.f32 %v1940_v26 }
 0x361   : > { %v9256_v4 = vpop.f32.mrf.mxu2 }
 0x362   : > { %12971 = vst [vmem:[#allocation214_spill] sm:$0xff] %v9256_v4 }
 0x365   : > { %v9258_v46 = vpop.f32.mrf.mxu3  ;;  %v9260_v24 = vpop.f32.mrf.mxu1 }
 0x366   : > { %12972 = vst [vmem:[#allocation215_spill] sm:$0xff] %v9258_v46  ;;  %v7767_v60 = vpop.eup %7766 }
 0x367   : > { %v1942_v48 = vpop.xlane.xlu0 %1941  ;;  %v1798_v5 = vpop.xlane.xlu2 %1797  ;;  %12973 = vst [vmem:[#allocation216_spill] sm:$0xff] %v9260_v24  ;;  %v9263_v42 = vmul.f32 %v7767_v60, %v9063_v63 }
 0x368   : > { %7768 = vrcp.f32 %v1942_v48  ;;  %v1852_v8 = vsub.f32 %v9077_v39, %v1798_v5 }
 0x369   : > { %12974 = vst [vmem:[#allocation217_spill] sm:$0xff] %v9263_v42 }
 0x36a   : > { %v1893_v18 = vmul.f32 1.442695, %v1852_v8 }
 0x36c   : > { %7770 = vpow2.f32 %v1893_v18 }
 0x36d   : > { %v9281_v63 = vpop.f32.mrf.mxu3 }
 0x36e   : > { %v7769_v38 = vpop.eup %7768  ;;  %12978 = vst [vmem:[#allocation221_spill] sm:$0xff] %v9281_v63 }
 0x36f   : > { %v9266_v26 = vmul.f32 %v7769_v38, %v9073_v49  ;;  %v1944_v48 = vpop.xlane.xlu0 %1943  ;;  %v1800_v3 = vpop.xlane.xlu2 %1799 }
 0x370   : > { %v1853_v39 = vsub.f32 %v9091_v56, %v1800_v3  ;;  %v9279_v49 = vpop.f32.mrf.mxu2  ;;  %v1714_v56 = vpop.f32.mrf.mxu0 }
 0x371   : > { %12975 = vst [vmem:[#allocation218_spill] sm:$0xff] %v9266_v26  ;;  %v9271_v5 = vpack.c.bf16 %v9266_v26, %v9263_v42 }
 0x372   : > { %v9273_v8 = vpop.eup %7770  ;;  %v1895_v18 = vmul.f32 1.442695, %v1853_v39  ;;  %12977 = vst [vmem:[#allocation220_spill] sm:$0xff] %v9279_v49  ;;  %v9285_v39 = vpop.f32.mrf.mxu1 }
 0x373   : > { %12976 = vst [vmem:[#allocation219_spill] sm:$0xff] %v9271_v5  ;;  %3005 = vmatmul.bf16.vlgmr.msra.gmra.mxu1 %v9271_v5  ;;  %3094 = vmatmul.bf16.vlgmr.msrb.gmra.mxu2 %v9271_v5 }
 0x374   : > { %7772 = vpow2.f32 %v1895_v18  ;;  %3183 = vmatmul.bf16.vlgmr.msrb.gmra.mxu3 %v9271_v5  ;;  %3272 = vmatmul.bf16.vlgmr.msrb.gmra.mxu0 %v9271_v5  ;;  %12979 = vst [vmem:[#allocation222_spill] sm:$0xff] %v9285_v39 }
 0x375   : > { %1957 = vadd.xlane.f32.xlu1 %v9273_v8  ;;  %7774 = vrcp.f32 %v1944_v48  ;;  %v9292_v46 = vpop.f32.mrf.mxu3 }
 0x376   : > { %12981 = vst [vmem:[#allocation224_spill] sm:$0xff] %v9292_v46 }
 0x377   : > { %v1946_v3 = vpop.xlane.xlu1 %1945  ;;  %v1802_v60 = vpop.xlane.xlu0 %1801 }
 0x378   : > { %7776 = vrcp.f32 %v1946_v3  ;;  %v1854_v38 = vsub.f32 %v9110_v17, %v1802_v60  ;;  %v9290_v63 = vpop.f32.mrf.mxu2 }
 0x379   : > { %12980 = vst [vmem:[#allocation223_spill] sm:$0xff] %v9290_v63 }
 0x37a   : > { %v9287_v18 = vpop.eup %7772  ;;  %v1897_v24 = vmul.f32 1.442695, %v1854_v38  ;;  %v1716_v38 = vpop.f32.mrf.mxu0 }
 0x37b   : > { %v7775_v4 = vpop.eup %7774  ;;  %v9307_v44 = vpop.f32.mrf.mxu1 }
 0x37c   : > { %7778 = vpow2.f32 %v1897_v24  ;;  %v9295_v48 = vmul.f32 %v7775_v4, %v9095_v34  ;;  %12985 = vst [vmem:[#allocation228_spill] sm:$0xff] %v9307_v44  ;;  %v9315_v34 = vsel %vm1746_vm0, %v1711_v15, -1e+30  ;;  %v9328_v15 = vsel %vm1746_vm0, %v1714_v56, -1e+30 }
 0x37d   : > { %1959 = vadd.xlane.f32.xlu1 %v9287_v18 }
 0x37e   : > { %v7777_v49 = vpop.eup %7776  ;;  %12982 = vst [vmem:[#allocation225_spill] sm:$0xff] %v9295_v48 }
 0x37f   : > { %v9298_v3 = vmul.f32 %v7777_v49, %v9106_v7  ;;  %v1948_v17 = vpop.xlane.xlu1 %1947  ;;  %v1804_v60 = vpop.xlane.xlu0 %1803 }
 0x380   : > { %v1855_v39 = vsub.f32 %v9124_v35, %v1804_v60  ;;  %v9320_v49 = vpop.f32.mrf.mxu2 }
 0x381   : > { %12983 = vst [vmem:[#allocation226_spill] sm:$0xff] %v9298_v3  ;;  %v9303_v24 = vpack.c.bf16 %v9298_v3, %v9295_v48 }
 0x382   : > { %v9305_v45 = vpop.eup %7778  ;;  %v1899_v63 = vmul.f32 1.442695, %v1855_v39  ;;  %12986 = vst [vmem:[#allocation229_spill] sm:$0xff] %v9320_v49  ;;  %v1719_v44 = vpop.f32.mrf.mxu0 }
 0x383   : > { %12984 = vst [vmem:[#allocation227_spill] sm:$0xff] %v9303_v24  ;;  %3010 = vmatmul.bf16.gmra.mxu1 %v9303_v24  ;;  %3099 = vmatmul.bf16.gmra.mxu2 %v9303_v24 }
 0x384   : > { %7780 = vpow2.f32 %v1899_v63  ;;  %3188 = vmatmul.bf16.gmra.mxu3 %v9303_v24  ;;  %3277 = vmatmul.bf16.gmra.mxu0 %v9303_v24  ;;  %v9322_v63 = vpop.f32.mrf.mxu3 }
 0x385   : > { %1961 = vadd.xlane.f32.xlu2 %v9305_v45  ;;  %1817 = vmax.xlane.f32.xlu1 %v9315_v34  ;;  %7782 = vrcp.f32 %v1948_v17  ;;  %12987 = vst [vmem:[#allocation230_spill] sm:$0xff] %v9322_v63  ;;  %v9330_v17 = vpop.f32.mrf.mxu1 }
 0x386   : > { %12988 = vst [vmem:[#allocation231_spill] sm:$0xff] %v9330_v17 }
 0x387   : > { %v1950_v35 = vpop.xlane.xlu2 %1949  ;;  %v1806_v7 = vpop.xlane.xlu1 %1805 }
 0x388   : > { %7784 = vrcp.f32 %v1950_v35  ;;  %v1856_v4 = vsub.f32 %v9143_v20, %v1806_v7  ;;  %v9347_v28 = vpop.f32.mrf.mxu2 }
 0x389   : > { %12992 = vst [vmem:[#allocation235_spill] sm:$0xff] %v9347_v28 }
 0x38a   : > { %v9324_v39 = vpop.eup %7780  ;;  %v1901_v60 = vmul.f32 1.442695, %v1856_v4 }
 0x38b   : > { %v7783_v46 = vpop.eup %7782 }
 0x38c   : > { %7786 = vpow2.f32 %v1901_v60  ;;  %v9335_v35 = vmul.f32 %v7783_v46, %v9128_v50  ;;  %v9351_v50 = vpop.f32.mrf.mxu3 }
 0x38d   : > { %1963 = vadd.xlane.f32.xlu2 %v9324_v39  ;;  %1819 = vmax.xlane.f32.xlu1 %v9328_v15  ;;  %12993 = vst [vmem:[#allocation236_spill] sm:$0xff] %v9351_v50  ;;  %v9361_v46 = vpop.f32.mrf.mxu1 }
 0x38e   : > { %v7785_v20 = vpop.eup %7784  ;;  %12989 = vst [vmem:[#allocation232_spill] sm:$0xff] %v9335_v35 }
 0x38f   : > { %v9338_v7 = vmul.f32 %v7785_v20, %v9139_v27  ;;  %v1952_v4 = vpop.xlane.xlu2 %1951  ;;  %v1808_v49 = vpop.xlane.xlu1 %1807  ;;  %v9357_v27 = vsel %vm1746_vm0, %v1716_v38, -1e+30  ;;  %12994 = vst [vmem:[#allocation237_spill] sm:$0xff] %v9361_v46  ;;  %v9368_v38 = vsel %vm1746_vm0, %v1719_v44, -1e+30 }
 0x390   : > { %v1857_v56 = vsub.f32 %v9157_v57, %v1808_v49  ;;  %v1721_v57 = vpop.f32.mrf.mxu0  ;;  %v9370_v16 = vpop.f32.mrf.mxu2 }
 0x391   : > { %12990 = vst [vmem:[#allocation233_spill] sm:$0xff] %v9338_v7  ;;  %v9343_v60 = vpack.c.bf16 %v9338_v7, %v9335_v35 }
 0x392   : > { %v9345_v17 = vpop.eup %7786  ;;  %v1903_v63 = vmul.f32 1.442695, %v1857_v56  ;;  %12995 = vst [vmem:[#allocation238_spill] sm:$0xff] %v9370_v16 }
 0x393   : > { %12991 = vst [vmem:[#allocation234_spill] sm:$0xff] %v9343_v60  ;;  %3015 = vmatmul.bf16.gmra.mxu1 %v9343_v60  ;;  %3104 = vmatmul.bf16.gmra.mxu2 %v9343_v60 }
 0x394   : > { %7788 = vpow2.f32 %v1903_v63  ;;  %3193 = vmatmul.bf16.gmra.mxu3 %v9343_v60  ;;  %3282 = vmatmul.bf16.gmra.mxu0 %v9343_v60 }
 0x395   : > { %1965 = vadd.xlane.f32.xlu0 %v9345_v17  ;;  %1821 = vmax.xlane.f32.xlu2 %v9357_v27  ;;  %7790 = vrcp.f32 %v1952_v4  ;;  %v9374_v4 = vpop.f32.mrf.mxu3  ;;  %v9385_v46 = vpop.f32.mrf.mxu1 }
 0x396   : > { %12996 = vst [vmem:[#allocation239_spill] sm:$0xff] %v9374_v4 }
 0x397   : > { %v1954_v49 = vpop.xlane.xlu0 %1953  ;;  %v1810_v20 = vpop.xlane.xlu2 %1809  ;;  %12999 = vst [vmem:[#allocation242_spill] sm:$0xff] %v9385_v46 }
 0x398   : > { %7792 = vrcp.f32 %v1954_v49  ;;  %v1858_v63 = vsub.f32 %v9172_v21, %v1810_v20  ;;  %v1724_v51 = vpop.f32.mrf.mxu0 }
 0x399   : > { %v9412_v46 = vsel %vm1746_vm0, %v1724_v51, -1e+30 }
 0x39a   : > { %v9364_v56 = vpop.eup %7788  ;;  %v1905_v28 = vmul.f32 1.442695, %v1858_v63 }
 0x39b   : > { %v7791_v50 = vpop.eup %7790 }
 0x39c   : > { %7794 = vpow2.f32 %v1905_v28  ;;  %v9377_v21 = vmul.f32 %v7791_v50, %v9161_v13 }
 0x39d   : > { %1967 = vadd.xlane.f32.xlu0 %v9364_v56  ;;  %1823 = vmax.xlane.f32.xlu2 %v9368_v38 }
 0x39e   : > { %v7793_v49 = vpop.eup %7792  ;;  %12997 = vst [vmem:[#allocation240_spill] sm:$0xff] %v9377_v21 }
 0x39f   : > { %v9380_v20 = vmul.f32 %v7793_v49, %v9176_v33  ;;  %v9382_v44 = vpop.xlane.xlu0 %1955  ;;  %v1812_v63 = vpop.xlane.xlu2 %1811  ;;  %v9399_v33 = vsel %vm1746_vm0, %v1721_v57, -1e+30 }
 0x3a0   : > { %v1859_v28 = vsub.f32 %v9189_v1, %v1812_v63  ;;  %v1726_v13 = vpop.f32.mrf.mxu0  ;;  %v9403_v1 = vpop.f32.mrf.mxu2 }
 0x3a1   : > { %12998 = vst [vmem:[#allocation241_spill] sm:$0xff] %v9380_v20  ;;  %v9389_v16 = vpack.c.bf16 %v9380_v20, %v9377_v21  ;;  %v9405_v49 = vpop.f32.mrf.mxu3  ;;  %v9414_v57 = vpop.f32.mrf.mxu1  ;;  %v9427_v51 = vsel %vm1746_vm0, %v1726_v13, -1e+30  ;;  %v2083_v20 = vld [vmem:[#allocation7] sm:$0xff] }
 0x3a2   : > { %v9391_v25 = vpop.eup %7794  ;;  %v1907_v4 = vmul.f32 1.442695, %v1859_v28  ;;  %13001 = vst [vmem:[#allocation244_spill] sm:$0xff] %v9403_v1  ;;  %v9500_v7 = vperm.slane %v2083_v20, 2  ;;  %v9502_v3 = vperm.slane %v2083_v20, 1 }
 0x3a3   : > { %13000 = vst [vmem:[#allocation243_spill] sm:$0xff] %v9389_v16  ;;  %3020 = vmatmul.bf16.gmra.mxu1 %v9389_v16  ;;  %3109 = vmatmul.bf16.gmra.mxu2 %v9389_v16 }
 0x3a4   : > { %7796 = vpow2.f32 %v1907_v4  ;;  %3198 = vmatmul.bf16.gmra.mxu3 %v9389_v16  ;;  %3287 = vmatmul.bf16.gmra.mxu0 %v9389_v16  ;;  %13002 = vst [vmem:[#allocation245_spill] sm:$0xff] %v9405_v49 }
 0x3a5   : > { %1969 = vadd.xlane.f32.xlu1 %v9391_v25  ;;  %1825 = vmax.xlane.f32.xlu0 %v9399_v33  ;;  %13003 = vst [vmem:[#allocation246_spill] sm:$0xff] %v9414_v57 }
 0x3a7   : > { %v1814_v50 = vpop.xlane.xlu0 %1813 }
 0x3a8   : > { %v1860_v4 = vsub.f32 %v9203_v9, %v1814_v50  ;;  %v9419_v49 = vpop.f32.mrf.mxu2  ;;  %v1729_v9 = vpop.f32.mrf.mxu0 }
 0x3a9   : > { %13004 = vst [vmem:[#allocation247_spill] sm:$0xff] %v9419_v49  ;;  %v9421_v50 = vpop.f32.mrf.mxu3 }
 0x3aa   : > { %v9408_v63 = vpop.eup %7796  ;;  %v1909_v28 = vmul.f32 1.442695, %v1860_v4  ;;  %13005 = vst [vmem:[#allocation248_spill] sm:$0xff] %v9421_v50 }
 0x3ac   : > { %7798 = vpow2.f32 %v1909_v28  ;;  %v9430_v28 = vpop.f32.mrf.mxu1 }
 0x3ad   : > { %1971 = vadd.xlane.f32.xlu1 %v9408_v63  ;;  %1827 = vmax.xlane.f32.xlu0 %v9412_v46  ;;  %13006 = vst [vmem:[#allocation249_spill] sm:$0xff] %v9430_v28 }
 0x3af   : > { %v1816_v1 = vpop.xlane.xlu0 %1815 }
 0x3b0   : > { %v1861_v37 = vsub.f32 %v9217_v0, %v1816_v1  ;;  %v9437_v1 = vsel %vm1746_vm0, %v1729_v9, -1e+30  ;;  %v9439_v49 = vpop.f32.mrf.mxu2 }
 0x3b1   : > { %13007 = vst [vmem:[#allocation250_spill] sm:$0xff] %v9439_v49  ;;  %v9442_v13 = vpop.f32.mrf.mxu3 }
 0x3b2   : > { %v9423_v4 = vpop.eup %7798  ;;  %v1911_v61 = vmul.f32 1.442695, %v1861_v37  ;;  %v1731_v37 = vpop.f32.mrf.mxu0  ;;  %13008 = vst [vmem:[#allocation251_spill] sm:$0xff] %v9442_v13 }
 0x3b3   : > { %1973 = vadd.xlane.f32.xlu2 %v9423_v4  ;;  %v9449_v28 = vsel %vm1746_vm0, %v1731_v37, -1e+30 }
 0x3b4   : > { %7800 = vpow2.f32 %v1911_v61  ;;  %v9445_v61 = vpop.f32.mrf.mxu1 }
 0x3b5   : > { %1829 = vmax.xlane.f32.xlu1 %v9427_v51  ;;  %13009 = vst [vmem:[#allocation252_spill] sm:$0xff] %v9445_v61  ;;  %7802 = vrcp.f32 %v9382_v44 }
 0x3b8   : > { %v9452_v57 = vpop.f32.mrf.mxu2 }
 0x3b9   : > { %13010 = vst [vmem:[#allocation253_spill] sm:$0xff] %v9452_v57  ;;  %v9454_v50 = vpop.f32.mrf.mxu3 }
 0x3ba   : > { %v9433_v0 = vpop.eup %7800  ;;  %v1734_v9 = vpop.f32.mrf.mxu0  ;;  %13011 = vst [vmem:[#allocation254_spill] sm:$0xff] %v9454_v50 }
 0x3bb   : > { %1975 = vadd.xlane.f32.xlu2 %v9433_v0  ;;  %v9458_v49 = vsel %vm1746_vm0, %v1734_v9, -1e+30  ;;  %v7803_v21 = vpop.eup %7802 }
 0x3bc   : > { %v9460_v13 = vpop.f32.mrf.mxu1 }
 0x3bd   : > { %1831 = vmax.xlane.f32.xlu1 %v9437_v1  ;;  %13012 = vst [vmem:[#allocation255_spill] sm:$0xff] %v9460_v13 }
 0x3c0   : > { %v9463_v61 = vpop.f32.mrf.mxu2 }
 0x3c1   : > { %13013 = vst [vmem:[#allocation256_spill] sm:$0xff] %v9463_v61  ;;  %v9465_v16 = vpop.f32.mrf.mxu3 }
 0x3c2   : > { %13014 = vst [vmem:[#allocation257_spill] sm:$0xff] %v9465_v16  ;;  %v9469_v60 = vpop.f32.mrf.mxu0  ;;  %v9485_v16 = vperm.slane %v2083_v20, 0 }
 0x3c3   : > { %1833 = vmax.xlane.f32.xlu2 %v9449_v28 }
 0x3c4   : > { %v9467_v37 = vpop.f32.mrf.mxu1 }
 0x3c5   : > { %13015 = vst [vmem:[#allocation258_spill] sm:$0xff] %v9467_v37 }
 0x3c8   : > { %v9471_v57 = vpop.f32.mrf.mxu2 }
 0x3c9   : > { %13016 = vst [vmem:[#allocation259_spill] sm:$0xff] %v9471_v57  ;;  %v9473_v24 = vpop.f32.mrf.mxu3  ;;  %v9490_v57 = vperm.slane %v2083_v20, 3 }
 0x3ca   : > { %13017 = vst [vmem:[#allocation260_spill] sm:$0xff] %v9473_v24  ;;  %v9477_v9 = vpop.f32.mrf.mxu0 }
 0x3cb   : > { %1835 = vmax.xlane.f32.xlu2 %v9458_v49 }
 0x3cc   : > { %v9475_v50 = vpop.f32.mrf.mxu1 }
 0x3cd   : > { %13018 = vst [vmem:[#allocation261_spill] sm:$0xff] %v9475_v50  ;;  %v2101_v50 = vadd.f32 %v9485_v16, %v8536_v43 }
 0x3cf   : > { %v2357_v35 = vmax.f32 %v2101_v50, 0.0  ;;  %v2103_v50 = vadd.f32 %v9500_v7, %v8735_v23 }
 0x3d0   : > { %v9479_v5 = vpop.f32.mrf.mxu2 }
 0x3d1   : > { %13019 = vst [vmem:[#allocation262_spill] sm:$0xff] %v9479_v5  ;;  %v9481_v13 = vpop.f32.mrf.mxu3  ;;  %v2104_v5 = vadd.f32 %v9490_v57, %v8737_v36  ;;  %v2359_v23 = vmax.f32 %v2103_v50, 0.0 }
 0x3d2   : > { %13020 = vst [vmem:[#allocation263_spill] sm:$0xff] %v9481_v13  ;;  %v9488_v37 = vpop.f32.mrf.mxu0 }
 0x3d3   : > { %v2360_v48 = vmax.f32 %v2104_v5, 0.0 }
 0x3d4   : > { %v9483_v61 = vpop.f32.mrf.mxu1 }
 0x3d5   : > { %13021 = vst [vmem:[#allocation264_spill] sm:$0xff] %v9483_v61 }
 0x3d8   : > { %v9496_v13 = vpop.f32.mrf.mxu2 }
 0x3d9   : > { %13022 = vst [vmem:[#allocation265_spill] sm:$0xff] %v9496_v13  ;;  %v9498_v61 = vpop.f32.mrf.mxu3  ;;  %v2102_v13 = vadd.f32 %v9502_v3, %v8846_v55 }
 0x3da   : > { %13023 = vst [vmem:[#allocation266_spill] sm:$0xff] %v9498_v61 }
 0x3db   : > { %v2358_v55 = vmax.f32 %v2102_v13, 0.0 }
 0x3e8   : > { %v1958_v24 = vpop.xlane.xlu1 %1957 }
 0x3e9   : > { %7804 = vrcp.f32 %v1958_v24  ;;  %v9505_v24 = vmul.f32 %v7803_v21, %v9193_v6  ;;  %v2112_v21 = vadd.f32 %v9490_v57, %v8744_v32 }
 0x3eb   : > { %13024 = vst [vmem:[#allocation267_spill] sm:$0xff] %v9505_v24 }
 0x3ef   : > { %v7805_v44 = vpop.eup %7804 }
 0x3f0   : > { %v9508_v43 = vmul.f32 %v7805_v44, %v9273_v8  ;;  %v1960_v42 = vpop.xlane.xlu1 %1959  ;;  %v3006_v36 = vpop.f32.mrf.mxu1  ;;  %v2109_v8 = vadd.f32 %v9485_v16, %v8543_v52  ;;  %v2368_v52 = vmax.f32 %v2112_v21, 0.0  ;;  %v2117_v21 = vadd.f32 %v9485_v16, %v8548_v53 }
 0x3f1   : > { %v9512_v26 = vmul.f32 %v3006_v36, %v2357_v35  ;;  %v3273_v61 = vpop.f32.mrf.mxu0  ;;  %7806 = vrcp.f32 %v1960_v42  ;;  %v2111_v42 = vadd.f32 %v9500_v7, %v8742_v10 }
 0x3f2   : > { %13025 = vst [vmem:[#allocation268_spill] sm:$0xff] %v9508_v43  ;;  %v9518_v5 = vpack.c.bf16 %v9508_v43, %v9505_v24  ;;  %v9520_v6 = vmul.f32 %v3273_v61, %v2360_v48  ;;  %v2365_v61 = vmax.f32 %v2109_v8, 0.0  ;;  %v2110_v43 = vadd.f32 %v9502_v3, %v8858_v41 }
 0x3f3   : > { %13026 = vst [vmem:[#allocation269_spill] sm:$0xff] %v9512_v26  ;;  %v2367_v10 = vmax.f32 %v2111_v42, 0.0 }
 0x3f4   : > { %13027 = vst [vmem:[#allocation270_spill] sm:$0xff] %v9518_v5  ;;  %3025 = vmatmul.bf16.gmra.mxu1 %v9518_v5  ;;  %3114 = vmatmul.bf16.gmra.mxu2 %v9518_v5 }
 0x3f5   : > { %13028 = vst [vmem:[#allocation271_spill] sm:$0xff] %v9520_v6  ;;  %3203 = vmatmul.bf16.gmra.mxu3 %v9518_v5  ;;  %3292 = vmatmul.bf16.gmra.mxu0 %v9518_v5 }
 0x3f6   : > { %v3095_v35 = vpop.f32.mrf.mxu2 }
 0x3f7   : > { %v9530_v48 = vmul.f32 %v3095_v35, %v2358_v55  ;;  %v3184_v20 = vpop.f32.mrf.mxu3  ;;  %v2120_v35 = vadd.f32 %v9490_v57, %v8752_v12 }
 0x3f8   : > { %v9532_v44 = vmul.f32 %v3184_v20, %v2359_v23  ;;  %v1962_v32 = vpop.xlane.xlu2 %1961  ;;  %v1818_v36 = vpop.xlane.xlu1 %1817  ;;  %v2366_v20 = vmax.f32 %v2110_v43, 0.0  ;;  %v2118_v43 = vadd.f32 %v9502_v3, %v8866_v54 }
 0x3f9   : > { %13029 = vst [vmem:[#allocation272_spill] sm:$0xff] %v9530_v48  ;;  %7808 = vrcp.f32 %v1962_v32  ;;  %v1862_v13 = vsub.f32 %v9315_v34, %v1818_v36  ;;  %v3008_v24 = vpop.f32.mrf.mxu1  ;;  %v3275_v5 = vpop.f32.mrf.mxu0  ;;  %v2373_v32 = vmax.f32 %v2117_v21, 0.0  ;;  %v2376_v12 = vmax.f32 %v2120_v35, 0.0  ;;  %v13181_v48 = vld [vmem:[#allocation124_spill] sm:$0xff] }
 0x3fa   : > { %13030 = vst [vmem:[#allocation273_spill] sm:$0xff] %v9532_v44  ;;  %v9539_v50 = vmul.f32 %v3008_v24, %v2365_v61  ;;  %v9541_v55 = vmul.f32 %v3275_v5, %v2368_v52  ;;  %v7807_v34 = vpop.eup %7806 }
 0x3fb   : > { %v1913_v8 = vmul.f32 1.442695, %v1862_v13  ;;  %v9554_v53 = vmul.f32 %v7807_v34, %v9287_v18  ;;  %v2119_v18 = vadd.f32 %v9500_v7, %v8750_v62  ;;  %v2128_v62 = vadd.f32 %v9490_v57, %v8759_v30 }
 0x3fc   : > { %13031 = vst [vmem:[#allocation274_spill] sm:$0xff] %v9539_v50 }
 0x3fd   : > { %13032 = vst [vmem:[#allocation275_spill] sm:$0xff] %v9541_v55  ;;  %7810 = vpow2.f32 %v1913_v8  ;;  %v2384_v30 = vmax.f32 %v2128_v62, 0.0 }
 0x3fe   : > { %v3097_v24 = vpop.f32.mrf.mxu2  ;;  %13034 = vst [vmem:[#allocation277_spill] sm:$0xff] %v9554_v53 }
 0x3ff   : > { %v7809_v5 = vpop.eup %7808  ;;  %v9551_v61 = vmul.f32 %v3097_v24, %v2366_v20  ;;  %v3186_v52 = vpop.f32.mrf.mxu3 }
 0x400   : > { %v9557_v36 = vmul.f32 %v7809_v5, %v9305_v45  ;;  %v9559_v13 = vmul.f32 %v3186_v52, %v2367_v10  ;;  %v1964_v41 = vpop.xlane.xlu2 %1963  ;;  %v1820_v23 = vpop.xlane.xlu1 %1819  ;;  %v2375_v5 = vmax.f32 %v2119_v18, 0.0 }
 0x401   : > { %13033 = vst [vmem:[#allocation276_spill] sm:$0xff] %v9551_v61  ;;  %v1863_v8 = vsub.f32 %v9328_v15, %v1820_v23  ;;  %v3011_v21 = vpop.f32.mrf.mxu1  ;;  %v3278_v20 = vpop.f32.mrf.mxu0  ;;  %v2125_v15 = vadd.f32 %v9485_v16, %v8555_v58  ;;  %v2374_v23 = vmax.f32 %v2118_v43, 0.0  ;;  %v2126_v43 = vadd.f32 %v9502_v3, %v8881_v14 }
 0x402   : > { %13035 = vst [vmem:[#allocation278_spill] sm:$0xff] %v9557_v36  ;;  %v9570_v45 = vpack.c.bf16 %v9557_v36, %v9554_v53  ;;  %v9574_v35 = vmul.f32 %v3011_v21, %v2373_v32  ;;  %v9578_v24 = vmul.f32 %v3278_v20, %v2376_v12 }
 0x403   : > { %13036 = vst [vmem:[#allocation279_spill] sm:$0xff] %v9559_v13  ;;  %v9576_v54 = vpop.eup %7810  ;;  %v1915_v10 = vmul.f32 1.442695, %v1863_v8  ;;  %v2381_v12 = vmax.f32 %v2125_v15, 0.0  ;;  %v13180_v13 = vld [vmem:[#allocation123_spill] sm:$0xff] }
 0x404   : > { %13037 = vst [vmem:[#allocation280_spill] sm:$0xff] %v9574_v35  ;;  %3030 = vmatmul.bf16.gmra.mxu1 %v9570_v45  ;;  %3119 = vmatmul.bf16.gmra.mxu2 %v9570_v45 }
 0x405   : > { %13038 = vst [vmem:[#allocation281_spill] sm:$0xff] %v9578_v24  ;;  %7812 = vpow2.f32 %v1915_v10  ;;  %3208 = vmatmul.bf16.gmra.mxu3 %v9570_v45  ;;  %3297 = vmatmul.bf16.gmra.mxu0 %v9570_v45  ;;  %v7137_v24 = vld [vmem:[#allocation8 + $0x1d0] sm:$0xf] }
 0x406   : > { %1977 = vadd.xlane.f32.xlu0 %v9576_v54  ;;  %v3100_v52 = vpop.f32.mrf.mxu2  ;;  %7814 = vrcp.f32 %v1964_v41  ;;  %v2127_v41 = vadd.f32 %v9500_v7, %v8757_v19  ;;  %v2136_v19 = vadd.f32 %v9490_v57, %v8767_v11 }
 0x407   : > { %v9589_v32 = vmul.f32 %v3100_v52, %v2374_v23  ;;  %v3189_v58 = vpop.f32.mrf.mxu3 }
 0x408   : > { %v9591_v8 = vmul.f32 %v3189_v58, %v2375_v5  ;;  %v1966_v21 = vpop.xlane.xlu0 %1965  ;;  %v1822_v20 = vpop.xlane.xlu2 %1821  ;;  %v2133_v5 = vadd.f32 %v9485_v16, %v8560_v59 }
 0x409   : > { %13039 = vst [vmem:[#allocation282_spill] sm:$0xff] %v9589_v32  ;;  %7816 = vrcp.f32 %v1966_v21  ;;  %v1864_v10 = vsub.f32 %v9357_v27, %v1822_v20  ;;  %v3013_v18 = vpop.f32.mrf.mxu1  ;;  %v3280_v34 = vpop.f32.mrf.mxu0 }
 0x40a   : > { %13040 = vst [vmem:[#allocation283_spill] sm:$0xff] %v9591_v8  ;;  %v9598_v23 = vmul.f32 %v3013_v18, %v2381_v12  ;;  %v9600_v52 = vmul.f32 %v3280_v34, %v2384_v30  ;;  %v2382_v12 = vmax.f32 %v2126_v43, 0.0  ;;  %v2383_v34 = vmax.f32 %v2127_v41, 0.0 }
 0x40b   : > { %v9602_v15 = vpop.eup %7812  ;;  %v1917_v62 = vmul.f32 1.442695, %v1864_v10  ;;  %v2389_v10 = vmax.f32 %v2133_v5, 0.0  ;;  %v2134_v41 = vadd.f32 %v9502_v3, %v8893_v22 }
 0x40c   : > { %13041 = vst [vmem:[#allocation284_spill] sm:$0xff] %v9598_v23  ;;  %v7815_v58 = vpop.eup %7814 }
 0x40d   : > { %13042 = vst [vmem:[#allocation285_spill] sm:$0xff] %v9600_v52  ;;  %7818 = vpow2.f32 %v1917_v62  ;;  %v9616_v18 = vmul.f32 %v7815_v58, %v9324_v39  ;;  %v2392_v62 = vmax.f32 %v2136_v19, 0.0  ;;  %v2135_v39 = vadd.f32 %v9500_v7, %v8765_v29  ;;  %v7550_v52 = vld [vmem:[#allocation8 + $0x1ec] sm:$0xf0] }
 0x40e   : > { %1979 = vadd.xlane.f32.xlu0 %v9602_v15  ;;  %v3102_v30 = vpop.f32.mrf.mxu2  ;;  %v2144_v29 = vadd.f32 %v9490_v57, %v8774_v40 }
 0x40f   : > { %v7817_v21 = vpop.eup %7816  ;;  %v9613_v20 = vmul.f32 %v3102_v30, %v2382_v12  ;;  %v3191_v59 = vpop.f32.mrf.mxu3  ;;  %13044 = vst [vmem:[#allocation287_spill] sm:$0xff] %v9616_v18 }
 0x410   : > { %v9619_v27 = vmul.f32 %v7817_v21, %v9345_v17  ;;  %v9621_v14 = vmul.f32 %v3191_v59, %v2383_v34  ;;  %v1968_v11 = vpop.xlane.xlu0 %1967  ;;  %v1824_v43 = vpop.xlane.xlu2 %1823  ;;  %v2390_v59 = vmax.f32 %v2134_v41, 0.0  ;;  %v2400_v41 = vmax.f32 %v2144_v29, 0.0 }
 0x411   : > { %13043 = vst [vmem:[#allocation286_spill] sm:$0xff] %v9613_v20  ;;  %v1865_v30 = vsub.f32 %v9368_v38, %v1824_v43  ;;  %v3016_v5 = vpop.f32.mrf.mxu1  ;;  %v3283_v42 = vpop.f32.mrf.mxu0  ;;  %v2141_v38 = vadd.f32 %v9485_v16, %v8567_v2  ;;  %v7138_v29 = vor.u32 %v7550_v52, %v7137_v24  ;;  %v13055_v24 = vld [vmem:[#allocation86_spill] sm:$0xff] }
 0x412   : > { %13045 = vst [vmem:[#allocation288_spill] sm:$0xff] %v9619_v27  ;;  %v9632_v17 = vpack.c.bf16 %v9619_v27, %v9616_v18  ;;  %v9636_v19 = vmul.f32 %v3016_v5, %v2389_v10  ;;  %v9640_v21 = vmul.f32 %v3283_v42, %v2392_v62  ;;  %v9653_v42 = vsel %vm1746_vm0, %v9469_v60, -1e+30 }
 0x413   : > { %13046 = vst [vmem:[#allocation289_spill] sm:$0xff] %v9621_v14  ;;  %v9638_v22 = vpop.eup %7818  ;;  %v1919_v34 = vmul.f32 1.442695, %v1865_v30  ;;  %v2391_v10 = vmax.f32 %v2135_v39, 0.0  ;;  %v2397_v62 = vmax.f32 %v2141_v38, 0.0  ;;  %v2142_v60 = vadd.f32 %v9502_v3, %v8908_v47  ;;  %3353 = vmatpush.bf16.msrb.mxu1 %v7138_v29 }
 0x414   : > { %13047 = vst [vmem:[#allocation290_spill] sm:$0xff] %v9636_v19  ;;  %3035 = vmatmul.bf16.gmra.mxu1 %v9632_v17  ;;  %3124 = vmatmul.bf16.gmra.mxu2 %v9632_v17  ;;  %v9675_v47 = vsel %vm1746_vm0, %v9477_v9, -1e+30  ;;  %v2152_v52 = vadd.f32 %v9490_v57, %v13055_v24 }
 0x415   : > { %13048 = vst [vmem:[#allocation291_spill] sm:$0xff] %v9640_v21  ;;  %7820 = vpow2.f32 %v1919_v34  ;;  %3213 = vmatmul.bf16.gmra.mxu3 %v9632_v17  ;;  %3302 = vmatmul.bf16.gmra.mxu0 %v9632_v17  ;;  %v13060_v21 = vld [vmem:[#allocation127_spill] sm:$0xff] }
 0x416   : > { %1981 = vadd.xlane.f32.xlu1 %v9638_v22  ;;  %1837 = vmax.xlane.f32.xlu0 %v9653_v42  ;;  %v3105_v2 = vpop.f32.mrf.mxu2  ;;  %7822 = vrcp.f32 %v1968_v11  ;;  %v13051_v11 = vld [vmem:[#allocation83_spill] sm:$0xff] }
 0x417   : > { %v9657_v40 = vmul.f32 %v3105_v2, %v2390_v59  ;;  %v3194_v43 = vpop.f32.mrf.mxu3  ;;  %v2143_v59 = vadd.f32 %v9500_v7, %v13051_v11 }
 0x418   : > { %v9659_v30 = vmul.f32 %v3194_v43, %v2391_v10  ;;  %v1970_v5 = vpop.xlane.xlu1 %1969  ;;  %v1826_v34 = vpop.xlane.xlu0 %1825 }
 0x419   : > { %13049 = vst [vmem:[#allocation292_spill] sm:$0xff] %v9657_v40  ;;  %7824 = vrcp.f32 %v1970_v5  ;;  %v1866_v39 = vsub.f32 %v9399_v33, %v1826_v34  ;;  %v3018_v58 = vpop.f32.mrf.mxu1  ;;  %v3285_v12 = vpop.f32.mrf.mxu0  ;;  %v13054_v33 = vld [vmem:[#allocation22_spill] sm:$0xff]  ;;  %v13069_v40 = vld [vmem:[#allocation88_spill] sm:$0xff] }
 0x41a   : > { %13050 = vst [vmem:[#allocation293_spill] sm:$0xff] %v9659_v30  ;;  %v9666_v2 = vmul.f32 %v3018_v58, %v2397_v62  ;;  %v9668_v38 = vmul.f32 %v3285_v12, %v2400_v41  ;;  %v2149_v5 = vadd.f32 %v9485_v16, %v13054_v33  ;;  %v2398_v62 = vmax.f32 %v2142_v60, 0.0 }
 0x41b   : > { %v9670_v10 = vpop.eup %7820  ;;  %v1921_v43 = vmul.f32 1.442695, %v1866_v39  ;;  %v2399_v41 = vmax.f32 %v2143_v59, 0.0 }
 0x41c   : > { %13052 = vst [vmem:[#allocation83_spill] sm:$0xff] %v9666_v2  ;;  %v7823_v12 = vpop.eup %7822  ;;  %v2405_v34 = vmax.f32 %v2149_v5, 0.0 }
 0x41d   : > { %13053 = vst [vmem:[#allocation294_spill] sm:$0xff] %v9668_v38  ;;  %7826 = vpow2.f32 %v1921_v43  ;;  %v9690_v58 = vmul.f32 %v7823_v12, %v9364_v56  ;;  %v2408_v43 = vmax.f32 %v2152_v52, 0.0  ;;  %v2150_v38 = vadd.f32 %v9502_v3, %v13060_v21  ;;  %v13061_v56 = vld [vmem:[#allocation85_spill] sm:$0xff]  ;;  %v13068_v52 = vld [vmem:[#allocation130_spill] sm:$0xff] }
 0x41e   : > { %1983 = vadd.xlane.f32.xlu1 %v9670_v10  ;;  %1839 = vmax.xlane.f32.xlu0 %v9675_v47  ;;  %v3107_v9 = vpop.f32.mrf.mxu2  ;;  %v2151_v12 = vadd.f32 %v9500_v7, %v13061_v56  ;;  %v2158_v31 = vadd.f32 %v9502_v3, %v13068_v52  ;;  %v13078_v52 = vld [vmem:[#allocation133_spill] sm:$0xff] }
 0x41f   : > { %v7825_v39 = vpop.eup %7824  ;;  %v9687_v11 = vmul.f32 %v3107_v9, %v2398_v62  ;;  %v3196_v33 = vpop.f32.mrf.mxu3  ;;  %13057 = vst [vmem:[#allocation86_spill] sm:$0xff] %v9690_v58  ;;  %v13065_v62 = vld [vmem:[#allocation89_spill] sm:$0xff]  ;;  %v2406_v55 = vmax.f32 %v2150_v38, 0.0 }
 0x420   : > { %v9693_v29 = vmul.f32 %v7825_v39, %v9391_v25  ;;  %v9695_v24 = vmul.f32 %v3196_v33, %v2399_v41  ;;  %v1972_v60 = vpop.xlane.xlu1 %1971  ;;  %v1828_v59 = vpop.xlane.xlu0 %1827  ;;  %v2160_v56 = vadd.f32 %v9490_v57, %v13065_v62  ;;  %v2414_v19 = vmax.f32 %v2158_v31, 0.0 }
 0x421   : > { %13056 = vst [vmem:[#allocation22_spill] sm:$0xff] %v9687_v11  ;;  %v1867_v9 = vsub.f32 %v9412_v46, %v1828_v59  ;;  %v3021_v5 = vpop.f32.mrf.mxu1  ;;  %v3288_v6 = vpop.f32.mrf.mxu0  ;;  %v13064_v46 = vld [vmem:[#allocation23_spill] sm:$0xff]  ;;  %7828 = vrcp.f32 %v1972_v60  ;;  %v2159_v11 = vadd.f32 %v9500_v7, %v13069_v40 }
 0x422   : > { %13058 = vst [vmem:[#allocation295_spill] sm:$0xff] %v9693_v29  ;;  %v9706_v25 = vpack.c.bf16 %v9693_v29, %v9690_v58  ;;  %v9710_v41 = vmul.f32 %v3021_v5, %v2405_v34  ;;  %v9714_v33 = vmul.f32 %v3288_v6, %v2408_v43  ;;  %v2157_v59 = vadd.f32 %v9485_v16, %v13064_v46 }
 0x423   : > { %13059 = vst [vmem:[#allocation296_spill] sm:$0xff] %v9695_v24  ;;  %v9712_v21 = vpop.eup %7826  ;;  %v1923_v39 = vmul.f32 1.442695, %v1867_v9  ;;  %v9727_v6 = vsel %vm1746_vm0, %v9488_v37, -1e+30  ;;  %v2407_v34 = vmax.f32 %v2151_v12, 0.0 }
 0x424   : > { %13062 = vst [vmem:[#allocation127_spill] sm:$0xff] %v9710_v41  ;;  %3040 = vmatmul.bf16.gmra.mxu1 %v9706_v25  ;;  %3129 = vmatmul.bf16.gmra.mxu2 %v9706_v25  ;;  %v2413_v9 = vmax.f32 %v2157_v59, 0.0  ;;  %v2416_v5 = vmax.f32 %v2160_v56, 0.0  ;;  %v7105_v59 = vld [vmem:[#allocation8 + $0x190] sm:$0xf]  ;;  %v2415_v40 = vmax.f32 %v2159_v11, 0.0 }
 0x425   : > { %13063 = vst [vmem:[#allocation85_spill] sm:$0xff] %v9714_v33  ;;  %7830 = vpow2.f32 %v1923_v39  ;;  %3218 = vmatmul.bf16.gmra.mxu3 %v9706_v25  ;;  %3307 = vmatmul.bf16.gmra.mxu0 %v9706_v25  ;;  %v7542_v56 = vld [vmem:[#allocation8 + $0x1ac] sm:$0xf0] }
 0x426   : > { %1985 = vadd.xlane.f32.xlu2 %v9712_v21  ;;  %1841 = vmax.xlane.f32.xlu1 %v9727_v6  ;;  %v3110_v60 = vpop.f32.mrf.mxu2  ;;  %v1974_v43 = vpop.xlane.xlu2 %1973 }
 0x427   : > { %v9731_v62 = vmul.f32 %v3110_v60, %v2406_v55  ;;  %v3199_v38 = vpop.f32.mrf.mxu3  ;;  %7832 = vrcp.f32 %v1974_v43  ;;  %v7829_v24 = vpop.eup %7828 }
 0x428   : > { %v9733_v39 = vmul.f32 %v3199_v38, %v2407_v34  ;;  %v1830_v46 = vpop.xlane.xlu1 %1829  ;;  %v7106_v38 = vor.u32 %v7542_v56, %v7105_v59 }
 0x429   : > { %13066 = vst [vmem:[#allocation23_spill] sm:$0xff] %v9731_v62  ;;  %v1868_v37 = vsub.f32 %v9427_v51, %v1830_v46  ;;  %v3023_v12 = vpop.f32.mrf.mxu1  ;;  %v3290_v30 = vpop.f32.mrf.mxu0 }
 0x42a   : > { %13067 = vst [vmem:[#allocation89_spill] sm:$0xff] %v9733_v39  ;;  %v9740_v55 = vmul.f32 %v3023_v12, %v2413_v9  ;;  %v9742_v60 = vmul.f32 %v3290_v30, %v2416_v5  ;;  %3354 = vmatpush.bf16.msrb.mxu1 %v7106_v38  ;;  %v9751_v30 = vmul.f32 %v7829_v24, %v9408_v63  ;;  %v13077_v24 = vld [vmem:[#allocation92_spill] sm:$0xff]  ;;  %v13080_v39 = vld [vmem:[#allocation91_spill] sm:$0xff] }
 0x42b   : > { %v9744_v34 = vpop.eup %7830  ;;  %v1925_v43 = vmul.f32 1.442695, %v1868_v37 }
 0x42c   : > { %13070 = vst [vmem:[#allocation130_spill] sm:$0xff] %v9740_v55 }
 0x42d   : > { %13071 = vst [vmem:[#allocation88_spill] sm:$0xff] %v9742_v60  ;;  %v7833_v46 = vpop.eup %7832  ;;  %7834 = vpow2.f32 %v1925_v43 }
 0x42e   : > { %13072 = vst [vmem:[#allocation297_spill] sm:$0xff] %v9751_v30  ;;  %v9754_v9 = vmul.f32 %v7833_v46, %v9423_v4  ;;  %1987 = vadd.xlane.f32.xlu2 %v9744_v34  ;;  %v3112_v5 = vpop.f32.mrf.mxu2  ;;  %v1976_v37 = vpop.xlane.xlu2 %1975 }
 0x42f   : > { %v9757_v12 = vmul.f32 %v3112_v5, %v2414_v19  ;;  %v3201_v59 = vpop.f32.mrf.mxu3 }
 0x430   : > { %13073 = vst [vmem:[#allocation298_spill] sm:$0xff] %v9754_v9  ;;  %v9761_v56 = vpack.c.bf16 %v9754_v9, %v9751_v30  ;;  %v9763_v31 = vmul.f32 %v3201_v59, %v2415_v40  ;;  %v1832_v11 = vpop.xlane.xlu1 %1831 }
 0x431   : > { %13074 = vst [vmem:[#allocation299_spill] sm:$0xff] %v9757_v12  ;;  %v1869_v4 = vsub.f32 %v9437_v1, %v1832_v11 }
 0x432   : > { %13075 = vst [vmem:[#allocation300_spill] sm:$0xff] %v9763_v31  ;;  %v2167_v31 = vadd.f32 %v9500_v7, %v13080_v39 }
 0x433   : > { %v9770_v43 = vpop.eup %7834  ;;  %v1927_v19 = vmul.f32 1.442695, %v1869_v4 }
 0x434   : > { %3045 = vmatmul.bf16.gmra.mxu1 %v9761_v56  ;;  %3134 = vmatmul.bf16.gmra.mxu2 %v9761_v56 }
 0x435   : > { %7836 = vpow2.f32 %v1927_v19  ;;  %3223 = vmatmul.bf16.gmra.mxu3 %v9761_v56  ;;  %3312 = vmatmul.bf16.gmra.mxu0 %v9761_v56 }
 0x436   : > { %1989 = vadd.xlane.f32.xlu0 %v9770_v43  ;;  %v1834_v38 = vpop.xlane.xlu2 %1833 }
 0x437   : > { %v1870_v1 = vsub.f32 %v9449_v28, %v1834_v38  ;;  %v7073_v28 = vld [vmem:[#allocation8 + $0x150] sm:$0xf] }
 0x438   : > { %v7534_v38 = vld [vmem:[#allocation8 + $0x16c] sm:$0xf0] }
 0x439   : > { %v1929_v46 = vmul.f32 1.442695, %v1870_v1  ;;  %v7074_v1 = vor.u32 %v7534_v38, %v7073_v28  ;;  %v13082_v38 = vld [vmem:[#allocation25_spill] sm:$0xff] }
 0x43b   : > { %v9778_v40 = vpop.eup %7836  ;;  %7838 = vpow2.f32 %v1929_v46  ;;  %3355 = vmatpush.bf16.msrb.mxu1 %v7074_v1  ;;  %v13076_v46 = vld [vmem:[#allocation24_spill] sm:$0xff]  ;;  %v2173_v1 = vadd.f32 %v9485_v16, %v13082_v38 }
 0x43c   : > { %1991 = vadd.xlane.f32.xlu1 %v9778_v40  ;;  %v2165_v51 = vadd.f32 %v9485_v16, %v13076_v46  ;;  %v13083_v46 = vld [vmem:[#allocation95_spill] sm:$0xff] }
 0x43d   : > { %v2429_v12 = vmax.f32 %v2173_v1, 0.0 }
 0x43e   : > { %v1836_v5 = vpop.xlane.xlu2 %1835 }
 0x43f   : > { %v1871_v59 = vsub.f32 %v9458_v49, %v1836_v5  ;;  %v2168_v49 = vadd.f32 %v9490_v57, %v13077_v24  ;;  %v2421_v5 = vmax.f32 %v2165_v51, 0.0  ;;  %v2176_v24 = vadd.f32 %v9490_v57, %v13083_v46 }
 0x441   : > { %v9782_v11 = vpop.eup %7838  ;;  %v1931_v4 = vmul.f32 1.442695, %v1871_v59  ;;  %v2424_v63 = vmax.f32 %v2168_v49, 0.0  ;;  %v2423_v49 = vmax.f32 %v2167_v31, 0.0 }
 0x442   : > { %1993 = vadd.xlane.f32.xlu2 %v9782_v11 }
 0x443   : > { %7840 = vpow2.f32 %v1931_v4  ;;  %v2166_v4 = vadd.f32 %v9502_v3, %v13078_v52 }
 0x444   : > { %7842 = vrcp.f32 %v1976_v37 }
 0x445   : > { %v2422_v51 = vmax.f32 %v2166_v4, 0.0  ;;  %v13088_v4 = vld [vmem:[#allocation94_spill] sm:$0xff] }
 0x446   : > { %v2175_v31 = vadd.f32 %v9500_v7, %v13088_v4 }
 0x448   : > { %v2431_v4 = vmax.f32 %v2175_v31, 0.0 }
 0x449   : > { %v9785_v19 = vpop.eup %7840 }
 0x44a   : > { %1995 = vadd.xlane.f32.xlu0 %v9785_v19 }
 0x471   : > { %v3026_v59 = vpop.f32.mrf.mxu1 }
 0x472   : > { %v9794_v33 = vmul.f32 %v3026_v59, %v2421_v5  ;;  %v3293_v60 = vpop.f32.mrf.mxu0  ;;  %v2432_v59 = vmax.f32 %v2176_v24, 0.0 }
 0x473   : > { %v9798_v28 = vmul.f32 %v3293_v60, %v2424_v63  ;;  %v13086_v63 = vld [vmem:[#allocation136_spill] sm:$0xff] }
 0x474   : > { %13079 = vst [vmem:[#allocation24_spill] sm:$0xff] %v9794_v33  ;;  %v2174_v55 = vadd.f32 %v9502_v3, %v13086_v63 }
 0x475   : > { %13081 = vst [vmem:[#allocation92_spill] sm:$0xff] %v9798_v28  ;;  %v13103_v28 = vld [vmem:[#allocation142_spill] sm:$0xff] }
 0x476   : > { %v2430_v2 = vmax.f32 %v2174_v55, 0.0  ;;  %v13095_v55 = vld [vmem:[#allocation139_spill] sm:$0xff] }
 0x477   : > { %v3115_v62 = vpop.f32.mrf.mxu2  ;;  %v2182_v31 = vadd.f32 %v9502_v3, %v13095_v55 }
 0x478   : > { %v9804_v52 = vmul.f32 %v3115_v62, %v2422_v51  ;;  %v3204_v5 = vpop.f32.mrf.mxu3  ;;  %v13090_v62 = vld [vmem:[#allocation26_spill] sm:$0xff] }
 0x479   : > { %v9806_v41 = vmul.f32 %v3204_v5, %v2423_v49  ;;  %v1978_v39 = vpop.xlane.xlu0 %1977  ;;  %v3028_v60 = vpop.f32.mrf.mxu1  ;;  %v2181_v37 = vadd.f32 %v9485_v16, %v13090_v62  ;;  %v7041_v51 = vld [vmem:[#allocation8 + $0x110] sm:$0xf] }
 0x47a   : > { %13084 = vst [vmem:[#allocation133_spill] sm:$0xff] %v9804_v52  ;;  %7844 = vrcp.f32 %v1978_v39  ;;  %v9810_v38 = vmul.f32 %v3028_v60, %v2429_v12  ;;  %v3295_v46 = vpop.f32.mrf.mxu0  ;;  %v7526_v49 = vld [vmem:[#allocation8 + $0x12c] sm:$0xf0]  ;;  %v7843_v60 = vpop.eup %7842 }
 0x47b   : > { %13085 = vst [vmem:[#allocation91_spill] sm:$0xff] %v9806_v41  ;;  %v9814_v1 = vmul.f32 %v3295_v46, %v2432_v59  ;;  %v13091_v5 = vld [vmem:[#allocation98_spill] sm:$0xff]  ;;  %v7042_v39 = vor.u32 %v7526_v49, %v7041_v51  ;;  %v2437_v8 = vmax.f32 %v2181_v37, 0.0  ;;  %v9827_v33 = vmul.f32 %v7843_v60, %v9433_v0 }
 0x47c   : > { %13087 = vst [vmem:[#allocation25_spill] sm:$0xff] %v9810_v38  ;;  %v2184_v63 = vadd.f32 %v9490_v57, %v13091_v5 }
 0x47d   : > { %13089 = vst [vmem:[#allocation95_spill] sm:$0xff] %v9814_v1  ;;  %3356 = vmatpush.bf16.msrb.mxu1 %v7042_v39  ;;  %v2190_v1 = vadd.f32 %v9502_v3, %v13103_v28 }
 0x47e   : > { %v2440_v24 = vmax.f32 %v2184_v63, 0.0  ;;  %13093 = vst [vmem:[#allocation94_spill] sm:$0xff] %v9827_v33  ;;  %v13097_v63 = vld [vmem:[#allocation97_spill] sm:$0xff] }
 0x47f   : > { %v3117_v59 = vpop.f32.mrf.mxu2  ;;  %v2183_v0 = vadd.f32 %v9500_v7, %v13097_v63  ;;  %v2446_v52 = vmax.f32 %v2190_v1, 0.0  ;;  %v13112_v1 = vld [vmem:[#allocation145_spill] sm:$0xff] }
 0x480   : > { %v7845_v46 = vpop.eup %7844  ;;  %v9824_v62 = vmul.f32 %v3117_v59, %v2430_v2  ;;  %v3206_v14 = vpop.f32.mrf.mxu3 }
 0x481   : > { %v9830_v5 = vmul.f32 %v7845_v46, %v9576_v54  ;;  %v9832_v38 = vmul.f32 %v3206_v14, %v2431_v4  ;;  %v1980_v51 = vpop.xlane.xlu0 %1979  ;;  %v3031_v49 = vpop.f32.mrf.mxu1  ;;  %v13099_v4 = vld [vmem:[#allocation27_spill] sm:$0xff]  ;;  %v13100_v46 = vld [vmem:[#allocation101_spill] sm:$0xff]  ;;  %v2439_v55 = vmax.f32 %v2183_v0, 0.0  ;;  %v13104_v0 = vld [vmem:[#allocation100_spill] sm:$0xff] }
 0x482   : > { %13092 = vst [vmem:[#allocation136_spill] sm:$0xff] %v9824_v62  ;;  %v9838_v2 = vmul.f32 %v3031_v49, %v2437_v8  ;;  %v3298_v39 = vpop.f32.mrf.mxu0  ;;  %v2189_v59 = vadd.f32 %v9485_v16, %v13099_v4  ;;  %v2192_v8 = vadd.f32 %v9490_v57, %v13100_v46  ;;  %v2438_v49 = vmax.f32 %v2182_v31, 0.0  ;;  %v13124_v62 = vld [vmem:[#allocation32_spill] sm:$0xff] }
 0x483   : > { %13094 = vst [vmem:[#allocation26_spill] sm:$0xff] %v9832_v38  ;;  %v9844_v54 = vpack.c.bf16 %v9830_v5, %v9827_v33  ;;  %v9848_v60 = vmul.f32 %v3298_v39, %v2440_v24  ;;  %7846 = vrcp.f32 %v1980_v51  ;;  %v2191_v51 = vadd.f32 %v9500_v7, %v13104_v0 }
 0x484   : > { %13096 = vst [vmem:[#allocation98_spill] sm:$0xff] %v9838_v2  ;;  %v2445_v12 = vmax.f32 %v2189_v59, 0.0  ;;  %v2448_v4 = vmax.f32 %v2192_v8, 0.0  ;;  %v13107_v8 = vld [vmem:[#allocation28_spill] sm:$0xff]  ;;  %v7009_v2 = vld [vmem:[#allocation8 + $0xd0] sm:$0xf] }
 0x485   : > { %13098 = vst [vmem:[#allocation139_spill] sm:$0xff] %v9848_v60  ;;  %3050 = vmatmul.bf16.gmra.mxu1 %v9844_v54  ;;  %3139 = vmatmul.bf16.gmra.mxu2 %v9844_v54 }
 0x486   : > { %3228 = vmatmul.bf16.gmra.mxu3 %v9844_v54  ;;  %3317 = vmatmul.bf16.gmra.mxu0 %v9844_v54 }
 0x487   : > { %v3120_v63 = vpop.f32.mrf.mxu2 }
 0x488   : > { %v9858_v24 = vmul.f32 %v3120_v63, %v2438_v49  ;;  %v3209_v39 = vpop.f32.mrf.mxu3 }
 0x489   : > { %v9860_v14 = vmul.f32 %v3209_v39, %v2439_v55  ;;  %v1982_v46 = vpop.xlane.xlu1 %1981  ;;  %v1838_v37 = vpop.xlane.xlu0 %1837  ;;  %v2197_v55 = vadd.f32 %v9485_v16, %v13107_v8 }
 0x48a   : > { %13101 = vst [vmem:[#allocation97_spill] sm:$0xff] %v9858_v24  ;;  %7848 = vrcp.f32 %v1982_v46  ;;  %v1872_v31 = vsub.f32 %v9653_v42, %v1838_v37  ;;  %v3033_v41 = vpop.f32.mrf.mxu1  ;;  %v3300_v38 = vpop.f32.mrf.mxu0  ;;  %v13108_v37 = vld [vmem:[#allocation104_spill] sm:$0xff] }
 0x48b   : > { %13102 = vst [vmem:[#allocation27_spill] sm:$0xff] %v9860_v14  ;;  %v9867_v49 = vmul.f32 %v3033_v41, %v2445_v12  ;;  %v9869_v63 = vmul.f32 %v3300_v38, %v2448_v4  ;;  %v7847_v42 = vpop.eup %7846  ;;  %v2200_v46 = vadd.f32 %v9490_v57, %v13108_v37  ;;  %v2447_v41 = vmax.f32 %v2191_v51, 0.0 }
 0x48c   : > { %v1933_v59 = vmul.f32 1.442695, %v1872_v31  ;;  %v2453_v0 = vmax.f32 %v2197_v55, 0.0  ;;  %v9882_v8 = vmul.f32 %v7847_v42, %v9602_v15  ;;  %v2198_v51 = vadd.f32 %v9502_v3, %v13112_v1  ;;  %v13113_v15 = vld [vmem:[#allocation103_spill] sm:$0xff] }
 0x48d   : > { %13105 = vst [vmem:[#allocation101_spill] sm:$0xff] %v9867_v49  ;;  %v2456_v37 = vmax.f32 %v2200_v46, 0.0  ;;  %v2199_v42 = vadd.f32 %v9500_v7, %v13113_v15  ;;  %v7518_v49 = vld [vmem:[#allocation8 + $0xec] sm:$0xf0] }
 0x48e   : > { %13106 = vst [vmem:[#allocation142_spill] sm:$0xff] %v9869_v63  ;;  %7850 = vpow2.f32 %v1933_v59  ;;  %v2454_v24 = vmax.f32 %v2198_v51, 0.0  ;;  %v13120_v51 = vld [vmem:[#allocation148_spill] sm:$0xff] }
 0x48f   : > { %v3122_v12 = vpop.f32.mrf.mxu2 }
 0x490   : > { %v7849_v38 = vpop.eup %7848  ;;  %v9879_v4 = vmul.f32 %v3122_v12, %v2446_v52  ;;  %v3211_v31 = vpop.f32.mrf.mxu3  ;;  %v13117_v52 = vld [vmem:[#allocation107_spill] sm:$0xff] }
 0x491   : > { %v9885_v39 = vmul.f32 %v7849_v38, %v9638_v22  ;;  %v9887_v28 = vmul.f32 %v3211_v31, %v2447_v41  ;;  %v1984_v60 = vpop.xlane.xlu1 %1983  ;;  %v1840_v63 = vpop.xlane.xlu0 %1839  ;;  %v2208_v15 = vadd.f32 %v9490_v57, %v13117_v52 }
 0x492   : > { %13109 = vst [vmem:[#allocation100_spill] sm:$0xff] %v9879_v4  ;;  %v1873_v59 = vsub.f32 %v9675_v47, %v1840_v63  ;;  %v3036_v55 = vpop.f32.mrf.mxu1  ;;  %v3303_v12 = vpop.f32.mrf.mxu0  ;;  %v13116_v47 = vld [vmem:[#allocation29_spill] sm:$0xff] }
 0x493   : > { %13110 = vst [vmem:[#allocation28_spill] sm:$0xff] %v9885_v39  ;;  %v9898_v22 = vpack.c.bf16 %v9885_v39, %v9882_v8  ;;  %v9902_v41 = vmul.f32 %v3036_v55, %v2453_v0  ;;  %v9906_v1 = vmul.f32 %v3303_v12, %v2456_v37  ;;  %v2205_v63 = vadd.f32 %v9485_v16, %v13116_v47 }
 0x494   : > { %13111 = vst [vmem:[#allocation104_spill] sm:$0xff] %v9887_v28  ;;  %v9904_v38 = vpop.eup %7850  ;;  %v1935_v31 = vmul.f32 1.442695, %v1873_v59  ;;  %v2455_v0 = vmax.f32 %v2199_v42, 0.0  ;;  %v2464_v52 = vmax.f32 %v2208_v15, 0.0  ;;  %v7010_v15 = vor.u32 %v7518_v49, %v7009_v2 }
 0x495   : > { %13114 = vst [vmem:[#allocation145_spill] sm:$0xff] %v9902_v41  ;;  %3055 = vmatmul.bf16.gmra.mxu1 %v9898_v22  ;;  %3144 = vmatmul.bf16.gmra.mxu2 %v9898_v22  ;;  %v2461_v12 = vmax.f32 %v2205_v63, 0.0  ;;  %v7502_v41 = vld [vmem:[#allocation8 + $0x6c] sm:$0xf0] }
 0x496   : > { %13115 = vst [vmem:[#allocation103_spill] sm:$0xff] %v9906_v1  ;;  %7852 = vpow2.f32 %v1935_v31  ;;  %3233 = vmatmul.bf16.gmra.mxu3 %v9898_v22  ;;  %3322 = vmatmul.bf16.gmra.mxu0 %v9898_v22  ;;  %v2206_v31 = vadd.f32 %v9502_v3, %v13120_v51  ;;  %v13125_v51 = vld [vmem:[#allocation110_spill] sm:$0xff] }
 0x497   : > { %1997 = vadd.xlane.f32.xlu1 %v9904_v38  ;;  %v3125_v37 = vpop.f32.mrf.mxu2  ;;  %7854 = vrcp.f32 %v1984_v60  ;;  %v13121_v60 = vld [vmem:[#allocation106_spill] sm:$0xff]  ;;  %3357 = vmatpush.bf16.msrb.mxu1 %v7010_v15 }
 0x498   : > { %v9917_v59 = vmul.f32 %v3125_v37, %v2454_v24  ;;  %v3214_v55 = vpop.f32.mrf.mxu3  ;;  %v2207_v24 = vadd.f32 %v9500_v7, %v13121_v60  ;;  %v2462_v2 = vmax.f32 %v2206_v31, 0.0 }
 0x499   : > { %v9919_v47 = vmul.f32 %v3214_v55, %v2455_v0  ;;  %v1986_v46 = vpop.xlane.xlu2 %1985  ;;  %v1842_v14 = vpop.xlane.xlu1 %1841 }
 0x49a   : > { %13118 = vst [vmem:[#allocation29_spill] sm:$0xff] %v9917_v59  ;;  %7856 = vrcp.f32 %v1986_v46  ;;  %v1874_v28 = vsub.f32 %v9727_v6, %v1842_v14  ;;  %v3038_v42 = vpop.f32.mrf.mxu1  ;;  %v3305_v4 = vpop.f32.mrf.mxu0  ;;  %v2213_v46 = vadd.f32 %v9485_v16, %v13124_v62  ;;  %v2463_v49 = vmax.f32 %v2207_v24, 0.0 }
 0x49b   : > { %13119 = vst [vmem:[#allocation107_spill] sm:$0xff] %v9919_v47  ;;  %v9926_v37 = vmul.f32 %v3038_v42, %v2461_v12  ;;  %v9928_v63 = vmul.f32 %v3305_v4, %v2464_v52  ;;  %v2216_v4 = vadd.f32 %v9490_v57, %v13125_v51 }
 0x49c   : > { %v9930_v0 = vpop.eup %7852  ;;  %v1937_v55 = vmul.f32 1.442695, %v1874_v28  ;;  %v2469_v60 = vmax.f32 %v2213_v46, 0.0 }
 0x49d   : > { %13122 = vst [vmem:[#allocation148_spill] sm:$0xff] %v9926_v37  ;;  %1999 = vadd.xlane.f32.xlu2 %v9930_v0  ;;  %v7855_v12 = vpop.eup %7854  ;;  %v2472_v1 = vmax.f32 %v2216_v4, 0.0  ;;  %v13136_v37 = vld [vmem:[#allocation155_spill] sm:$0xff] }
 0x49e   : > { %13123 = vst [vmem:[#allocation106_spill] sm:$0xff] %v9928_v63  ;;  %7858 = vpow2.f32 %v1937_v55  ;;  %v9944_v6 = vmul.f32 %v7855_v12, %v9670_v10  ;;  %v13128_v63 = vld [vmem:[#allocation151_spill] sm:$0xff] }
 0x49f   : > { %v3127_v28 = vpop.f32.mrf.mxu2  ;;  %v2214_v31 = vadd.f32 %v9502_v3, %v13128_v63 }
 0x4a0   : > { %v7857_v52 = vpop.eup %7856  ;;  %v9941_v42 = vmul.f32 %v3127_v28, %v2462_v2  ;;  %v3216_v62 = vpop.f32.mrf.mxu3  ;;  %v13129_v2 = vld [vmem:[#allocation109_spill] sm:$0xff] }
 0x4a1   : > { %v9947_v14 = vmul.f32 %v7857_v52, %v9712_v21  ;;  %v9949_v15 = vmul.f32 %v3216_v62, %v2463_v49  ;;  %v2215_v46 = vadd.f32 %v9500_v7, %v13129_v2  ;;  %v13132_v49 = vld [vmem:[#allocation35_spill] sm:$0xff]  ;;  %v13133_v52 = vld [vmem:[#allocation113_spill] sm:$0xff]  ;;  %v1988_v2 = vpop.xlane.xlu2 %1987  ;;  %v2470_v24 = vmax.f32 %v2214_v31, 0.0 }
 0x4a2   : > { %13126 = vst [vmem:[#allocation32_spill] sm:$0xff] %v9941_v42  ;;  %v3041_v55 = vpop.f32.mrf.mxu1  ;;  %v3308_v51 = vpop.f32.mrf.mxu0  ;;  %v2221_v28 = vadd.f32 %v9485_v16, %v13132_v49  ;;  %v2224_v62 = vadd.f32 %v9490_v57, %v13133_v52  ;;  %7860 = vrcp.f32 %v1988_v2  ;;  %v6977_v49 = vld [vmem:[#allocation8 + $0x90] sm:$0xf]  ;;  %v13137_v2 = vld [vmem:[#allocation112_spill] sm:$0xff] }
 0x4a3   : > { %13127 = vst [vmem:[#allocation110_spill] sm:$0xff] %v9949_v15  ;;  %v9959_v10 = vpack.c.bf16 %v9947_v14, %v9944_v6  ;;  %v9963_v12 = vmul.f32 %v3041_v55, %v2469_v60  ;;  %v9967_v63 = vmul.f32 %v3308_v51, %v2472_v1  ;;  %v2471_v60 = vmax.f32 %v2215_v46, 0.0  ;;  %v7510_v52 = vld [vmem:[#allocation8 + $0xac] sm:$0xf0] }
 0x4a4   : > { %v9965_v4 = vpop.eup %7858  ;;  %v2477_v21 = vmax.f32 %v2221_v28, 0.0  ;;  %v2480_v47 = vmax.f32 %v2224_v62, 0.0  ;;  %v6978_v31 = vor.u32 %v7510_v52, %v6977_v49  ;;  %v6945_v42 = vld [vmem:[#allocation8 + $0x50] sm:$0xf]  ;;  %v2222_v46 = vadd.f32 %v9502_v3, %v13136_v37  ;;  %v13141_v49 = vld [vmem:[#allocation116_spill] sm:$0xff] }
 0x4a5   : > { %13130 = vst [vmem:[#allocation151_spill] sm:$0xff] %v9963_v12  ;;  %3060 = vmatmul.bf16.gmra.mxu1 %v9959_v10  ;;  %3149 = vmatmul.bf16.gmra.mxu2 %v9959_v10  ;;  %v6946_v28 = vor.u32 %v7502_v41, %v6945_v42  ;;  %v13140_v62 = vld [vmem:[#allocation30_spill] sm:$0xff]  ;;  %v2232_v52 = vadd.f32 %v9490_v57, %v13141_v49 }
 0x4a6   : > { %13131 = vst [vmem:[#allocation109_spill] sm:$0xff] %v9967_v63  ;;  %3238 = vmatmul.bf16.gmra.mxu3 %v9959_v10  ;;  %3327 = vmatmul.bf16.gmra.mxu0 %v9959_v10  ;;  %v13146_v63 = vld [vmem:[#allocation31_spill] sm:$0xff] }
 0x4a7   : > { %2001 = vadd.xlane.f32.xlu0 %v9965_v4  ;;  %v3130_v1 = vpop.f32.mrf.mxu2  ;;  %3358 = vmatpush.bf16.msrb.mxu1 %v6978_v31 }
 0x4a8   : > { %v9978_v55 = vmul.f32 %v3130_v1, %v2470_v24  ;;  %v3219_v51 = vpop.f32.mrf.mxu3  ;;  %v2223_v24 = vadd.f32 %v9500_v7, %v13137_v2  ;;  %v7861_v37 = vpop.eup %7860  ;;  %v2478_v2 = vmax.f32 %v2222_v46, 0.0  ;;  %v2230_v46 = vadd.f32 %v9502_v3, %v13146_v63  ;;  %v13150_v63 = vld [vmem:[#allocation33_spill] sm:$0xff] }
 0x4a9   : > { %v9980_v15 = vmul.f32 %v3219_v51, %v2471_v60  ;;  %v1990_v59 = vpop.xlane.xlu0 %1989  ;;  %v2229_v60 = vadd.f32 %v9485_v16, %v13140_v62  ;;  %v10001_v31 = vmul.f32 %v7861_v37, %v9744_v34 }
 0x4aa   : > { %13134 = vst [vmem:[#allocation35_spill] sm:$0xff] %v9978_v55  ;;  %7862 = vrcp.f32 %v1990_v59  ;;  %v3043_v32 = vpop.f32.mrf.mxu1  ;;  %v3310_v20 = vpop.f32.mrf.mxu0  ;;  %v13155_v55 = vld [vmem:[#allocation118_spill] sm:$0xff] }
 0x4ab   : > { %13135 = vst [vmem:[#allocation113_spill] sm:$0xff] %v9980_v15  ;;  %v9986_v1 = vmul.f32 %v3043_v32, %v2477_v21  ;;  %v9988_v35 = vmul.f32 %v3310_v20, %v2480_v47  ;;  %v2479_v32 = vmax.f32 %v2223_v24, 0.0  ;;  %3359 = vmatpush.bf16.msrb.mxu1 %v6946_v28  ;;  %v2485_v42 = vmax.f32 %v2229_v60, 0.0 }
 0x4ac   : > { %13143 = vst [vmem:[#allocation116_spill] sm:$0xff] %v10001_v31  ;;  %v2488_v24 = vmax.f32 %v2232_v52, 0.0  ;;  %v2237_v52 = vadd.f32 %v9485_v16, %v13150_v63  ;;  %v2486_v28 = vmax.f32 %v2230_v46, 0.0 }
 0x4ad   : > { %13138 = vst [vmem:[#allocation155_spill] sm:$0xff] %v9986_v1 }
 0x4ae   : > { %13139 = vst [vmem:[#allocation112_spill] sm:$0xff] %v9988_v35  ;;  %v2493_v63 = vmax.f32 %v2237_v52, 0.0  ;;  %v13163_v52 = vld [vmem:[#allocation218_spill] sm:$0xff] }
 0x4af   : > { %v3132_v21 = vpop.f32.mrf.mxu2  ;;  %v1992_v51 = vpop.xlane.xlu1 %1991 }
 0x4b0   : > { %v7863_v20 = vpop.eup %7862  ;;  %v9998_v47 = vmul.f32 %v3132_v21, %v2478_v2  ;;  %v3221_v41 = vpop.f32.mrf.mxu3  ;;  %v13147_v21 = vld [vmem:[#allocation115_spill] sm:$0xff]  ;;  %7864 = vrcp.f32 %v1992_v51  ;;  %v13154_v51 = vld [vmem:[#allocation34_spill] sm:$0xff] }
 0x4b1   : > { %v10004_v62 = vmul.f32 %v7863_v20, %v9770_v43  ;;  %v10006_v59 = vmul.f32 %v3221_v41, %v2479_v32  ;;  %v2231_v60 = vadd.f32 %v9500_v7, %v13147_v21  ;;  %v13151_v20 = vld [vmem:[#allocation119_spill] sm:$0xff]  ;;  %v2238_v35 = vadd.f32 %v9502_v3, %v13154_v51 }
 0x4b2   : > { %13142 = vst [vmem:[#allocation30_spill] sm:$0xff] %v9998_v47  ;;  %v3046_v49 = vpop.f32.mrf.mxu1  ;;  %v3313_v2 = vpop.f32.mrf.mxu0  ;;  %v2240_v41 = vadd.f32 %v9490_v57, %v13151_v20  ;;  %v2239_v47 = vadd.f32 %v9500_v7, %v13155_v55 }
 0x4b3   : > { %13144 = vst [vmem:[#allocation301_spill] sm:$0xff] %v10004_v62  ;;  %v10016_v34 = vpack.c.bf16 %v10004_v62, %v10001_v31  ;;  %v10020_v37 = vmul.f32 %v3046_v49, %v2485_v42  ;;  %v10022_v32 = vmul.f32 %v3313_v2, %v2488_v24  ;;  %v2487_v42 = vmax.f32 %v2231_v60, 0.0 }
 0x4b4   : > { %13145 = vst [vmem:[#allocation302_spill] sm:$0xff] %v10006_v59  ;;  %v2496_v43 = vmax.f32 %v2240_v41, 0.0 }
 0x4b5   : > { %13148 = vst [vmem:[#allocation31_spill] sm:$0xff] %v10020_v37  ;;  %3065 = vmatmul.bf16.gmra.mxu1 %v10016_v34  ;;  %3154 = vmatmul.bf16.gmra.mxu2 %v10016_v34  ;;  %v1994_v21 = vpop.xlane.xlu2 %1993 }
 0x4b6   : > { %13149 = vst [vmem:[#allocation115_spill] sm:$0xff] %v10022_v32  ;;  %3243 = vmatmul.bf16.gmra.mxu3 %v10016_v34  ;;  %3332 = vmatmul.bf16.gmra.mxu0 %v10016_v34  ;;  %7866 = vrcp.f32 %v1994_v21  ;;  %v7865_v46 = vpop.eup %7864 }
 0x4b7   : > { %v3135_v24 = vpop.f32.mrf.mxu2 }
 0x4b8   : > { %v10032_v49 = vmul.f32 %v3135_v24, %v2486_v28  ;;  %v3224_v2 = vpop.f32.mrf.mxu3  ;;  %v2495_v24 = vmax.f32 %v2239_v47, 0.0 }
 0x4b9   : > { %v10034_v20 = vmul.f32 %v3224_v2, %v2487_v42  ;;  %v2494_v42 = vmax.f32 %v2238_v35, 0.0  ;;  %v10052_v2 = vmul.f32 %v7865_v46, %v9778_v40  ;;  %v13162_v40 = vlaneseq }
 0x4ba   : > { %13152 = vst [vmem:[#allocation33_spill] sm:$0xff] %v10032_v49  ;;  %v3048_v15 = vpop.f32.mrf.mxu1  ;;  %v3315_v59 = vpop.f32.mrf.mxu0 }
 0x4bb   : > { %13153 = vst [vmem:[#allocation119_spill] sm:$0xff] %v10034_v20  ;;  %v10040_v12 = vmul.f32 %v3048_v15, %v2493_v63  ;;  %v10042_v60 = vmul.f32 %v3315_v59, %v2496_v43  ;;  %v10071_v47 = vshrl.u32 %v13162_v40, 7  ;;  %v13164_v20 = vld [vmem:[#allocation217_spill] sm:$0xff] }
 0x4bc   : > { %v7867_v28 = vpop.eup %7866  ;;  %13159 = vst [vmem:[#allocation304_spill] sm:$0xff] %v10052_v2 }
 0x4bd   : > { %13156 = vst [vmem:[#allocation34_spill] sm:$0xff] %v10040_v12  ;;  %v10045_v21 = vmul.f32 %v7867_v28, %v9782_v11  ;;  %v6231_v51 = vadd.s32 8, %v10071_v47  ;;  %v6232_v46 = vadd.s32 16, %v10071_v47  ;;  %v10078_v28 = vstv %s7407_s17  ;;  %v13167_v12 = vld [vmem:[#allocation232_spill] sm:$0xff] }
 0x4be   : > { %13157 = vst [vmem:[#allocation118_spill] sm:$0xff] %v10042_v60  ;;  %v6234_v40 = vadd.s32 32, %v10071_v47  ;;  %v6235_v35 = vadd.s32 40, %v10071_v47  ;;  %v6239_v1 = vadd.s32 72, %v10071_v47  ;;  %v6248_v61 = vadd.s32 144, %v10071_v47 }
 0x4bf   : > { %13158 = vst [vmem:[#allocation303_spill] sm:$0xff] %v10045_v21  ;;  %v3137_v15 = vpop.f32.mrf.mxu2  ;;  %v10058_v11 = vpack.c.bf16 %v10045_v21, %v10052_v2 }
 0x4c0   : > { %v10054_v55 = vmul.f32 %v3137_v15, %v2494_v42  ;;  %v3226_v59 = vpop.f32.mrf.mxu3  ;;  %v6265_v42 = vadd.s32 %v10078_v28, %v6231_v51  ;;  %v6264_v15 = vadd.s32 %v10078_v28, %v10071_v47  ;;  %v6268_v63 = vadd.s32 %v10078_v28, %v6234_v40  ;;  %v13166_v40 = vld [vmem:[#allocation226_spill] sm:$0xff] }
 0x4c1   : > { %v10060_v43 = vmul.f32 %v3226_v59, %v2495_v24  ;;  %v6233_v24 = vadd.s32 24, %v10071_v47  ;;  %v6266_v59 = vadd.s32 %v10078_v28, %v6232_v46  ;;  %v6236_v51 = vadd.s32 48, %v10071_v47 }
 0x4c2   : > { %13160 = vst [vmem:[#allocation305_spill] sm:$0xff] %v10054_v55  ;;  %vm6297_vm1 = vcmp.lt.s32.totalorder %v6265_v42, 400  ;;  %vm6296_vm2 = vcmp.lt.s32.totalorder %v6264_v15, 400  ;;  %v6269_v60 = vadd.s32 %v10078_v28, %v6235_v35  ;;  %v6237_v46 = vadd.s32 56, %v10071_v47  ;;  %v13165_v42 = vld [vmem:[#allocation225_spill] sm:$0xff] }
 0x4c3   : > { %13161 = vst [vmem:[#allocation306_spill] sm:$0xff] %v10060_v43  ;;  %v6267_v41 = vadd.s32 %v10078_v28, %v6233_v24  ;;  %vm6298_vm3 = vcmp.lt.s32.totalorder %v6266_v59, 400  ;;  %v6329_v32 = vsel %vm6297_vm1, %v13163_v52, 0.0  ;;  %v6328_v43 = vsel %vm6296_vm2, %v13164_v20, 0.0  ;;  %v13169_v52 = vld [vmem:[#allocation240_spill] sm:$0xff] }
 0x4c4   : > { %v6330_v49 = vsel %vm6298_vm3, %v13165_v42, 0.0  ;;  %v6360_v24 = vadd.f32 %v6329_v32, %v6328_v43  ;;  %vm6300_vm5 = vcmp.lt.s32.totalorder %v6268_v63, 400  ;;  %v6270_v15 = vadd.s32 %v10078_v28, %v6236_v51  ;;  %v13168_v32 = vld [vmem:[#allocation233_spill] sm:$0xff] }
 0x4c5   : > { %3070 = vmatmul.bf16.gmra.mxu1 %v10058_v11  ;;  %3159 = vmatmul.bf16.gmra.mxu2 %v10058_v11  ;;  %vm6299_vm4 = vcmp.lt.s32.totalorder %v6267_v41, 400  ;;  %v6238_v59 = vadd.s32 64, %v10071_v47  ;;  %vm6301_vm6 = vcmp.lt.s32.totalorder %v6269_v60, 400  ;;  %v6271_v41 = vadd.s32 %v10078_v28, %v6237_v46  ;;  %v13170_v46 = vld [vmem:[#allocation36_spill] sm:$0xff] }
 0x4c6   : > { %3248 = vmatmul.bf16.gmra.mxu3 %v10058_v11  ;;  %3337 = vmatmul.bf16.gmra.mxu0 %v10058_v11  ;;  %v6331_v55 = vsel %vm6299_vm4, %v13166_v40, 0.0  ;;  %v6361_v37 = vadd.f32 %v6360_v24, %v6330_v49  ;;  %v6332_v35 = vsel %vm6300_vm5, %v13167_v12, 0.0  ;;  %vm6302_vm7 = vcmp.lt.s32.totalorder %v6270_v15, 400 }
 0x4c7   : > { %v6272_v42 = vadd.s32 %v10078_v28, %v6238_v59  ;;  %v6333_v43 = vsel %vm6301_vm6, %v13168_v32, 0.0  ;;  %v6240_v63 = vadd.s32 80, %v10071_v47  ;;  %vm6303_vm8 = vcmp.lt.s32.totalorder %v6271_v41, 400  ;;  %v13172_v59 = vld [vmem:[#allocation241_spill] sm:$0xff] }
 0x4c8   : > { %v6362_v23 = vadd.f32 %v6361_v37, %v6331_v55  ;;  %v6334_v40 = vsel %vm6302_vm7, %v13169_v52, 0.0  ;;  %v6273_v49 = vadd.s32 %v10078_v28, %v6239_v1  ;;  %v6241_v60 = vadd.s32 88, %v10071_v47  ;;  %v13171_v55 = vld [vmem:[#allocation37_spill] sm:$0xff]  ;;  %v13173_v1 = vld [vmem:[#allocation267_spill] sm:$0xff] }
 0x4c9   : > { %v10109_v24 = vadd.f32 %v9485_v16, %v13170_v46  ;;  %vm6304_vm9 = vcmp.lt.s32.totalorder %v6272_v42, 400  ;;  %v10113_v15 = vadd.f32 %v9502_v3, %v13171_v55  ;;  %v6335_v32 = vsel %vm6303_vm8, %v13172_v59, 0.0  ;;  %v13174_v59 = vld [vmem:[#allocation39_spill] sm:$0xff] }
 0x4ca   : > { %v6363_v51 = vadd.f32 %v6362_v23, %v6332_v35  ;;  %v6274_v23 = vadd.s32 %v10078_v28, %v6240_v63  ;;  %v6242_v41 = vadd.s32 96, %v10071_v47  ;;  %v6336_v52 = vsel %vm6304_vm9, %v13173_v1, 0.0  ;;  %v13176_v1 = vld [vmem:[#allocation268_spill] sm:$0xff] }
 0x4cb   : > { %vm6305_vm10 = vcmp.lt.s32.totalorder %v6273_v49, 400  ;;  %v6275_v12 = vadd.s32 %v10078_v28, %v6241_v60  ;;  %v6243_v46 = vadd.s32 104, %v10071_v47  ;;  %v6244_v63 = vadd.s32 112, %v10071_v47 }
 0x4cc   : > { %v6364_v37 = vadd.f32 %v6363_v51, %v6333_v43  ;;  %vm6306_vm11 = vcmp.lt.s32.totalorder %v6274_v23, 400  ;;  %v6276_v55 = vadd.s32 %v10078_v28, %v6242_v41  ;;  %v6337_v44 = vsel %vm6305_vm10, %v13176_v1, 0.0 }
 0x4cd   : > { %vm6307_vm12 = vcmp.lt.s32.totalorder %v6275_v12, 400  ;;  %v6245_v23 = vadd.s32 120, %v10071_v47  ;;  %v6246_v41 = vadd.s32 128, %v10071_v47  ;;  %v6278_v1 = vadd.s32 %v10078_v28, %v6244_v63 }
 0x4ce   : > { %v6365_v35 = vadd.f32 %v6364_v37, %v6334_v40  ;;  %v10127_v40 = vadd.f32 %v9485_v16, %v13174_v59  ;;  %v13175_v37 = vld [vmem:[#allocation40_spill] sm:$0xff]  ;;  %v13178_v59 = vld [vmem:[#allocation121_spill] sm:$0xff]  ;;  %vm6308_vm13 = vcmp.lt.s32.totalorder %v6276_v55, 400 }
 0x4cf   : > { %v10131_v49 = vadd.f32 %v9502_v3, %v13175_v37  ;;  %v10143_v42 = vadd.f32 %v9500_v7, %v13178_v59  ;;  %v6338_v37 = vsel %vm6306_vm11, %v9554_v53, 0.0  ;;  %v10158_v59 = vadd.f32 %v9490_v57, %v13181_v48 }
 0x4d0   : > { %v6366_v43 = vadd.f32 %v6365_v35, %v6335_v32  ;;  %v6277_v32 = vadd.s32 %v10078_v28, %v6243_v46  ;;  %v13177_v35 = vld [vmem:[#allocation42_spill] sm:$0xff]  ;;  %v6339_v53 = vsel %vm6307_vm12, %v9557_v36, 0.0  ;;  %vm6310_vm15 = vcmp.lt.s32.totalorder %v6278_v1, 400  ;;  %v7145_v36 = vld [vmem:[#allocation8 + $0x1d8] sm:$0xf] }
 0x4d1   : > { %v10139_v51 = vadd.f32 %v9485_v16, %v13177_v35  ;;  %v10154_v35 = vadd.f32 %v9500_v7, %v13180_v13  ;;  %v6340_v13 = vsel %vm6308_vm13, %v9616_v18, 0.0  ;;  %v7139_v1 = vld [vmem:[#allocation8 + $0x1f0] sm:$0xf0] }
 0x4d2   : > { %v6367_v60 = vadd.f32 %v6366_v43, %v6336_v52  ;;  %v6247_v52 = vadd.s32 136, %v10071_v47  ;;  %v13179_v43 = vld [vmem:[#allocation122_spill] sm:$0xff]  ;;  %vm6309_vm14 = vcmp.lt.s32.totalorder %v6277_v32, 400  ;;  %v7551_v32 = vld [vmem:[#allocation8 + $0x1f4] sm:$0xf0] }
 0x4d3   : > { %v10149_v12 = vadd.f32 %v9490_v57, %v13179_v43  ;;  %v6279_v43 = vadd.s32 %v10078_v28, %v6245_v23 }
 0x4d4   : > { %v6368_v46 = vadd.f32 %v6367_v60, %v6337_v44  ;;  %v6280_v44 = vadd.s32 %v10078_v28, %v6246_v41  ;;  %v6281_v60 = vadd.s32 %v10078_v28, %v6247_v52  ;;  %v6341_v41 = vsel %vm6309_vm14, %v9619_v27, 0.0  ;;  %v13182_v52 = vld [vmem:[#allocation126_spill] sm:$0xff]  ;;  %v7547_v27 = vld [vmem:[#allocation8 + $0x1dc] sm:$0xf] }
 0x4d5   : > { %vm6311_vm0 = vcmp.lt.s32.totalorder %v6279_v43, 400  ;;  %v10177_v48 = vadd.f32 %v9490_v57, %v13182_v52  ;;  %v7146_v43 = vor.u32 %v7551_v32, %v7145_v36  ;;  %v6250_v52 = vadd.s32 160, %v10071_v47  ;;  %v7113_v36 = vld [vmem:[#allocation8 + $0x198] sm:$0xf] }
 0x4d6   : > { %v6369_v26 = vadd.f32 %v6368_v46, %v6338_v37  ;;  %v6282_v37 = vadd.s32 %v10078_v28, %v6248_v61  ;;  %vm6312_vm1 = vcmp.lt.s32.totalorder %v6280_v44, 400  ;;  %vm6313_vm2 = vcmp.lt.s32.totalorder %v6281_v60, 400  ;;  %v7543_v32 = vld [vmem:[#allocation8 + $0x1b4] sm:$0xf0]  ;;  %v6913_v44 = vld [vmem:[#allocation8 + $0x10] sm:$0xf] }
 0x4d7   : > { %v6343_v61 = vsel %vm6311_vm0, %v9693_v29, 0.0  ;;  %3531 = vmatpush.bf16.msra.mxu3 %v7146_v43  ;;  %v7114_v43 = vor.u32 %v7543_v32, %v7113_v36  ;;  %v7115_v60 = vld [vmem:[#allocation8 + $0x1b8] sm:$0xf0]  ;;  %v7535_v36 = vld [vmem:[#allocation8 + $0x174] sm:$0xf0] }
 0x4d8   : > { %v6370_v50 = vadd.f32 %v6369_v26, %v6339_v53  ;;  %v6342_v26 = vsel %vm6310_vm15, %v9690_v58, 0.0  ;;  %v7546_v53 = vld [vmem:[#allocation8 + $0x1d4] sm:$0xf]  ;;  %vm6314_vm3 = vcmp.lt.s32.totalorder %v6282_v37, 400  ;;  %v6251_v58 = vadd.s32 168, %v10071_v47 }
 0x4d9   : > { %v7142_v23 = vor.u32 %v7546_v53, %v7139_v1  ;;  %v7538_v53 = vld [vmem:[#allocation8 + $0x194] sm:$0xf]  ;;  %v7531_v32 = vld [vmem:[#allocation8 + $0x15c] sm:$0xf] }
 0x4da   : > { %v6371_v63 = vadd.f32 %v6370_v50, %v6340_v13  ;;  %v6249_v50 = vadd.s32 152, %v10071_v47  ;;  %v7147_v13 = vld [vmem:[#allocation8 + $0x1f8] sm:$0xf0]  ;;  %v7107_v1 = vld [vmem:[#allocation8 + $0x1b0] sm:$0xf0] }
 0x4db   : > { %3442 = vmatpush.bf16.msra.mxu2 %v7142_v23  ;;  %v7150_v18 = vor.u32 %v7547_v27, %v7147_v13  ;;  %v7110_v20 = vor.u32 %v7538_v53, %v7107_v1  ;;  %v6346_v27 = vsel %vm6314_vm3, %v9827_v33, 0.0  ;;  %v7494_v13 = vld [vmem:[#allocation8 + $0x2c] sm:$0xf0]  ;;  %3532 = vmatpush.bf16.msra.mxu3 %v7114_v43  ;;  %v7530_v53 = vld [vmem:[#allocation8 + $0x154] sm:$0xf] }
 0x4dc   : > { %v6372_v55 = vadd.f32 %v6371_v63, %v6341_v41  ;;  %v6344_v41 = vsel %vm6312_vm1, %v9751_v30, 0.0  ;;  %v10192_v23 = vadd.s32 %v10078_v28, %v6249_v50  ;;  %v10195_v63 = vadd.s32 %v10078_v28, %v6250_v52  ;;  %v7075_v1 = vld [vmem:[#allocation8 + $0x170] sm:$0xf0]  ;;  %v7081_v50 = vld [vmem:[#allocation8 + $0x158] sm:$0xf] }
 0x4dd   : > { %3620 = vmatpush.bf16.msra.mxu0 %v7150_v18  ;;  %v10198_v18 = vadd.s32 %v10078_v28, %v6251_v58  ;;  %v7083_v52 = vld [vmem:[#allocation8 + $0x178] sm:$0xf0]  ;;  %v6253_v58 = vadd.s32 184, %v10071_v47  ;;  %v7082_v30 = vor.u32 %v7535_v36, %v7081_v50  ;;  %v13183_v36 = vmax.f32 %v10109_v24, 0.0  ;;  %v7514_v24 = vld [vmem:[#allocation8 + $0xd4] sm:$0xf] }
 0x4de   : > { %v6373_v46 = vadd.f32 %v6372_v55, %v6342_v26  ;;  %v7539_v55 = vld [vmem:[#allocation8 + $0x19c] sm:$0xf]  ;;  %v6345_v26 = vsel %vm6313_vm2, %v9754_v9, 0.0  ;;  %v7078_v9 = vor.u32 %v7530_v53, %v7075_v1  ;;  %vm6315_vm4 = vcmp.lt.s32.totalorder %v10192_v23, 400 }
 0x4df   : > { %3443 = vmatpush.bf16.msra.mxu2 %v7110_v20  ;;  %v7118_v37 = vor.u32 %v7539_v55, %v7115_v60  ;;  %vm6316_vm5 = vcmp.lt.s32.totalorder %v10195_v63, 400  ;;  %vm6317_vm6 = vcmp.lt.s32.totalorder %v10198_v18, 400  ;;  %3533 = vmatpush.bf16.msra.mxu3 %v7082_v30  ;;  %v7043_v55 = vld [vmem:[#allocation8 + $0x130] sm:$0xf0]  ;;  %v7523_v53 = vld [vmem:[#allocation8 + $0x11c] sm:$0xf]  ;;  %v10210_v50 = vadd.s32 %v10078_v28, %v6253_v58 }
 0x4e0   : > { %v6374_v29 = vadd.f32 %v6373_v46, %v6343_v61  ;;  %v6252_v46 = vadd.s32 176, %v10071_v47  ;;  %v6914_v61 = vor.u32 %v7494_v13, %v6913_v44  ;;  %v7086_v44 = vor.u32 %v7531_v32, %v7083_v52  ;;  %v7049_v13 = vld [vmem:[#allocation8 + $0x118] sm:$0xf]  ;;  %v7051_v1 = vld [vmem:[#allocation8 + $0x138] sm:$0xf0] }
 0x4e1   : > { %3621 = vmatpush.bf16.msra.mxu0 %v7118_v37  ;;  %v7527_v37 = vld [vmem:[#allocation8 + $0x134] sm:$0xf0]  ;;  %v7054_v30 = vor.u32 %v7523_v53, %v7051_v1  ;;  %v13184_v52 = vmax.f32 %v10149_v12, 0.0  ;;  %v7011_v58 = vld [vmem:[#allocation8 + $0xf0] sm:$0xf0]  ;;  %vm6319_vm8 = vcmp.lt.s32.totalorder %v10210_v50, 400 }
 0x4e2   : > { %v6375_v33 = vadd.f32 %v6374_v29, %v6344_v41  ;;  %3360 = vmatpush.bf16.msrb.mxu1 %v6914_v61  ;;  %v10206_v20 = vadd.s32 %v10078_v28, %v6252_v46  ;;  %v6254_v29 = vadd.s32 192, %v10071_v47  ;;  %v7522_v41 = vld [vmem:[#allocation8 + $0x114] sm:$0xf]  ;;  %v7515_v53 = vld [vmem:[#allocation8 + $0xdc] sm:$0xf]  ;;  %v13186_v23 = vmax.f32 %v10113_v15, 0.0 }
 0x4e3   : > { %3444 = vmatpush.bf16.msra.mxu2 %v7078_v9  ;;  %v7046_v60 = vor.u32 %v7522_v41, %v7043_v55  ;;  %v7050_v9 = vor.u32 %v7527_v37, %v7049_v13  ;;  %v7017_v55 = vld [vmem:[#allocation8 + $0xd8] sm:$0xf]  ;;  %v7014_v13 = vor.u32 %v7514_v24, %v7011_v58  ;;  %v7019_v1 = vld [vmem:[#allocation8 + $0xf8] sm:$0xf0]  ;;  %v6979_v63 = vld [vmem:[#allocation8 + $0xb0] sm:$0xf0] }
 0x4e4   : > { %v6376_v43 = vadd.f32 %v6375_v33, %v6345_v26  ;;  %vm6318_vm7 = vcmp.lt.s32.totalorder %v10206_v20, 400  ;;  %v10218_v33 = vadd.s32 %v10078_v28, %v6254_v29  ;;  %v6255_v26 = vadd.s32 200, %v10071_v47  ;;  %v7519_v37 = vld [vmem:[#allocation8 + $0xf4] sm:$0xf0]  ;;  %v7507_v15 = vld [vmem:[#allocation8 + $0x9c] sm:$0xf] }
 0x4e5   : > { %3622 = vmatpush.bf16.msra.mxu0 %v7086_v44  ;;  %3534 = vmatpush.bf16.msra.mxu3 %v7050_v9  ;;  %v1996_v44 = vpop.xlane.xlu0 %1995  ;;  %v6347_v29 = vsel %vm6315_vm4, %v9830_v5, 0.0  ;;  %v7018_v12 = vor.u32 %v7519_v37, %v7017_v55  ;;  %v6985_v24 = vld [vmem:[#allocation8 + $0x98] sm:$0xf]  ;;  %v13187_v55 = vmax.f32 %v10143_v42, 0.0  ;;  %v6350_v42 = vsel %vm6318_vm7, %v9944_v6, 0.0 }
 0x4e6   : > { %vm6320_vm9 = vcmp.lt.s32.totalorder %v10218_v33, 400  ;;  %7868 = vrcp.f32 %v1996_v44  ;;  %v10242_v18 = vadd.s32 %v10078_v28, %v6255_v26  ;;  %v7498_v20 = vld [vmem:[#allocation8 + $0x54] sm:$0xf]  ;;  %v13194_v50 = vmax.f32 %v10131_v49, 0.0  ;;  %v7495_v49 = vld [vmem:[#allocation8 + $0x34] sm:$0xf0] }
 0x4e7   : > { %3445 = vmatpush.bf16.msra.mxu2 %v7046_v60  ;;  %v6348_v60 = vsel %vm6316_vm5, %v9882_v8, 0.0 }
 0x4e8   : > { %vm6321_vm10 = vcmp.lt.s32.totalorder %v10242_v18, 400 }
 0x4e9   : > { %3623 = vmatpush.bf16.msra.mxu0 %v7054_v30  ;;  %3535 = vmatpush.bf16.msra.mxu3 %v7018_v12  ;;  %v13188_v12 = vmax.f32 %v10127_v40, 0.0  ;;  %v13191_v40 = vld [vmem:[#allocation43_spill] sm:$0xff] }
 0x4eb   : > { %3446 = vmatpush.bf16.msra.mxu2 %v7014_v13 }
 0x502   : > { %v3051_v61 = vpop.f32.mrf.mxu1 }
 0x503   : > { %v10214_v46 = vmul.f32 %v3051_v61, %v13183_v36  ;;  %v3318_v32 = vpop.f32.mrf.mxu0  ;;  %v6377_v61 = vadd.f32 %v6376_v43, %v6346_v27  ;;  %v7022_v36 = vor.u32 %v7515_v53, %v7019_v1  ;;  %v6349_v27 = vsel %vm6317_vm6, %v9885_v39, 0.0  ;;  %v7511_v1 = vld [vmem:[#allocation8 + $0xb4] sm:$0xf0] }
 0x504   : > { %v10223_v41 = vmul.f32 %v3318_v32, %v13184_v52  ;;  %v6256_v43 = vadd.s32 208, %v10071_v47  ;;  %v7506_v52 = vld [vmem:[#allocation8 + $0x94] sm:$0xf] }
 0x505   : > { %v6378_v58 = vadd.f32 %v6377_v61, %v6347_v29  ;;  %v6982_v44 = vor.u32 %v7506_v52, %v6979_v63  ;;  %3624 = vmatpush.bf16.msra.mxu0 %v7022_v36  ;;  %v6986_v61 = vor.u32 %v7511_v1, %v6985_v24  ;;  %v6257_v29 = vadd.s32 216, %v10071_v47  ;;  %v13192_v1 = vld [vmem:[#allocation45_spill] sm:$0xff] }
 0x506   : > { %13185 = vst [vmem:[#allocation36_spill] sm:$0xff] %v10223_v41  ;;  %v13189_v52 = vmax.f32 %v10158_v59, 0.0  ;;  %v13193_v59 = vld [vmem:[#allocation125_spill] sm:$0xff] }
 0x507   : > { %3447 = vmatpush.bf16.msra.mxu2 %v6982_v44  ;;  %v6379_v36 = vadd.f32 %v6378_v58, %v6348_v60  ;;  %3536 = vmatpush.bf16.msra.mxu3 %v6986_v61  ;;  %v7503_v60 = vld [vmem:[#allocation8 + $0x74] sm:$0xf0]  ;;  %v7499_v58 = vld [vmem:[#allocation8 + $0x5c] sm:$0xf] }
 0x508   : > { %v3140_v32 = vpop.f32.mrf.mxu2 }
 0x509   : > { %v10239_v9 = vmul.f32 %v3140_v32, %v13186_v23  ;;  %v3229_v30 = vpop.f32.mrf.mxu3  ;;  %v6987_v32 = vld [vmem:[#allocation8 + $0xb8] sm:$0xf0]  ;;  %v6380_v61 = vadd.f32 %v6379_v36, %v6349_v27 }
 0x50a   : > { %v10246_v37 = vmul.f32 %v3229_v30, %v13187_v55  ;;  %v1998_v53 = vpop.xlane.xlu1 %1997  ;;  %v3053_v13 = vpop.f32.mrf.mxu1  ;;  %v6990_v26 = vor.u32 %v7507_v15, %v6987_v32  ;;  %v6258_v30 = vadd.s32 224, %v10071_v47  ;;  %v10263_v55 = vadd.f32 %v9502_v3, %v13191_v40 }
 0x50b   : > { %7870 = vrcp.f32 %v1998_v53  ;;  %v10250_v23 = vmul.f32 %v3053_v13, %v13188_v12  ;;  %v3320_v39 = vpop.f32.mrf.mxu0  ;;  %v6947_v53 = vld [vmem:[#allocation8 + $0x70] sm:$0xf0]  ;;  %v6953_v13 = vld [vmem:[#allocation8 + $0x58] sm:$0xf]  ;;  %v10269_v15 = vadd.f32 %v9485_v16, %v13192_v1  ;;  %v6955_v12 = vld [vmem:[#allocation8 + $0x78] sm:$0xf0]  ;;  %v6381_v36 = vadd.f32 %v6380_v61, %v6350_v42 }
 0x50c   : > { %v10259_v63 = vmul.f32 %v3320_v39, %v13189_v52  ;;  %v10273_v39 = vadd.f32 %v9500_v7, %v13193_v59  ;;  %v6950_v32 = vor.u32 %v7498_v20, %v6947_v53  ;;  %v7869_v52 = vpop.eup %7868  ;;  %3625 = vmatpush.bf16.msra.mxu0 %v6990_v26  ;;  %v6954_v40 = vor.u32 %v7503_v60, %v6953_v13 }
 0x50d   : > { %v6958_v24 = vor.u32 %v7499_v58, %v6955_v12  ;;  %v6351_v1 = vsel %vm6319_vm8, %v9947_v14, 0.0  ;;  %v6352_v59 = vsel %vm6320_vm9, %v10001_v31, 0.0  ;;  %v6290_v20 = vadd.s32 %v10078_v28, %v6256_v43  ;;  %v7490_v58 = vld [vmem:[#allocation8 + $0x14] sm:$0xf]  ;;  %v6921_v12 = vld [vmem:[#allocation8 + $0x18] sm:$0xf] }
 0x50e   : > { %13190 = vst [vmem:[#allocation37_spill] sm:$0xff] %v10259_v63  ;;  %v6259_v53 = vadd.s32 232, %v10071_v47  ;;  %3448 = vmatpush.bf16.msra.mxu2 %v6950_v32  ;;  %v6291_v26 = vadd.s32 %v10078_v28, %v6257_v29  ;;  %v10288_v13 = vadd.s32 %v10078_v28, %v6258_v30  ;;  %3537 = vmatpush.bf16.msra.mxu3 %v6954_v40  ;;  %v6915_v43 = vld [vmem:[#allocation8 + $0x30] sm:$0xf0]  ;;  %v13197_v42 = vmax.f32 %v10154_v35, 0.0 }
 0x50f   : > { %v10295_v63 = vmul.f32 %v7869_v52, %v9785_v19  ;;  %v6918_v61 = vor.u32 %v7490_v58, %v6915_v43  ;;  %v13198_v31 = vmax.f32 %v10139_v51, 0.0  ;;  %v6382_v43 = vadd.f32 %v6381_v36, %v6351_v1 }
 0x510   : > { %v3142_v44 = vpop.f32.mrf.mxu2  ;;  %v2000_v41 = vpop.xlane.xlu2 %1999  ;;  %3626 = vmatpush.bf16.msra.mxu0 %v6958_v24  ;;  %vm6322_vm11 = vcmp.lt.s32.totalorder %v6290_v20, 400  ;;  %v2518_v51 = vmax.f32 %v10263_v55, 0.0  ;;  %v13201_v24 = vld [vmem:[#allocation129_spill] sm:$0xff]  ;;  %vm6323_vm12 = vcmp.lt.s32.totalorder %v6291_v26, 400  ;;  %v4236_v55 = vld [vmem:[#allocation11 + $0x78] sm:$0xff]  ;;  %v2519_v18 = vmax.f32 %v10273_v39, 0.0 }
 0x511   : > { %v7871_v27 = vpop.eup %7870  ;;  %v10292_v60 = vmul.f32 %v3142_v44, %v13194_v50  ;;  %v3231_v33 = vpop.f32.mrf.mxu3  ;;  %13195 = vst [vmem:[#allocation39_spill] sm:$0xff] %v10295_v63  ;;  %v7491_v44 = vld [vmem:[#allocation8 + $0x1c] sm:$0xf]  ;;  %7872 = vrcp.f32 %v2000_v41  ;;  %v6383_v36 = vadd.f32 %v6382_v43, %v6352_v59  ;;  %vm6324_vm13 = vcmp.lt.s32.totalorder %v10288_v13, 400  ;;  %4237 = vmatpush.msra.mxu1 %v4236_v55 }
 0x512   : > { %v10298_v32 = vmul.f32 %v7871_v27, %v9904_v38  ;;  %v10302_v29 = vmul.f32 %v3231_v33, %v13197_v42  ;;  %v3056_v30 = vpop.f32.mrf.mxu1  ;;  %v6923_v50 = vld [vmem:[#allocation8 + $0x38] sm:$0xf0]  ;;  %v6922_v38 = vor.u32 %v7495_v49, %v6921_v12  ;;  %v13199_v33 = vmax.f32 %v10177_v48, 0.0  ;;  %3449 = vmatpush.bf16.msra.mxu2 %v6918_v61  ;;  %v13202_v48 = vld [vmem:[#allocation46_spill] sm:$0xff] }
 0x513   : > { %v10308_v19 = vmul.f32 %v3056_v30, %v13198_v31  ;;  %v3323_v52 = vpop.f32.mrf.mxu0  ;;  %v6926_v41 = vor.u32 %v7491_v44, %v6923_v50  ;;  %v6260_v31 = vadd.s32 240, %v10071_v47  ;;  %v2272_v12 = vadd.f32 %v9490_v57, %v13201_v24 }
 0x514   : > { %13196 = vst [vmem:[#allocation40_spill] sm:$0xff] %v10298_v32  ;;  %v10312_v35 = vpack.c.bf16 %v10298_v32, %v10295_v63  ;;  %v10318_v58 = vmul.f32 %v3323_v52, %v13199_v33  ;;  %3538 = vmatpush.bf16.msra.mxu3 %v6922_v38  ;;  %v6353_v42 = vsel %vm6321_vm10, %v10004_v62, 0.0  ;;  %v2270_v1 = vadd.f32 %v9502_v3, %v13202_v48  ;;  %v13241_v62 = vld [vmem:[#allocation146_spill] sm:$0xff] }
 0x515   : > { %v6293_v30 = vadd.s32 %v10078_v28, %v6259_v53  ;;  %v2525_v61 = vmax.f32 %v10269_v15, 0.0  ;;  %v6354_v49 = vsel %vm6322_vm11, %v10052_v2, 0.0  ;;  %3627 = vmatpush.bf16.msra.mxu0 %v6926_v41  ;;  %v6384_v50 = vadd.f32 %v6383_v36, %v6353_v42  ;;  %v13203_v15 = vld [vmem:[#allocation48_spill] sm:$0xff] }
 0x516   : > { %13200 = vst [vmem:[#allocation42_spill] sm:$0xff] %v10318_v58  ;;  %3075 = vmatmul.bf16.gmra.mxu1 %v10312_v35  ;;  %3164 = vmatmul.bf16.gmra.mxu2 %v10312_v35  ;;  %v6294_v53 = vadd.s32 %v10078_v28, %v6260_v31  ;;  %v6261_v33 = vadd.s32 248, %v10071_v47  ;;  %v2277_v39 = vadd.f32 %v9485_v16, %v13203_v15  ;;  %v2528_v43 = vmax.f32 %v2272_v12, 0.0  ;;  %v13204_v42 = vld [vmem:[#allocation128_spill] sm:$0xff] }
 0x517   : > { %3253 = vmatmul.bf16.gmra.mxu3 %v10312_v35  ;;  %3342 = vmatmul.bf16.gmra.mxu0 %v10312_v35  ;;  %v7873_v59 = vpop.eup %7872  ;;  %v6355_v20 = vsel %vm6323_vm12, %v10045_v21, 0.0  ;;  %v6385_v55 = vadd.f32 %v6384_v50, %v6354_v49  ;;  %vm6325_vm14 = vcmp.lt.s32.totalorder %v6293_v30, 400  ;;  %v2271_v47 = vadd.f32 %v9500_v7, %v13204_v42  ;;  %v13207_v49 = vld [vmem:[#allocation132_spill] sm:$0xff] }
 0x518   : > { %v3145_v44 = vpop.f32.mrf.mxu2  ;;  %v6356_v12 = vsel %vm6324_vm13, %v10295_v63, 0.0  ;;  %v10357_v26 = vmul.f32 %v7873_v59, %v9930_v0  ;;  %vm6326_vm15 = vcmp.lt.s32.totalorder %v6294_v53, 400  ;;  %v6295_v30 = vadd.s32 %v10078_v28, %v6261_v33 }
 0x519   : > { %v10340_v52 = vmul.f32 %v3145_v44, %v2518_v51  ;;  %v3234_v38 = vpop.f32.mrf.mxu3  ;;  %v2280_v44 = vadd.f32 %v9490_v57, %v13207_v49  ;;  %v6357_v50 = vsel %vm6325_vm14, %v10298_v32, 0.0  ;;  %v2527_v59 = vmax.f32 %v2271_v47, 0.0  ;;  %v13230_v32 = vld [vmem:[#allocation61_spill] sm:$0xff] }
 0x51a   : > { %v10347_v24 = vmul.f32 %v3234_v38, %v2519_v18  ;;  %v2002_v41 = vpop.xlane.xlu0 %2001  ;;  %v3058_v48 = vpop.f32.mrf.mxu1  ;;  %13205 = vst [vmem:[#allocation121_spill] sm:$0xff] %v10357_v26  ;;  %v6386_v18 = vadd.f32 %v6385_v55, %v6355_v20  ;;  %v2526_v38 = vmax.f32 %v2270_v1, 0.0  ;;  %v6358_v15 = vsel %vm6326_vm15, %v10357_v26, 0.0 }
 0x51b   : > { %7874 = vrcp.f32 %v2002_v41  ;;  %v10349_v31 = vmul.f32 %v3058_v48, %v2525_v61  ;;  %v3325_v51 = vpop.f32.mrf.mxu0  ;;  %v2533_v20 = vmax.f32 %v2277_v39, 0.0  ;;  %vm6327_vm0 = vcmp.lt.s32.totalorder %v6295_v30, 400  ;;  %v13208_v48 = vld [vmem:[#allocation49_spill] sm:$0xff] }
 0x51c   : > { %v10359_v36 = vmul.f32 %v3325_v51, %v2528_v43  ;;  %v6387_v0 = vadd.f32 %v6386_v18, %v6356_v12  ;;  %v2278_v55 = vadd.f32 %v9502_v3, %v13208_v48  ;;  %v2536_v51 = vmax.f32 %v2280_v44, 0.0  ;;  %v13210_v12 = vld [vmem:[#allocation131_spill] sm:$0xff]  ;;  %v4235_v48 = vld [vmem:[#allocation11 + $0x70] sm:$0xff] }
 0x51d   : > { %v2279_v18 = vadd.f32 %v9500_v7, %v13210_v12  ;;  %4238 = vmatpush.msra.mxu1 %v4235_v48 }
 0x51e   : > { %13206 = vst [vmem:[#allocation122_spill] sm:$0xff] %v10359_v36  ;;  %v6388_v28 = vadd.f32 %v6387_v0, %v6357_v50 }
 0x520   : > { %v3147_v43 = vpop.f32.mrf.mxu2  ;;  %v6389_v49 = vadd.f32 %v6388_v28, %v6358_v15  ;;  %v2534_v28 = vmax.f32 %v2278_v55, 0.0  ;;  %v13214_v55 = vld [vmem:[#allocation52_spill] sm:$0xff] }
 0x521   : > { %v7875_v53 = vpop.eup %7874  ;;  %v10370_v33 = vmul.f32 %v3147_v43, %v2526_v38  ;;  %v3236_v41 = vpop.f32.mrf.mxu3  ;;  %v2286_v44 = vadd.f32 %v9502_v3, %v13214_v55 }
 0x522   : > { %v10375_v42 = vmul.f32 %v7875_v53, %v9965_v4  ;;  %v10377_v1 = vmul.f32 %v3236_v41, %v2527_v59  ;;  %v3061_v47 = vpop.f32.mrf.mxu1  ;;  %v13212_v59 = vld [vmem:[#allocation51_spill] sm:$0xff] }
 0x523   : > { %v10383_v30 = vmul.f32 %v3061_v47, %v2533_v20  ;;  %v3328_v50 = vpop.f32.mrf.mxu0  ;;  %v2285_v15 = vadd.f32 %v9485_v16, %v13212_v59  ;;  %v13213_v53 = vld [vmem:[#allocation135_spill] sm:$0xff] }
 0x524   : > { %13209 = vst [vmem:[#allocation123_spill] sm:$0xff] %v10375_v42  ;;  %v10387_v38 = vpack.c.bf16 %v10375_v42, %v10357_v26  ;;  %v6359_v4 = vsel %vm6327_vm0, %v10375_v42, 0.0  ;;  %v10392_v0 = vmul.f32 %v3328_v50, %v2536_v51  ;;  %v2288_v20 = vadd.f32 %v9490_v57, %v13213_v53  ;;  %v13226_v42 = vld [vmem:[#allocation140_spill] sm:$0xff] }
 0x525   : > { %v6390_v43 = vadd.f32 %v6389_v49, %v6359_v4  ;;  %v2535_v51 = vmax.f32 %v2279_v18, 0.0  ;;  %v2541_v12 = vmax.f32 %v2285_v15, 0.0  ;;  %v13215_v18 = vld [vmem:[#allocation134_spill] sm:$0xff] }
 0x526   : > { %13211 = vst [vmem:[#allocation124_spill] sm:$0xff] %v10392_v0  ;;  %3080 = vmatmul.bf16.gmra.mxu1 %v10387_v38  ;;  %3169 = vmatmul.bf16.gmra.mxu2 %v10387_v38  ;;  %v2544_v59 = vmax.f32 %v2288_v20, 0.0  ;;  %v2287_v48 = vadd.f32 %v9500_v7, %v13215_v18  ;;  %v13217_v15 = vld [vmem:[#allocation54_spill] sm:$0xff] }
 0x527   : > { %v6391_v41 = vrot.slane %v6390_v43, 4  ;;  %3258 = vmatmul.bf16.gmra.mxu3 %v10387_v38  ;;  %3347 = vmatmul.bf16.gmra.mxu0 %v10387_v38 }
 0x528   : > { %v3150_v47 = vpop.f32.mrf.mxu2 }
 0x529   : > { %v10402_v49 = vmul.f32 %v3150_v47, %v2534_v28  ;;  %v3239_v50 = vpop.f32.mrf.mxu3  ;;  %v6392_v4 = vadd.f32 %v6391_v41, %v6390_v43  ;;  %v2293_v28 = vadd.f32 %v9485_v16, %v13217_v15  ;;  %v13218_v41 = vld [vmem:[#allocation138_spill] sm:$0xff]  ;;  %v2542_v47 = vmax.f32 %v2286_v44, 0.0 }
 0x52a   : > { %v10404_v53 = vmul.f32 %v3239_v50, %v2535_v51  ;;  %v3063_v13 = vpop.f32.mrf.mxu1  ;;  %v2296_v51 = vadd.f32 %v9490_v57, %v13218_v41  ;;  %v2543_v50 = vmax.f32 %v2287_v48, 0.0  ;;  %v13220_v48 = vld [vmem:[#allocation137_spill] sm:$0xff]  ;;  %v13225_v41 = vld [vmem:[#allocation58_spill] sm:$0xff] }
 0x52b   : > { %v10408_v39 = vmul.f32 %v3063_v13, %v2541_v12  ;;  %v3330_v61 = vpop.f32.mrf.mxu0  ;;  %v6393_v27 = vrot.slane %v6392_v4, 2  ;;  %v2302_v0 = vadd.f32 %v9502_v3, %v13225_v41 }
 0x52c   : > { %v10412_v40 = vmul.f32 %v3330_v61, %v2544_v59  ;;  %v2549_v61 = vmax.f32 %v2293_v28, 0.0  ;;  %v2552_v58 = vmax.f32 %v2296_v51, 0.0  ;;  %v2295_v28 = vadd.f32 %v9500_v7, %v13220_v48 }
 0x52d   : > { %v6394_v20 = vadd.f32 %v6393_v27, %v6392_v4  ;;  %v13219_v27 = vld [vmem:[#allocation55_spill] sm:$0xff] }
 0x52e   : > { %13216 = vst [vmem:[#allocation126_spill] sm:$0xff] %v10412_v40  ;;  %v2294_v4 = vadd.f32 %v9502_v3, %v13219_v27 }
 0x52f   : > { %v6395_v12 = vrot.slane %v6394_v20, 1 }
 0x530   : > { %v3152_v55 = vpop.f32.mrf.mxu2 }
 0x531   : > { %v10423_v59 = vmul.f32 %v3152_v55, %v2542_v47  ;;  %v3241_v18 = vpop.f32.mrf.mxu3  ;;  %v6396_v15 = vadd.f32 %v6395_v12, %v6394_v20  ;;  %v13222_v47 = vld [vmem:[#allocation57_spill] sm:$0xff]  ;;  %v13224_v55 = vld [vmem:[#allocation219_spill] sm:$0xff] }
 0x532   : > { %v10425_v36 = vmul.f32 %v3241_v18, %v2543_v50  ;;  %v3066_v43 = vpop.f32.mrf.mxu1  ;;  %v2301_v12 = vadd.f32 %v9485_v16, %v13222_v47  ;;  %v13223_v50 = vld [vmem:[#allocation141_spill] sm:$0xff] }
 0x533   : > { %v10431_v13 = vmul.f32 %v3066_v43, %v2549_v61  ;;  %v3333_v44 = vpop.f32.mrf.mxu0  ;;  %6397 = vst [vmem:[%s10433_s23] sm:$0xff] %v6396_v15  ;;  %v2304_v43 = vadd.f32 %v9490_v57, %v13223_v50  ;;  %v2550_v61 = vmax.f32 %v2294_v4, 0.0  ;;  %v4234_v18 = vld [vmem:[#allocation11 + $0x68] sm:$0xff]  ;;  %v2551_v15 = vmax.f32 %v2295_v28, 0.0 }
 0x534   : > { %v10440_v51 = vmul.f32 %v3333_v44, %v2552_v58  ;;  %4239 = vmatpush.msra.mxu1 %v4234_v18  ;;  %v2557_v58 = vmax.f32 %v2301_v12, 0.0  ;;  %v13228_v18 = vld [vmem:[#allocation60_spill] sm:$0xff] }
 0x535   : > { %v2560_v47 = vmax.f32 %v2304_v43, 0.0  ;;  %v2309_v12 = vadd.f32 %v9485_v16, %v13228_v18  ;;  %v2310_v43 = vadd.f32 %v9502_v3, %v13230_v32 }
 0x536   : > { %13221 = vst [vmem:[#allocation43_spill] sm:$0xff] %v10440_v51  ;;  %3361 = vmatmul.bf16.vlgmr.msrb.gmra.mxu1 %v13224_v55  ;;  %3450 = vmatmul.bf16.vlgmr.msra.gmra.mxu2 %v13224_v55 }
 0x537   : > { %3539 = vmatmul.bf16.vlgmr.msra.gmra.mxu3 %v13224_v55  ;;  %3628 = vmatmul.bf16.vlgmr.msra.gmra.mxu0 %v13224_v55  ;;  %v2303_v55 = vadd.f32 %v9500_v7, %v13226_v42 }
 0x538   : > { %v3155_v27 = vpop.f32.mrf.mxu2 }
 0x539   : > { %v10450_v44 = vmul.f32 %v3155_v27, %v2550_v61  ;;  %v3244_v48 = vpop.f32.mrf.mxu3  ;;  %v13229_v61 = vld [vmem:[#allocation144_spill] sm:$0xff]  ;;  %v2558_v27 = vmax.f32 %v2302_v0, 0.0  ;;  %v13232_v0 = vld [vmem:[#allocation143_spill] sm:$0xff] }
 0x53a   : > { %v10452_v20 = vmul.f32 %v3244_v48, %v2551_v15  ;;  %v3068_v50 = vpop.f32.mrf.mxu1  ;;  %v2312_v15 = vadd.f32 %v9490_v57, %v13229_v61 }
 0x53b   : > { %v10456_v4 = vmul.f32 %v3068_v50, %v2557_v58  ;;  %v3335_v40 = vpop.f32.mrf.mxu0  ;;  %v2559_v58 = vmax.f32 %v2303_v55, 0.0  ;;  %v2565_v50 = vmax.f32 %v2309_v12, 0.0  ;;  %v2311_v55 = vadd.f32 %v9500_v7, %v13232_v0 }
 0x53c   : > { %v10460_v28 = vmul.f32 %v3335_v40, %v2560_v47  ;;  %v2568_v42 = vmax.f32 %v2312_v15, 0.0  ;;  %v13234_v15 = vld [vmem:[#allocation63_spill] sm:$0xff] }
 0x53d   : > { %v2567_v0 = vmax.f32 %v2311_v55, 0.0 }
 0x53e   : > { %13227 = vst [vmem:[#allocation45_spill] sm:$0xff] %v10460_v28  ;;  %v13239_v28 = vld [vmem:[#allocation64_spill] sm:$0xff] }
 0x53f   : > { %v2318_v21 = vadd.f32 %v9502_v3, %v13239_v28 }
 0x540   : > { %v3157_v48 = vpop.f32.mrf.mxu2 }
 0x541   : > { %v10470_v26 = vmul.f32 %v3157_v48, %v2558_v27  ;;  %v3246_v40 = vpop.f32.mrf.mxu3  ;;  %v13235_v48 = vld [vmem:[#allocation147_spill] sm:$0xff] }
 0x542   : > { %v10472_v47 = vmul.f32 %v3246_v40, %v2559_v58  ;;  %v3071_v18 = vpop.f32.mrf.mxu1  ;;  %v2317_v58 = vadd.f32 %v9485_v16, %v13234_v15  ;;  %v2320_v32 = vadd.f32 %v9490_v57, %v13235_v48  ;;  %v13236_v40 = vld [vmem:[#allocation227_spill] sm:$0xff] }
 0x543   : > { %v10478_v63 = vmul.f32 %v3071_v18, %v2565_v50  ;;  %v3338_v41 = vpop.f32.mrf.mxu0  ;;  %v2566_v50 = vmax.f32 %v2310_v43, 0.0  ;;  %v4233_v18 = vld [vmem:[#allocation11 + $0x60] sm:$0xff] }
 0x544   : > { %v10484_v27 = vmul.f32 %v3338_v41, %v2568_v42  ;;  %4240 = vmatpush.msra.mxu1 %v4233_v18  ;;  %v2573_v41 = vmax.f32 %v2317_v58, 0.0  ;;  %v2576_v61 = vmax.f32 %v2320_v32, 0.0  ;;  %v2574_v32 = vmax.f32 %v2318_v21, 0.0  ;;  %v4232_v21 = vld [vmem:[#allocation11 + $0x58] sm:$0xff] }
 0x545   : > { %13231 = vst [vmem:[#allocation125_spill] sm:$0xff] %v10478_v63 }
 0x546   : > { %13233 = vst [vmem:[#allocation129_spill] sm:$0xff] %v10484_v27  ;;  %3366 = vmatmul.bf16.gmra.mxu1 %v13236_v40  ;;  %3455 = vmatmul.bf16.gmra.mxu2 %v13236_v40 }
 0x547   : > { %3544 = vmatmul.bf16.gmra.mxu3 %v13236_v40  ;;  %3633 = vmatmul.bf16.gmra.mxu0 %v13236_v40  ;;  %v2319_v40 = vadd.f32 %v9500_v7, %v13241_v62 }
 0x548   : > { %v3160_v12 = vpop.f32.mrf.mxu2  ;;  %4241 = vmatpush.msra.mxu1 %v4232_v21 }
 0x549   : > { %v10494_v42 = vmul.f32 %v3160_v12, %v2566_v50  ;;  %v3249_v15 = vpop.f32.mrf.mxu3  ;;  %v2575_v50 = vmax.f32 %v2319_v40, 0.0  ;;  %v13247_v40 = vld [vmem:[#allocation270_spill] sm:$0xff]  ;;  %v13252_v12 = vld [vmem:[#allocation149_spill] sm:$0xff] }
 0x54a   : > { %v10496_v51 = vmul.f32 %v3249_v15, %v2567_v0  ;;  %v3073_v48 = vpop.f32.mrf.mxu1 }
 0x54b   : > { %13237 = vst [vmem:[#allocation46_spill] sm:$0xff] %v10494_v42  ;;  %v10500_v43 = vmul.f32 %v3073_v48, %v2573_v41  ;;  %v3340_v2 = vpop.f32.mrf.mxu0  ;;  %v4231_v48 = vld [vmem:[#allocation11 + $0x50] sm:$0xff] }
 0x54c   : > { %13238 = vst [vmem:[#allocation48_spill] sm:$0xff] %v10496_v51  ;;  %v10504_v55 = vmul.f32 %v3340_v2, %v2576_v61  ;;  %v13245_v2 = vld [vmem:[#allocation234_spill] sm:$0xff]  ;;  %v13246_v61 = vld [vmem:[#allocation243_spill] sm:$0xff]  ;;  %4242 = vmatpush.msra.mxu1 %v4231_v48 }
 0x54d   : > { %13240 = vst [vmem:[#allocation128_spill] sm:$0xff] %v10500_v43  ;;  %v13264_v43 = vld [vmem:[#allocation73_spill] sm:$0xff] }
 0x54e   : > { %13242 = vst [vmem:[#allocation132_spill] sm:$0xff] %v10504_v55 }
 0x550   : > { %v3162_v18 = vpop.f32.mrf.mxu2 }
 0x551   : > { %v10510_v0 = vmul.f32 %v3162_v18, %v2574_v32  ;;  %v3251_v28 = vpop.f32.mrf.mxu3  ;;  %v4230_v32 = vld [vmem:[#allocation11 + $0x48] sm:$0xff]  ;;  %v13248_v18 = vld [vmem:[#allocation66_spill] sm:$0xff] }
 0x552   : > { %v10512_v41 = vmul.f32 %v3251_v28, %v2575_v50  ;;  %4243 = vmatpush.msra.mxu1 %v4230_v32  ;;  %v4229_v50 = vld [vmem:[#allocation11 + $0x40] sm:$0xff]  ;;  %v2325_v28 = vadd.f32 %v9485_v16, %v13248_v18  ;;  %v13250_v32 = vld [vmem:[#allocation67_spill] sm:$0xff] }
 0x553   : > { %13243 = vst [vmem:[#allocation49_spill] sm:$0xff] %v10510_v0  ;;  %v2326_v58 = vadd.f32 %v9502_v3, %v13250_v32 }
 0x554   : > { %13244 = vst [vmem:[#allocation131_spill] sm:$0xff] %v10512_v41  ;;  %4244 = vmatpush.msra.mxu1 %v4229_v50  ;;  %v13254_v50 = vld [vmem:[#allocation69_spill] sm:$0xff]  ;;  %v13258_v41 = vld [vmem:[#allocation70_spill] sm:$0xff] }
 0x555   : > { %v2333_v18 = vadd.f32 %v9485_v16, %v13254_v50 }
 0x556   : > { %3371 = vmatmul.bf16.gmra.mxu1 %v13245_v2  ;;  %3460 = vmatmul.bf16.gmra.mxu2 %v13245_v2 }
 0x557   : > { %3549 = vmatmul.bf16.gmra.mxu3 %v13245_v2  ;;  %3638 = vmatmul.bf16.gmra.mxu0 %v13245_v2  ;;  %v13249_v2 = vld [vmem:[#allocation150_spill] sm:$0xff] }
 0x558   : > { %v2328_v21 = vadd.f32 %v9490_v57, %v13249_v2 }
 0x55a   : > { %v2584_v48 = vmax.f32 %v2328_v21, 0.0  ;;  %v4228_v21 = vld [vmem:[#allocation11 + $0x38] sm:$0xff] }
 0x55b   : > { %4245 = vmatpush.msra.mxu1 %v4228_v21 }
 0x566   : > { %3376 = vmatmul.bf16.gmra.mxu1 %v13246_v61  ;;  %3465 = vmatmul.bf16.gmra.mxu2 %v13246_v61 }
 0x567   : > { %3554 = vmatmul.bf16.gmra.mxu3 %v13246_v61  ;;  %3643 = vmatmul.bf16.gmra.mxu0 %v13246_v61  ;;  %v2581_v61 = vmax.f32 %v2325_v28, 0.0  ;;  %v13255_v28 = vld [vmem:[#allocation153_spill] sm:$0xff] }
 0x568   : > { %v2336_v2 = vadd.f32 %v9490_v57, %v13255_v28  ;;  %v2334_v28 = vadd.f32 %v9502_v3, %v13258_v41 }
 0x56a   : > { %v2592_v50 = vmax.f32 %v2336_v2, 0.0  ;;  %v2342_v2 = vadd.f32 %v9502_v3, %v13264_v43  ;;  %v13269_v43 = vld [vmem:[#allocation158_spill] sm:$0xff] }
 0x576   : > { %3381 = vmatmul.bf16.gmra.mxu1 %v13247_v40  ;;  %3470 = vmatmul.bf16.gmra.mxu2 %v13247_v40 }
 0x577   : > { %3559 = vmatmul.bf16.gmra.mxu3 %v13247_v40  ;;  %3648 = vmatmul.bf16.gmra.mxu0 %v13247_v40 }
 0x586   : > { %3386 = vmatmul.bf16.gmra.mxu1 %v9570_v45  ;;  %3475 = vmatmul.bf16.gmra.mxu2 %v9570_v45 }
 0x587   : > { %3564 = vmatmul.bf16.gmra.mxu3 %v9570_v45  ;;  %3653 = vmatmul.bf16.gmra.mxu0 %v9570_v45  ;;  %v2327_v45 = vadd.f32 %v9500_v7, %v13252_v12 }
 0x589   : > { %v2583_v12 = vmax.f32 %v2327_v45, 0.0  ;;  %v13261_v45 = vld [vmem:[#allocation72_spill] sm:$0xff] }
 0x593   : > { %v3076_v40 = vpop.f32.mrf.mxu1 }
 0x594   : > { %v10540_v62 = vmul.f32 %v3076_v40, %v2581_v61  ;;  %v3343_v15 = vpop.f32.mrf.mxu0  ;;  %v2582_v61 = vmax.f32 %v2326_v58, 0.0 }
 0x595   : > { %v10544_v27 = vmul.f32 %v3343_v15, %v2584_v48  ;;  %v2589_v48 = vmax.f32 %v2333_v18, 0.0  ;;  %v2341_v18 = vadd.f32 %v9485_v16, %v13261_v45 }
 0x596   : > { %13251 = vst [vmem:[#allocation51_spill] sm:$0xff] %v10540_v62  ;;  %3391 = vmatmul.bf16.gmra.mxu1 %v9632_v17  ;;  %3480 = vmatmul.bf16.gmra.mxu2 %v9632_v17 }
 0x597   : > { %13253 = vst [vmem:[#allocation135_spill] sm:$0xff] %v10544_v27  ;;  %3569 = vmatmul.bf16.gmra.mxu3 %v9632_v17  ;;  %3658 = vmatmul.bf16.gmra.mxu0 %v9632_v17  ;;  %v13259_v17 = vld [vmem:[#allocation152_spill] sm:$0xff] }
 0x598   : > { %v2335_v58 = vadd.f32 %v9500_v7, %v13259_v17 }
 0x599   : > { %v3165_v15 = vpop.f32.mrf.mxu2 }
 0x59a   : > { %v10554_v40 = vmul.f32 %v3165_v15, %v2582_v61  ;;  %v3254_v32 = vpop.f32.mrf.mxu3  ;;  %v13262_v61 = vld [vmem:[#allocation156_spill] sm:$0xff]  ;;  %v2591_v15 = vmax.f32 %v2335_v58, 0.0 }
 0x59b   : > { %v10556_v55 = vmul.f32 %v3254_v32, %v2583_v12  ;;  %v3078_v51 = vpop.f32.mrf.mxu1  ;;  %v2344_v12 = vadd.f32 %v9490_v57, %v13262_v61  ;;  %v2597_v32 = vmax.f32 %v2341_v18, 0.0 }
 0x59c   : > { %13256 = vst [vmem:[#allocation52_spill] sm:$0xff] %v10554_v40  ;;  %v10560_v42 = vmul.f32 %v3078_v51, %v2589_v48  ;;  %v3345_v0 = vpop.f32.mrf.mxu0  ;;  %v2590_v51 = vmax.f32 %v2334_v28, 0.0  ;;  %v13266_v28 = vld [vmem:[#allocation154_spill] sm:$0xff] }
 0x59d   : > { %13257 = vst [vmem:[#allocation134_spill] sm:$0xff] %v10556_v55  ;;  %v10564_v21 = vmul.f32 %v3345_v0, %v2592_v50  ;;  %v2600_v50 = vmax.f32 %v2344_v12, 0.0  ;;  %v2343_v58 = vadd.f32 %v9500_v7, %v13266_v28  ;;  %v13268_v12 = vld [vmem:[#allocation75_spill] sm:$0xff] }
 0x59f   : > { %13260 = vst [vmem:[#allocation54_spill] sm:$0xff] %v10564_v21  ;;  %v13272_v21 = vld [vmem:[#allocation76_spill] sm:$0xff] }
 0x5a1   : > { %v3167_v48 = vpop.f32.mrf.mxu2 }
 0x5a2   : > { %v10574_v63 = vmul.f32 %v3167_v48, %v2590_v51  ;;  %v3256_v0 = vpop.f32.mrf.mxu3  ;;  %v2352_v48 = vadd.f32 %v9490_v57, %v13269_v43 }
 0x5a3   : > { %v10576_v17 = vmul.f32 %v3256_v0, %v2591_v15  ;;  %v3081_v45 = vpop.f32.mrf.mxu1  ;;  %v2349_v15 = vadd.f32 %v9485_v16, %v13268_v12  ;;  %v2598_v0 = vmax.f32 %v2342_v2, 0.0 }
 0x5a4   : > { %v10582_v62 = vmul.f32 %v3081_v45, %v2597_v32  ;;  %v3348_v41 = vpop.f32.mrf.mxu0  ;;  %v4227_v32 = vld [vmem:[#allocation11 + $0x30] sm:$0xff]  ;;  %v2599_v45 = vmax.f32 %v2343_v58, 0.0  ;;  %v2608_v61 = vmax.f32 %v2352_v48, 0.0 }
 0x5a5   : > { %13263 = vst [vmem:[#allocation138_spill] sm:$0xff] %v10576_v17  ;;  %v10588_v51 = vmul.f32 %v3348_v41, %v2600_v50  ;;  %4246 = vmatpush.msra.mxu1 %v4227_v32  ;;  %v7942_v50 = vld [vmem:[#allocation7] sm:$0xff]  ;;  %v2605_v16 = vmax.f32 %v2349_v15, 0.0  ;;  %v13274_v32 = vld [vmem:[#allocation157_spill] sm:$0xff]  ;;  %v13276_v15 = vld [vmem:[#allocation38_spill] sm:$0xff] }
 0x5a6   : > { %13265 = vst [vmem:[#allocation55_spill] sm:$0xff] %v10582_v62  ;;  %3396 = vmatmul.bf16.gmra.mxu1 %v9706_v25  ;;  %3485 = vmatmul.bf16.gmra.mxu2 %v9706_v25  ;;  %v10598_v28 = vperm.slane %v7942_v50, 4  ;;  %v10602_v27 = vperm.slane %v7942_v50, 7  ;;  %v2351_v55 = vadd.f32 %v9500_v7, %v13274_v32  ;;  %v13280_v62 = vld [vmem:[#allocation159_spill] sm:$0xff] }
 0x5a7   : > { %13267 = vst [vmem:[#allocation137_spill] sm:$0xff] %v10588_v51  ;;  %3574 = vmatmul.bf16.gmra.mxu3 %v9706_v25  ;;  %3663 = vmatmul.bf16.gmra.mxu0 %v9706_v25  ;;  %v2350_v25 = vadd.f32 %v9502_v3, %v13272_v21 }
 0x5a9   : > { %v3170_v41 = vpop.f32.mrf.mxu2  ;;  %v2606_v21 = vmax.f32 %v2350_v25, 0.0 }
 0x5aa   : > { %v10600_v12 = vmul.f32 %v3170_v41, %v2598_v0  ;;  %v3259_v18 = vpop.f32.mrf.mxu3  ;;  %v2105_v0 = vadd.f32 %v10598_v28, %v13276_v15  ;;  %v10622_v41 = vperm.slane %v7942_v50, 5 }
 0x5ab   : > { %v10604_v57 = vmul.f32 %v3259_v18, %v2599_v45  ;;  %v3083_v43 = vpop.f32.mrf.mxu1  ;;  %v13277_v18 = vld [vmem:[#allocation161_spill] sm:$0xff] }
 0x5ac   : > { %13270 = vst [vmem:[#allocation57_spill] sm:$0xff] %v10600_v12  ;;  %v10608_v2 = vmul.f32 %v3083_v43, %v2605_v16  ;;  %v3350_v58 = vpop.f32.mrf.mxu0  ;;  %v2108_v45 = vadd.f32 %v10602_v27, %v13277_v18  ;;  %v2607_v16 = vmax.f32 %v2351_v55, 0.0  ;;  %v10624_v43 = vperm.slane %v7942_v50, 6  ;;  %v13282_v50 = vld [vmem:[#allocation160_spill] sm:$0xff] }
 0x5ad   : > { %13271 = vst [vmem:[#allocation141_spill] sm:$0xff] %v10604_v57  ;;  %v10612_v17 = vmul.f32 %v3350_v58, %v2608_v61  ;;  %v2361_v61 = vmax.f32 %v2105_v0, 0.0  ;;  %v2106_v18 = vadd.f32 %v10622_v41, %v13280_v62  ;;  %v13285_v62 = vld [vmem:[#allocation164_spill] sm:$0xff]  ;;  %v13288_v57 = vld [vmem:[#allocation162_spill] sm:$0xff] }
 0x5ae   : > { %13273 = vst [vmem:[#allocation219_spill] sm:$0xff] %v10608_v2  ;;  %v2364_v15 = vmax.f32 %v2108_v45, 0.0  ;;  %v2107_v51 = vadd.f32 %v10624_v43, %v13282_v50  ;;  %v13284_v45 = vld [vmem:[#allocation41_spill] sm:$0xff] }
 0x5af   : > { %13275 = vst [vmem:[#allocation58_spill] sm:$0xff] %v10612_v17  ;;  %v13295_v2 = vld [vmem:[#allocation165_spill] sm:$0xff] }
 0x5b1   : > { %v3172_v7 = vpop.f32.mrf.mxu2 }
 0x5b2   : > { %v10626_v58 = vmul.f32 %v3172_v7, %v2606_v21  ;;  %v3261_v32 = vpop.f32.mrf.mxu3  ;;  %v4226_v7 = vld [vmem:[#allocation11 + $0x28] sm:$0xff] }
 0x5b3   : > { %v10628_v40 = vmul.f32 %v3261_v32, %v2607_v16  ;;  %v3362_v48 = vpop.f32.mrf.mxu1  ;;  %v2113_v16 = vadd.f32 %v10598_v28, %v13284_v45  ;;  %4247 = vmatpush.msra.mxu1 %v4226_v7  ;;  %v2363_v32 = vmax.f32 %v2107_v51, 0.0  ;;  %v13291_v51 = vld [vmem:[#allocation44_spill] sm:$0xff] }
 0x5b4   : > { %13278 = vst [vmem:[#allocation140_spill] sm:$0xff] %v10626_v58  ;;  %v10634_v3 = vmul.f32 %v3362_v48, %v2361_v61  ;;  %v3629_v55 = vpop.f32.mrf.mxu0  ;;  %v2116_v48 = vadd.f32 %v10602_v27, %v13285_v62  ;;  %v2362_v61 = vmax.f32 %v2106_v18, 0.0  ;;  %v2114_v62 = vadd.f32 %v10622_v41, %v13288_v57 }
 0x5b5   : > { %13279 = vst [vmem:[#allocation60_spill] sm:$0xff] %v10628_v40  ;;  %v10640_v21 = vmul.f32 %v3629_v55, %v2364_v15  ;;  %v2369_v55 = vmax.f32 %v2113_v16, 0.0  ;;  %v2121_v16 = vadd.f32 %v10598_v28, %v13291_v51 }
 0x5b6   : > { %13281 = vst [vmem:[#allocation144_spill] sm:$0xff] %v10634_v3  ;;  %3401 = vmatmul.bf16.gmra.mxu1 %v9761_v56  ;;  %3490 = vmatmul.bf16.gmra.mxu2 %v9761_v56  ;;  %v2372_v0 = vmax.f32 %v2116_v48, 0.0  ;;  %v2122_v48 = vadd.f32 %v10622_v41, %v13295_v2  ;;  %v13300_v2 = vld [vmem:[#allocation170_spill] sm:$0xff] }
 0x5b7   : > { %13283 = vst [vmem:[#allocation61_spill] sm:$0xff] %v10640_v21  ;;  %3579 = vmatmul.bf16.gmra.mxu3 %v9761_v56  ;;  %3668 = vmatmul.bf16.gmra.mxu0 %v9761_v56  ;;  %v13289_v56 = vld [vmem:[#allocation163_spill] sm:$0xff] }
 0x5b8   : > { %v2115_v18 = vadd.f32 %v10624_v43, %v13289_v56 }
 0x5b9   : > { %v3451_v15 = vpop.f32.mrf.mxu2 }
 0x5ba   : > { %v10650_v50 = vmul.f32 %v3451_v15, %v2362_v61  ;;  %v3540_v45 = vpop.f32.mrf.mxu3  ;;  %v13292_v61 = vld [vmem:[#allocation167_spill] sm:$0xff]  ;;  %v2371_v15 = vmax.f32 %v2115_v18, 0.0 }
 0x5bb   : > { %v10652_v25 = vmul.f32 %v3540_v45, %v2363_v32  ;;  %v3364_v17 = vpop.f32.mrf.mxu1  ;;  %v2124_v32 = vadd.f32 %v10602_v27, %v13292_v61  ;;  %v2377_v45 = vmax.f32 %v2121_v16, 0.0 }
 0x5bc   : > { %13286 = vst [vmem:[#allocation143_spill] sm:$0xff] %v10650_v50  ;;  %v10656_v40 = vmul.f32 %v3364_v17, %v2369_v55  ;;  %v3631_v12 = vpop.f32.mrf.mxu0  ;;  %v2370_v17 = vmax.f32 %v2114_v62, 0.0  ;;  %v13297_v62 = vld [vmem:[#allocation166_spill] sm:$0xff] }
 0x5bd   : > { %13287 = vst [vmem:[#allocation63_spill] sm:$0xff] %v10652_v25  ;;  %v10660_v7 = vmul.f32 %v3631_v12, %v2372_v0  ;;  %v2380_v0 = vmax.f32 %v2124_v32, 0.0  ;;  %v2123_v18 = vadd.f32 %v10624_v43, %v13297_v62  ;;  %v13299_v32 = vld [vmem:[#allocation47_spill] sm:$0xff] }
 0x5bf   : > { %13290 = vst [vmem:[#allocation147_spill] sm:$0xff] %v10660_v7  ;;  %v13303_v7 = vld [vmem:[#allocation168_spill] sm:$0xff] }
 0x5c1   : > { %v3453_v55 = vpop.f32.mrf.mxu2 }
 0x5c2   : > { %v10670_v58 = vmul.f32 %v3453_v55, %v2370_v17  ;;  %v3542_v12 = vpop.f32.mrf.mxu3  ;;  %v2132_v55 = vadd.f32 %v10602_v27, %v13300_v2  ;;  %v2130_v2 = vadd.f32 %v10622_v41, %v13303_v7 }
 0x5c3   : > { %v10672_v56 = vmul.f32 %v3542_v12, %v2371_v15  ;;  %v3367_v51 = vpop.f32.mrf.mxu1  ;;  %v2129_v15 = vadd.f32 %v10598_v28, %v13299_v32  ;;  %v2378_v12 = vmax.f32 %v2122_v48, 0.0 }
 0x5c4   : > { %13293 = vst [vmem:[#allocation227_spill] sm:$0xff] %v10670_v58  ;;  %v10678_v3 = vmul.f32 %v3367_v51, %v2377_v45  ;;  %v3634_v57 = vpop.f32.mrf.mxu0  ;;  %v4225_v45 = vld [vmem:[#allocation11 + $0x20] sm:$0xff]  ;;  %v2379_v51 = vmax.f32 %v2123_v18, 0.0  ;;  %v2388_v16 = vmax.f32 %v2132_v55, 0.0  ;;  %v13306_v18 = vld [vmem:[#allocation50_spill] sm:$0xff]  ;;  %v13310_v58 = vld [vmem:[#allocation171_spill] sm:$0xff] }
 0x5c5   : > { %13294 = vst [vmem:[#allocation64_spill] sm:$0xff] %v10672_v56  ;;  %v10684_v17 = vmul.f32 %v3634_v57, %v2380_v0  ;;  %4248 = vmatpush.msra.mxu1 %v4225_v45  ;;  %v2385_v0 = vmax.f32 %v2129_v15, 0.0  ;;  %v2137_v15 = vadd.f32 %v10598_v28, %v13306_v18  ;;  %v2138_v55 = vadd.f32 %v10622_v41, %v13310_v58  ;;  %v13315_v58 = vld [vmem:[#allocation176_spill] sm:$0xff] }
 0x5c6   : > { %13296 = vst [vmem:[#allocation146_spill] sm:$0xff] %v10678_v3  ;;  %3406 = vmatmul.bf16.gmra.mxu1 %v9844_v54  ;;  %3495 = vmatmul.bf16.gmra.mxu2 %v9844_v54 }
 0x5c7   : > { %13298 = vst [vmem:[#allocation234_spill] sm:$0xff] %v10684_v17  ;;  %3584 = vmatmul.bf16.gmra.mxu3 %v9844_v54  ;;  %3673 = vmatmul.bf16.gmra.mxu0 %v9844_v54  ;;  %v13304_v54 = vld [vmem:[#allocation169_spill] sm:$0xff] }
 0x5c8   : > { %v2131_v48 = vadd.f32 %v10624_v43, %v13304_v54 }
 0x5c9   : > { %v3456_v57 = vpop.f32.mrf.mxu2 }
 0x5ca   : > { %v10694_v62 = vmul.f32 %v3456_v57, %v2378_v12  ;;  %v3545_v32 = vpop.f32.mrf.mxu3  ;;  %v13307_v12 = vld [vmem:[#allocation173_spill] sm:$0xff]  ;;  %v2387_v57 = vmax.f32 %v2131_v48, 0.0 }
 0x5cb   : > { %v10696_v61 = vmul.f32 %v3545_v32, %v2379_v51  ;;  %v3369_v21 = vpop.f32.mrf.mxu1  ;;  %v2140_v51 = vadd.f32 %v10602_v27, %v13307_v12  ;;  %v2393_v32 = vmax.f32 %v2137_v15, 0.0 }
 0x5cc   : > { %13301 = vst [vmem:[#allocation243_spill] sm:$0xff] %v10694_v62  ;;  %v10700_v25 = vmul.f32 %v3369_v21, %v2385_v0  ;;  %v3636_v56 = vpop.f32.mrf.mxu0  ;;  %v2386_v21 = vmax.f32 %v2130_v2, 0.0  ;;  %v13312_v2 = vld [vmem:[#allocation172_spill] sm:$0xff] }
 0x5cd   : > { %13302 = vst [vmem:[#allocation270_spill] sm:$0xff] %v10696_v61  ;;  %v10704_v45 = vmul.f32 %v3636_v56, %v2388_v16  ;;  %v2396_v16 = vmax.f32 %v2140_v51, 0.0  ;;  %v2139_v48 = vadd.f32 %v10624_v43, %v13312_v2  ;;  %v13314_v51 = vld [vmem:[#allocation53_spill] sm:$0xff] }
 0x5cf   : > { %13305 = vst [vmem:[#allocation66_spill] sm:$0xff] %v10704_v45  ;;  %v13318_v45 = vld [vmem:[#allocation174_spill] sm:$0xff] }
 0x5d1   : > { %v3458_v0 = vpop.f32.mrf.mxu2 }
 0x5d2   : > { %v10714_v50 = vmul.f32 %v3458_v0, %v2386_v21  ;;  %v3547_v56 = vpop.f32.mrf.mxu3  ;;  %v2148_v0 = vadd.f32 %v10602_v27, %v13315_v58  ;;  %v2146_v58 = vadd.f32 %v10622_v41, %v13318_v45 }
 0x5d3   : > { %v10716_v54 = vmul.f32 %v3547_v56, %v2387_v57  ;;  %v3372_v18 = vpop.f32.mrf.mxu1  ;;  %v2145_v57 = vadd.f32 %v10598_v28, %v13314_v51  ;;  %v2394_v56 = vmax.f32 %v2138_v55, 0.0 }
 0x5d4   : > { %13308 = vst [vmem:[#allocation150_spill] sm:$0xff] %v10714_v50  ;;  %v10722_v3 = vmul.f32 %v3372_v18, %v2393_v32  ;;  %v3639_v7 = vpop.f32.mrf.mxu0  ;;  %v4224_v32 = vld [vmem:[#allocation11 + $0x18] sm:$0xff]  ;;  %v2395_v18 = vmax.f32 %v2139_v48, 0.0  ;;  %v2404_v15 = vmax.f32 %v2148_v0, 0.0  ;;  %v13322_v48 = vld [vmem:[#allocation56_spill] sm:$0xff]  ;;  %v13326_v50 = vld [vmem:[#allocation177_spill] sm:$0xff] }
 0x5d5   : > { %13309 = vst [vmem:[#allocation67_spill] sm:$0xff] %v10716_v54  ;;  %v10728_v21 = vmul.f32 %v3639_v7, %v2396_v16  ;;  %4249 = vmatpush.msra.mxu1 %v4224_v32  ;;  %v2401_v16 = vmax.f32 %v2145_v57, 0.0  ;;  %v2153_v57 = vadd.f32 %v10598_v28, %v13322_v48  ;;  %v2154_v0 = vadd.f32 %v10622_v41, %v13326_v50  ;;  %v13331_v50 = vld [vmem:[#allocation182_spill] sm:$0xff] }
 0x5d6   : > { %13311 = vst [vmem:[#allocation149_spill] sm:$0xff] %v10722_v3  ;;  %3411 = vmatmul.bf16.gmra.mxu1 %v9898_v22  ;;  %3500 = vmatmul.bf16.gmra.mxu2 %v9898_v22 }
 0x5d7   : > { %13313 = vst [vmem:[#allocation69_spill] sm:$0xff] %v10728_v21  ;;  %3589 = vmatmul.bf16.gmra.mxu3 %v9898_v22  ;;  %3678 = vmatmul.bf16.gmra.mxu0 %v9898_v22  ;;  %v13320_v22 = vld [vmem:[#allocation175_spill] sm:$0xff] }
 0x5d8   : > { %v2147_v55 = vadd.f32 %v10624_v43, %v13320_v22 }
 0x5d9   : > { %v3461_v7 = vpop.f32.mrf.mxu2 }
 0x5da   : > { %v10738_v2 = vmul.f32 %v3461_v7, %v2394_v56  ;;  %v3550_v51 = vpop.f32.mrf.mxu3  ;;  %v13323_v56 = vld [vmem:[#allocation179_spill] sm:$0xff]  ;;  %v2403_v7 = vmax.f32 %v2147_v55, 0.0 }
 0x5db   : > { %v10740_v12 = vmul.f32 %v3550_v51, %v2395_v18  ;;  %v3374_v17 = vpop.f32.mrf.mxu1  ;;  %v2156_v18 = vadd.f32 %v10602_v27, %v13323_v56  ;;  %v2409_v51 = vmax.f32 %v2153_v57, 0.0 }
 0x5dc   : > { %13316 = vst [vmem:[#allocation153_spill] sm:$0xff] %v10738_v2  ;;  %v10744_v61 = vmul.f32 %v3374_v17, %v2401_v16  ;;  %v3641_v54 = vpop.f32.mrf.mxu0  ;;  %v2402_v17 = vmax.f32 %v2146_v58, 0.0  ;;  %v13328_v58 = vld [vmem:[#allocation178_spill] sm:$0xff] }
 0x5dd   : > { %13317 = vst [vmem:[#allocation70_spill] sm:$0xff] %v10740_v12  ;;  %v10748_v32 = vmul.f32 %v3641_v54, %v2404_v15  ;;  %v2412_v15 = vmax.f32 %v2156_v18, 0.0  ;;  %v2155_v55 = vadd.f32 %v10624_v43, %v13328_v58  ;;  %v13330_v18 = vld [vmem:[#allocation59_spill] sm:$0xff] }
 0x5de   : > { %13319 = vst [vmem:[#allocation152_spill] sm:$0xff] %v10744_v61  ;;  %v13349_v61 = vld [vmem:[#allocation186_spill] sm:$0xff] }
 0x5df   : > { %13321 = vst [vmem:[#allocation72_spill] sm:$0xff] %v10748_v32  ;;  %v13334_v32 = vld [vmem:[#allocation180_spill] sm:$0xff] }
 0x5e1   : > { %v3463_v16 = vpop.f32.mrf.mxu2 }
 0x5e2   : > { %v10758_v62 = vmul.f32 %v3463_v16, %v2402_v17  ;;  %v3552_v54 = vpop.f32.mrf.mxu3  ;;  %v2164_v16 = vadd.f32 %v10602_v27, %v13331_v50  ;;  %v2162_v50 = vadd.f32 %v10622_v41, %v13334_v32 }
 0x5e3   : > { %v10760_v22 = vmul.f32 %v3552_v54, %v2403_v7  ;;  %v3377_v48 = vpop.f32.mrf.mxu1  ;;  %v2161_v7 = vadd.f32 %v10598_v28, %v13330_v18  ;;  %v2410_v54 = vmax.f32 %v2154_v0, 0.0 }
 0x5e4   : > { %13324 = vst [vmem:[#allocation156_spill] sm:$0xff] %v10758_v62  ;;  %v10766_v3 = vmul.f32 %v3377_v48, %v2409_v51  ;;  %v3644_v45 = vpop.f32.mrf.mxu0  ;;  %v4223_v51 = vld [vmem:[#allocation11 + $0x10] sm:$0xff]  ;;  %v2411_v48 = vmax.f32 %v2155_v55, 0.0  ;;  %v2420_v57 = vmax.f32 %v2164_v16, 0.0  ;;  %v7575_v55 = vld [vmem:[#allocation10 + $0xb8] sm:$0xff] }
 0x5e5   : > { %13325 = vst [vmem:[#allocation73_spill] sm:$0xff] %v10760_v22  ;;  %v10772_v17 = vmul.f32 %v3644_v45, %v2412_v15  ;;  %4250 = vmatpush.msra.mxu1 %v4223_v51  ;;  %v2417_v15 = vmax.f32 %v2161_v7, 0.0  ;;  %v13338_v7 = vld [vmem:[#allocation185_spill] sm:$0xff]  ;;  %4912 = vmatpush.bf16.msrb.mxu0 %v7575_v55 }
 0x5e6   : > { %13327 = vst [vmem:[#allocation154_spill] sm:$0xff] %v10766_v3  ;;  %3416 = vmatmul.bf16.gmra.mxu1 %v9959_v10  ;;  %3505 = vmatmul.bf16.gmra.mxu2 %v9959_v10  ;;  %v2172_v16 = vadd.f32 %v10602_v27, %v13338_v7  ;;  %v13342_v3 = vld [vmem:[#allocation184_spill] sm:$0xff] }
 0x5e7   : > { %13329 = vst [vmem:[#allocation75_spill] sm:$0xff] %v10772_v17  ;;  %3594 = vmatmul.bf16.gmra.mxu3 %v9959_v10  ;;  %3683 = vmatmul.bf16.gmra.mxu0 %v9959_v10  ;;  %v13336_v10 = vld [vmem:[#allocation181_spill] sm:$0xff]  ;;  %v13346_v17 = vld [vmem:[#allocation188_spill] sm:$0xff] }
 0x5e8   : > { %v2163_v0 = vadd.f32 %v10624_v43, %v13336_v10 }
 0x5e9   : > { %v3466_v45 = vpop.f32.mrf.mxu2 }
 0x5ea   : > { %v10782_v58 = vmul.f32 %v3466_v45, %v2410_v54  ;;  %v3555_v18 = vpop.f32.mrf.mxu3  ;;  %v2419_v45 = vmax.f32 %v2163_v0, 0.0  ;;  %v2171_v54 = vadd.f32 %v10624_v43, %v13342_v3  ;;  %v2180_v3 = vadd.f32 %v10602_v27, %v13346_v17  ;;  %v7574_v17 = vld [vmem:[#allocation10 + $0xb0] sm:$0xff] }
 0x5eb   : > { %v10784_v56 = vmul.f32 %v3555_v18, %v2411_v48  ;;  %v3379_v21 = vpop.f32.mrf.mxu1  ;;  %v2418_v48 = vmax.f32 %v2162_v50, 0.0  ;;  %v2428_v18 = vmax.f32 %v2172_v16, 0.0  ;;  %4913 = vmatpush.bf16.msrb.mxu0 %v7574_v17  ;;  %v7564_v17 = vld [vmem:[#allocation10 + $0x60] sm:$0xff] }
 0x5ec   : > { %13332 = vst [vmem:[#allocation158_spill] sm:$0xff] %v10782_v58  ;;  %v10788_v12 = vmul.f32 %v3379_v21, %v2417_v15  ;;  %v3646_v22 = vpop.f32.mrf.mxu0  ;;  %v7558_v58 = vld [vmem:[#allocation10 + $0x30] sm:$0xff] }
 0x5ed   : > { %13333 = vst [vmem:[#allocation76_spill] sm:$0xff] %v10784_v56  ;;  %v10792_v51 = vmul.f32 %v3646_v22, %v2420_v57  ;;  %v13341_v57 = vld [vmem:[#allocation183_spill] sm:$0xff] }
 0x5ee   : > { %13335 = vst [vmem:[#allocation157_spill] sm:$0xff] %v10788_v12  ;;  %v2170_v10 = vadd.f32 %v10622_v41, %v13341_v57  ;;  %v7567_v57 = vld [vmem:[#allocation10 + $0x78] sm:$0xff]  ;;  %v2436_v12 = vmax.f32 %v2180_v3, 0.0  ;;  %v7557_v3 = vld [vmem:[#allocation10 + $0x28] sm:$0xff] }
 0x5ef   : > { %13337 = vst [vmem:[#allocation38_spill] sm:$0xff] %v10792_v51  ;;  %4823 = vmatpush.bf16.msrb.mxu3 %v7567_v57 }
 0x5f1   : > { %v3468_v32 = vpop.f32.mrf.mxu2 }
 0x5f2   : > { %v10800_v21 = vmul.f32 %v3468_v32, %v2418_v48  ;;  %v3557_v15 = vpop.f32.mrf.mxu3  ;;  %v13344_v48 = vld [vmem:[#allocation62_spill] sm:$0xff] }
 0x5f3   : > { %v10802_v2 = vmul.f32 %v3557_v15, %v2419_v45  ;;  %v3382_v22 = vpop.f32.mrf.mxu1  ;;  %v2169_v16 = vadd.f32 %v10598_v28, %v13344_v48  ;;  %v13345_v45 = vld [vmem:[#allocation65_spill] sm:$0xff]  ;;  %v7559_v15 = vld [vmem:[#allocation10 + $0x38] sm:$0xff]  ;;  %v2427_v48 = vmax.f32 %v2171_v54, 0.0 }
 0x5f4   : > { %13339 = vst [vmem:[#allocation161_spill] sm:$0xff] %v10800_v21  ;;  %v3649_v7 = vpop.f32.mrf.mxu0  ;;  %v2177_v32 = vadd.f32 %v10598_v28, %v13345_v45  ;;  %4734 = vmatpush.bf16.msrb.mxu2 %v7559_v15  ;;  %v7566_v21 = vld [vmem:[#allocation10 + $0x70] sm:$0xff] }
 0x5f5   : > { %13340 = vst [vmem:[#allocation159_spill] sm:$0xff] %v10802_v2  ;;  %v10812_v0 = vmul.f32 %v3649_v7, %v2428_v18  ;;  %v4222_v18 = vld [vmem:[#allocation11 + $0x8] sm:$0xff]  ;;  %v2426_v7 = vmax.f32 %v2170_v10, 0.0  ;;  %v2425_v50 = vmax.f32 %v2169_v16, 0.0  ;;  %v2178_v10 = vadd.f32 %v10622_v41, %v13349_v61  ;;  %v13351_v16 = vld [vmem:[#allocation187_spill] sm:$0xff]  ;;  %4824 = vmatpush.bf16.msrb.mxu3 %v7566_v21 }
 0x5f6   : > { %3421 = vmatmul.bf16.gmra.mxu1 %v10016_v34  ;;  %3510 = vmatmul.bf16.gmra.mxu2 %v10016_v34  ;;  %v2433_v51 = vmax.f32 %v2177_v32, 0.0  ;;  %v2179_v32 = vadd.f32 %v10624_v43, %v13351_v16  ;;  %v13353_v61 = vld [vmem:[#allocation191_spill] sm:$0xff] }
 0x5f7   : > { %13343 = vst [vmem:[#allocation160_spill] sm:$0xff] %v10812_v0  ;;  %3599 = vmatmul.bf16.gmra.mxu3 %v10016_v34  ;;  %3688 = vmatmul.bf16.gmra.mxu0 %v10016_v34  ;;  %v10830_v15 = vmul.f32 %v3382_v22, %v2425_v50  ;;  %v2188_v22 = vadd.f32 %v10602_v27, %v13353_v61  ;;  %v13356_v61 = vld [vmem:[#allocation189_spill] sm:$0xff] }
 0x5f8   : > { %4251 = vmatpush.msra.mxu1 %v4222_v18  ;;  %4735 = vmatpush.bf16.msrb.mxu2 %v7558_v58  ;;  %v7565_v18 = vld [vmem:[#allocation10 + $0x68] sm:$0xff]  ;;  %v2434_v58 = vmax.f32 %v2178_v10, 0.0  ;;  %v2435_v50 = vmax.f32 %v2179_v32, 0.0 }
 0x5f9   : > { %v3471_v45 = vpop.f32.mrf.mxu2  ;;  %13350 = vst [vmem:[#allocation162_spill] sm:$0xff] %v10830_v15  ;;  %4825 = vmatpush.bf16.msrb.mxu3 %v7565_v18  ;;  %v2186_v15 = vadd.f32 %v10622_v41, %v13356_v61  ;;  %v7563_v61 = vld [vmem:[#allocation10 + $0x58] sm:$0xff] }
 0x5fa   : > { %v10824_v56 = vmul.f32 %v3471_v45, %v2426_v7  ;;  %v3560_v2 = vpop.f32.mrf.mxu3  ;;  %v7573_v7 = vld [vmem:[#allocation10 + $0xa8] sm:$0xff]  ;;  %v7556_v45 = vld [vmem:[#allocation10 + $0x20] sm:$0xff] }
 0x5fb   : > { %v10826_v62 = vmul.f32 %v3560_v2, %v2427_v48  ;;  %v3384_v34 = vpop.f32.mrf.mxu1  ;;  %4914 = vmatpush.bf16.msrb.mxu0 %v7573_v7 }
 0x5fc   : > { %13347 = vst [vmem:[#allocation41_spill] sm:$0xff] %v10824_v56  ;;  %v10832_v54 = vmul.f32 %v3384_v34, %v2433_v51  ;;  %v3651_v55 = vpop.f32.mrf.mxu0  ;;  %4736 = vmatpush.bf16.msrb.mxu2 %v7557_v3  ;;  %v7572_v34 = vld [vmem:[#allocation10 + $0xa0] sm:$0xff]  ;;  %v13357_v3 = vld [vmem:[#allocation190_spill] sm:$0xff] }
 0x5fd   : > { %13348 = vst [vmem:[#allocation164_spill] sm:$0xff] %v10826_v62  ;;  %v10836_v57 = vmul.f32 %v3651_v55, %v2436_v12  ;;  %v2444_v55 = vmax.f32 %v2188_v22, 0.0  ;;  %v2187_v18 = vadd.f32 %v10624_v43, %v13357_v3  ;;  %4826 = vmatpush.bf16.msrb.mxu3 %v7564_v17  ;;  %v13359_v22 = vld [vmem:[#allocation68_spill] sm:$0xff]  ;;  %v7571_v3 = vld [vmem:[#allocation10 + $0x98] sm:$0xff]  ;;  %v13361_v51 = vld [vmem:[#allocation194_spill] sm:$0xff] }
 0x5fe   : > { %v2196_v7 = vadd.f32 %v10602_v27, %v13361_v51  ;;  %v4221_v17 = vld [vmem:[#allocation11] sm:$0xff]  ;;  %v7562_v62 = vld [vmem:[#allocation10 + $0x50] sm:$0xff] }
 0x5ff   : > { %13352 = vst [vmem:[#allocation163_spill] sm:$0xff] %v10836_v57  ;;  %4915 = vmatpush.bf16.msrb.mxu0 %v7572_v34  ;;  %v2442_v34 = vmax.f32 %v2186_v15, 0.0  ;;  %4252 = vmatpush.msra.mxu1 %v4221_v17  ;;  %v7554_v57 = vld [vmem:[#allocation10 + $0x10] sm:$0xff]  ;;  %v7561_v17 = vld [vmem:[#allocation10 + $0x48] sm:$0xff] }
 0x600   : > { %4737 = vmatpush.bf16.msrb.mxu2 %v7556_v45  ;;  %v7555_v45 = vld [vmem:[#allocation10 + $0x18] sm:$0xff]  ;;  %v7570_v51 = vld [vmem:[#allocation10 + $0x90] sm:$0xff] }
 0x601   : > { %v3473_v48 = vpop.f32.mrf.mxu2  ;;  %4827 = vmatpush.bf16.msrb.mxu3 %v7563_v61 }
 0x602   : > { %v10844_v12 = vmul.f32 %v3473_v48, %v2434_v58  ;;  %v3562_v21 = vpop.f32.mrf.mxu3  ;;  %v13360_v48 = vld [vmem:[#allocation71_spill] sm:$0xff] }
 0x603   : > { %v10846_v16 = vmul.f32 %v3562_v21, %v2435_v50  ;;  %v3387_v2 = vpop.f32.mrf.mxu1  ;;  %v2185_v50 = vadd.f32 %v10598_v28, %v13359_v22  ;;  %v2193_v21 = vadd.f32 %v10598_v28, %v13360_v48  ;;  %4916 = vmatpush.bf16.msrb.mxu0 %v7571_v3 }
 0x604   : > { %13354 = vst [vmem:[#allocation44_spill] sm:$0xff] %v10844_v12  ;;  %v3654_v32 = vpop.f32.mrf.mxu0  ;;  %4738 = vmatpush.bf16.msrb.mxu2 %v7555_v45  ;;  %v13363_v12 = vld [vmem:[#allocation192_spill] sm:$0xff] }
 0x605   : > { %13355 = vst [vmem:[#allocation167_spill] sm:$0xff] %v10846_v16  ;;  %v10856_v58 = vmul.f32 %v3654_v32, %v2444_v55  ;;  %v2443_v55 = vmax.f32 %v2187_v18, 0.0  ;;  %v2441_v22 = vmax.f32 %v2185_v50, 0.0  ;;  %v2449_v48 = vmax.f32 %v2193_v21, 0.0  ;;  %v13365_v50 = vld [vmem:[#allocation193_spill] sm:$0xff]  ;;  %4828 = vmatpush.bf16.msrb.mxu3 %v7562_v62 }
 0x606   : > { %3426 = vmatmul.bf16.gmra.mxu1 %v10058_v11  ;;  %3515 = vmatmul.bf16.gmra.mxu2 %v10058_v11  ;;  %v2452_v16 = vmax.f32 %v2196_v7, 0.0  ;;  %v2194_v15 = vadd.f32 %v10622_v41, %v13363_v12  ;;  %v2195_v21 = vadd.f32 %v10624_v43, %v13365_v50  ;;  %v7553_v7 = vld [vmem:[#allocation10 + $0x8] sm:$0xff] }
 0x607   : > { %13358 = vst [vmem:[#allocation165_spill] sm:$0xff] %v10856_v58  ;;  %3604 = vmatmul.bf16.gmra.mxu3 %v10058_v11  ;;  %3693 = vmatmul.bf16.gmra.mxu0 %v10058_v11  ;;  %v10874_v45 = vmul.f32 %v3387_v2, %v2441_v22  ;;  %v13367_v12 = vld [vmem:[#allocation197_spill] sm:$0xff] }
 0x608   : > { %4739 = vmatpush.bf16.msrb.mxu2 %v7554_v57  ;;  %4917 = vmatpush.bf16.msrb.mxu0 %v7570_v51  ;;  %v2204_v2 = vadd.f32 %v10602_v27, %v13367_v12  ;;  %v2450_v57 = vmax.f32 %v2194_v15, 0.0  ;;  %v7560_v51 = vld [vmem:[#allocation10 + $0x40] sm:$0xff]  ;;  %v13369_v12 = vld [vmem:[#allocation195_spill] sm:$0xff] }
 0x609   : > { %v3476_v32 = vpop.f32.mrf.mxu2  ;;  %13364 = vst [vmem:[#allocation47_spill] sm:$0xff] %v10874_v45  ;;  %4829 = vmatpush.bf16.msrb.mxu3 %v7561_v17  ;;  %v2202_v45 = vadd.f32 %v10622_v41, %v13369_v12 }
 0x60a   : > { %v10868_v10 = vmul.f32 %v3476_v32, %v2442_v34  ;;  %v3565_v0 = vpop.f32.mrf.mxu3  ;;  %v7569_v34 = vld [vmem:[#allocation10 + $0x88] sm:$0xff]  ;;  %v2451_v32 = vmax.f32 %v2195_v21, 0.0 }
 0x60b   : > { %v10870_v56 = vmul.f32 %v3565_v0, %v2443_v55  ;;  %v3389_v11 = vpop.f32.mrf.mxu1 }
 0x60c   : > { %v10876_v18 = vmul.f32 %v3389_v11, %v2449_v48  ;;  %v3656_v61 = vpop.f32.mrf.mxu0  ;;  %4740 = vmatpush.bf16.msrb.mxu2 %v7553_v7  ;;  %4918 = vmatpush.bf16.msrb.mxu0 %v7569_v34  ;;  %v7552_v48 = vld [vmem:[#allocation10] sm:$0xff] }
 0x60d   : > { %13362 = vst [vmem:[#allocation166_spill] sm:$0xff] %v10870_v56  ;;  %v10880_v3 = vmul.f32 %v3656_v61, %v2452_v16  ;;  %v7568_v11 = vld [vmem:[#allocation10 + $0x80] sm:$0xff]  ;;  %v2460_v61 = vmax.f32 %v2204_v2, 0.0  ;;  %4830 = vmatpush.bf16.msrb.mxu3 %v7560_v51  ;;  %v13372_v2 = vld [vmem:[#allocation74_spill] sm:$0xff]  ;;  %v2458_v51 = vmax.f32 %v2202_v45, 0.0 }
 0x60e   : > { %v13370_v7 = vld [vmem:[#allocation196_spill] sm:$0xff] }
 0x60f   : > { %13366 = vst [vmem:[#allocation170_spill] sm:$0xff] %v10880_v3  ;;  %v2203_v17 = vadd.f32 %v10624_v43, %v13370_v7  ;;  %v13377_v3 = vld [vmem:[#allocation198_spill] sm:$0xff] }
 0x610   : > { %4741 = vmatpush.bf16.msrb.mxu2 %v7552_v48  ;;  %4919 = vmatpush.bf16.msrb.mxu0 %v7568_v11  ;;  %v13374_v48 = vld [vmem:[#allocation200_spill] sm:$0xff] }
 0x611   : > { %v3478_v22 = vpop.f32.mrf.mxu2  ;;  %v2212_v12 = vadd.f32 %v10602_v27, %v13374_v48  ;;  %v2459_v11 = vmax.f32 %v2203_v17, 0.0  ;;  %v2210_v48 = vadd.f32 %v10622_v41, %v13377_v3  ;;  %v13380_v17 = vld [vmem:[#allocation199_spill] sm:$0xff] }
 0x612   : > { %v10888_v62 = vmul.f32 %v3478_v22, %v2450_v57  ;;  %v3567_v16 = vpop.f32.mrf.mxu3  ;;  %v13373_v22 = vld [vmem:[#allocation77_spill] sm:$0xff] }
 0x613   : > { %v10890_v50 = vmul.f32 %v3567_v16, %v2451_v32  ;;  %v3392_v0 = vpop.f32.mrf.mxu1  ;;  %v2201_v32 = vadd.f32 %v10598_v28, %v13372_v2  ;;  %v2209_v16 = vadd.f32 %v10598_v28, %v13373_v22  ;;  %v2468_v34 = vmax.f32 %v2212_v12, 0.0  ;;  %v13382_v12 = vld [vmem:[#allocation203_spill] sm:$0xff] }
 0x614   : > { %v3659_v21 = vpop.f32.mrf.mxu0  ;;  %v2466_v3 = vmax.f32 %v2210_v48, 0.0 }
 0x615   : > { %13368 = vst [vmem:[#allocation168_spill] sm:$0xff] %v10890_v50  ;;  %v10900_v57 = vmul.f32 %v3659_v21, %v2460_v61  ;;  %v7583_v61 = vld [vmem:[#allocation10 + $0xf8] sm:$0xff]  ;;  %v2457_v7 = vmax.f32 %v2201_v32, 0.0  ;;  %v2465_v2 = vmax.f32 %v2209_v16, 0.0 }
 0x616   : > { %3431 = vmatmul.bf16.gmra.mxu1 %v10312_v35  ;;  %3520 = vmatmul.bf16.gmra.mxu2 %v10312_v35 }
 0x617   : > { %13371 = vst [vmem:[#allocation169_spill] sm:$0xff] %v10900_v57  ;;  %3609 = vmatmul.bf16.gmra.mxu3 %v10312_v35  ;;  %3698 = vmatmul.bf16.gmra.mxu0 %v10312_v35  ;;  %v10918_v56 = vmul.f32 %v3392_v0, %v2457_v7 }
 0x618   : > { %5001 = vmatpush.bf16.msrb.mxu1 %v7583_v61  ;;  %v2211_v61 = vadd.f32 %v10624_v43, %v13380_v17 }
 0x619   : > { %v3481_v21 = vpop.f32.mrf.mxu2  ;;  %13378 = vst [vmem:[#allocation171_spill] sm:$0xff] %v10918_v56  ;;  %v13386_v56 = vld [vmem:[#allocation202_spill] sm:$0xff] }
 0x61a   : > { %v10912_v55 = vmul.f32 %v3481_v21, %v2458_v51  ;;  %v3570_v22 = vpop.f32.mrf.mxu3  ;;  %v2220_v51 = vadd.f32 %v10602_v27, %v13382_v12  ;;  %v2467_v0 = vmax.f32 %v2211_v61, 0.0 }
 0x61b   : > { %v10914_v15 = vmul.f32 %v3570_v22, %v2459_v11  ;;  %v3394_v58 = vpop.f32.mrf.mxu1  ;;  %v2219_v11 = vadd.f32 %v10624_v43, %v13386_v56 }
 0x61c   : > { %13375 = vst [vmem:[#allocation50_spill] sm:$0xff] %v10912_v55  ;;  %v10920_v35 = vmul.f32 %v3394_v58, %v2465_v2  ;;  %v3661_v45 = vpop.f32.mrf.mxu0  ;;  %v2476_v2 = vmax.f32 %v2220_v51, 0.0 }
 0x61d   : > { %13376 = vst [vmem:[#allocation173_spill] sm:$0xff] %v10914_v15  ;;  %v10924_v32 = vmul.f32 %v3661_v45, %v2468_v34  ;;  %v13385_v45 = vld [vmem:[#allocation201_spill] sm:$0xff] }
 0x61e   : > { %13379 = vst [vmem:[#allocation172_spill] sm:$0xff] %v10920_v35  ;;  %v2218_v17 = vadd.f32 %v10622_v41, %v13385_v45 }
 0x61f   : > { %13381 = vst [vmem:[#allocation53_spill] sm:$0xff] %v10924_v32 }
 0x620   : > { %v2474_v56 = vmax.f32 %v2218_v17, 0.0  ;;  %v13396_v17 = vld [vmem:[#allocation205_spill] sm:$0xff] }
 0x621   : > { %v3483_v21 = vpop.f32.mrf.mxu2 }
 0x622   : > { %v10932_v58 = vmul.f32 %v3483_v21, %v2466_v3  ;;  %v3572_v7 = vpop.f32.mrf.mxu3  ;;  %v13388_v3 = vld [vmem:[#allocation78_spill] sm:$0xff] }
 0x623   : > { %v10934_v22 = vmul.f32 %v3572_v7, %v2467_v0  ;;  %v3397_v34 = vpop.f32.mrf.mxu1  ;;  %v2217_v51 = vadd.f32 %v10598_v28, %v13388_v3  ;;  %v13389_v0 = vld [vmem:[#allocation79_spill] sm:$0xff]  ;;  %v13390_v7 = vld [vmem:[#allocation206_spill] sm:$0xff] }
 0x624   : > { %13383 = vst [vmem:[#allocation176_spill] sm:$0xff] %v10932_v58  ;;  %v3664_v12 = vpop.f32.mrf.mxu0  ;;  %v2225_v21 = vadd.f32 %v10598_v28, %v13389_v0  ;;  %v2228_v45 = vadd.f32 %v10602_v27, %v13390_v7 }
 0x625   : > { %13384 = vst [vmem:[#allocation174_spill] sm:$0xff] %v10934_v22  ;;  %v10944_v61 = vmul.f32 %v3664_v12, %v2476_v2  ;;  %v2475_v2 = vmax.f32 %v2219_v11, 0.0  ;;  %v2473_v48 = vmax.f32 %v2217_v51, 0.0  ;;  %v13393_v22 = vld [vmem:[#allocation204_spill] sm:$0xff]  ;;  %v2227_v11 = vadd.f32 %v10624_v43, %v13396_v17 }
 0x626   : > { %3436 = vmatmul.bf16.gmra.mxu1 %v10387_v38  ;;  %3525 = vmatmul.bf16.gmra.mxu2 %v10387_v38  ;;  %v2481_v16 = vmax.f32 %v2225_v21, 0.0  ;;  %v2484_v0 = vmax.f32 %v2228_v45, 0.0  ;;  %v2226_v55 = vadd.f32 %v10622_v41, %v13393_v22  ;;  %v13398_v45 = vld [vmem:[#allocation209_spill] sm:$0xff] }
 0x627   : > { %13387 = vst [vmem:[#allocation175_spill] sm:$0xff] %v10944_v61  ;;  %3614 = vmatmul.bf16.gmra.mxu3 %v10387_v38  ;;  %3703 = vmatmul.bf16.gmra.mxu0 %v10387_v38  ;;  %v10962_v7 = vmul.f32 %v3397_v34, %v2473_v48  ;;  %v2483_v34 = vmax.f32 %v2227_v11, 0.0  ;;  %v13408_v61 = vld [vmem:[#allocation269_spill] sm:$0xff] }
 0x628   : > { %v2482_v22 = vmax.f32 %v2226_v55, 0.0 }
 0x629   : > { %v3486_v12 = vpop.f32.mrf.mxu2  ;;  %13394 = vst [vmem:[#allocation177_spill] sm:$0xff] %v10962_v7  ;;  %v13402_v7 = vld [vmem:[#allocation208_spill] sm:$0xff] }
 0x62a   : > { %v10956_v3 = vmul.f32 %v3486_v12, %v2474_v56  ;;  %v3575_v57 = vpop.f32.mrf.mxu3  ;;  %v2235_v56 = vadd.f32 %v10624_v43, %v13402_v7 }
 0x62b   : > { %v10958_v32 = vmul.f32 %v3575_v57, %v2475_v2  ;;  %v3399_v15 = vpop.f32.mrf.mxu1  ;;  %v2236_v57 = vadd.f32 %v10602_v27, %v13398_v45 }
 0x62c   : > { %13391 = vst [vmem:[#allocation56_spill] sm:$0xff] %v10956_v3  ;;  %v10964_v58 = vmul.f32 %v3399_v15, %v2481_v16  ;;  %v3666_v38 = vpop.f32.mrf.mxu0  ;;  %v13411_v3 = vld [vmem:[#allocation276_spill] sm:$0xff] }
 0x62d   : > { %13392 = vst [vmem:[#allocation179_spill] sm:$0xff] %v10958_v32  ;;  %v10968_v51 = vmul.f32 %v3666_v38, %v2484_v0  ;;  %v2492_v2 = vmax.f32 %v2236_v57, 0.0  ;;  %v13401_v38 = vld [vmem:[#allocation207_spill] sm:$0xff] }
 0x62e   : > { %13395 = vst [vmem:[#allocation178_spill] sm:$0xff] %v10964_v58  ;;  %v2234_v17 = vadd.f32 %v10622_v41, %v13401_v38  ;;  %v13407_v38 = vld [vmem:[#allocation274_spill] sm:$0xff] }
 0x62f   : > { %13397 = vst [vmem:[#allocation59_spill] sm:$0xff] %v10968_v51  ;;  %v13409_v21 = vpack.c.bf16 %v13407_v38, %v13408_v61  ;;  %v13410_v51 = vld [vmem:[#allocation212_spill] sm:$0xff] }
 0x630   : > { %v2244_v7 = vadd.f32 %v10602_v27, %v13410_v51 }
 0x631   : > { %v3488_v48 = vpop.f32.mrf.mxu2 }
 0x632   : > { %v10976_v15 = vmul.f32 %v3488_v48, %v2482_v22  ;;  %v3577_v16 = vpop.f32.mrf.mxu3  ;;  %v13404_v22 = vld [vmem:[#allocation80_spill] sm:$0xff]  ;;  %v2500_v38 = vmax.f32 %v2244_v7, 0.0 }
 0x633   : > { %v10978_v12 = vmul.f32 %v3577_v16, %v2483_v34  ;;  %v3402_v0 = vpop.f32.mrf.mxu1  ;;  %v2233_v57 = vadd.f32 %v10598_v28, %v13404_v22  ;;  %v13405_v34 = vld [vmem:[#allocation81_spill] sm:$0xff]  ;;  %v7582_v22 = vld [vmem:[#allocation10 + $0xf0] sm:$0xff] }
 0x634   : > { %13399 = vst [vmem:[#allocation182_spill] sm:$0xff] %v10976_v15  ;;  %v3669_v45 = vpop.f32.mrf.mxu0  ;;  %v2241_v48 = vadd.f32 %v10598_v28, %v13405_v34  ;;  %v13406_v16 = vld [vmem:[#allocation217_spill] sm:$0xff]  ;;  %v13412_v15 = vld [vmem:[#allocation272_spill] sm:$0xff]  ;;  %v2491_v34 = vmax.f32 %v2235_v56, 0.0  ;;  %5002 = vmatpush.bf16.msrb.mxu1 %v7582_v22  ;;  %v13422_v56 = vld [vmem:[#allocation211_spill] sm:$0xff] }
 0x635   : > { %13400 = vst [vmem:[#allocation180_spill] sm:$0xff] %v10978_v12  ;;  %v10988_v11 = vmul.f32 %v3669_v45, %v2492_v2  ;;  %v13413_v55 = vpack.c.bf16 %v13411_v3, %v13412_v15  ;;  %v13414_v2 = vld [vmem:[#allocation279_spill] sm:$0xff]  ;;  %v13415_v45 = vld [vmem:[#allocation273_spill] sm:$0xff]  ;;  %v2490_v12 = vmax.f32 %v2234_v17, 0.0  ;;  %v13419_v3 = vld [vmem:[#allocation210_spill] sm:$0xff] }
 0x636   : > { %4253 = vmatmul.f32.vlgmr.msra.gmra.mxu1 %v13406_v16  ;;  %4742 = vmatmul.bf16.vlgmr.msrb.gmra.mxu2 %v13409_v21  ;;  %v13416_v32 = vpack.c.bf16 %v13414_v2, %v13415_v45  ;;  %v2489_v16 = vmax.f32 %v2233_v57, 0.0  ;;  %v2497_v35 = vmax.f32 %v2241_v48, 0.0  ;;  %v2242_v15 = vadd.f32 %v10622_v41, %v13419_v3  ;;  %v13425_v48 = vld [vmem:[#allocation215_spill] sm:$0xff]  ;;  %v13428_v3 = vld [vmem:[#allocation213_spill] sm:$0xff] }
 0x637   : > { %13403 = vst [vmem:[#allocation181_spill] sm:$0xff] %v10988_v11  ;;  %4831 = vmatmul.bf16.vlgmr.msrb.gmra.mxu3 %v13413_v55  ;;  %v2243_v2 = vadd.f32 %v10624_v43, %v13422_v56  ;;  %v2252_v7 = vadd.f32 %v10602_v27, %v13425_v48  ;;  %v13429_v48 = vld [vmem:[#allocation214_spill] sm:$0xff]  ;;  %v13437_v11 = vld [vmem:[#allocation221_spill] sm:$0xff] }
 0x638   : > { %4920 = vmatmul.bf16.vlgmr.msrb.gmra.mxu0 %v13416_v32  ;;  %v11012_v55 = vmul.f32 %v3402_v0, %v2489_v16  ;;  %v2498_v45 = vmax.f32 %v2242_v15, 0.0  ;;  %v2251_v0 = vadd.f32 %v10624_v43, %v13429_v48  ;;  %v2260_v48 = vadd.f32 %v10602_v27, %v13437_v11 }
 0x639   : > { %v3491_v58 = vpop.f32.mrf.mxu2  ;;  %v2508_v16 = vmax.f32 %v2252_v7, 0.0 }
 0x63a   : > { %v11006_v61 = vmul.f32 %v3491_v58, %v2490_v12  ;;  %v3580_v21 = vpop.f32.mrf.mxu3  ;;  %13420 = vst [vmem:[#allocation184_spill] sm:$0xff] %v11012_v55  ;;  %v13424_v12 = vld [vmem:[#allocation218_spill] sm:$0xff]  ;;  %v13435_v58 = vld [vmem:[#allocation280_spill] sm:$0xff] }
 0x63b   : > { %v11008_v51 = vmul.f32 %v3580_v21, %v2491_v34  ;;  %v3404_v50 = vpop.f32.mrf.mxu1 }
 0x63c   : > { %13417 = vst [vmem:[#allocation185_spill] sm:$0xff] %v11006_v61  ;;  %v11014_v32 = vmul.f32 %v3404_v50, %v2497_v35  ;;  %v3671_v17 = vpop.f32.mrf.mxu0  ;;  %v2499_v50 = vmax.f32 %v2243_v2, 0.0  ;;  %v13439_v61 = vld [vmem:[#allocation282_spill] sm:$0xff] }
 0x63d   : > { %13418 = vst [vmem:[#allocation183_spill] sm:$0xff] %v11008_v51  ;;  %v11018_v57 = vmul.f32 %v3671_v17, %v2500_v38  ;;  %v2250_v17 = vadd.f32 %v10622_v41, %v13428_v3  ;;  %v13434_v3 = vld [vmem:[#allocation284_spill] sm:$0xff] }
 0x63e   : > { %13421 = vst [vmem:[#allocation62_spill] sm:$0xff] %v11014_v32  ;;  %4256 = vmatmul.f32.gmra.mxu1 %v13424_v12  ;;  %v13436_v56 = vpack.c.bf16 %v13434_v3, %v13435_v58  ;;  %v13446_v32 = vld [vmem:[#allocation216_spill] sm:$0xff] }
 0x63f   : > { %13423 = vst [vmem:[#allocation65_spill] sm:$0xff] %v11018_v57  ;;  %v13438_v57 = vld [vmem:[#allocation286_spill] sm:$0xff] }
 0x640   : > { %v13440_v15 = vpack.c.bf16 %v13438_v57, %v13439_v61  ;;  %v2258_v61 = vadd.f32 %v10622_v41, %v13446_v32 }
 0x641   : > { %v3493_v35 = vpop.f32.mrf.mxu2 }
 0x642   : > { %v11027_v22 = vmul.f32 %v3493_v35, %v2498_v45  ;;  %v3582_v34 = vpop.f32.mrf.mxu3  ;;  %v13431_v45 = vld [vmem:[#allocation82_spill] sm:$0xff] }
 0x643   : > { %v11029_v21 = vmul.f32 %v3582_v34, %v2499_v50  ;;  %v3407_v38 = vpop.f32.mrf.mxu1  ;;  %v2249_v7 = vadd.f32 %v10598_v28, %v13431_v45  ;;  %v13432_v50 = vld [vmem:[#allocation84_spill] sm:$0xff]  ;;  %v13433_v34 = vld [vmem:[#allocation225_spill] sm:$0xff]  ;;  %v2506_v45 = vmax.f32 %v2250_v17, 0.0 }
 0x644   : > { %13426 = vst [vmem:[#allocation188_spill] sm:$0xff] %v11027_v22  ;;  %v3674_v12 = vpop.f32.mrf.mxu0  ;;  %v2257_v35 = vadd.f32 %v10598_v28, %v13432_v50  ;;  %v13449_v17 = vld [vmem:[#allocation220_spill] sm:$0xff] }
 0x645   : > { %13427 = vst [vmem:[#allocation186_spill] sm:$0xff] %v11029_v21  ;;  %v11039_v2 = vmul.f32 %v3674_v12, %v2508_v16  ;;  %v13441_v16 = vld [vmem:[#allocation289_spill] sm:$0xff]  ;;  %v13442_v12 = vld [vmem:[#allocation283_spill] sm:$0xff]  ;;  %v2507_v21 = vmax.f32 %v2251_v0, 0.0  ;;  %v2505_v22 = vmax.f32 %v2249_v7, 0.0  ;;  %v2259_v0 = vadd.f32 %v10624_v43, %v13449_v17 }
 0x646   : > { %4259 = vmatmul.f32.gmra.mxu1 %v13433_v34  ;;  %4747 = vmatmul.bf16.gmra.mxu2 %v13436_v56  ;;  %v13443_v51 = vpack.c.bf16 %v13441_v16, %v13442_v12  ;;  %v2513_v34 = vmax.f32 %v2257_v35, 0.0  ;;  %v2516_v56 = vmax.f32 %v2260_v48, 0.0  ;;  %v13451_v48 = vld [vmem:[#allocation226_spill] sm:$0xff] }
 0x647   : > { %13430 = vst [vmem:[#allocation187_spill] sm:$0xff] %v11039_v2  ;;  %4836 = vmatmul.bf16.gmra.mxu3 %v13440_v15  ;;  %v11063_v57 = vmul.f32 %v3407_v38, %v2505_v22  ;;  %v2514_v22 = vmax.f32 %v2258_v61, 0.0  ;;  %v2515_v38 = vmax.f32 %v2259_v0, 0.0  ;;  %v13462_v35 = vld [vmem:[#allocation290_spill] sm:$0xff] }
 0x648   : > { %4925 = vmatmul.bf16.gmra.mxu0 %v13443_v51  ;;  %v13464_v2 = vld [vmem:[#allocation230_spill] sm:$0xff] }
 0x649   : > { %v3496_v50 = vpop.f32.mrf.mxu2  ;;  %13447 = vst [vmem:[#allocation190_spill] sm:$0xff] %v11063_v57 }
 0x64a   : > { %v11057_v55 = vmul.f32 %v3496_v50, %v2506_v45  ;;  %v3585_v58 = vpop.f32.mrf.mxu3 }
 0x64b   : > { %v11059_v3 = vmul.f32 %v3585_v58, %v2507_v21  ;;  %v3409_v11 = vpop.f32.mrf.mxu1  ;;  %v13452_v21 = vld [vmem:[#allocation224_spill] sm:$0xff] }
 0x64c   : > { %13444 = vst [vmem:[#allocation191_spill] sm:$0xff] %v11057_v55  ;;  %v11065_v15 = vmul.f32 %v3409_v11, %v2513_v34  ;;  %v3676_v51 = vpop.f32.mrf.mxu0  ;;  %v2268_v16 = vadd.f32 %v10602_v27, %v13452_v21  ;;  %v13455_v11 = vld [vmem:[#allocation222_spill] sm:$0xff]  ;;  %v13456_v21 = vld [vmem:[#allocation223_spill] sm:$0xff]  ;;  %v13466_v55 = vld [vmem:[#allocation292_spill] sm:$0xff] }
 0x64d   : > { %13445 = vst [vmem:[#allocation189_spill] sm:$0xff] %v11059_v3  ;;  %v11069_v7 = vmul.f32 %v3676_v51, %v2516_v56  ;;  %v2266_v51 = vadd.f32 %v10622_v41, %v13455_v11  ;;  %v2267_v32 = vadd.f32 %v10624_v43, %v13456_v21  ;;  %v13461_v11 = vld [vmem:[#allocation83_spill] sm:$0xff]  ;;  %v2276_v21 = vadd.f32 %v10602_v27, %v13464_v2 }
 0x64e   : > { %13448 = vst [vmem:[#allocation68_spill] sm:$0xff] %v11065_v15  ;;  %4262 = vmatmul.f32.gmra.mxu1 %v13451_v48  ;;  %v2524_v34 = vmax.f32 %v2268_v16, 0.0  ;;  %v13463_v17 = vpack.c.bf16 %v13461_v11, %v13462_v35 }
 0x64f   : > { %13450 = vst [vmem:[#allocation71_spill] sm:$0xff] %v11069_v7  ;;  %v13465_v7 = vld [vmem:[#allocation22_spill] sm:$0xff]  ;;  %v2532_v11 = vmax.f32 %v2276_v21, 0.0 }
 0x650   : > { %v13467_v61 = vpack.c.bf16 %v13465_v7, %v13466_v55  ;;  %v13473_v55 = vld [vmem:[#allocation228_spill] sm:$0xff] }
 0x651   : > { %v3498_v12 = vpop.f32.mrf.mxu2  ;;  %v2274_v7 = vadd.f32 %v10622_v41, %v13473_v55  ;;  %v13482_v55 = vld [vmem:[#allocation231_spill] sm:$0xff] }
 0x652   : > { %v11078_v45 = vmul.f32 %v3498_v12, %v2514_v22  ;;  %v3587_v50 = vpop.f32.mrf.mxu3  ;;  %v13458_v22 = vld [vmem:[#allocation87_spill] sm:$0xff] }
 0x653   : > { %v11080_v58 = vmul.f32 %v3587_v50, %v2515_v38  ;;  %v3412_v56 = vpop.f32.mrf.mxu1  ;;  %v2265_v16 = vadd.f32 %v10598_v28, %v13458_v22  ;;  %v13459_v38 = vld [vmem:[#allocation90_spill] sm:$0xff]  ;;  %v13460_v50 = vld [vmem:[#allocation232_spill] sm:$0xff]  ;;  %v7581_v22 = vld [vmem:[#allocation10 + $0xe8] sm:$0xff] }
 0x654   : > { %13453 = vst [vmem:[#allocation194_spill] sm:$0xff] %v11078_v45  ;;  %v3679_v48 = vpop.f32.mrf.mxu0  ;;  %v2273_v12 = vadd.f32 %v10598_v28, %v13459_v38  ;;  %v2523_v38 = vmax.f32 %v2267_v32, 0.0  ;;  %5003 = vmatpush.bf16.msrb.mxu1 %v7581_v22  ;;  %v13476_v32 = vld [vmem:[#allocation229_spill] sm:$0xff] }
 0x655   : > { %13454 = vst [vmem:[#allocation192_spill] sm:$0xff] %v11080_v58  ;;  %v11090_v0 = vmul.f32 %v3679_v48, %v2524_v34  ;;  %v13468_v34 = vld [vmem:[#allocation296_spill] sm:$0xff]  ;;  %v13469_v48 = vld [vmem:[#allocation293_spill] sm:$0xff]  ;;  %v2522_v58 = vmax.f32 %v2266_v51, 0.0 }
 0x656   : > { %4265 = vmatmul.f32.gmra.mxu1 %v13460_v50  ;;  %4752 = vmatmul.bf16.gmra.mxu2 %v13463_v17  ;;  %v13470_v3 = vpack.c.bf16 %v13468_v34, %v13469_v48  ;;  %v2521_v50 = vmax.f32 %v2265_v16, 0.0  ;;  %v2529_v57 = vmax.f32 %v2273_v12, 0.0  ;;  %v2275_v34 = vadd.f32 %v10624_v43, %v13476_v32  ;;  %v13479_v12 = vld [vmem:[#allocation236_spill] sm:$0xff] }
 0x657   : > { %13457 = vst [vmem:[#allocation193_spill] sm:$0xff] %v11090_v0  ;;  %4841 = vmatmul.bf16.gmra.mxu3 %v13467_v61  ;;  %v2284_v21 = vadd.f32 %v10602_v27, %v13479_v12  ;;  %v2530_v48 = vmax.f32 %v2274_v7, 0.0  ;;  %v13483_v12 = vld [vmem:[#allocation235_spill] sm:$0xff] }
 0x658   : > { %4930 = vmatmul.bf16.gmra.mxu0 %v13470_v3  ;;  %v11114_v61 = vmul.f32 %v3412_v56, %v2521_v50  ;;  %v2283_v56 = vadd.f32 %v10624_v43, %v13483_v12  ;;  %v13491_v0 = vld [vmem:[#allocation239_spill] sm:$0xff] }
 0x659   : > { %v3501_v45 = vpop.f32.mrf.mxu2  ;;  %v2540_v50 = vmax.f32 %v2284_v21, 0.0  ;;  %v2292_v12 = vadd.f32 %v10602_v27, %v13491_v0 }
 0x65a   : > { %v11108_v35 = vmul.f32 %v3501_v45, %v2522_v58  ;;  %v3590_v17 = vpop.f32.mrf.mxu3  ;;  %13474 = vst [vmem:[#allocation196_spill] sm:$0xff] %v11114_v61  ;;  %v13478_v58 = vld [vmem:[#allocation233_spill] sm:$0xff]  ;;  %v13489_v45 = vld [vmem:[#allocation127_spill] sm:$0xff] }
 0x65b   : > { %v11110_v2 = vmul.f32 %v3590_v17, %v2523_v38  ;;  %v3414_v15 = vpop.f32.mrf.mxu1 }
 0x65c   : > { %13471 = vst [vmem:[#allocation197_spill] sm:$0xff] %v11108_v35  ;;  %v11116_v3 = vmul.f32 %v3414_v15, %v2529_v57  ;;  %v3681_v51 = vpop.f32.mrf.mxu0  ;;  %v2531_v57 = vmax.f32 %v2275_v34, 0.0  ;;  %v13493_v35 = vld [vmem:[#allocation23_spill] sm:$0xff] }
 0x65d   : > { %13472 = vst [vmem:[#allocation195_spill] sm:$0xff] %v11110_v2  ;;  %v11120_v16 = vmul.f32 %v3681_v51, %v2532_v11  ;;  %v2282_v51 = vadd.f32 %v10622_v41, %v13482_v55  ;;  %v13488_v55 = vld [vmem:[#allocation130_spill] sm:$0xff] }
 0x65e   : > { %13475 = vst [vmem:[#allocation74_spill] sm:$0xff] %v11116_v3  ;;  %4268 = vmatmul.f32.gmra.mxu1 %v13478_v58  ;;  %v13490_v32 = vpack.c.bf16 %v13488_v55, %v13489_v45  ;;  %v13500_v3 = vld [vmem:[#allocation237_spill] sm:$0xff] }
 0x65f   : > { %13477 = vst [vmem:[#allocation77_spill] sm:$0xff] %v11120_v16  ;;  %v13492_v16 = vld [vmem:[#allocation299_spill] sm:$0xff] }
 0x660   : > { %v13494_v7 = vpack.c.bf16 %v13492_v16, %v13493_v35  ;;  %v2290_v35 = vadd.f32 %v10622_v41, %v13500_v3 }
 0x661   : > { %v3503_v15 = vpop.f32.mrf.mxu2 }
 0x662   : > { %v11129_v22 = vmul.f32 %v3503_v15, %v2530_v48  ;;  %v3592_v38 = vpop.f32.mrf.mxu3  ;;  %v13485_v48 = vld [vmem:[#allocation93_spill] sm:$0xff] }
 0x663   : > { %v11131_v17 = vmul.f32 %v3592_v38, %v2531_v57  ;;  %v3417_v11 = vpop.f32.mrf.mxu1  ;;  %v2281_v21 = vadd.f32 %v10598_v28, %v13485_v48  ;;  %v13486_v57 = vld [vmem:[#allocation96_spill] sm:$0xff]  ;;  %v2538_v48 = vmax.f32 %v2282_v51, 0.0  ;;  %v13503_v51 = vld [vmem:[#allocation238_spill] sm:$0xff] }
 0x664   : > { %13480 = vst [vmem:[#allocation200_spill] sm:$0xff] %v11129_v22  ;;  %v3684_v58 = vpop.f32.mrf.mxu0  ;;  %v2289_v15 = vadd.f32 %v10598_v28, %v13486_v57  ;;  %v13487_v38 = vld [vmem:[#allocation240_spill] sm:$0xff] }
 0x665   : > { %13481 = vst [vmem:[#allocation198_spill] sm:$0xff] %v11131_v17  ;;  %v11141_v34 = vmul.f32 %v3684_v58, %v2540_v50  ;;  %v13495_v50 = vld [vmem:[#allocation300_spill] sm:$0xff]  ;;  %v13496_v58 = vld [vmem:[#allocation89_spill] sm:$0xff]  ;;  %v2539_v17 = vmax.f32 %v2283_v56, 0.0  ;;  %v2537_v22 = vmax.f32 %v2281_v21, 0.0  ;;  %v2291_v56 = vadd.f32 %v10624_v43, %v13503_v51 }
 0x666   : > { %4271 = vmatmul.f32.gmra.mxu1 %v13487_v38  ;;  %4757 = vmatmul.bf16.gmra.mxu2 %v13490_v32  ;;  %v13497_v2 = vpack.c.bf16 %v13495_v50, %v13496_v58  ;;  %v2545_v38 = vmax.f32 %v2289_v15, 0.0  ;;  %v2548_v32 = vmax.f32 %v2292_v12, 0.0  ;;  %v13505_v12 = vld [vmem:[#allocation241_spill] sm:$0xff]  ;;  %v13516_v15 = vld [vmem:[#allocation24_spill] sm:$0xff] }
 0x667   : > { %13484 = vst [vmem:[#allocation199_spill] sm:$0xff] %v11141_v34  ;;  %4846 = vmatmul.bf16.gmra.mxu3 %v13494_v7  ;;  %v11165_v16 = vmul.f32 %v3417_v11, %v2537_v22  ;;  %v2546_v22 = vmax.f32 %v2290_v35, 0.0  ;;  %v2547_v11 = vmax.f32 %v2291_v56, 0.0  ;;  %v13518_v34 = vld [vmem:[#allocation248_spill] sm:$0xff] }
 0x668   : > { %4935 = vmatmul.bf16.gmra.mxu0 %v13497_v2 }
 0x669   : > { %v3506_v57 = vpop.f32.mrf.mxu2  ;;  %13501 = vst [vmem:[#allocation202_spill] sm:$0xff] %v11165_v16 }
 0x66a   : > { %v11159_v61 = vmul.f32 %v3506_v57, %v2538_v48  ;;  %v3595_v45 = vpop.f32.mrf.mxu3 }
 0x66b   : > { %v11161_v55 = vmul.f32 %v3595_v45, %v2539_v17  ;;  %v3419_v0 = vpop.f32.mrf.mxu1  ;;  %v13506_v17 = vld [vmem:[#allocation245_spill] sm:$0xff] }
 0x66c   : > { %13498 = vst [vmem:[#allocation203_spill] sm:$0xff] %v11159_v61  ;;  %v11167_v7 = vmul.f32 %v3419_v0, %v2545_v38  ;;  %v3686_v2 = vpop.f32.mrf.mxu0  ;;  %v2300_v50 = vadd.f32 %v10602_v27, %v13506_v17  ;;  %v13509_v0 = vld [vmem:[#allocation242_spill] sm:$0xff]  ;;  %v13510_v17 = vld [vmem:[#allocation244_spill] sm:$0xff]  ;;  %v13520_v61 = vld [vmem:[#allocation133_spill] sm:$0xff] }
 0x66d   : > { %13499 = vst [vmem:[#allocation201_spill] sm:$0xff] %v11161_v55  ;;  %v11171_v21 = vmul.f32 %v3686_v2, %v2548_v32  ;;  %v2298_v2 = vadd.f32 %v10622_v41, %v13509_v0  ;;  %v2299_v3 = vadd.f32 %v10624_v43, %v13510_v17  ;;  %v13515_v0 = vld [vmem:[#allocation25_spill] sm:$0xff]  ;;  %v2308_v17 = vadd.f32 %v10602_v27, %v13518_v34 }
 0x66e   : > { %13502 = vst [vmem:[#allocation78_spill] sm:$0xff] %v11167_v7  ;;  %4274 = vmatmul.f32.gmra.mxu1 %v13505_v12  ;;  %v2556_v38 = vmax.f32 %v2300_v50, 0.0  ;;  %v13517_v51 = vpack.c.bf16 %v13515_v0, %v13516_v15 }
 0x66f   : > { %13504 = vst [vmem:[#allocation79_spill] sm:$0xff] %v11171_v21  ;;  %v13519_v21 = vld [vmem:[#allocation136_spill] sm:$0xff]  ;;  %v2564_v0 = vmax.f32 %v2308_v17, 0.0 }
 0x670   : > { %v13521_v35 = vpack.c.bf16 %v13519_v21, %v13520_v61  ;;  %v13527_v61 = vld [vmem:[#allocation246_spill] sm:$0xff] }
 0x671   : > { %v3508_v58 = vpop.f32.mrf.mxu2  ;;  %v2306_v21 = vadd.f32 %v10622_v41, %v13527_v61  ;;  %v13536_v61 = vld [vmem:[#allocation249_spill] sm:$0xff] }
 0x672   : > { %v11180_v48 = vmul.f32 %v3508_v58, %v2546_v22  ;;  %v3597_v57 = vpop.f32.mrf.mxu3  ;;  %v13512_v22 = vld [vmem:[#allocation99_spill] sm:$0xff] }
 0x673   : > { %v11182_v45 = vmul.f32 %v3597_v57, %v2547_v11  ;;  %v3422_v32 = vpop.f32.mrf.mxu1  ;;  %v2297_v50 = vadd.f32 %v10598_v28, %v13512_v22  ;;  %v13513_v11 = vld [vmem:[#allocation102_spill] sm:$0xff]  ;;  %v13514_v57 = vld [vmem:[#allocation267_spill] sm:$0xff]  ;;  %v7580_v22 = vld [vmem:[#allocation10 + $0xe0] sm:$0xff] }
 0x674   : > { %13507 = vst [vmem:[#allocation206_spill] sm:$0xff] %v11180_v48  ;;  %v3689_v12 = vpop.f32.mrf.mxu0  ;;  %v2305_v58 = vadd.f32 %v10598_v28, %v13513_v11  ;;  %v2555_v11 = vmax.f32 %v2299_v3, 0.0  ;;  %5004 = vmatpush.bf16.msrb.mxu1 %v7580_v22  ;;  %v13530_v3 = vld [vmem:[#allocation247_spill] sm:$0xff] }
 0x675   : > { %13508 = vst [vmem:[#allocation204_spill] sm:$0xff] %v11182_v45  ;;  %v11192_v56 = vmul.f32 %v3689_v12, %v2556_v38  ;;  %v13522_v38 = vld [vmem:[#allocation26_spill] sm:$0xff]  ;;  %v13523_v12 = vld [vmem:[#allocation91_spill] sm:$0xff]  ;;  %v2554_v45 = vmax.f32 %v2298_v2, 0.0 }
 0x676   : > { %4277 = vmatmul.f32.gmra.mxu1 %v13514_v57  ;;  %4762 = vmatmul.bf16.gmra.mxu2 %v13517_v51  ;;  %v13524_v55 = vpack.c.bf16 %v13522_v38, %v13523_v12  ;;  %v2553_v57 = vmax.f32 %v2297_v50, 0.0  ;;  %v2561_v16 = vmax.f32 %v2305_v58, 0.0  ;;  %v2307_v38 = vadd.f32 %v10624_v43, %v13530_v3  ;;  %v13533_v58 = vld [vmem:[#allocation251_spill] sm:$0xff] }
 0x677   : > { %13511 = vst [vmem:[#allocation205_spill] sm:$0xff] %v11192_v56  ;;  %4851 = vmatmul.bf16.gmra.mxu3 %v13521_v35  ;;  %v2316_v17 = vadd.f32 %v10602_v27, %v13533_v58  ;;  %v2562_v12 = vmax.f32 %v2306_v21, 0.0  ;;  %v13537_v58 = vld [vmem:[#allocation250_spill] sm:$0xff] }
 0x678   : > { %4940 = vmatmul.bf16.gmra.mxu0 %v13524_v55  ;;  %v11216_v35 = vmul.f32 %v3422_v32, %v2553_v57  ;;  %v2315_v32 = vadd.f32 %v10624_v43, %v13537_v58  ;;  %v13545_v56 = vld [vmem:[#allocation254_spill] sm:$0xff] }
 0x679   : > { %v3511_v48 = vpop.f32.mrf.mxu2  ;;  %v2572_v57 = vmax.f32 %v2316_v17, 0.0  ;;  %v2324_v58 = vadd.f32 %v10602_v27, %v13545_v56 }
 0x67a   : > { %v11210_v15 = vmul.f32 %v3511_v48, %v2554_v45  ;;  %v3600_v51 = vpop.f32.mrf.mxu3  ;;  %13528 = vst [vmem:[#allocation208_spill] sm:$0xff] %v11216_v35  ;;  %v13532_v45 = vld [vmem:[#allocation268_spill] sm:$0xff]  ;;  %v13543_v48 = vld [vmem:[#allocation98_spill] sm:$0xff] }
 0x67b   : > { %v11212_v34 = vmul.f32 %v3600_v51, %v2555_v11  ;;  %v3424_v7 = vpop.f32.mrf.mxu1 }
 0x67c   : > { %13525 = vst [vmem:[#allocation209_spill] sm:$0xff] %v11210_v15  ;;  %v11218_v55 = vmul.f32 %v3424_v7, %v2561_v16  ;;  %v3691_v2 = vpop.f32.mrf.mxu0  ;;  %v2563_v16 = vmax.f32 %v2307_v38, 0.0  ;;  %v13547_v15 = vld [vmem:[#allocation97_spill] sm:$0xff] }
 0x67d   : > { %13526 = vst [vmem:[#allocation207_spill] sm:$0xff] %v11212_v34  ;;  %v11222_v50 = vmul.f32 %v3691_v2, %v2564_v0  ;;  %v2314_v2 = vadd.f32 %v10622_v41, %v13536_v61  ;;  %v13542_v61 = vld [vmem:[#allocation101_spill] sm:$0xff] }
 0x67e   : > { %13529 = vst [vmem:[#allocation80_spill] sm:$0xff] %v11218_v55  ;;  %4280 = vmatmul.f32.gmra.mxu1 %v13532_v45  ;;  %v13544_v3 = vpack.c.bf16 %v13542_v61, %v13543_v48  ;;  %v13554_v55 = vld [vmem:[#allocation252_spill] sm:$0xff] }
 0x67f   : > { %13531 = vst [vmem:[#allocation81_spill] sm:$0xff] %v11222_v50  ;;  %v13546_v50 = vld [vmem:[#allocation100_spill] sm:$0xff] }
 0x680   : > { %v13548_v21 = vpack.c.bf16 %v13546_v50, %v13547_v15  ;;  %v2322_v15 = vadd.f32 %v10622_v41, %v13554_v55 }
 0x681   : > { %v3513_v7 = vpop.f32.mrf.mxu2 }
 0x682   : > { %v11231_v22 = vmul.f32 %v3513_v7, %v2562_v12  ;;  %v3602_v11 = vpop.f32.mrf.mxu3  ;;  %v13539_v12 = vld [vmem:[#allocation105_spill] sm:$0xff] }
 0x683   : > { %v11233_v51 = vmul.f32 %v3602_v11, %v2563_v16  ;;  %v3427_v0 = vpop.f32.mrf.mxu1  ;;  %v2313_v17 = vadd.f32 %v10598_v28, %v13539_v12  ;;  %v13540_v16 = vld [vmem:[#allocation108_spill] sm:$0xff]  ;;  %v13541_v11 = vld [vmem:[#allocation277_spill] sm:$0xff]  ;;  %v2570_v12 = vmax.f32 %v2314_v2, 0.0 }
 0x684   : > { %13534 = vst [vmem:[#allocation217_spill] sm:$0xff] %v11231_v22  ;;  %v3694_v45 = vpop.f32.mrf.mxu0  ;;  %v2321_v7 = vadd.f32 %v10598_v28, %v13540_v16  ;;  %v13557_v2 = vld [vmem:[#allocation253_spill] sm:$0xff] }
 0x685   : > { %13535 = vst [vmem:[#allocation274_spill] sm:$0xff] %v11233_v51  ;;  %v11243_v38 = vmul.f32 %v3694_v45, %v2572_v57  ;;  %v13549_v57 = vld [vmem:[#allocation104_spill] sm:$0xff]  ;;  %v13550_v45 = vld [vmem:[#allocation27_spill] sm:$0xff]  ;;  %v2571_v51 = vmax.f32 %v2315_v32, 0.0  ;;  %v2569_v22 = vmax.f32 %v2313_v17, 0.0  ;;  %v2323_v32 = vadd.f32 %v10624_v43, %v13557_v2 }
 0x686   : > { %4283 = vmatmul.f32.gmra.mxu1 %v13541_v11  ;;  %4767 = vmatmul.bf16.gmra.mxu2 %v13544_v3  ;;  %v13551_v34 = vpack.c.bf16 %v13549_v57, %v13550_v45  ;;  %v2577_v11 = vmax.f32 %v2321_v7, 0.0  ;;  %v2580_v3 = vmax.f32 %v2324_v58, 0.0  ;;  %v13559_v58 = vld [vmem:[#allocation278_spill] sm:$0xff]  ;;  %v13570_v7 = vld [vmem:[#allocation145_spill] sm:$0xff] }
 0x687   : > { %13538 = vst [vmem:[#allocation269_spill] sm:$0xff] %v11243_v38  ;;  %4856 = vmatmul.bf16.gmra.mxu3 %v13548_v21  ;;  %v11267_v50 = vmul.f32 %v3427_v0, %v2569_v22  ;;  %v2578_v22 = vmax.f32 %v2322_v15, 0.0  ;;  %v2579_v0 = vmax.f32 %v2323_v32, 0.0  ;;  %v13572_v38 = vld [vmem:[#allocation260_spill] sm:$0xff] }
 0x688   : > { %4945 = vmatmul.bf16.gmra.mxu0 %v13551_v34 }
 0x689   : > { %v3516_v16 = vpop.f32.mrf.mxu2  ;;  %13555 = vst [vmem:[#allocation272_spill] sm:$0xff] %v11267_v50 }
 0x68a   : > { %v11261_v35 = vmul.f32 %v3516_v16, %v2570_v12  ;;  %v3605_v48 = vpop.f32.mrf.mxu3 }
 0x68b   : > { %v11263_v61 = vmul.f32 %v3605_v48, %v2571_v51  ;;  %v3429_v56 = vpop.f32.mrf.mxu1  ;;  %v13560_v51 = vld [vmem:[#allocation257_spill] sm:$0xff] }
 0x68c   : > { %13552 = vst [vmem:[#allocation212_spill] sm:$0xff] %v11261_v35  ;;  %v11269_v21 = vmul.f32 %v3429_v56, %v2577_v11  ;;  %v3696_v34 = vpop.f32.mrf.mxu0  ;;  %v2332_v57 = vadd.f32 %v10602_v27, %v13560_v51  ;;  %v13563_v56 = vld [vmem:[#allocation255_spill] sm:$0xff]  ;;  %v13564_v51 = vld [vmem:[#allocation256_spill] sm:$0xff]  ;;  %v13574_v35 = vld [vmem:[#allocation29_spill] sm:$0xff] }
 0x68d   : > { %13553 = vst [vmem:[#allocation276_spill] sm:$0xff] %v11263_v61  ;;  %v11273_v17 = vmul.f32 %v3696_v34, %v2580_v3  ;;  %v2330_v34 = vadd.f32 %v10622_v41, %v13563_v56  ;;  %v2331_v55 = vadd.f32 %v10624_v43, %v13564_v51  ;;  %v13569_v56 = vld [vmem:[#allocation148_spill] sm:$0xff]  ;;  %v2340_v51 = vadd.f32 %v10602_v27, %v13572_v38 }
 0x68e   : > { %13556 = vst [vmem:[#allocation279_spill] sm:$0xff] %v11269_v21  ;;  %4286 = vmatmul.f32.gmra.mxu1 %v13559_v58  ;;  %v2588_v11 = vmax.f32 %v2332_v57, 0.0  ;;  %v13571_v2 = vpack.c.bf16 %v13569_v56, %v13570_v7 }
 0x68f   : > { %13558 = vst [vmem:[#allocation273_spill] sm:$0xff] %v11273_v17  ;;  %v13573_v17 = vld [vmem:[#allocation32_spill] sm:$0xff]  ;;  %v2596_v56 = vmax.f32 %v2340_v51, 0.0 }
 0x690   : > { %v13575_v15 = vpack.c.bf16 %v13573_v17, %v13574_v35  ;;  %v13581_v35 = vld [vmem:[#allocation258_spill] sm:$0xff] }
 0x691   : > { %v3518_v45 = vpop.f32.mrf.mxu2  ;;  %v2338_v17 = vadd.f32 %v10622_v41, %v13581_v35  ;;  %v13588_v35 = vld [vmem:[#allocation261_spill] sm:$0xff] }
 0x692   : > { %v11282_v12 = vmul.f32 %v3518_v45, %v2578_v22  ;;  %v3607_v16 = vpop.f32.mrf.mxu3  ;;  %v13566_v22 = vld [vmem:[#allocation111_spill] sm:$0xff] }
 0x693   : > { %v11284_v48 = vmul.f32 %v3607_v16, %v2579_v0  ;;  %v3432_v3 = vpop.f32.mrf.mxu1  ;;  %v2329_v57 = vadd.f32 %v10598_v28, %v13566_v22  ;;  %v13567_v0 = vld [vmem:[#allocation114_spill] sm:$0xff]  ;;  %v13568_v16 = vld [vmem:[#allocation287_spill] sm:$0xff] }
 0x694   : > { %13561 = vst [vmem:[#allocation210_spill] sm:$0xff] %v11282_v12  ;;  %v3699_v58 = vpop.f32.mrf.mxu0  ;;  %v2337_v45 = vadd.f32 %v10598_v28, %v13567_v0  ;;  %v7579_v22 = vld [vmem:[#allocation10 + $0xd8] sm:$0xff]  ;;  %v2587_v0 = vmax.f32 %v2331_v55, 0.0 }
 0x695   : > { %13562 = vst [vmem:[#allocation211_spill] sm:$0xff] %v11284_v48  ;;  %v11294_v32 = vmul.f32 %v3699_v58, %v2588_v11  ;;  %v13576_v11 = vld [vmem:[#allocation110_spill] sm:$0xff]  ;;  %v13577_v58 = vld [vmem:[#allocation107_spill] sm:$0xff]  ;;  %v2586_v48 = vmax.f32 %v2330_v34, 0.0  ;;  %5005 = vmatpush.bf16.msrb.mxu1 %v7579_v22 }
 0x696   : > { %4289 = vmatmul.f32.gmra.mxu1 %v13568_v16  ;;  %4772 = vmatmul.bf16.gmra.mxu2 %v13571_v2  ;;  %v13578_v61 = vpack.c.bf16 %v13576_v11, %v13577_v58  ;;  %v2585_v16 = vmax.f32 %v2329_v57, 0.0  ;;  %v2593_v50 = vmax.f32 %v2337_v45, 0.0  ;;  %v13582_v55 = vld [vmem:[#allocation259_spill] sm:$0xff]  ;;  %v2594_v58 = vmax.f32 %v2338_v17, 0.0 }
 0x697   : > { %13565 = vst [vmem:[#allocation218_spill] sm:$0xff] %v11294_v32  ;;  %4861 = vmatmul.bf16.gmra.mxu3 %v13575_v15  ;;  %v2339_v11 = vadd.f32 %v10624_v43, %v13582_v55  ;;  %v13585_v45 = vld [vmem:[#allocation263_spill] sm:$0xff]  ;;  %v13597_v32 = vld [vmem:[#allocation266_spill] sm:$0xff] }
 0x698   : > { %4950 = vmatmul.bf16.gmra.mxu0 %v13578_v61  ;;  %v11318_v15 = vmul.f32 %v3432_v3, %v2585_v16  ;;  %v2348_v51 = vadd.f32 %v10602_v27, %v13585_v45  ;;  %v13589_v45 = vld [vmem:[#allocation262_spill] sm:$0xff] }
 0x699   : > { %v3521_v12 = vpop.f32.mrf.mxu2  ;;  %v2347_v3 = vadd.f32 %v10624_v43, %v13589_v45  ;;  %v2356_v45 = vadd.f32 %v10602_v27, %v13597_v32  ;;  %v13604_v32 = vld [vmem:[#allocation264_spill] sm:$0xff] }
 0x69a   : > { %v11312_v7 = vmul.f32 %v3521_v12, %v2586_v48  ;;  %v3610_v2 = vpop.f32.mrf.mxu3  ;;  %v13584_v48 = vld [vmem:[#allocation288_spill] sm:$0xff]  ;;  %v2604_v16 = vmax.f32 %v2348_v51, 0.0  ;;  %v13595_v12 = vld [vmem:[#allocation151_spill] sm:$0xff] }
 0x69b   : > { %v11314_v38 = vmul.f32 %v3610_v2, %v2587_v0  ;;  %v3434_v21 = vpop.f32.mrf.mxu1 }
 0x69c   : > { %13579 = vst [vmem:[#allocation215_spill] sm:$0xff] %v11312_v7  ;;  %v11320_v61 = vmul.f32 %v3434_v21, %v2593_v50  ;;  %v3701_v34 = vpop.f32.mrf.mxu0  ;;  %v2595_v50 = vmax.f32 %v2339_v11, 0.0  ;;  %v13599_v7 = vld [vmem:[#allocation35_spill] sm:$0xff] }
 0x69d   : > { %13580 = vst [vmem:[#allocation213_spill] sm:$0xff] %v11314_v38  ;;  %v11324_v57 = vmul.f32 %v3701_v34, %v2596_v56  ;;  %v2346_v34 = vadd.f32 %v10622_v41, %v13588_v35  ;;  %v13594_v35 = vld [vmem:[#allocation155_spill] sm:$0xff] }
 0x69e   : > { %4292 = vmatmul.f32.gmra.mxu1 %v13584_v48  ;;  %v13596_v55 = vpack.c.bf16 %v13594_v35, %v13595_v12 }
 0x69f   : > { %13583 = vst [vmem:[#allocation214_spill] sm:$0xff] %v11324_v57  ;;  %v13598_v57 = vld [vmem:[#allocation30_spill] sm:$0xff] }
 0x6a0   : > { %v13600_v17 = vpack.c.bf16 %v13598_v57, %v13599_v7  ;;  %v2354_v7 = vadd.f32 %v10622_v41, %v13604_v32  ;;  %v13610_v32 = vld [vmem:[#allocation31_spill] sm:$0xff] }
 0x6a1   : > { %v3523_v21 = vpop.f32.mrf.mxu2 }
 0x6a2   : > { %v11333_v22 = vmul.f32 %v3523_v21, %v2594_v58  ;;  %v3612_v0 = vpop.f32.mrf.mxu3  ;;  %v13591_v58 = vld [vmem:[#allocation117_spill] sm:$0xff] }
 0x6a3   : > { %v11335_v2 = vmul.f32 %v3612_v0, %v2595_v50  ;;  %v3437_v56 = vpop.f32.mrf.mxu1  ;;  %v2345_v51 = vadd.f32 %v10598_v28, %v13591_v58  ;;  %v13592_v50 = vld [vmem:[#allocation120_spill] sm:$0xff]  ;;  %v13593_v0 = vld [vmem:[#allocation86_spill] sm:$0xff]  ;;  %v2602_v58 = vmax.f32 %v2346_v34, 0.0  ;;  %v13605_v34 = vld [vmem:[#allocation265_spill] sm:$0xff] }
 0x6a4   : > { %13586 = vst [vmem:[#allocation82_spill] sm:$0xff] %v11333_v22  ;;  %v3704_v48 = vpop.f32.mrf.mxu0  ;;  %v2353_v21 = vadd.f32 %v10598_v28, %v13592_v50 }
 0x6a5   : > { %13587 = vst [vmem:[#allocation84_spill] sm:$0xff] %v11335_v2  ;;  %v11345_v11 = vmul.f32 %v3704_v48, %v2604_v16  ;;  %v13601_v16 = vld [vmem:[#allocation302_spill] sm:$0xff]  ;;  %v13602_v48 = vld [vmem:[#allocation113_spill] sm:$0xff]  ;;  %v2603_v2 = vmax.f32 %v2347_v3, 0.0  ;;  %v2601_v50 = vmax.f32 %v2345_v51, 0.0  ;;  %v2355_v3 = vadd.f32 %v10624_v43, %v13605_v34 }
 0x6a6   : > { %4295 = vmatmul.f32.gmra.mxu1 %v13593_v0  ;;  %4777 = vmatmul.bf16.gmra.mxu2 %v13596_v55  ;;  %v13603_v38 = vpack.c.bf16 %v13601_v16, %v13602_v48  ;;  %v2609_v0 = vmax.f32 %v2353_v21, 0.0  ;;  %v2612_v55 = vmax.f32 %v2356_v45, 0.0  ;;  %v13607_v45 = vld [vmem:[#allocation295_spill] sm:$0xff]  ;;  %v2610_v16 = vmax.f32 %v2354_v7, 0.0  ;;  %v13613_v34 = vld [vmem:[#allocation33_spill] sm:$0xff] }
 0x6a7   : > { %13590 = vst [vmem:[#allocation225_spill] sm:$0xff] %v11345_v11  ;;  %4866 = vmatmul.bf16.gmra.mxu3 %v13600_v17  ;;  %v11369_v57 = vmul.f32 %v3437_v56, %v2601_v50  ;;  %v2611_v41 = vmax.f32 %v2355_v3, 0.0  ;;  %v13618_v11 = vld [vmem:[#allocation298_spill] sm:$0xff] }
 0x6a8   : > { %4955 = vmatmul.bf16.gmra.mxu0 %v13603_v38 }
 0x6a9   : > { %v3526_v28 = vpop.f32.mrf.mxu2 }
 0x6aa   : > { %v11363_v22 = vmul.f32 %v3526_v28, %v2602_v58  ;;  %v3615_v12 = vpop.f32.mrf.mxu3 }
 0x6ab   : > { %v11365_v35 = vmul.f32 %v3615_v12, %v2603_v2  ;;  %v3439_v27 = vpop.f32.mrf.mxu1 }
 0x6ac   : > { %v11371_v17 = vmul.f32 %v3439_v27, %v2609_v0  ;;  %v3706_v38 = vpop.f32.mrf.mxu0  ;;  %v13609_v27 = vld [vmem:[#allocation34_spill] sm:$0xff] }
 0x6ad   : > { %v11375_v51 = vmul.f32 %v3706_v38, %v2612_v55  ;;  %v13608_v55 = vld [vmem:[#allocation297_spill] sm:$0xff]  ;;  %v13611_v7 = vpack.c.bf16 %v13609_v27, %v13610_v32 }
 0x6ae   : > { %4298 = vmatmul.f32.gmra.mxu1 %v13607_v45  ;;  %v13612_v38 = vld [vmem:[#allocation305_spill] sm:$0xff]  ;;  %v13615_v45 = vld [vmem:[#allocation306_spill] sm:$0xff] }
 0x6af   : > { %13606 = vst [vmem:[#allocation284_spill] sm:$0xff] %v11375_v51  ;;  %v13614_v3 = vpack.c.bf16 %v13612_v38, %v13613_v34 }
 0x6b1   : > { %v3528_v56 = vpop.f32.mrf.mxu2 }
 0x6b2   : > { %v11382_v48 = vmul.f32 %v3528_v56, %v2610_v16  ;;  %v3617_v58 = vpop.f32.mrf.mxu3  ;;  %v13616_v16 = vld [vmem:[#allocation119_spill] sm:$0xff]  ;;  %v7578_v56 = vld [vmem:[#allocation10 + $0xd0] sm:$0xff] }
 0x6b3   : > { %v11384_v28 = vmul.f32 %v3617_v58, %v2611_v41  ;;  %v4254_v50 = vpop.f32.mrf.mxu1  ;;  %v13617_v41 = vpack.c.bf16 %v13615_v45, %v13616_v16  ;;  %5006 = vmatpush.bf16.msrb.mxu1 %v7578_v56  ;;  %v13619_v45 = vld [vmem:[#allocation94_spill] sm:$0xff]  ;;  %v13620_v16 = vpack.c.bf16 %v10250_v23, %v10214_v46 }
 0x6b5   : > { %v4921_v0 = vpop.f32.mrf.mxu0 }
 0x6b6   : > { %4301 = vmatmul.f32.gmra.mxu1 %v13608_v55  ;;  %4782 = vmatmul.bf16.gmra.mxu2 %v13611_v7 }
 0x6b7   : > { %4871 = vmatmul.bf16.gmra.mxu3 %v13614_v3 }
 0x6b8   : > { %4960 = vmatmul.bf16.gmra.mxu0 %v13617_v41 }
 0x6b9   : > { %v4743_v58 = vpop.f32.mrf.mxu2 }
 0x6ba   : > { %v4744_v2 = vadd.f32 %v4743_v58, %v4254_v50  ;;  %v4832_v43 = vpop.f32.mrf.mxu3 }
 0x6bb   : > { %v4257_v12 = vpop.f32.mrf.mxu1 }
 0x6bc   : > { %v4833_v21 = vadd.f32 %v4832_v43, %v4744_v2  ;;  %v13621_v2 = vpack.c.bf16 %v10292_v60, %v10239_v9 }
 0x6bd   : > { %v4923_v55 = vpop.f32.mrf.mxu0 }
 0x6be   : > { %4304 = vmatmul.f32.gmra.mxu1 %v13618_v11  ;;  %v11401_v27 = vadd.f32 %v4921_v0, %v4833_v21  ;;  %v13622_v11 = vpack.c.bf16 %v10302_v29, %v10246_v37  ;;  %v13623_v37 = vpack.c.bf16 %v10349_v31, %v10308_v19  ;;  %v13626_v19 = vld [vmem:[#allocation28_spill] sm:$0xff] }
 0x6c1   : > { %v4745_v32 = vpop.f32.mrf.mxu2 }
 0x6c2   : > { %v4746_v7 = vadd.f32 %v4745_v32, %v4257_v12  ;;  %v4834_v38 = vpop.f32.mrf.mxu3 }
 0x6c3   : > { %v4260_v34 = vpop.f32.mrf.mxu1 }
 0x6c4   : > { %v4835_v3 = vadd.f32 %v4834_v38, %v4746_v7  ;;  %v13624_v7 = vpack.c.bf16 %v10370_v33, %v10340_v52 }
 0x6c5   : > { %v4926_v51 = vpop.f32.mrf.mxu0 }
 0x6c6   : > { %4307 = vmatmul.f32.gmra.mxu1 %v13619_v45  ;;  %4787 = vmatmul.bf16.gmra.mxu2 %v13620_v16  ;;  %v11407_v50 = vadd.f32 %v4923_v55, %v4835_v3 }
 0x6c7   : > { %4876 = vmatmul.bf16.gmra.mxu3 %v13621_v2 }
 0x6c8   : > { %4965 = vmatmul.bf16.gmra.mxu0 %v13622_v11 }
 0x6c9   : > { %v4748_v21 = vpop.f32.mrf.mxu2 }
 0x6ca   : > { %v4749_v43 = vadd.f32 %v4748_v21, %v4260_v34  ;;  %v4837_v0 = vpop.f32.mrf.mxu3 }
 0x6cb   : > { %v4263_v12 = vpop.f32.mrf.mxu1 }
 0x6cc   : > { %v4838_v41 = vadd.f32 %v4837_v0, %v4749_v43  ;;  %v13628_v0 = vpack.c.bf16 %v10423_v59, %v10402_v49 }
 0x6cd   : > { %v4928_v56 = vpop.f32.mrf.mxu0 }
 0x6ce   : > { %4310 = vmatmul.f32.gmra.mxu1 %v9830_v5  ;;  %v11416_v46 = vadd.f32 %v4926_v51, %v4838_v41  ;;  %v13625_v5 = vpack.c.bf16 %v10377_v1, %v10347_v24  ;;  %v7577_v51 = vld [vmem:[#allocation10 + $0xc8] sm:$0xff]  ;;  %v13627_v24 = vpack.c.bf16 %v10408_v39, %v10383_v30 }
 0x6cf   : > { %5007 = vmatpush.bf16.msrb.mxu1 %v7577_v51 }
 0x6d1   : > { %v4750_v23 = vpop.f32.mrf.mxu2 }
 0x6d2   : > { %v4751_v58 = vadd.f32 %v4750_v23, %v4263_v12  ;;  %v4839_v55 = vpop.f32.mrf.mxu3  ;;  %v13629_v12 = vpack.c.bf16 %v10425_v36, %v10404_v53  ;;  %v13631_v36 = vpack.c.bf16 %v10456_v4, %v10431_v13  ;;  %v7591_v53 = vld [vmem:[#allocation10 + $0x138] sm:$0xff] }
 0x6d3   : > { %v4266_v32 = vpop.f32.mrf.mxu1  ;;  %5090 = vmatpush.bf16.msra.mxu2 %v7591_v53  ;;  %v13642_v53 = vld [vmem:[#allocation131_spill] sm:$0xff] }
 0x6d4   : > { %v4840_v9 = vadd.f32 %v4839_v55, %v4751_v58 }
 0x6d5   : > { %v4931_v60 = vpop.f32.mrf.mxu0 }
 0x6d6   : > { %4313 = vmatmul.f32.gmra.mxu1 %v9882_v8  ;;  %4792 = vmatmul.bf16.gmra.mxu2 %v13623_v37  ;;  %v11422_v29 = vadd.f32 %v4928_v56, %v4840_v9  ;;  %v13630_v37 = vld [vmem:[#allocation116_spill] sm:$0xff] }
 0x6d7   : > { %4881 = vmatmul.bf16.gmra.mxu3 %v13624_v7  ;;  %v7599_v7 = vld [vmem:[#allocation10 + $0x178] sm:$0xff] }
 0x6d8   : > { %4970 = vmatmul.bf16.gmra.mxu0 %v13625_v5  ;;  %v7607_v5 = vld [vmem:[#allocation10 + $0x1b8] sm:$0xff]  ;;  %5179 = vmatpush.bf16.msra.mxu3 %v7599_v7  ;;  %v13643_v7 = vld [vmem:[#allocation48_spill] sm:$0xff] }
 0x6d9   : > { %v4753_v38 = vpop.f32.mrf.mxu2  ;;  %5268 = vmatpush.bf16.msra.mxu0 %v7607_v5  ;;  %v13644_v5 = vpack.c.bf16 %v13642_v53, %v13643_v7 }
 0x6da   : > { %v4754_v34 = vadd.f32 %v4753_v38, %v4266_v32  ;;  %v4842_v3 = vpop.f32.mrf.mxu3  ;;  %v13633_v38 = vpack.c.bf16 %v10472_v47, %v10452_v20  ;;  %v7589_v20 = vld [vmem:[#allocation10 + $0x128] sm:$0xff] }
 0x6db   : > { %v4269_v8 = vpop.f32.mrf.mxu1  ;;  %v7605_v47 = vld [vmem:[#allocation10 + $0x1a8] sm:$0xff] }
 0x6dc   : > { %v4843_v45 = vadd.f32 %v4842_v3, %v4754_v34  ;;  %v7576_v34 = vld [vmem:[#allocation10 + $0xc0] sm:$0xff] }
 0x6dd   : > { %v4933_v16 = vpop.f32.mrf.mxu0  ;;  %5008 = vmatpush.bf16.msrb.mxu1 %v7576_v34 }
 0x6de   : > { %4316 = vmatmul.f32.gmra.mxu1 %v13626_v19  ;;  %v11431_v31 = vadd.f32 %v4931_v60, %v4843_v45  ;;  %v7598_v45 = vld [vmem:[#allocation10 + $0x170] sm:$0xff] }
 0x6df   : > { %5180 = vmatpush.bf16.msra.mxu3 %v7598_v45 }
 0x6e1   : > { %v4755_v2 = vpop.f32.mrf.mxu2 }
 0x6e2   : > { %v4756_v11 = vadd.f32 %v4755_v2, %v4269_v8  ;;  %v4844_v52 = vpop.f32.mrf.mxu3  ;;  %v7590_v8 = vld [vmem:[#allocation10 + $0x130] sm:$0xff] }
 0x6e3   : > { %v4272_v33 = vpop.f32.mrf.mxu1  ;;  %5091 = vmatpush.bf16.msra.mxu2 %v7590_v8 }
 0x6e4   : > { %v4845_v21 = vadd.f32 %v4844_v52, %v4756_v11 }
 0x6e5   : > { %v4936_v43 = vpop.f32.mrf.mxu0 }
 0x6e6   : > { %4319 = vmatmul.f32.gmra.mxu1 %v9944_v6  ;;  %4797 = vmatmul.bf16.gmra.mxu2 %v13627_v24  ;;  %v11437_v1 = vadd.f32 %v4933_v16, %v4845_v21  ;;  %v7606_v16 = vld [vmem:[#allocation10 + $0x1b0] sm:$0xff]  ;;  %v7588_v24 = vld [vmem:[#allocation10 + $0x120] sm:$0xff] }
 0x6e7   : > { %4886 = vmatmul.bf16.gmra.mxu3 %v13628_v0  ;;  %5269 = vmatpush.bf16.msra.mxu0 %v7606_v16  ;;  %v7596_v0 = vld [vmem:[#allocation10 + $0x160] sm:$0xff] }
 0x6e8   : > { %4975 = vmatmul.bf16.gmra.mxu0 %v13629_v12  ;;  %5092 = vmatpush.bf16.msra.mxu2 %v7589_v20  ;;  %v7604_v12 = vld [vmem:[#allocation10 + $0x1a0] sm:$0xff] }
 0x6e9   : > { %v4758_v41 = vpop.f32.mrf.mxu2 }
 0x6ea   : > { %v4759_v56 = vadd.f32 %v4758_v41, %v4272_v33  ;;  %v4847_v23 = vpop.f32.mrf.mxu3 }
 0x6eb   : > { %v4275_v58 = vpop.f32.mrf.mxu1  ;;  %5270 = vmatpush.bf16.msra.mxu0 %v7605_v47 }
 0x6ec   : > { %v4848_v55 = vadd.f32 %v4847_v23, %v4759_v56  ;;  %5093 = vmatpush.bf16.msra.mxu2 %v7588_v24  ;;  %v7600_v24 = vld [vmem:[#allocation10 + $0x180] sm:$0xff] }
 0x6ed   : > { %v4938_v6 = vpop.f32.mrf.mxu0 }
 0x6ee   : > { %4322 = vmatmul.f32.gmra.mxu1 %v9947_v14  ;;  %v11446_v39 = vadd.f32 %v4936_v43, %v4848_v55  ;;  %v13632_v14 = vpack.c.bf16 %v10470_v26, %v10450_v44  ;;  %v13634_v26 = vld [vmem:[#allocation301_spill] sm:$0xff]  ;;  %v13636_v55 = vld [vmem:[#allocation128_spill] sm:$0xff] }
 0x6ef   : > { %v7597_v44 = vld [vmem:[#allocation10 + $0x168] sm:$0xff]  ;;  %5271 = vmatpush.bf16.msra.mxu0 %v7604_v12 }
 0x6f0   : > { %5181 = vmatpush.bf16.msra.mxu3 %v7597_v44 }
 0x6f1   : > { %v4760_v30 = vpop.f32.mrf.mxu2 }
 0x6f2   : > { %v4761_v32 = vadd.f32 %v4760_v30, %v4275_v58  ;;  %v4849_v9 = vpop.f32.mrf.mxu3  ;;  %v13635_v58 = vld [vmem:[#allocation304_spill] sm:$0xff] }
 0x6f3   : > { %v4278_v60 = vpop.f32.mrf.mxu1 }
 0x6f4   : > { %v4850_v49 = vadd.f32 %v4849_v9, %v4761_v32  ;;  %5182 = vmatpush.bf16.msra.mxu3 %v7596_v0  ;;  %v7587_v32 = vld [vmem:[#allocation10 + $0x118] sm:$0xff] }
 0x6f5   : > { %v4941_v59 = vpop.f32.mrf.mxu0  ;;  %v7595_v9 = vld [vmem:[#allocation10 + $0x158] sm:$0xff]  ;;  %5094 = vmatpush.bf16.msra.mxu2 %v7587_v32  ;;  %v13651_v32 = vld [vmem:[#allocation138_spill] sm:$0xff] }
 0x6f6   : > { %4325 = vmatmul.f32.gmra.mxu1 %v13630_v37  ;;  %4802 = vmatmul.bf16.gmra.mxu2 %v13631_v36  ;;  %v11452_v51 = vadd.f32 %v4938_v6, %v4850_v49  ;;  %v13637_v6 = vld [vmem:[#allocation125_spill] sm:$0xff]  ;;  %v13640_v37 = vld [vmem:[#allocation46_spill] sm:$0xff] }
 0x6f7   : > { %4891 = vmatmul.bf16.gmra.mxu3 %v13632_v14  ;;  %v13638_v30 = vpack.c.bf16 %v13636_v55, %v13637_v6  ;;  %v13649_v6 = vld [vmem:[#allocation52_spill] sm:$0xff] }
 0x6f8   : > { %4980 = vmatmul.bf16.gmra.mxu0 %v13633_v38  ;;  %5183 = vmatpush.bf16.msra.mxu3 %v7595_v9  ;;  %v13652_v9 = vld [vmem:[#allocation134_spill] sm:$0xff] }
 0x6f9   : > { %v4763_v3 = vpop.f32.mrf.mxu2 }
 0x6fa   : > { %v4764_v13 = vadd.f32 %v4763_v3, %v4278_v60  ;;  %v4852_v4 = vpop.f32.mrf.mxu3  ;;  %v7603_v60 = vld [vmem:[#allocation10 + $0x198] sm:$0xff]  ;;  %v7586_v3 = vld [vmem:[#allocation10 + $0x110] sm:$0xff] }
 0x6fb   : > { %v4281_v19 = vpop.f32.mrf.mxu1  ;;  %5272 = vmatpush.bf16.msra.mxu0 %v7603_v60  ;;  %5095 = vmatpush.bf16.msra.mxu2 %v7586_v3  ;;  %v13653_v60 = vpack.c.bf16 %v13651_v32, %v13652_v9 }
 0x6fc   : > { %v4853_v2 = vadd.f32 %v4852_v4, %v4764_v13  ;;  %v7594_v13 = vld [vmem:[#allocation10 + $0x150] sm:$0xff] }
 0x6fd   : > { %v4943_v11 = vpop.f32.mrf.mxu0  ;;  %v7602_v4 = vld [vmem:[#allocation10 + $0x190] sm:$0xff]  ;;  %5184 = vmatpush.bf16.msra.mxu3 %v7594_v13 }
 0x6fe   : > { %4328 = vmatmul.f32.gmra.mxu1 %v13634_v26  ;;  %v11461_v52 = vadd.f32 %v4941_v59, %v4853_v2  ;;  %v13639_v59 = vld [vmem:[#allocation49_spill] sm:$0xff] }
 0x6ff   : > { %v13641_v36 = vpack.c.bf16 %v13639_v59, %v13640_v37  ;;  %5273 = vmatpush.bf16.msra.mxu0 %v7602_v4  ;;  %v7585_v2 = vld [vmem:[#allocation10 + $0x108] sm:$0xff]  ;;  %v7615_v59 = vld [vmem:[#allocation10 + $0x1f8] sm:$0xff] }
 0x700   : > { %v7601_v26 = vld [vmem:[#allocation10 + $0x188] sm:$0xff]  ;;  %5096 = vmatpush.bf16.msra.mxu2 %v7585_v2  ;;  %5357 = vmatpush.bf16.msra.mxu1 %v7615_v59 }
 0x701   : > { %v4765_v33 = vpop.f32.mrf.mxu2 }
 0x702   : > { %v4766_v21 = vadd.f32 %v4765_v33, %v4281_v19  ;;  %v4854_v43 = vpop.f32.mrf.mxu3  ;;  %v13645_v19 = vld [vmem:[#allocation303_spill] sm:$0xff] }
 0x703   : > { %v4284_v41 = vpop.f32.mrf.mxu1  ;;  %5274 = vmatpush.bf16.msra.mxu0 %v7601_v26  ;;  %v13659_v26 = vld [vmem:[#allocation140_spill] sm:$0xff] }
 0x704   : > { %v4855_v56 = vadd.f32 %v4854_v43, %v4766_v21  ;;  %v7584_v21 = vld [vmem:[#allocation10 + $0x100] sm:$0xff] }
 0x705   : > { %v4946_v23 = vpop.f32.mrf.mxu0  ;;  %v7592_v43 = vld [vmem:[#allocation10 + $0x140] sm:$0xff]  ;;  %5097 = vmatpush.bf16.msra.mxu2 %v7584_v21  ;;  %v13663_v21 = vld [vmem:[#allocation141_spill] sm:$0xff] }
 0x706   : > { %4331 = vmatmul.f32.gmra.mxu1 %v13635_v58  ;;  %4807 = vmatmul.bf16.gmra.mxu2 %v13638_v30  ;;  %v11467_v49 = vadd.f32 %v4943_v11, %v4855_v56  ;;  %v7593_v11 = vld [vmem:[#allocation10 + $0x148] sm:$0xff]  ;;  %v13646_v56 = vld [vmem:[#allocation39_spill] sm:$0xff]  ;;  %v13650_v30 = vpack.c.bf16 %v10574_v63, %v13649_v6 }
 0x707   : > { %4896 = vmatmul.bf16.gmra.mxu3 %v13641_v36  ;;  %5275 = vmatpush.bf16.msra.mxu0 %v7600_v24 }
 0x708   : > { %4985 = vmatmul.bf16.gmra.mxu0 %v13644_v5  ;;  %5185 = vmatpush.bf16.msra.mxu3 %v7593_v11 }
 0x709   : > { %v4768_v14 = vpop.f32.mrf.mxu2 }
 0x70a   : > { %v4769_v38 = vadd.f32 %v4768_v14, %v4284_v41  ;;  %v4857_v34 = vpop.f32.mrf.mxu3 }
 0x70b   : > { %v4287_v8 = vpop.f32.mrf.mxu1 }
 0x70c   : > { %v4858_v45 = vadd.f32 %v4857_v34, %v4769_v38  ;;  %5186 = vmatpush.bf16.msra.mxu3 %v7592_v43 }
 0x70d   : > { %v4948_v16 = vpop.f32.mrf.mxu0 }
 0x70e   : > { %4334 = vmatmul.f32.gmra.mxu1 %v13645_v19  ;;  %v11476_v20 = vadd.f32 %v4946_v23, %v4858_v45  ;;  %v13647_v23 = vld [vmem:[#allocation51_spill] sm:$0xff]  ;;  %v13655_v45 = vld [vmem:[#allocation121_spill] sm:$0xff] }
 0x70f   : > { %v13648_v58 = vpack.c.bf16 %v10560_v42, %v13647_v23  ;;  %v13654_v42 = vld [vmem:[#allocation40_spill] sm:$0xff]  ;;  %v13657_v19 = vld [vmem:[#allocation55_spill] sm:$0xff] }
 0x711   : > { %v4770_v44 = vpop.f32.mrf.mxu2 }
 0x712   : > { %v4771_v47 = vadd.f32 %v4770_v44, %v4287_v8  ;;  %v4859_v33 = vpop.f32.mrf.mxu3  ;;  %v13660_v44 = vld [vmem:[#allocation57_spill] sm:$0xff] }
 0x713   : > { %v4290_v0 = vpop.f32.mrf.mxu1 }
 0x714   : > { %v4860_v12 = vadd.f32 %v4859_v33, %v4771_v47  ;;  %v13661_v47 = vpack.c.bf16 %v13659_v26, %v13660_v44  ;;  %v13662_v33 = vld [vmem:[#allocation60_spill] sm:$0xff] }
 0x715   : > { %v4951_v41 = vpop.f32.mrf.mxu0  ;;  %v13664_v43 = vpack.c.bf16 %v13662_v33, %v13663_v21 }
 0x716   : > { %4337 = vmatmul.f32.gmra.mxu1 %v13646_v56  ;;  %4812 = vmatmul.bf16.gmra.mxu2 %v13648_v58  ;;  %v11482_v55 = vadd.f32 %v4948_v16, %v4860_v12  ;;  %v13656_v16 = vld [vmem:[#allocation219_spill] sm:$0xff] }
 0x717   : > { %4901 = vmatmul.bf16.gmra.mxu3 %v13650_v30  ;;  %v13658_v2 = vpack.c.bf16 %v13656_v16, %v13657_v19  ;;  %v13665_v58 = vld [vmem:[#allocation123_spill] sm:$0xff] }
 0x718   : > { %4990 = vmatmul.bf16.gmra.mxu0 %v13653_v60 }
 0x719   : > { %v4773_v37 = vpop.f32.mrf.mxu2 }
 0x71a   : > { %v4774_v36 = vadd.f32 %v4773_v37, %v4290_v0  ;;  %v4862_v53 = vpop.f32.mrf.mxu3 }
 0x71b   : > { %v4293_v7 = vpop.f32.mrf.mxu1 }
 0x71c   : > { %v4863_v5 = vadd.f32 %v4862_v53, %v4774_v36  ;;  %v13666_v36 = vld [vmem:[#allocation275_spill] sm:$0xff] }
 0x71d   : > { %v4953_v14 = vpop.f32.mrf.mxu0  ;;  %v13667_v53 = vld [vmem:[#allocation271_spill] sm:$0xff] }
 0x71e   : > { %4340 = vmatmul.f32.gmra.mxu1 %v13654_v42  ;;  %v11491_v38 = vadd.f32 %v4951_v41, %v4863_v5  ;;  %v13669_v5 = vld [vmem:[#allocation144_spill] sm:$0xff] }
 0x721   : > { %v4775_v34 = vpop.f32.mrf.mxu2 }
 0x722   : > { %v4776_v3 = vadd.f32 %v4775_v34, %v4293_v7  ;;  %v4864_v63 = vpop.f32.mrf.mxu3  ;;  %v13668_v7 = vpack.c.bf16 %v13666_v36, %v13667_v53  ;;  %v13671_v34 = vld [vmem:[#allocation227_spill] sm:$0xff]  ;;  %v13686_v36 = vld [vmem:[#allocation270_spill] sm:$0xff] }
 0x723   : > { %v4296_v13 = vpop.f32.mrf.mxu1 }
 0x724   : > { %v4865_v4 = vadd.f32 %v4864_v63, %v4776_v3  ;;  %v13672_v3 = vld [vmem:[#allocation143_spill] sm:$0xff] }
 0x725   : > { %v4956_v8 = vpop.f32.mrf.mxu0  ;;  %v13673_v63 = vpack.c.bf16 %v13671_v34, %v13672_v3 }
 0x726   : > { %4343 = vmatmul.f32.gmra.mxu1 %v13655_v45  ;;  %4817 = vmatmul.bf16.gmra.mxu2 %v13658_v2  ;;  %v11497_v11 = vadd.f32 %v4953_v14, %v4865_v4  ;;  %v13670_v14 = vpack.c.bf16 %v10656_v40, %v13669_v5  ;;  %v13675_v4 = vld [vmem:[#allocation63_spill] sm:$0xff]  ;;  %v7614_v45 = vld [vmem:[#allocation10 + $0x1f0] sm:$0xff] }
 0x727   : > { %4906 = vmatmul.bf16.gmra.mxu3 %v13661_v47  ;;  %5358 = vmatpush.bf16.msra.mxu1 %v7614_v45 }
 0x728   : > { %4995 = vmatmul.bf16.gmra.mxu0 %v13664_v43 }
 0x729   : > { %v4778_v24 = vpop.f32.mrf.mxu2 }
 0x72a   : > { %v4779_v0 = vadd.f32 %v4778_v24, %v4296_v13  ;;  %v4867_v12 = vpop.f32.mrf.mxu3  ;;  %v13674_v13 = vld [vmem:[#allocation64_spill] sm:$0xff] }
 0x72b   : > { %v4299_v41 = vpop.f32.mrf.mxu1 }
 0x72c   : > { %v4868_v56 = vadd.f32 %v4867_v12, %v4779_v0 }
 0x72d   : > { %v4958_v23 = vpop.f32.mrf.mxu0 }
 0x72e   : > { %4346 = vmatmul.f32.gmra.mxu1 %v13665_v58  ;;  %v11506_v6 = vadd.f32 %v4956_v8, %v4868_v56  ;;  %v13676_v8 = vpack.c.bf16 %v13674_v13, %v13675_v4  ;;  %v13678_v56 = vld [vmem:[#allocation281_spill] sm:$0xff]  ;;  %v13680_v58 = vld [vmem:[#allocation146_spill] sm:$0xff] }
 0x731   : > { %v4780_v30 = vpop.f32.mrf.mxu2 }
 0x732   : > { %v4781_v32 = vadd.f32 %v4780_v30, %v4299_v41  ;;  %v4869_v9 = vpop.f32.mrf.mxu3  ;;  %v13677_v41 = vld [vmem:[#allocation285_spill] sm:$0xff]  ;;  %v13681_v30 = vpack.c.bf16 %v10700_v25, %v13680_v58 }
 0x733   : > { %v4302_v60 = vpop.f32.mrf.mxu1  ;;  %v7613_v58 = vld [vmem:[#allocation10 + $0x1e8] sm:$0xff] }
 0x734   : > { %v4870_v59 = vadd.f32 %v4869_v9, %v4781_v32  ;;  %v13682_v9 = vld [vmem:[#allocation150_spill] sm:$0xff]  ;;  %5359 = vmatpush.bf16.msra.mxu1 %v7613_v58 }
 0x735   : > { %v4961_v37 = vpop.f32.mrf.mxu0 }
 0x736   : > { %5009 = vmatmul.bf16.vlgmr.msrb.gmra.mxu1 %v13668_v7  ;;  %5098 = vmatmul.bf16.vlgmr.msra.gmra.mxu2 %v13670_v14  ;;  %v11514_v42 = vadd.f32 %v4958_v23, %v4870_v59  ;;  %v13679_v23 = vpack.c.bf16 %v13677_v41, %v13678_v56  ;;  %v13697_v41 = vld [vmem:[#allocation73_spill] sm:$0xff]  ;;  %v13698_v56 = vld [vmem:[#allocation70_spill] sm:$0xff] }
 0x737   : > { %5187 = vmatmul.bf16.vlgmr.msra.gmra.mxu3 %v13673_v63 }
 0x738   : > { %5276 = vmatmul.bf16.vlgmr.msra.gmra.mxu0 %v13676_v8 }
 0x739   : > { %v4783_v16 = vpop.f32.mrf.mxu2 }
 0x73a   : > { %v4784_v19 = vadd.f32 %v4783_v16, %v4302_v60  ;;  %v4872_v2 = vpop.f32.mrf.mxu3  ;;  %v13683_v60 = vld [vmem:[#allocation243_spill] sm:$0xff] }
 0x73b   : > { %v4305_v26 = vpop.f32.mrf.mxu1  ;;  %v13684_v59 = vpack.c.bf16 %v13682_v9, %v13683_v60 }
 0x73c   : > { %v4873_v44 = vadd.f32 %v4872_v2, %v4784_v19  ;;  %v13688_v2 = vld [vmem:[#allocation294_spill] sm:$0xff] }
 0x73d   : > { %v4963_v47 = vpop.f32.mrf.mxu0 }
 0x73e   : > { %v11522_v40 = vadd.f32 %v4961_v37, %v4873_v44  ;;  %v13685_v37 = vld [vmem:[#allocation67_spill] sm:$0xff] }
 0x73f   : > { %v13687_v53 = vpack.c.bf16 %v13685_v37, %v13686_v36 }
 0x741   : > { %v4785_v33 = vpop.f32.mrf.mxu2 }
 0x742   : > { %v4786_v21 = vadd.f32 %v4785_v33, %v4305_v26  ;;  %v4874_v43 = vpop.f32.mrf.mxu3  ;;  %v13689_v26 = vld [vmem:[#allocation291_spill] sm:$0xff]  ;;  %v13692_v33 = vld [vmem:[#allocation149_spill] sm:$0xff] }
 0x743   : > { %v4308_v24 = vpop.f32.mrf.mxu1  ;;  %v13690_v44 = vpack.c.bf16 %v13688_v2, %v13689_v26  ;;  %v13704_v2 = vld [vmem:[#allocation154_spill] sm:$0xff] }
 0x744   : > { %v4875_v0 = vadd.f32 %v4874_v43, %v4786_v21 }
 0x745   : > { %v4966_v12 = vpop.f32.mrf.mxu0 }
 0x746   : > { %5014 = vmatmul.bf16.gmra.mxu1 %v13679_v23  ;;  %5103 = vmatmul.bf16.gmra.mxu2 %v13681_v30  ;;  %v11530_v32 = vadd.f32 %v4963_v47, %v4875_v0  ;;  %v13691_v47 = vld [vmem:[#allocation152_spill] sm:$0xff]  ;;  %v13695_v0 = vld [vmem:[#allocation153_spill] sm:$0xff]  ;;  %v13699_v23 = vpack.c.bf16 %v13697_v41, %v13698_v56 }
 0x747   : > { %5192 = vmatmul.bf16.gmra.mxu3 %v13684_v59  ;;  %v13693_v21 = vpack.c.bf16 %v13691_v47, %v13692_v33  ;;  %v13707_v47 = vld [vmem:[#allocation158_spill] sm:$0xff]  ;;  %v13709_v33 = vld [vmem:[#allocation159_spill] sm:$0xff] }
 0x748   : > { %5281 = vmatmul.bf16.gmra.mxu0 %v13687_v53 }
 0x749   : > { %v4788_v7 = vpop.f32.mrf.mxu2 }
 0x74a   : > { %v4789_v5 = vadd.f32 %v4788_v7, %v4308_v24  ;;  %v4877_v14 = vpop.f32.mrf.mxu3  ;;  %v13694_v24 = vld [vmem:[#allocation156_spill] sm:$0xff] }
 0x74b   : > { %v4311_v34 = vpop.f32.mrf.mxu1 }
 0x74c   : > { %v4878_v3 = vadd.f32 %v4877_v14, %v4789_v5 }
 0x74d   : > { %v4968_v63 = vpop.f32.mrf.mxu0 }
 0x74e   : > { %v11538_v13 = vadd.f32 %v4966_v12, %v4878_v3  ;;  %v13696_v12 = vpack.c.bf16 %v13694_v24, %v13695_v0 }
 0x751   : > { %v4790_v25 = vpop.f32.mrf.mxu2 }
 0x752   : > { %v4791_v4 = vadd.f32 %v4790_v25, %v4311_v34  ;;  %v4879_v8 = vpop.f32.mrf.mxu3  ;;  %v13700_v25 = vld [vmem:[#allocation88_spill] sm:$0xff] }
 0x753   : > { %v4314_v45 = vpop.f32.mrf.mxu1 }
 0x754   : > { %v4880_v16 = vadd.f32 %v4879_v8, %v4791_v4  ;;  %v13701_v4 = vld [vmem:[#allocation85_spill] sm:$0xff] }
 0x755   : > { %v4971_v19 = vpop.f32.mrf.mxu0  ;;  %v13702_v8 = vpack.c.bf16 %v13700_v25, %v13701_v4  ;;  %v13715_v25 = vld [vmem:[#allocation162_spill] sm:$0xff] }
 0x756   : > { %5019 = vmatmul.bf16.gmra.mxu1 %v13690_v44  ;;  %5108 = vmatmul.bf16.gmra.mxu2 %v13693_v21  ;;  %v11546_v43 = vadd.f32 %v4968_v63, %v4880_v16  ;;  %v13703_v16 = vld [vmem:[#allocation157_spill] sm:$0xff]  ;;  %v13710_v21 = vld [vmem:[#allocation76_spill] sm:$0xff]  ;;  %v13716_v4 = vpack.c.bf16 %v10832_v54, %v13715_v25 }
 0x757   : > { %5197 = vmatmul.bf16.gmra.mxu3 %v13696_v12  ;;  %v13705_v26 = vpack.c.bf16 %v13703_v16, %v13704_v2  ;;  %v13706_v44 = vld [vmem:[#allocation161_spill] sm:$0xff]  ;;  %v13711_v24 = vpack.c.bf16 %v13709_v33, %v13710_v21  ;;  %v13720_v2 = vld [vmem:[#allocation167_spill] sm:$0xff]  ;;  %v13729_v25 = vld [vmem:[#allocation168_spill] sm:$0xff] }
 0x758   : > { %5286 = vmatmul.bf16.gmra.mxu0 %v13699_v23  ;;  %v13718_v16 = vld [vmem:[#allocation41_spill] sm:$0xff] }
 0x759   : > { %v4793_v30 = vpop.f32.mrf.mxu2 }
 0x75a   : > { %v4794_v9 = vadd.f32 %v4793_v30, %v4314_v45  ;;  %v4882_v60 = vpop.f32.mrf.mxu3 }
 0x75b   : > { %v4317_v59 = vpop.f32.mrf.mxu1 }
 0x75c   : > { %v4883_v37 = vadd.f32 %v4882_v60, %v4794_v9 }
 0x75d   : > { %v4973_v36 = vpop.f32.mrf.mxu0 }
 0x75e   : > { %v11554_v53 = vadd.f32 %v4971_v19, %v4883_v37  ;;  %v13708_v19 = vpack.c.bf16 %v13706_v44, %v13707_v47  ;;  %v7612_v47 = vld [vmem:[#allocation10 + $0x1e0] sm:$0xff] }
 0x75f   : > { %5360 = vmatpush.bf16.msra.mxu1 %v7612_v47 }
 0x761   : > { %v4795_v7 = vpop.f32.mrf.mxu2 }
 0x762   : > { %v4796_v5 = vadd.f32 %v4795_v7, %v4317_v59  ;;  %v4884_v14 = vpop.f32.mrf.mxu3 }
 0x763   : > { %v4320_v34 = vpop.f32.mrf.mxu1 }
 0x764   : > { %v4885_v3 = vadd.f32 %v4884_v14, %v4796_v5  ;;  %v13712_v5 = vld [vmem:[#allocation95_spill] sm:$0xff]  ;;  %v13713_v14 = vld [vmem:[#allocation92_spill] sm:$0xff] }
 0x765   : > { %v4976_v63 = vpop.f32.mrf.mxu0 }
 0x766   : > { %5024 = vmatmul.bf16.gmra.mxu1 %v13702_v8  ;;  %5113 = vmatmul.bf16.gmra.mxu2 %v13705_v26  ;;  %v11562_v45 = vadd.f32 %v4973_v36, %v4885_v3  ;;  %v13714_v3 = vpack.c.bf16 %v13712_v5, %v13713_v14  ;;  %v13717_v8 = vld [vmem:[#allocation44_spill] sm:$0xff]  ;;  %v13726_v14 = vld [vmem:[#allocation47_spill] sm:$0xff] }
 0x767   : > { %5202 = vmatmul.bf16.gmra.mxu3 %v13708_v19  ;;  %v13721_v26 = vld [vmem:[#allocation164_spill] sm:$0xff] }
 0x768   : > { %5291 = vmatmul.bf16.gmra.mxu0 %v13711_v24  ;;  %v13722_v44 = vpack.c.bf16 %v13720_v2, %v13721_v26 }
 0x769   : > { %v4798_v0 = vpop.f32.mrf.mxu2 }
 0x76a   : > { %v4799_v12 = vadd.f32 %v4798_v0, %v4320_v34  ;;  %v4887_v41 = vpop.f32.mrf.mxu3 }
 0x76b   : > { %v4323_v56 = vpop.f32.mrf.mxu1 }
 0x76c   : > { %v4888_v23 = vadd.f32 %v4887_v41, %v4799_v12 }
 0x76d   : > { %v4978_v58 = vpop.f32.mrf.mxu0 }
 0x76e   : > { %v11570_v30 = vadd.f32 %v4976_v63, %v4888_v23  ;;  %v13719_v63 = vpack.c.bf16 %v13717_v8, %v13718_v16 }
 0x771   : > { %v4800_v9 = vpop.f32.mrf.mxu2 }
 0x772   : > { %v4801_v60 = vadd.f32 %v4800_v9, %v4323_v56  ;;  %v4889_v59 = vpop.f32.mrf.mxu3 }
 0x773   : > { %v4326_v37 = vpop.f32.mrf.mxu1 }
 0x774   : > { %v4890_v36 = vadd.f32 %v4889_v59, %v4801_v60  ;;  %v13723_v59 = vld [vmem:[#allocation142_spill] sm:$0xff] }
 0x775   : > { %v4981_v7 = vpop.f32.mrf.mxu0 }
 0x776   : > { %5029 = vmatmul.bf16.gmra.mxu1 %v13714_v3  ;;  %5118 = vmatmul.bf16.gmra.mxu2 %v13716_v4  ;;  %v11578_v34 = vadd.f32 %v4978_v58, %v4890_v36  ;;  %v13724_v36 = vld [vmem:[#allocation139_spill] sm:$0xff]  ;;  %v13727_v3 = vpack.c.bf16 %v10876_v18, %v13726_v14  ;;  %v13730_v4 = vld [vmem:[#allocation166_spill] sm:$0xff]  ;;  %v13742_v14 = vld [vmem:[#allocation173_spill] sm:$0xff] }
 0x777   : > { %5207 = vmatmul.bf16.gmra.mxu3 %v13719_v63  ;;  %v13725_v5 = vpack.c.bf16 %v13723_v59, %v13724_v36  ;;  %v13731_v8 = vpack.c.bf16 %v13729_v25, %v13730_v4  ;;  %v13738_v59 = vld [vmem:[#allocation176_spill] sm:$0xff]  ;;  %v13739_v36 = vld [vmem:[#allocation50_spill] sm:$0xff] }
 0x778   : > { %5296 = vmatmul.bf16.gmra.mxu0 %v13722_v44 }
 0x779   : > { %v4803_v19 = vpop.f32.mrf.mxu2 }
 0x77a   : > { %v4804_v33 = vadd.f32 %v4803_v19, %v4326_v37  ;;  %v4892_v21 = vpop.f32.mrf.mxu3 }
 0x77b   : > { %v4329_v24 = vpop.f32.mrf.mxu1 }
 0x77c   : > { %v4893_v0 = vadd.f32 %v4892_v21, %v4804_v33 }
 0x77d   : > { %v4983_v12 = vpop.f32.mrf.mxu0 }
 0x77e   : > { %v11586_v54 = vadd.f32 %v4981_v7, %v4893_v0  ;;  %v13728_v7 = vpack.c.bf16 %v10888_v62, %v10868_v10  ;;  %v13732_v10 = vld [vmem:[#allocation106_spill] sm:$0xff]  ;;  %v13733_v62 = vld [vmem:[#allocation103_spill] sm:$0xff] }
 0x781   : > { %v4805_v41 = vpop.f32.mrf.mxu2 }
 0x782   : > { %v4806_v56 = vadd.f32 %v4805_v41, %v4329_v24  ;;  %v4894_v23 = vpop.f32.mrf.mxu3  ;;  %v13734_v41 = vpack.c.bf16 %v13732_v10, %v13733_v62  ;;  %v13744_v10 = vld [vmem:[#allocation112_spill] sm:$0xff]  ;;  %v13745_v62 = vld [vmem:[#allocation109_spill] sm:$0xff] }
 0x783   : > { %v4332_v58 = vpop.f32.mrf.mxu1 }
 0x784   : > { %v4895_v9 = vadd.f32 %v4894_v23, %v4806_v56  ;;  %v13735_v56 = vld [vmem:[#allocation172_spill] sm:$0xff]  ;;  %v13736_v23 = vld [vmem:[#allocation171_spill] sm:$0xff] }
 0x785   : > { %v4986_v60 = vpop.f32.mrf.mxu0 }
 0x786   : > { %5034 = vmatmul.bf16.gmra.mxu1 %v13725_v5  ;;  %5123 = vmatmul.bf16.gmra.mxu2 %v13727_v3  ;;  %v11594_v37 = vadd.f32 %v4983_v12, %v4895_v9  ;;  %v13737_v9 = vpack.c.bf16 %v13735_v56, %v13736_v23  ;;  %v13741_v5 = vld [vmem:[#allocation174_spill] sm:$0xff]  ;;  %v13748_v23 = vld [vmem:[#allocation177_spill] sm:$0xff] }
 0x787   : > { %5212 = vmatmul.bf16.gmra.mxu3 %v13728_v7  ;;  %v13743_v3 = vpack.c.bf16 %v13741_v5, %v13742_v14  ;;  %v7611_v7 = vld [vmem:[#allocation10 + $0x1d8] sm:$0xff]  ;;  %v13747_v56 = vld [vmem:[#allocation178_spill] sm:$0xff] }
 0x788   : > { %5301 = vmatmul.bf16.gmra.mxu0 %v13731_v8  ;;  %5361 = vmatpush.bf16.msra.mxu1 %v7611_v7  ;;  %v13754_v5 = vld [vmem:[#allocation179_spill] sm:$0xff] }
 0x789   : > { %v4808_v16 = vpop.f32.mrf.mxu2 }
 0x78a   : > { %v4809_v63 = vadd.f32 %v4808_v16, %v4332_v58  ;;  %v4897_v2 = vpop.f32.mrf.mxu3 }
 0x78b   : > { %v4335_v26 = vpop.f32.mrf.mxu1 }
 0x78c   : > { %v4898_v44 = vadd.f32 %v4897_v2, %v4809_v63 }
 0x78d   : > { %v4988_v47 = vpop.f32.mrf.mxu0 }
 0x78e   : > { %v11602_v19 = vadd.f32 %v4986_v60, %v4898_v44  ;;  %v13740_v60 = vpack.c.bf16 %v13738_v59, %v13739_v36  ;;  %v13750_v59 = vld [vmem:[#allocation182_spill] sm:$0xff]  ;;  %v13751_v36 = vld [vmem:[#allocation56_spill] sm:$0xff] }
 0x791   : > { %v4810_v18 = vpop.f32.mrf.mxu2 }
 0x792   : > { %v4811_v33 = vadd.f32 %v4810_v18, %v4335_v26  ;;  %v4899_v21 = vpop.f32.mrf.mxu3 }
 0x793   : > { %v4338_v24 = vpop.f32.mrf.mxu1 }
 0x794   : > { %v4900_v0 = vadd.f32 %v4899_v21, %v4811_v33 }
 0x795   : > { %v4991_v12 = vpop.f32.mrf.mxu0 }
 0x796   : > { %5039 = vmatmul.bf16.gmra.mxu1 %v13734_v41  ;;  %5128 = vmatmul.bf16.gmra.mxu2 %v13737_v9  ;;  %v11610_v58 = vadd.f32 %v4988_v47, %v4900_v0  ;;  %v13746_v41 = vpack.c.bf16 %v13744_v10, %v13745_v62  ;;  %v13749_v9 = vpack.c.bf16 %v13747_v56, %v13748_v23  ;;  %v13757_v56 = vld [vmem:[#allocation115_spill] sm:$0xff] }
 0x797   : > { %5217 = vmatmul.bf16.gmra.mxu3 %v13740_v60  ;;  %v13753_v60 = vld [vmem:[#allocation180_spill] sm:$0xff] }
 0x798   : > { %5306 = vmatmul.bf16.gmra.mxu0 %v13743_v3  ;;  %v13755_v14 = vpack.c.bf16 %v13753_v60, %v13754_v5  ;;  %v13765_v5 = vld [vmem:[#allocation186_spill] sm:$0xff] }
 0x799   : > { %v4813_v25 = vpop.f32.mrf.mxu2 }
 0x79a   : > { %v4814_v4 = vadd.f32 %v4813_v25, %v4338_v24  ;;  %v4902_v8 = vpop.f32.mrf.mxu3 }
 0x79b   : > { %v4341_v16 = vpop.f32.mrf.mxu1 }
 0x79c   : > { %v4903_v63 = vadd.f32 %v4902_v8, %v4814_v4 }
 0x79d   : > { %v4993_v2 = vpop.f32.mrf.mxu0 }
 0x79e   : > { %v11618_v26 = vadd.f32 %v4991_v12, %v4903_v63  ;;  %v13752_v12 = vpack.c.bf16 %v13750_v59, %v13751_v36 }
 0x7a1   : > { %v4815_v44 = vpop.f32.mrf.mxu2 }
 0x7a2   : > { %v4816_v47 = vadd.f32 %v4815_v44, %v4341_v16  ;;  %v4904_v18 = vpop.f32.mrf.mxu3 }
 0x7a3   : > { %v4344_v33 = vpop.f32.mrf.mxu1 }
 0x7a4   : > { %v4905_v21 = vadd.f32 %v4904_v18, %v4816_v47 }
 0x7a5   : > { %v4996_v0 = vpop.f32.mrf.mxu0 }
 0x7a6   : > { %5044 = vmatmul.bf16.gmra.mxu1 %v13746_v41  ;;  %5133 = vmatmul.bf16.gmra.mxu2 %v13749_v9  ;;  %v11626_v24 = vadd.f32 %v4993_v2, %v4905_v21  ;;  %v13756_v41 = vld [vmem:[#allocation118_spill] sm:$0xff] }
 0x7a7   : > { %5222 = vmatmul.bf16.gmra.mxu3 %v13752_v12  ;;  %v13758_v23 = vpack.c.bf16 %v13756_v41, %v13757_v56  ;;  %v13759_v9 = vld [vmem:[#allocation62_spill] sm:$0xff]  ;;  %v13763_v12 = vld [vmem:[#allocation185_spill] sm:$0xff] }
 0x7a8   : > { %5311 = vmatmul.bf16.gmra.mxu0 %v13755_v14  ;;  %v13766_v14 = vld [vmem:[#allocation183_spill] sm:$0xff] }
 0x7a9   : > { %v4818_v3 = vpop.f32.mrf.mxu2 }
 0x7aa   : > { %v4819_v7 = vadd.f32 %v4818_v3, %v4344_v33  ;;  %v4907_v25 = vpop.f32.mrf.mxu3  ;;  %v13760_v33 = vld [vmem:[#allocation184_spill] sm:$0xff]  ;;  %v13767_v3 = vpack.c.bf16 %v13765_v5, %v13766_v14  ;;  %v13775_v14 = vld [vmem:[#allocation191_spill] sm:$0xff] }
 0x7ab   : > { %v4347_v4 = vpop.f32.mrf.mxu1  ;;  %v13761_v59 = vpack.c.bf16 %v13759_v9, %v13760_v33 }
 0x7ac   : > { %v4908_v8 = vadd.f32 %v4907_v25, %v4819_v7 }
 0x7ad   : > { %v4998_v16 = vpop.f32.mrf.mxu0 }
 0x7ae   : > { %v11634_v63 = vadd.f32 %v4996_v0, %v4908_v8  ;;  %v13762_v0 = vld [vmem:[#allocation188_spill] sm:$0xff] }
 0x7af   : > { %v13764_v60 = vpack.c.bf16 %v13762_v0, %v13763_v12  ;;  %v13769_v0 = vld [vmem:[#allocation36_spill] sm:$0xff] }
 0x7b1   : > { %v4820_v44 = vpop.f32.mrf.mxu2 }
 0x7b2   : > { %v4821_v47 = vadd.f32 %v4820_v44, %v4347_v4  ;;  %v4909_v2 = vpop.f32.mrf.mxu3 }
 0x7b3   : > { %v5010_v18 = vpop.f32.mrf.mxu1 }
 0x7b4   : > { %v4910_v21 = vadd.f32 %v4909_v2, %v4821_v47  ;;  %v5011_v10 = vadd.f32 %v5010_v18, %v11401_v27  ;;  %v7610_v27 = vld [vmem:[#allocation10 + $0x1d0] sm:$0xff] }
 0x7b5   : > { %v5277_v62 = vpop.f32.mrf.mxu0  ;;  %5362 = vmatpush.bf16.msra.mxu1 %v7610_v27  ;;  %v13777_v27 = vld [vmem:[#allocation192_spill] sm:$0xff] }
 0x7b6   : > { %5049 = vmatmul.bf16.gmra.mxu1 %v13758_v23  ;;  %5138 = vmatmul.bf16.gmra.mxu2 %v13761_v59  ;;  %v11643_v36 = vadd.f32 %v4998_v16, %v4910_v21  ;;  %v13768_v59 = vld [vmem:[#allocation37_spill] sm:$0xff] }
 0x7b7   : > { %5227 = vmatmul.bf16.gmra.mxu3 %v13764_v60  ;;  %v13770_v12 = vpack.c.bf16 %v13768_v59, %v13769_v0  ;;  %v13772_v60 = vld [vmem:[#allocation190_spill] sm:$0xff] }
 0x7b8   : > { %5316 = vmatmul.bf16.gmra.mxu0 %v13767_v3 }
 0x7b9   : > { %v5099_v7 = vpop.f32.mrf.mxu2 }
 0x7ba   : > { %v5100_v25 = vadd.f32 %v5099_v7, %v5011_v10  ;;  %v5188_v4 = vpop.f32.mrf.mxu3  ;;  %v13771_v10 = vld [vmem:[#allocation68_spill] sm:$0xff]  ;;  %v13778_v7 = vld [vmem:[#allocation189_spill] sm:$0xff] }
 0x7bb   : > { %v5012_v8 = vpop.f32.mrf.mxu1  ;;  %v13773_v5 = vpack.c.bf16 %v13771_v10, %v13772_v60  ;;  %v13780_v10 = vld [vmem:[#allocation122_spill] sm:$0xff] }
 0x7bc   : > { %v5189_v44 = vadd.f32 %v5188_v4, %v5100_v25  ;;  %v5013_v47 = vadd.f32 %v5012_v8, %v11407_v50  ;;  %v13779_v25 = vpack.c.bf16 %v13777_v27, %v13778_v7  ;;  %v13781_v60 = vld [vmem:[#allocation42_spill] sm:$0xff]  ;;  %v13787_v27 = vld [vmem:[#allocation197_spill] sm:$0xff] }
 0x7bd   : > { %v5279_v2 = vpop.f32.mrf.mxu0 }
 0x7be   : > { %v11652_v16 = vadd.f32 %v5277_v62, %v5189_v44  ;;  %v13774_v62 = vld [vmem:[#allocation194_spill] sm:$0xff] }
 0x7bf   : > { %v13776_v3 = vpack.c.bf16 %v13774_v62, %v13775_v14  ;;  %v13784_v62 = vld [vmem:[#allocation196_spill] sm:$0xff] }
 0x7c1   : > { %v5101_v18 = vpop.f32.mrf.mxu2 }
 0x7c2   : > { %v5102_v21 = vadd.f32 %v5101_v18, %v5013_v47  ;;  %v5190_v41 = vpop.f32.mrf.mxu3 }
 0x7c3   : > { %v5015_v56 = vpop.f32.mrf.mxu1 }
 0x7c4   : > { %v5191_v23 = vadd.f32 %v5190_v41, %v5102_v21  ;;  %v5016_v9 = vadd.f32 %v5015_v56, %v11416_v46 }
 0x7c5   : > { %v5282_v33 = vpop.f32.mrf.mxu0 }
 0x7c6   : > { %5054 = vmatmul.bf16.gmra.mxu1 %v13770_v12  ;;  %5143 = vmatmul.bf16.gmra.mxu2 %v13773_v5  ;;  %v11661_v50 = vadd.f32 %v5279_v2, %v5191_v23  ;;  %v13782_v5 = vpack.c.bf16 %v13780_v10, %v13781_v60 }
 0x7c7   : > { %5232 = vmatmul.bf16.gmra.mxu3 %v13776_v3 }
 0x7c8   : > { %5321 = vmatmul.bf16.gmra.mxu0 %v13779_v25  ;;  %v13789_v25 = vld [vmem:[#allocation198_spill] sm:$0xff] }
 0x7c9   : > { %v5104_v46 = vpop.f32.mrf.mxu2 }
 0x7ca   : > { %v5105_v4 = vadd.f32 %v5104_v46, %v5016_v9  ;;  %v5193_v8 = vpop.f32.mrf.mxu3  ;;  %v13783_v9 = vld [vmem:[#allocation74_spill] sm:$0xff]  ;;  %v13790_v46 = vld [vmem:[#allocation195_spill] sm:$0xff] }
 0x7cb   : > { %v5017_v44 = vpop.f32.mrf.mxu1  ;;  %v13785_v14 = vpack.c.bf16 %v13783_v9, %v13784_v62  ;;  %v13792_v62 = vld [vmem:[#allocation126_spill] sm:$0xff] }
 0x7cc   : > { %v5194_v47 = vadd.f32 %v5193_v8, %v5105_v4  ;;  %v5018_v18 = vadd.f32 %v5017_v44, %v11422_v29  ;;  %v13791_v4 = vpack.c.bf16 %v13789_v25, %v13790_v46 }
 0x7cd   : > { %v5284_v21 = vpop.f32.mrf.mxu0 }
 0x7ce   : > { %v11670_v41 = vadd.f32 %v5282_v33, %v5194_v47  ;;  %v13786_v33 = vld [vmem:[#allocation200_spill] sm:$0xff] }
 0x7cf   : > { %v13788_v7 = vpack.c.bf16 %v13786_v33, %v13787_v27  ;;  %v13796_v27 = vld [vmem:[#allocation202_spill] sm:$0xff] }
 0x7d1   : > { %v5106_v2 = vpop.f32.mrf.mxu2 }
 0x7d2   : > { %v5107_v56 = vadd.f32 %v5106_v2, %v5018_v18  ;;  %v5195_v23 = vpop.f32.mrf.mxu3 }
 0x7d3   : > { %v5020_v59 = vpop.f32.mrf.mxu1 }
 0x7d4   : > { %v5196_v0 = vadd.f32 %v5195_v23, %v5107_v56  ;;  %v5021_v12 = vadd.f32 %v5020_v59, %v11431_v31  ;;  %v7609_v31 = vld [vmem:[#allocation10 + $0x1c8] sm:$0xff] }
 0x7d5   : > { %v5287_v29 = vpop.f32.mrf.mxu0  ;;  %5363 = vmatpush.bf16.msra.mxu1 %v7609_v31  ;;  %v13802_v31 = vld [vmem:[#allocation201_spill] sm:$0xff] }
 0x7d6   : > { %5059 = vmatmul.bf16.gmra.mxu1 %v13782_v5  ;;  %5148 = vmatmul.bf16.gmra.mxu2 %v13785_v14  ;;  %v11679_v3 = vadd.f32 %v5284_v21, %v5196_v0  ;;  %v13793_v14 = vld [vmem:[#allocation124_spill] sm:$0xff] }
 0x7d7   : > { %5237 = vmatmul.bf16.gmra.mxu3 %v13788_v7  ;;  %v13794_v33 = vpack.c.bf16 %v13792_v62, %v13793_v14 }
 0x7d8   : > { %5326 = vmatmul.bf16.gmra.mxu0 %v13791_v4  ;;  %v13801_v4 = vld [vmem:[#allocation204_spill] sm:$0xff] }
 0x7d9   : > { %v5109_v8 = vpop.f32.mrf.mxu2 }
 0x7da   : > { %v5110_v44 = vadd.f32 %v5109_v8, %v5021_v12  ;;  %v5198_v47 = vpop.f32.mrf.mxu3  ;;  %v13795_v12 = vld [vmem:[#allocation78_spill] sm:$0xff]  ;;  %v13803_v8 = vpack.c.bf16 %v13801_v4, %v13802_v31  ;;  %v13811_v4 = vld [vmem:[#allocation209_spill] sm:$0xff] }
 0x7db   : > { %v5022_v18 = vpop.f32.mrf.mxu1  ;;  %v13797_v7 = vpack.c.bf16 %v13795_v12, %v13796_v27  ;;  %v13804_v12 = vld [vmem:[#allocation45_spill] sm:$0xff]  ;;  %v13805_v27 = vld [vmem:[#allocation43_spill] sm:$0xff] }
 0x7dc   : > { %v5199_v2 = vadd.f32 %v5198_v47, %v5110_v44  ;;  %v5023_v56 = vadd.f32 %v5022_v18, %v11437_v1  ;;  %v13798_v1 = vld [vmem:[#allocation206_spill] sm:$0xff] }
 0x7dd   : > { %v5289_v23 = vpop.f32.mrf.mxu0 }
 0x7de   : > { %v11688_v21 = vadd.f32 %v5287_v29, %v5199_v2  ;;  %v13799_v29 = vld [vmem:[#allocation203_spill] sm:$0xff] }
 0x7df   : > { %v13800_v46 = vpack.c.bf16 %v13798_v1, %v13799_v29  ;;  %v13808_v1 = vld [vmem:[#allocation208_spill] sm:$0xff] }
 0x7e1   : > { %v5111_v59 = vpop.f32.mrf.mxu2 }
 0x7e2   : > { %v5112_v0 = vadd.f32 %v5111_v59, %v5023_v56  ;;  %v5200_v10 = vpop.f32.mrf.mxu3 }
 0x7e3   : > { %v5025_v60 = vpop.f32.mrf.mxu1 }
 0x7e4   : > { %v5201_v5 = vadd.f32 %v5200_v10, %v5112_v0  ;;  %v5026_v9 = vadd.f32 %v5025_v60, %v11446_v39 }
 0x7e5   : > { %v5292_v18 = vpop.f32.mrf.mxu0 }
 0x7e6   : > { %5064 = vmatmul.bf16.gmra.mxu1 %v13794_v33  ;;  %5153 = vmatmul.bf16.gmra.mxu2 %v13797_v7  ;;  %v11697_v25 = vadd.f32 %v5289_v23, %v5201_v5  ;;  %v13807_v7 = vld [vmem:[#allocation80_spill] sm:$0xff] }
 0x7e7   : > { %5242 = vmatmul.bf16.gmra.mxu3 %v13800_v46  ;;  %v13809_v29 = vpack.c.bf16 %v13807_v7, %v13808_v1  ;;  %v13810_v46 = vld [vmem:[#allocation217_spill] sm:$0xff]  ;;  %v13826_v7 = vld [vmem:[#allocation276_spill] sm:$0xff] }
 0x7e8   : > { %5331 = vmatmul.bf16.gmra.mxu0 %v13803_v8  ;;  %v13812_v31 = vpack.c.bf16 %v13810_v46, %v13811_v4  ;;  %v13813_v8 = vld [vmem:[#allocation274_spill] sm:$0xff] }
 0x7e9   : > { %v5114_v44 = vpop.f32.mrf.mxu2  ;;  %v13828_v4 = vld [vmem:[#allocation54_spill] sm:$0xff] }
 0x7ea   : > { %v5115_v39 = vadd.f32 %v5114_v44, %v5026_v9  ;;  %v5203_v47 = vpop.f32.mrf.mxu3  ;;  %v13806_v9 = vpack.c.bf16 %v13804_v12, %v13805_v27  ;;  %v13814_v44 = vld [vmem:[#allocation207_spill] sm:$0xff]  ;;  %v13823_v12 = vld [vmem:[#allocation212_spill] sm:$0xff] }
 0x7eb   : > { %v5027_v2 = vpop.f32.mrf.mxu1 }
 0x7ec   : > { %v5204_v56 = vadd.f32 %v5203_v47, %v5115_v39  ;;  %v5028_v59 = vadd.f32 %v5027_v2, %v11452_v51  ;;  %v13815_v39 = vpack.c.bf16 %v13813_v8, %v13814_v44  ;;  %v13831_v44 = vpack.c.bf16 %v11320_v61, %v11318_v15 }
 0x7ed   : > { %v5294_v33 = vpop.f32.mrf.mxu0  ;;  %v13841_v61 = vpack.c.bf16 %v11371_v17, %v11369_v57 }
 0x7ee   : > { %v11706_v0 = vadd.f32 %v5292_v18, %v5204_v56 }
 0x7f1   : > { %v5116_v23 = vpop.f32.mrf.mxu2 }
 0x7f2   : > { %v5117_v10 = vadd.f32 %v5116_v23, %v5028_v59  ;;  %v5205_v60 = vpop.f32.mrf.mxu3  ;;  %v13816_v59 = vld [vmem:[#allocation132_spill] sm:$0xff]  ;;  %v13817_v23 = vld [vmem:[#allocation129_spill] sm:$0xff] }
 0x7f3   : > { %v5030_v5 = vpop.f32.mrf.mxu1 }
 0x7f4   : > { %v5206_v62 = vadd.f32 %v5205_v60, %v5117_v10  ;;  %v11709_v14 = vadd.f32 %v5030_v5, %v11461_v52  ;;  %v7608_v52 = vld [vmem:[#allocation10 + $0x1c0] sm:$0xff]  ;;  %v13818_v10 = vpack.c.bf16 %v13816_v59, %v13817_v23  ;;  %v13819_v60 = vld [vmem:[#allocation279_spill] sm:$0xff]  ;;  %v13836_v59 = vld [vmem:[#allocation213_spill] sm:$0xff] }
 0x7f5   : > { %5364 = vmatpush.bf16.msra.mxu1 %v7608_v52  ;;  %v13820_v5 = vld [vmem:[#allocation272_spill] sm:$0xff]  ;;  %v13833_v52 = vld [vmem:[#allocation215_spill] sm:$0xff] }
 0x7f6   : > { %5069 = vmatmul.bf16.gmra.mxu1 %v13806_v9  ;;  %5158 = vmatmul.bf16.gmra.mxu2 %v13809_v29  ;;  %v11717_v51 = vadd.f32 %v5294_v33, %v5206_v62  ;;  %v13821_v62 = vpack.c.bf16 %v13819_v60, %v13820_v5  ;;  %v13822_v33 = vld [vmem:[#allocation210_spill] sm:$0xff]  ;;  %v13825_v9 = vld [vmem:[#allocation211_spill] sm:$0xff] }
 0x7f7   : > { %5247 = vmatmul.bf16.gmra.mxu3 %v13812_v31  ;;  %v13824_v27 = vpack.c.bf16 %v13822_v33, %v13823_v12  ;;  %v13829_v31 = vld [vmem:[#allocation135_spill] sm:$0xff]  ;;  %v13838_v5 = vld [vmem:[#allocation58_spill] sm:$0xff]  ;;  %v13842_v33 = vpack.c.bf16 %v11382_v48, %v11363_v22 }
 0x7f8   : > { %5336 = vmatmul.bf16.gmra.mxu0 %v13815_v39  ;;  %v13830_v8 = vpack.c.bf16 %v13828_v4, %v13829_v31  ;;  %v13832_v39 = vld [vmem:[#allocation82_spill] sm:$0xff] }
 0x7fb   : > { %v5032_v47 = vpop.f32.mrf.mxu1 }
 0x7fc   : > { %v11726_v18 = vadd.f32 %v5032_v47, %v11467_v49  ;;  %v13827_v49 = vpack.c.bf16 %v13825_v9, %v13826_v7  ;;  %v13834_v47 = vpack.c.bf16 %v13832_v39, %v13833_v52  ;;  %v13844_v7 = vld [vmem:[#allocation147_spill] sm:$0xff] }
 0x803   : > { %v5035_v2 = vpop.f32.mrf.mxu1 }
 0x804   : > { %v11729_v56 = vadd.f32 %v5035_v2, %v11476_v20  ;;  %v13835_v2 = vld [vmem:[#allocation84_spill] sm:$0xff] }
 0x806   : > { %5074 = vmatmul.bf16.gmra.mxu1 %v13818_v10  ;;  %5163 = vmatmul.bf16.gmra.mxu2 %v13821_v62  ;;  %v13839_v62 = vld [vmem:[#allocation137_spill] sm:$0xff] }
 0x807   : > { %5252 = vmatmul.bf16.gmra.mxu3 %v13824_v27  ;;  %v13840_v15 = vpack.c.bf16 %v13838_v5, %v13839_v62  ;;  %v13856_v5 = vld [vmem:[#allocation163_spill] sm:$0xff]  ;;  %v13857_v62 = vld [vmem:[#allocation160_spill] sm:$0xff] }
 0x808   : > { %5341 = vmatmul.bf16.gmra.mxu0 %v13827_v49  ;;  %v13845_v49 = vld [vmem:[#allocation61_spill] sm:$0xff] }
 0x809   : > { %v13846_v57 = vpack.c.bf16 %v13844_v7, %v13845_v49 }
 0x80b   : > { %v5037_v1 = vpop.f32.mrf.mxu1 }
 0x80c   : > { %v11744_v20 = vadd.f32 %v5037_v1, %v11482_v55  ;;  %v13837_v55 = vpack.c.bf16 %v13835_v2, %v13836_v59  ;;  %v13848_v1 = vld [vmem:[#allocation234_spill] sm:$0xff]  ;;  %v13854_v59 = vld [vmem:[#allocation75_spill] sm:$0xff] }
 0x80d   : > { %v13853_v2 = vld [vmem:[#allocation38_spill] sm:$0xff] }
 0x813   : > { %v5040_v29 = vpop.f32.mrf.mxu1 }
 0x814   : > { %v11747_v46 = vadd.f32 %v5040_v29, %v11491_v38 }
 0x816   : > { %5079 = vmatmul.bf16.gmra.mxu1 %v13830_v8  ;;  %5168 = vmatmul.bf16.gmra.mxu2 %v13831_v44  ;;  %v13850_v8 = vld [vmem:[#allocation72_spill] sm:$0xff]  ;;  %v13851_v44 = vld [vmem:[#allocation69_spill] sm:$0xff] }
 0x817   : > { %5257 = vmatmul.bf16.gmra.mxu3 %v13834_v47 }
 0x818   : > { %5346 = vmatmul.bf16.gmra.mxu0 %v13837_v55 }
 0x81b   : > { %v5042_v23 = vpop.f32.mrf.mxu1 }
 0x81c   : > { %v11762_v38 = vadd.f32 %v5042_v23, %v11497_v11  ;;  %v13843_v11 = vpack.c.bf16 %v11384_v28, %v11365_v35  ;;  %v13847_v28 = vld [vmem:[#allocation66_spill] sm:$0xff] }
 0x823   : > { %v5045_v10 = vpop.f32.mrf.mxu1 }
 0x824   : > { %v11765_v60 = vadd.f32 %v5045_v10, %v11506_v6 }
 0x826   : > { %5084 = vmatmul.bf16.gmra.mxu1 %v13840_v15  ;;  %5173 = vmatmul.bf16.gmra.mxu2 %v13841_v61 }
 0x827   : > { %5262 = vmatmul.bf16.gmra.mxu3 %v13842_v33 }
 0x828   : > { %5351 = vmatmul.bf16.gmra.mxu0 %v13843_v11  ;;  %v13859_v11 = vld [vmem:[#allocation170_spill] sm:$0xff] }
 0x82b   : > { %v5047_v12 = vpop.f32.mrf.mxu1 }
 0x82c   : > { %v11780_v6 = vadd.f32 %v5047_v12, %v11514_v42  ;;  %v13849_v42 = vpack.c.bf16 %v13847_v28, %v13848_v1  ;;  %v13860_v12 = vld [vmem:[#allocation165_spill] sm:$0xff] }
 0x833   : > { %v5050_v27 = vpop.f32.mrf.mxu1 }
 0x834   : > { %v11783_v9 = vadd.f32 %v5050_v27, %v11522_v40 }
 0x836   : > { %5365 = vmatmul.bf16.vlgmr.msra.gmra.mxu1 %v13846_v57  ;;  %v13862_v57 = vld [vmem:[#allocation53_spill] sm:$0xff] }
 0x83b   : > { %v5052_v17 = vpop.f32.mrf.mxu1 }
 0x83c   : > { %v11789_v22 = vadd.f32 %v5052_v17, %v11530_v32  ;;  %v13852_v32 = vpack.c.bf16 %v13850_v8, %v13851_v44 }
 0x843   : > { %v5055_v48 = vpop.f32.mrf.mxu1 }
 0x844   : > { %v11792_v35 = vadd.f32 %v5055_v48, %v11538_v13 }
 0x846   : > { %5370 = vmatmul.bf16.gmra.mxu1 %v13849_v42  ;;  %v13865_v42 = vld [vmem:[#allocation59_spill] sm:$0xff] }
 0x84b   : > { %v5057_v29 = vpop.f32.mrf.mxu1 }
 0x84c   : > { %v11798_v40 = vadd.f32 %v5057_v29, %v11546_v43  ;;  %v13855_v43 = vpack.c.bf16 %v13853_v2, %v13854_v59 }
 0x853   : > { %v5060_v4 = vpop.f32.mrf.mxu1 }
 0x854   : > { %v11801_v31 = vadd.f32 %v5060_v4, %v11554_v53 }
 0x856   : > { %5375 = vmatmul.bf16.gmra.mxu1 %v13852_v32  ;;  %v13868_v32 = vld [vmem:[#allocation65_spill] sm:$0xff] }
 0x85b   : > { %v5062_v39 = vpop.f32.mrf.mxu1 }
 0x85c   : > { %v11807_v13 = vadd.f32 %v5062_v39, %v11562_v45  ;;  %v13858_v45 = vpack.c.bf16 %v13856_v5, %v13857_v62  ;;  %v13869_v39 = vld [vmem:[#allocation181_spill] sm:$0xff] }
 0x863   : > { %v5065_v52 = vpop.f32.mrf.mxu1 }
 0x864   : > { %v11810_v47 = vadd.f32 %v5065_v52, %v11570_v30  ;;  %v7943_v52 = vld [vmem:[%s8464_s26] sm:$0xff] }
 0x866   : > { %5380 = vmatmul.bf16.gmra.mxu1 %v13855_v43 }
 0x86b   : > { %v5067_v55 = vpop.f32.mrf.mxu1 }
 0x86c   : > { %v11816_v53 = vadd.f32 %v5067_v55, %v11578_v34  ;;  %v13861_v34 = vpack.c.bf16 %v13859_v11, %v13860_v12  ;;  %v5208_v55 = vpop.f32.mrf.mxu3  ;;  %v7945_v12 = vld [vmem:[%s8464_s26 + $0x10] sm:$0xff] }
 0x873   : > { %v5070_v23 = vpop.f32.mrf.mxu1 }
 0x874   : > { %v11819_v10 = vadd.f32 %v5070_v23, %v11586_v54 }
 0x876   : > { %5385 = vmatmul.bf16.gmra.mxu1 %v13858_v45 }
 0x87b   : > { %v5072_v15 = vpop.f32.mrf.mxu1 }
 0x87c   : > { %v11825_v30 = vadd.f32 %v5072_v15, %v11594_v37  ;;  %v13863_v37 = vld [vmem:[#allocation169_spill] sm:$0xff]  ;;  %v13871_v15 = vld [vmem:[#allocation71_spill] sm:$0xff] }
 0x87d   : > { %v13864_v17 = vpack.c.bf16 %v13862_v57, %v13863_v37 }
 0x883   : > { %v5075_v61 = vpop.f32.mrf.mxu1 }
 0x884   : > { %v11828_v33 = vadd.f32 %v5075_v61, %v11602_v19  ;;  %v13872_v61 = vld [vmem:[#allocation187_spill] sm:$0xff] }
 0x885   : > { %v13873_v11 = vpack.c.bf16 %v13871_v15, %v13872_v61  ;;  %v13877_v61 = vld [vmem:[#allocation79_spill] sm:$0xff] }
 0x886   : > { %5390 = vmatmul.bf16.gmra.mxu1 %v13861_v34 }
 0x88b   : > { %v5077_v27 = vpop.f32.mrf.mxu1 }
 0x88c   : > { %v11834_v54 = vadd.f32 %v5077_v27, %v11610_v58  ;;  %v13866_v58 = vld [vmem:[#allocation175_spill] sm:$0xff] }
 0x88d   : > { %v13867_v29 = vpack.c.bf16 %v13865_v42, %v13866_v58 }
 0x893   : > { %v5080_v7 = vpop.f32.mrf.mxu1 }
 0x894   : > { %v11837_v49 = vadd.f32 %v5080_v7, %v11618_v26 }
 0x896   : > { %5395 = vmatmul.bf16.gmra.mxu1 %v13864_v17  ;;  %v7946_v17 = vld [vmem:[%s8464_s26 + $0x18] sm:$0xff] }
 0x89b   : > { %v5082_v48 = vpop.f32.mrf.mxu1 }
 0x89c   : > { %v11843_v19 = vadd.f32 %v5082_v48, %v11626_v24  ;;  %v13870_v24 = vpack.c.bf16 %v13868_v32, %v13869_v39  ;;  %v7947_v32 = vld [vmem:[%s8464_s26 + $0x20] sm:$0xff] }
 0x8a3   : > { %v5085_v28 = vpop.f32.mrf.mxu1 }
 0x8a4   : > { %v11846_v1 = vadd.f32 %v5085_v28, %v11634_v63  ;;  %v5119_v63 = vpop.f32.mrf.mxu2 }
 0x8a6   : > { %5400 = vmatmul.bf16.gmra.mxu1 %v13867_v29 }
 0x8ab   : > { %v5087_v4 = vpop.f32.mrf.mxu1 }
 0x8ac   : > { %v11852_v26 = vadd.f32 %v5087_v4, %v11643_v36  ;;  %v7944_v36 = vld [vmem:[%s8464_s26 + $0x8] sm:$0xff]  ;;  %v5121_v5 = vpop.f32.mrf.mxu2  ;;  %v13874_v4 = vld [vmem:[#allocation77_spill] sm:$0xff] }
 0x8b3   : > { %v5366_v8 = vpop.f32.mrf.mxu1 }
 0x8b4   : > { %v5367_v44 = vadd.f32 %v5366_v8, %v11652_v16  ;;  %v5297_v16 = vpop.f32.mrf.mxu0  ;;  %v5124_v57 = vpop.f32.mrf.mxu2  ;;  %v13875_v8 = vld [vmem:[#allocation193_spill] sm:$0xff] }
 0x8b6   : > { %5405 = vmatmul.bf16.gmra.mxu1 %v13870_v24  ;;  %v11859_v2 = vadd.f32 %v7943_v52, %v5367_v44  ;;  %v13876_v44 = vpack.c.bf16 %v13874_v4, %v13875_v8 }
 0x8b8   : > { %5478 = vadd.xlane.f32.xlu1 %v11859_v2 }
 0x8bb   : > { %v5368_v59 = vpop.f32.mrf.mxu1 }
 0x8bc   : > { %v5369_v43 = vadd.f32 %v5368_v59, %v11661_v50  ;;  %v5210_v50 = vpop.f32.mrf.mxu3  ;;  %v5299_v7 = vpop.f32.mrf.mxu0  ;;  %v7948_v59 = vld [vmem:[%s8464_s26 + $0x28] sm:$0xff] }
 0x8bd   : > { %v5126_v29 = vpop.f32.mrf.mxu2 }
 0x8be   : > { %v11864_v23 = vadd.f32 %v7944_v36, %v5369_v43 }
 0x8c0   : > { %5480 = vadd.xlane.f32.xlu2 %v11864_v23 }
 0x8c3   : > { %v5371_v62 = vpop.f32.mrf.mxu1 }
 0x8c4   : > { %v5372_v45 = vadd.f32 %v5371_v62, %v11670_v41  ;;  %v5213_v41 = vpop.f32.mrf.mxu3  ;;  %v5302_v58 = vpop.f32.mrf.mxu0 }
 0x8c5   : > { %v5129_v36 = vpop.f32.mrf.mxu2 }
 0x8c6   : > { %5410 = vmatmul.bf16.gmra.mxu1 %v13873_v11  ;;  %v11872_v34 = vadd.f32 %v7945_v12, %v5372_v45  ;;  %v13878_v11 = vld [vmem:[#allocation199_spill] sm:$0xff] }
 0x8c7   : > { %v13879_v12 = vpack.c.bf16 %v13877_v61, %v13878_v11  ;;  %v13880_v61 = vld [vmem:[#allocation81_spill] sm:$0xff] }
 0x8c8   : > { %5482 = vadd.xlane.f32.xlu0 %v11872_v34  ;;  %v13881_v11 = vld [vmem:[#allocation205_spill] sm:$0xff] }
 0x8cb   : > { %v5373_v27 = vpop.f32.mrf.mxu1 }
 0x8cc   : > { %v5374_v37 = vadd.f32 %v5373_v27, %v11679_v3  ;;  %v5215_v24 = vpop.f32.mrf.mxu3  ;;  %v7949_v27 = vld [vmem:[%s8464_s26 + $0x30] sm:$0xff] }
 0x8ce   : > { %v11877_v48 = vadd.f32 %v7946_v17, %v5374_v37 }
 0x8d0   : > { %5484 = vadd.xlane.f32.xlu1 %v11877_v48 }
 0x8d3   : > { %v5376_v28 = vpop.f32.mrf.mxu1 }
 0x8d4   : > { %v5377_v42 = vadd.f32 %v5376_v28, %v11688_v21  ;;  %v5304_v21 = vpop.f32.mrf.mxu0  ;;  %v5218_v15 = vpop.f32.mrf.mxu3 }
 0x8d5   : > { %v5131_v28 = vpop.f32.mrf.mxu2 }
 0x8d6   : > { %5415 = vmatmul.bf16.gmra.mxu1 %v13876_v44  ;;  %v11885_v39 = vadd.f32 %v7947_v32, %v5377_v42 }
 0x8d8   : > { %5486 = vadd.xlane.f32.xlu2 %v11885_v39 }
 0x8db   : > { %v5378_v3 = vpop.f32.mrf.mxu1 }
 0x8dc   : > { %v5379_v52 = vadd.f32 %v5378_v3, %v11697_v25  ;;  %v5120_v25 = vadd.f32 %v5119_v63, %v11709_v14  ;;  %v5307_v17 = vpop.f32.mrf.mxu0  ;;  %v5220_v32 = vpop.f32.mrf.mxu3  ;;  %v5122_v3 = vadd.f32 %v5121_v5, %v11726_v18 }
 0x8dd   : > { %v5134_v14 = vpop.f32.mrf.mxu2 }
 0x8de   : > { %v11890_v43 = vadd.f32 %v7948_v59, %v5379_v52  ;;  %v5209_v8 = vadd.f32 %v5208_v55, %v5120_v25 }
 0x8e0   : > { %5488 = vadd.xlane.f32.xlu0 %v11890_v43  ;;  %v5298_v52 = vadd.f32 %v5297_v16, %v5209_v8 }
 0x8e3   : > { %v5381_v62 = vpop.f32.mrf.mxu1 }
 0x8e4   : > { %v5382_v45 = vadd.f32 %v5381_v62, %v11706_v0  ;;  %v7950_v0 = vld [vmem:[%s8464_s26 + $0x38] sm:$0xff]  ;;  %v5309_v62 = vpop.f32.mrf.mxu0  ;;  %v5223_v25 = vpop.f32.mrf.mxu3 }
 0x8e5   : > { %v5136_v8 = vpop.f32.mrf.mxu2 }
 0x8e6   : > { %5420 = vmatmul.bf16.gmra.mxu1 %v13879_v12  ;;  %v11898_v37 = vadd.f32 %v7949_v27, %v5382_v45  ;;  %v5211_v45 = vadd.f32 %v5210_v50, %v5122_v3  ;;  %v13882_v12 = vpack.c.bf16 %v13880_v61, %v13881_v11  ;;  %v5125_v27 = vadd.f32 %v5124_v57, %v11729_v56  ;;  %v7952_v50 = vld [vmem:[%s8464_s26 + $0x48] sm:$0xff] }
 0x8e7   : > { %v5127_v3 = vadd.f32 %v5126_v29, %v11744_v20 }
 0x8e8   : > { %5490 = vadd.xlane.f32.xlu1 %v11898_v37  ;;  %v5300_v18 = vadd.f32 %v5299_v7, %v5211_v45  ;;  %v13883_v7 = vld [vmem:[#allocation273_spill] sm:$0xff] }
 0x8e9   : > { %v5216_v57 = vadd.f32 %v5215_v24, %v5127_v3  ;;  %v13884_v45 = vld [vmem:[#allocation269_spill] sm:$0xff]  ;;  %v7954_v24 = vld [vmem:[%s8464_s26 + $0x58] sm:$0xff] }
 0x8ea   : > { %v13885_v61 = vpack.c.bf16 %v13883_v7, %v13884_v45  ;;  %v7955_v45 = vld [vmem:[%s8464_s26 + $0x60] sm:$0xff] }
 0x8eb   : > { %v5383_v42 = vpop.f32.mrf.mxu1  ;;  %v5305_v20 = vadd.f32 %v5304_v21, %v5216_v57  ;;  %v13887_v57 = vld [vmem:[#allocation218_spill] sm:$0xff] }
 0x8ec   : > { %v5384_v4 = vadd.f32 %v5383_v42, %v11717_v51  ;;  %v7951_v51 = vld [vmem:[%s8464_s26 + $0x40] sm:$0xff]  ;;  %v5214_v42 = vadd.f32 %v5213_v41, %v5125_v27  ;;  %v7953_v41 = vld [vmem:[%s8464_s26 + $0x50] sm:$0xff]  ;;  %v5130_v27 = vadd.f32 %v5129_v36, %v11747_v46 }
 0x8ee   : > { %v11904_v44 = vadd.f32 %v7950_v0, %v5384_v4  ;;  %v5312_v4 = vpop.f32.mrf.mxu0 }
 0x8f0   : > { %5492 = vadd.xlane.f32.xlu2 %v11904_v44 }
 0x8f3   : > { %v5386_v59 = vpop.f32.mrf.mxu1 }
 0x8f4   : > { %v5387_v63 = vadd.f32 %v5386_v59, %v5298_v52  ;;  %v5303_v52 = vadd.f32 %v5302_v58, %v5214_v42  ;;  %v8282_v42 = vmov 128.0  }
 0x8f5   : > { %7876 = vrcp.f32 %v8282_v42 }
 0x8f6   : > { %5425 = vmatmul.bf16.gmra.mxu1 %v13882_v12  ;;  %v11912_v55 = vadd.f32 %v7951_v51, %v5387_v63  ;;  %v5225_v63 = vpop.f32.mrf.mxu3  ;;  %v5314_v12 = vpop.f32.mrf.mxu0 }
 0x8f7   : > { %v5139_v51 = vpop.f32.mrf.mxu2 }
 0x8f8   : > { %5494 = vadd.xlane.f32.xlu0 %v11912_v55 }
 0x8fb   : > { %v5388_v16 = vpop.f32.mrf.mxu1  ;;  %v7877_v21 = vpop.eup %7876 }
 0x8fc   : > { %v5389_v5 = vadd.f32 %v5388_v16, %v5300_v18  ;;  %v5219_v18 = vadd.f32 %v5218_v15, %v5130_v27  ;;  %v13886_v15 = vld [vmem:[#allocation214_spill] sm:$0xff]  ;;  %v5543_v27 = vmul.f32 128.0, %v7877_v21  ;;  %vm5547_vm1 = vweird.f32 %v7877_v21 }
 0x8fd   : > { %v13888_v7 = vpack.c.bf16 %v13886_v15, %v13887_v57 }
 0x8fe   : > { %v11917_v0 = vadd.f32 %v7952_v50, %v5389_v5  ;;  %v5228_v16 = vpop.f32.mrf.mxu3  ;;  %v5132_v50 = vadd.f32 %v5131_v28, %v11762_v38  ;;  %v5317_v3 = vpop.f32.mrf.mxu0  ;;  %v5135_v38 = vadd.f32 %v5134_v14, %v11765_v60 }
 0x900   : > { %5496 = vadd.xlane.f32.xlu1 %v11917_v0  ;;  %v5221_v36 = vadd.f32 %v5220_v32, %v5132_v50  ;;  %v5224_v32 = vadd.f32 %v5223_v25, %v5135_v38  ;;  %v7957_v25 = vld [vmem:[%s8464_s26 + $0x70] sm:$0xff] }
 0x902   : > { %v5310_v28 = vadd.f32 %v5309_v62, %v5221_v36 }
 0x903   : > { %v5391_v59 = vpop.f32.mrf.mxu1 }
 0x904   : > { %v5392_v56 = vadd.f32 %v5391_v59, %v5303_v52  ;;  %v5141_v52 = vpop.f32.mrf.mxu2  ;;  %v5308_v59 = vadd.f32 %v5307_v17, %v5219_v18  ;;  %v5544_v18 = vsub.f32 1.0, %v5543_v27 }
 0x906   : > { %5430 = vmatmul.bf16.gmra.mxu1 %v13885_v61  ;;  %v11925_v11 = vadd.f32 %v7953_v41, %v5392_v56  ;;  %v5230_v41 = vpop.f32.mrf.mxu3  ;;  %v5545_v50 = vmul.f32 %v7877_v21, %v5544_v18 }
 0x908   : > { %5498 = vadd.xlane.f32.xlu2 %v11925_v11  ;;  %v5546_v62 = vadd.f32 %v7877_v21, %v5545_v50  ;;  %v7958_v50 = vld [vmem:[%s8464_s26 + $0x78] sm:$0xff] }
 0x90b   : > { %v5393_v58 = vpop.f32.mrf.mxu1 }
 0x90c   : > { %v5394_v29 = vadd.f32 %v5393_v58, %v5305_v20  ;;  %v5319_v20 = vpop.f32.mrf.mxu0  ;;  %v5144_v58 = vpop.f32.mrf.mxu2 }
 0x90e   : > { %v11930_v5 = vadd.f32 %v7954_v24, %v5394_v29  ;;  %v7956_v24 = vld [vmem:[%s8464_s26 + $0x68] sm:$0xff] }
 0x910   : > { %5500 = vadd.xlane.f32.xlu0 %v11930_v5 }
 0x913   : > { %v5396_v56 = vpop.f32.mrf.mxu1 }
 0x914   : > { %v5397_v46 = vadd.f32 %v5396_v56, %v5308_v59  ;;  %v5137_v59 = vadd.f32 %v5136_v8, %v11780_v6  ;;  %v5233_v56 = vpop.f32.mrf.mxu3  ;;  %v5322_v36 = vpop.f32.mrf.mxu0  ;;  %v11954_v6 = vsel %vm5547_vm1, %v7877_v21, %v5546_v62 }
 0x915   : > { %v5146_v57 = vpop.f32.mrf.mxu2 }
 0x916   : > { %5435 = vmatmul.bf16.gmra.mxu1 %v13888_v7  ;;  %v11938_v61 = vadd.f32 %v7955_v45, %v5397_v46  ;;  %v5313_v46 = vadd.f32 %v5312_v4, %v5224_v32  ;;  %v5226_v14 = vadd.f32 %v5225_v63, %v5137_v59  ;;  %v13889_v7 = vld [vmem:[#allocation284_spill] sm:$0xff]  ;;  %v13890_v45 = vld [vmem:[#allocation225_spill] sm:$0xff]  ;;  %v5140_v4 = vadd.f32 %v5139_v51, %v11783_v9 }
 0x917   : > { %v13891_v27 = vpack.c.bf16 %v13889_v7, %v13890_v45  ;;  %v7959_v45 = vld [vmem:[%s8464_s26 + $0x80] sm:$0xff] }
 0x918   : > { %5502 = vadd.xlane.f32.xlu1 %v11938_v61  ;;  %v5315_v8 = vadd.f32 %v5314_v12, %v5226_v14  ;;  %v5229_v32 = vadd.f32 %v5228_v16, %v5140_v4  ;;  %v5142_v12 = vadd.f32 %v5141_v52, %v11789_v22 }
 0x91a   : > { %v5318_v51 = vadd.f32 %v5317_v3, %v5229_v32  ;;  %v5231_v62 = vadd.f32 %v5230_v41, %v5142_v12  ;;  %v5145_v3 = vadd.f32 %v5144_v58, %v11792_v35 }
 0x91b   : > { %v5398_v17 = vpop.f32.mrf.mxu1 }
 0x91c   : > { %v5399_v29 = vadd.f32 %v5398_v17, %v5310_v28  ;;  %v5235_v17 = vpop.f32.mrf.mxu3  ;;  %v5320_v4 = vadd.f32 %v5319_v20, %v5231_v62  ;;  %v5147_v20 = vadd.f32 %v5146_v57, %v11798_v40 }
 0x91d   : > { %v5149_v21 = vpop.f32.mrf.mxu2 }
 0x91e   : > { %v11943_v42 = vadd.f32 %v7956_v24, %v5399_v29 }
 0x920   : > { %5504 = vadd.xlane.f32.xlu2 %v11943_v42 }
 0x923   : > { %v5401_v15 = vpop.f32.mrf.mxu1 }
 0x924   : > { %v5402_v60 = vadd.f32 %v5401_v15, %v5313_v46  ;;  %v5324_v46 = vpop.f32.mrf.mxu0  ;;  %v5238_v14 = vpop.f32.mrf.mxu3 }
 0x926   : > { %5440 = vmatmul.bf16.gmra.mxu1 %v13891_v27  ;;  %v11951_v38 = vadd.f32 %v7957_v25, %v5402_v60  ;;  %v5151_v25 = vpop.f32.mrf.mxu2 }
 0x928   : > { %5506 = vadd.xlane.f32.xlu0 %v11951_v38 }
 0x92b   : > { %v5403_v28 = vpop.f32.mrf.mxu1  ;;  %v5479_v63 = vpop.xlane.xlu1 %5478 }
 0x92c   : > { %v5404_v29 = vadd.f32 %v5403_v28, %v5315_v8  ;;  %v5549_v18 = vmul.f32 %v11954_v6, %v5479_v63  ;;  %v5327_v52 = vpop.f32.mrf.mxu0  ;;  %v5234_v63 = vadd.f32 %v5233_v56, %v5145_v3 }
 0x92e   : > { %v11959_v24 = vsub.f32 %v11859_v2, %v5549_v18  ;;  %v11962_v59 = vadd.f32 %v7958_v50, %v5404_v29  ;;  %v7960_v18 = vld [vmem:[%s8464_s26 + $0x88] sm:$0xff]  ;;  %v5240_v50 = vpop.f32.mrf.mxu3  ;;  %v5323_v58 = vadd.f32 %v5322_v36, %v5234_v63  ;;  %v5150_v36 = vadd.f32 %v5149_v21, %v11801_v31 }
 0x930   : > { %5508 = vadd.xlane.f32.xlu1 %v11962_v59  ;;  %v5613_v9 = vmul.f32 %v11959_v24, %v11959_v24 }
 0x932   : > { %5645 = vadd.xlane.f32.xlu0 %v5613_v9 }
 0x933   : > { %v5406_v15 = vpop.f32.mrf.mxu1  ;;  %v5481_v16 = vpop.xlane.xlu2 %5480 }
 0x934   : > { %v5407_v60 = vadd.f32 %v5406_v15, %v5318_v51  ;;  %v5550_v2 = vmul.f32 %v11954_v6, %v5481_v16  ;;  %v5329_v56 = vpop.f32.mrf.mxu0  ;;  %v5154_v51 = vpop.f32.mrf.mxu2  ;;  %v5236_v16 = vadd.f32 %v5235_v17, %v5147_v20 }
 0x936   : > { %v11970_v7 = vsub.f32 %v11864_v23, %v5550_v2  ;;  %v11973_v27 = vadd.f32 %v7959_v45, %v5407_v60  ;;  %v7961_v2 = vld [vmem:[%s8464_s26 + $0x90] sm:$0xff]  ;;  %v5243_v57 = vpop.f32.mrf.mxu3  ;;  %v5325_v45 = vadd.f32 %v5324_v46, %v5236_v16  ;;  %v5152_v46 = vadd.f32 %v5151_v25, %v11807_v13 }
 0x938   : > { %5510 = vadd.xlane.f32.xlu2 %v11973_v27  ;;  %v5614_v22 = vmul.f32 %v11970_v7, %v11970_v7 }
 0x93a   : > { %5647 = vadd.xlane.f32.xlu1 %v5614_v22 }
 0x93b   : > { %v5408_v41 = vpop.f32.mrf.mxu1  ;;  %v5483_v8 = vpop.xlane.xlu0 %5482 }
 0x93c   : > { %v5409_v28 = vadd.f32 %v5408_v41, %v5320_v4  ;;  %v5551_v23 = vmul.f32 %v11954_v6, %v5483_v8  ;;  %v5239_v4 = vadd.f32 %v5238_v14, %v5150_v36  ;;  %v5332_v41 = vpop.f32.mrf.mxu0  ;;  %v5156_v8 = vpop.f32.mrf.mxu2 }
 0x93e   : > { %v11981_v29 = vsub.f32 %v11872_v34, %v5551_v23  ;;  %v11984_v32 = vadd.f32 %v7960_v18, %v5409_v28  ;;  %v7962_v23 = vld [vmem:[%s8464_s26 + $0x98] sm:$0xff]  ;;  %v5328_v21 = vadd.f32 %v5327_v52, %v5239_v4  ;;  %v5155_v52 = vadd.f32 %v5154_v51, %v11810_v47 }
 0x940   : > { %5512 = vadd.xlane.f32.xlu0 %v11984_v32  ;;  %v5615_v35 = vmul.f32 %v11981_v29, %v11981_v29  ;;  %v5244_v36 = vadd.f32 %v5243_v57, %v5155_v52 }
 0x942   : > { %5649 = vadd.xlane.f32.xlu2 %v5615_v35  ;;  %v5245_v35 = vpop.f32.mrf.mxu3  ;;  %v5333_v4 = vadd.f32 %v5332_v41, %v5244_v36 }
 0x943   : > { %v5411_v9 = vpop.f32.mrf.mxu1  ;;  %v5485_v12 = vpop.xlane.xlu1 %5484 }
 0x944   : > { %v5412_v34 = vadd.f32 %v5411_v9, %v5323_v58  ;;  %v5552_v15 = vmul.f32 %v11954_v6, %v5485_v12  ;;  %v7963_v12 = vld [vmem:[%s8464_s26 + $0xa0] sm:$0xff]  ;;  %v5159_v16 = vpop.f32.mrf.mxu2 }
 0x945   : > { %v5160_v41 = vadd.f32 %v5159_v16, %v11819_v10 }
 0x946   : > { %v11992_v60 = vsub.f32 %v11877_v48, %v5552_v15  ;;  %v11995_v62 = vadd.f32 %v7961_v2, %v5412_v34  ;;  %v5334_v15 = vpop.f32.mrf.mxu0 }
 0x948   : > { %5514 = vadd.xlane.f32.xlu1 %v11995_v62  ;;  %v5616_v40 = vmul.f32 %v11992_v60, %v11992_v60 }
 0x94a   : > { %5651 = vadd.xlane.f32.xlu0 %v5616_v40 }
 0x94b   : > { %v5413_v22 = vpop.f32.mrf.mxu1  ;;  %v5487_v3 = vpop.xlane.xlu2 %5486 }
 0x94c   : > { %v5414_v17 = vadd.f32 %v5413_v22, %v5325_v45  ;;  %v5553_v48 = vmul.f32 %v11954_v6, %v5487_v3  ;;  %v5248_v45 = vpop.f32.mrf.mxu3  ;;  %v7964_v3 = vld [vmem:[%s8464_s26 + $0xa8] sm:$0xff] }
 0x94d   : > { %v5249_v52 = vadd.f32 %v5248_v45, %v5160_v41  ;;  %v7968_v41 = vld [vmem:[%s8464_s26 + $0xc8] sm:$0xff] }
 0x94e   : > { %v12003_v28 = vsub.f32 %v11885_v39, %v5553_v48  ;;  %v12006_v63 = vadd.f32 %v7962_v23, %v5414_v17  ;;  %v5241_v39 = vadd.f32 %v5240_v50, %v5152_v46  ;;  %v5337_v51 = vpop.f32.mrf.mxu0  ;;  %v5161_v48 = vpop.f32.mrf.mxu2 }
 0x950   : > { %5516 = vadd.xlane.f32.xlu2 %v12006_v63  ;;  %v5617_v31 = vmul.f32 %v12003_v28, %v12003_v28  ;;  %v5330_v25 = vadd.f32 %v5329_v56, %v5241_v39  ;;  %v5157_v56 = vadd.f32 %v5156_v8, %v11816_v53 }
 0x952   : > { %5653 = vadd.xlane.f32.xlu1 %v5617_v31  ;;  %v5246_v46 = vadd.f32 %v5245_v35, %v5157_v56 }
 0x953   : > { %v5416_v18 = vpop.f32.mrf.mxu1  ;;  %v5489_v14 = vpop.xlane.xlu0 %5488 }
 0x954   : > { %v5417_v20 = vadd.f32 %v5416_v18, %v5328_v21  ;;  %v5554_v58 = vmul.f32 %v11954_v6, %v5489_v14  ;;  %v7965_v18 = vld [vmem:[%s8464_s26 + $0xb0] sm:$0xff]  ;;  %v5335_v8 = vadd.f32 %v5334_v15, %v5246_v46  ;;  %v5162_v15 = vadd.f32 %v5161_v48, %v11825_v30 }
 0x956   : > { %v12014_v9 = vsub.f32 %v11890_v43, %v5554_v58  ;;  %v12017_v34 = vadd.f32 %v7963_v12, %v5417_v20  ;;  %v5250_v20 = vpop.f32.mrf.mxu3  ;;  %v5339_v35 = vpop.f32.mrf.mxu0 }
 0x957   : > { %v5164_v12 = vpop.f32.mrf.mxu2 }
 0x958   : > { %5518 = vadd.xlane.f32.xlu0 %v12017_v34  ;;  %v5618_v13 = vmul.f32 %v12014_v9, %v12014_v9 }
 0x95a   : > { %5655 = vadd.xlane.f32.xlu2 %v5618_v13 }
 0x95b   : > { %v5418_v2 = vpop.f32.mrf.mxu1  ;;  %v5491_v50 = vpop.xlane.xlu1 %5490 }
 0x95c   : > { %v5419_v40 = vadd.f32 %v5418_v2, %v5330_v25  ;;  %v5555_v43 = vmul.f32 %v11954_v6, %v5491_v50  ;;  %v7966_v2 = vld [vmem:[%s8464_s26 + $0xb8] sm:$0xff] }
 0x95e   : > { %v12025_v22 = vsub.f32 %v11898_v37, %v5555_v43  ;;  %v12028_v17 = vadd.f32 %v7964_v3, %v5419_v40  ;;  %v5253_v16 = vpop.f32.mrf.mxu3  ;;  %v5338_v40 = vadd.f32 %v5337_v51, %v5249_v52  ;;  %v5251_v3 = vadd.f32 %v5250_v20, %v5162_v15  ;;  %v7969_v15 = vld [vmem:[%s8464_s26 + $0xd0] sm:$0xff] }
 0x95f   : > { %v5166_v56 = vpop.f32.mrf.mxu2  ;;  %v5165_v51 = vadd.f32 %v5164_v12, %v11828_v33 }
 0x960   : > { %5520 = vadd.xlane.f32.xlu1 %v12028_v17  ;;  %v5619_v47 = vmul.f32 %v12025_v22, %v12025_v22  ;;  %v5340_v48 = vadd.f32 %v5339_v35, %v5251_v3  ;;  %v5167_v35 = vadd.f32 %v5166_v56, %v11834_v54 }
 0x962   : > { %5657 = vadd.xlane.f32.xlu0 %v5619_v47  ;;  %v5342_v47 = vpop.f32.mrf.mxu0 }
 0x963   : > { %v5421_v57 = vpop.f32.mrf.mxu1  ;;  %v5493_v23 = vpop.xlane.xlu2 %5492 }
 0x964   : > { %v5422_v31 = vadd.f32 %v5421_v57, %v5333_v4  ;;  %v5556_v37 = vmul.f32 %v11954_v6, %v5493_v23  ;;  %v7967_v57 = vld [vmem:[%s8464_s26 + $0xc0] sm:$0xff] }
 0x966   : > { %v12036_v21 = vsub.f32 %v11904_v44, %v5556_v37  ;;  %v12039_v14 = vadd.f32 %v7965_v18, %v5422_v31  ;;  %v5255_v20 = vpop.f32.mrf.mxu3 }
 0x968   : > { %5522 = vadd.xlane.f32.xlu2 %v12039_v14  ;;  %v5620_v53 = vmul.f32 %v12036_v21, %v12036_v21 }
 0x96a   : > { %5659 = vadd.xlane.f32.xlu1 %v5620_v53 }
 0x96b   : > { %v5423_v58 = vpop.f32.mrf.mxu1  ;;  %v5495_v39 = vpop.xlane.xlu0 %5494 }
 0x96c   : > { %v5424_v44 = vadd.f32 %v5423_v58, %v5335_v8  ;;  %v5557_v13 = vmul.f32 %v11954_v6, %v5495_v39  ;;  %v5344_v58 = vpop.f32.mrf.mxu0  ;;  %v5169_v39 = vpop.f32.mrf.mxu2 }
 0x96e   : > { %v12047_v25 = vsub.f32 %v11912_v55, %v5557_v13  ;;  %v12050_v50 = vadd.f32 %v7966_v2, %v5424_v44  ;;  %v5256_v2 = vadd.f32 %v5255_v20, %v5167_v35  ;;  %v7971_v35 = vld [vmem:[%s8464_s26 + $0xe0] sm:$0xff] }
 0x970   : > { %5524 = vadd.xlane.f32.xlu0 %v12050_v50  ;;  %v5621_v10 = vmul.f32 %v12047_v25, %v12047_v25 }
 0x972   : > { %5661 = vadd.xlane.f32.xlu2 %v5621_v10 }
 0x973   : > { %v5426_v43 = vpop.f32.mrf.mxu1  ;;  %v5497_v36 = vpop.xlane.xlu1 %5496 }
 0x974   : > { %v5427_v45 = vadd.f32 %v5426_v43, %v5338_v40  ;;  %v5558_v55 = vmul.f32 %v11954_v6, %v5497_v36  ;;  %v5258_v40 = vpop.f32.mrf.mxu3  ;;  %v5347_v43 = vpop.f32.mrf.mxu0  ;;  %v5170_v36 = vadd.f32 %v5169_v39, %v11837_v49 }
 0x976   : > { %v12058_v4 = vsub.f32 %v11917_v0, %v5558_v55  ;;  %v12061_v23 = vadd.f32 %v7967_v57, %v5427_v45  ;;  %v5254_v0 = vadd.f32 %v5253_v16, %v5165_v51  ;;  %v5171_v45 = vpop.f32.mrf.mxu2  ;;  %v5345_v55 = vadd.f32 %v5344_v58, %v5256_v2  ;;  %v7970_v51 = vld [vmem:[%s8464_s26 + $0xd8] sm:$0xff] }
 0x977   : > { %v5259_v57 = vadd.f32 %v5258_v40, %v5170_v36 }
 0x978   : > { %5526 = vadd.xlane.f32.xlu1 %v12061_v23  ;;  %v5622_v30 = vmul.f32 %v12058_v4, %v12058_v4  ;;  %v5343_v12 = vadd.f32 %v5342_v47, %v5254_v0 }
 0x97a   : > { %5663 = vadd.xlane.f32.xlu0 %v5622_v30 }
 0x97b   : > { %v5428_v31 = vpop.f32.mrf.mxu1  ;;  %v5499_v37 = vpop.xlane.xlu2 %5498 }
 0x97c   : > { %v5429_v46 = vadd.f32 %v5428_v31, %v5340_v48  ;;  %v5559_v18 = vmul.f32 %v11954_v6, %v5499_v37  ;;  %v5260_v31 = vpop.f32.mrf.mxu3  ;;  %v5172_v37 = vadd.f32 %v5171_v45, %v11843_v19 }
 0x97e   : > { %v12069_v53 = vsub.f32 %v11925_v11, %v5559_v18  ;;  %v12072_v8 = vadd.f32 %v7968_v41, %v5429_v46  ;;  %v5348_v46 = vadd.f32 %v5347_v43, %v5259_v57  ;;  %v5349_v41 = vpop.f32.mrf.mxu0  ;;  %v5174_v58 = vpop.f32.mrf.mxu2  ;;  %v5261_v39 = vadd.f32 %v5260_v31, %v5172_v37  ;;  %v7973_v37 = vld [vmem:[%s8464_s26 + $0xf0] sm:$0xff] }
 0x980   : > { %5528 = vadd.xlane.f32.xlu2 %v12072_v8  ;;  %v5623_v33 = vmul.f32 %v12069_v53, %v12069_v53 }
 0x982   : > { %5665 = vadd.xlane.f32.xlu1 %v5623_v33 }
 0x983   : > { %v5431_v44 = vpop.f32.mrf.mxu1  ;;  %v5501_v13 = vpop.xlane.xlu0 %5500 }
 0x984   : > { %v5432_v52 = vadd.f32 %v5431_v44, %v5343_v12  ;;  %v5560_v11 = vmul.f32 %v11954_v6, %v5501_v13  ;;  %v5175_v44 = vadd.f32 %v5174_v58, %v11846_v1  ;;  %v5350_v13 = vadd.f32 %v5349_v41, %v5261_v39 }
 0x986   : > { %v12080_v10 = vsub.f32 %v11930_v5, %v5560_v11  ;;  %v12083_v16 = vadd.f32 %v7969_v15, %v5432_v52  ;;  %v5263_v52 = vpop.f32.mrf.mxu3  ;;  %v5352_v43 = vpop.f32.mrf.mxu0 }
 0x987   : > { %v5264_v40 = vadd.f32 %v5263_v52, %v5175_v44  ;;  %v5176_v36 = vpop.f32.mrf.mxu2 }
 0x988   : > { %5530 = vadd.xlane.f32.xlu0 %v12083_v16  ;;  %v5624_v54 = vmul.f32 %v12080_v10, %v12080_v10  ;;  %v5177_v45 = vadd.f32 %v5176_v36, %v11852_v26 }
 0x98a   : > { %5667 = vadd.xlane.f32.xlu2 %v5624_v54  ;;  %v7972_v54 = vld [vmem:[%s8464_s26 + $0xe8] sm:$0xff] }
 0x98b   : > { %v5433_v3 = vpop.f32.mrf.mxu1  ;;  %v5503_v47 = vpop.xlane.xlu1 %5502 }
 0x98c   : > { %v5434_v5 = vadd.f32 %v5433_v3, %v5345_v55  ;;  %v5561_v56 = vmul.f32 %v11954_v6, %v5503_v47  ;;  %v5353_v55 = vadd.f32 %v5352_v43, %v5264_v40 }
 0x98e   : > { %v12091_v30 = vsub.f32 %v11938_v61, %v5561_v56  ;;  %v12094_v48 = vadd.f32 %v7970_v51, %v5434_v5  ;;  %v5265_v56 = vpop.f32.mrf.mxu3 }
 0x98f   : > { %v5266_v51 = vadd.f32 %v5265_v56, %v5177_v45 }
 0x990   : > { %5532 = vadd.xlane.f32.xlu1 %v12094_v48  ;;  %v5625_v49 = vmul.f32 %v12091_v30, %v12091_v30 }
 0x992   : > { %5669 = vadd.xlane.f32.xlu0 %v5625_v49 }
 0x993   : > { %v5436_v18 = vpop.f32.mrf.mxu1  ;;  %v5505_v20 = vpop.xlane.xlu2 %5504 }
 0x994   : > { %v5437_v0 = vadd.f32 %v5436_v18, %v5348_v46  ;;  %v5562_v61 = vmul.f32 %v11954_v6, %v5505_v20  ;;  %v5354_v20 = vpop.f32.mrf.mxu0 }
 0x996   : > { %v12102_v33 = vsub.f32 %v11943_v42, %v5562_v61  ;;  %v12105_v12 = vadd.f32 %v7971_v35, %v5437_v0  ;;  %v5355_v0 = vadd.f32 %v5354_v20, %v5266_v51  ;;  %v12149_v51 = vld [vmem:[%s12494_s6] ss:$0 sm:$0xff] }
 0x998   : > { %5534 = vadd.xlane.f32.xlu2 %v12105_v12  ;;  %v5626_v19 = vmul.f32 %v12102_v33, %v12102_v33 }
 0x99a   : > { %5671 = vadd.xlane.f32.xlu1 %v5626_v19 }
 0x99b   : > { %v5438_v11 = vpop.f32.mrf.mxu1  ;;  %v5507_v15 = vpop.xlane.xlu0 %5506 }
 0x99c   : > { %v5439_v2 = vadd.f32 %v5438_v11, %v5350_v13  ;;  %v5563_v35 = vmul.f32 %v11954_v6, %v5507_v15  ;;  %v7974_v13 = vld [vmem:[%s8464_s26 + $0xf8] sm:$0xff]  ;;  %s6435_s26 = sshll.u32 %s6431_s2, 4  ;;  %s6436_s26 = int_to_ptr.hbm [resolvable:$true] %s6435_s26 }
 0x99d   : > { %s8171_s29 = sshra.s32 %s6436_s26, 4  ;;  %s8172_s29 = int_to_ptr.hbm [resolvable:$true] %s8171_s29 }
 0x99e   : > { %v12112_v42 = vadd.f32 %v7972_v54, %v5439_v2  ;;  %v12140_v43 = vsub.f32 %v11951_v38, %v5563_v35  ;;  %s8173_s23 = scalar_lea.hbm %s8172_s29, 8  ;;  %p8178_p12 = scmp.lt.s32.totalorder %s8172_s29, %s12497_s9 }
 0x99f   : > { %p8174_p1 = scmp.ne.s32.totalorder %s8172_s29, %s8173_s23  ;;  %p8179_p8 = scmp.lt.s32.totalorder %s8177_s25, %s8173_s23 }
 0x9a0   : > { %5536 = vadd.xlane.f32.xlu0 %v12112_v42 }
 0x9a1   : > { %p8175_p3 = pnand %p8174_p1, %p8424_p13  ;;  %p8180_p7 = por %p8179_p8, %p8178_p12 }
 0x9a3   : > { %v5441_v3 = vpop.f32.mrf.mxu1  ;;  %v5509_v1 = vpop.xlane.xlu1 %5508  ;;  %p8176_p5 = pneg %p8175_p3 }
 0x9a4   : > { %v5442_v47 = vadd.f32 %v5441_v3, %v5353_v55  ;;  %v5564_v5 = vmul.f32 %v11954_v6, %v5509_v1  ;;  %v5627_v1 = vmul.f32 %v12140_v43, %v12140_v43 }
 0x9a5   : > { %v5646_v57 = vpop.xlane.xlu0 %5645  ;;  %p8181_p9 = pnand %p8180_p7, %p8176_p5 }
 0x9a6   : > { %v12118_v49 = vsub.f32 %v11962_v59, %v5564_v5  ;;  %v5709_v31 = vmul.f32 %v5646_v57, %v11954_v6  ;;  %v12122_v46 = vadd.f32 %v7973_v37, %v5442_v47 }
 0x9a8   : > { %v5741_v18 = vadd.f32 1e-05, %v5709_v31  ;;  %5538 = vadd.xlane.f32.xlu1 %v12122_v46  ;;  %v5628_v26 = vmul.f32 %v12118_v49, %v12118_v49 }
 0x9aa   : > { %7878 = vrsqrt.f32 %v5741_v18  ;;  %5675 = vadd.xlane.f32.xlu0 %v5628_v26  ;;  %vm5779_vm3 = vweird.f32 %v5741_v18 }
 0x9ab   : > { %v5443_v61 = vpop.f32.mrf.mxu1  ;;  %v5511_v41 = vpop.xlane.xlu2 %5510 }
 0x9ac   : > { %v5444_v59 = vadd.f32 %v5443_v61, %v5355_v0  ;;  %v5565_v58 = vmul.f32 %v11954_v6, %v5511_v41  ;;  %v12157_v0 = vld [vmem:[%s12495_s7] ss:$0 sm:$0xff] }
 0x9ad   : > { %v5648_v39 = vpop.xlane.xlu1 %5647 }
 0x9ae   : > { %v12130_v19 = vsub.f32 %v11973_v27, %v5565_v58  ;;  %v5710_v44 = vmul.f32 %v5648_v39, %v11954_v6  ;;  %v12134_v52 = vadd.f32 %v7974_v13, %v5444_v59 }
 0x9b0   : > { %v7879_v11 = vpop.eup %7878  ;;  %v5742_v2 = vadd.f32 1e-05, %v5710_v44  ;;  %5540 = vadd.xlane.f32.xlu2 %v12134_v52  ;;  %v5629_v40 = vmul.f32 %v12130_v19, %v12130_v19 }
 0x9b1   : > { %v5774_v54 = vmul.f32 %v7879_v11, %v5741_v18  ;;  %vm5780_vm2 = vweird.f32 %v7879_v11 }
 0x9b2   : > { %7880 = vrsqrt.f32 %v5742_v2  ;;  %5677 = vadd.xlane.f32.xlu1 %v5629_v40  ;;  %vm5781_vm4 = vmor %vm5779_vm3, %vm5780_vm2  ;;  %vm5789_vm6 = vweird.f32 %v5742_v2 }
 0x9b3   : > { %v5775_v27 = vmul.f32 %v7879_v11, %v5774_v54  ;;  %v5513_v15 = vpop.xlane.xlu0 %5512 }
 0x9b4   : > { %v5566_v55 = vmul.f32 %v11954_v6, %v5513_v15 }
 0x9b5   : > { %v5776_v36 = vmul.f32 0.5, %v5775_v27  ;;  %v5650_v45 = vpop.xlane.xlu2 %5649 }
 0x9b6   : > { %v5711_v3 = vmul.f32 %v5650_v45, %v11954_v6  ;;  %v12152_v31 = vsub.f32 %v11984_v32, %v5566_v55 }
 0x9b7   : > { %v5777_v47 = vsub.f32 1.5, %v5776_v36 }
 0x9b8   : > { %v7881_v5 = vpop.eup %7880  ;;  %v5743_v56 = vadd.f32 1e-05, %v5711_v3  ;;  %5673 = vadd.xlane.f32.xlu2 %v5627_v1  ;;  %v5630_v35 = vmul.f32 %v12152_v31, %v12152_v31 }
 0x9b9   : > { %v5778_v38 = vmul.f32 %v7879_v11, %v5777_v47  ;;  %v5784_v57 = vmul.f32 %v7881_v5, %v5742_v2  ;;  %vm5790_vm5 = vweird.f32 %v7881_v5 }
 0x9ba   : > { %7882 = vrsqrt.f32 %v5743_v56  ;;  %vm5791_vm7 = vmor %vm5789_vm6, %vm5790_vm5  ;;  %vm5799_vm9 = vweird.f32 %v5743_v56 }
 0x9bb   : > { %v5782_v37 = vsel %vm5781_vm4, %v7879_v11, %v5778_v38  ;;  %v5785_v26 = vmul.f32 %v7881_v5, %v5784_v57  ;;  %v5515_v20 = vpop.xlane.xlu1 %5514 }
 0x9bc   : > { %v6093_v18 = vmul.f32 %v5782_v37, %v11959_v24  ;;  %v5567_v61 = vmul.f32 %v11954_v6, %v5515_v20 }
 0x9bd   : > { %v5786_v41 = vmul.f32 0.5, %v5785_v26  ;;  %v5652_v59 = vpop.xlane.xlu0 %5651 }
 0x9be   : > { %v6129_v58 = vmul.f32 %v12149_v51, %v6093_v18  ;;  %v12163_v32 = vsub.f32 %v11995_v62, %v5567_v61  ;;  %v5712_v39 = vmul.f32 %v5652_v59, %v11954_v6 }
 0x9bf   : > { %v5787_v44 = vsub.f32 1.5, %v5786_v41 }
 0x9c0   : > { %v7883_v13 = vpop.eup %7882  ;;  %v6165_v24 = vadd.f32 %v12157_v0, %v6129_v58  ;;  %v5744_v11 = vadd.f32 1e-05, %v5712_v39  ;;  %5679 = vadd.xlane.f32.xlu2 %v5630_v35  ;;  %v5631_v40 = vmul.f32 %v12163_v32, %v12163_v32 }
 0x9c1   : > { %v5788_v54 = vmul.f32 %v7881_v5, %v5787_v44  ;;  %v5794_v27 = vmul.f32 %v7883_v13, %v5743_v56  ;;  %vm5800_vm8 = vweird.f32 %v7883_v13 }
 0x9c2   : > { %6197 = vst [vmem:[%s12173_s27] sm:$0xff] %v6165_v24  ;;  %7884 = vrsqrt.f32 %v5744_v11  ;;  %5681 = vadd.xlane.f32.xlu0 %v5631_v40  ;;  %vm5801_vm10 = vmor %vm5799_vm9, %vm5800_vm8  ;;  %vm5809_vm12 = vweird.f32 %v5744_v11 }
 0x9c3   : > { %v5792_v62 = vsel %vm5791_vm7, %v7881_v5, %v5788_v54  ;;  %v5795_v15 = vmul.f32 %v7883_v13, %v5794_v27  ;;  %v5517_v36 = vpop.xlane.xlu2 %5516 }
 0x9c4   : > { %v6094_v45 = vmul.f32 %v5792_v62, %v11970_v7  ;;  %v5568_v55 = vmul.f32 %v11954_v6, %v5517_v36 }
 0x9c5   : > { %v5796_v3 = vmul.f32 0.5, %v5795_v15  ;;  %v5654_v1 = vpop.xlane.xlu1 %5653 }
 0x9c6   : > { %v6130_v2 = vmul.f32 %v12149_v51, %v6094_v45  ;;  %v12180_v47 = vsub.f32 %v12006_v63, %v5568_v55  ;;  %v5713_v38 = vmul.f32 %v5654_v1, %v11954_v6 }
 0x9c7   : > { %v5797_v57 = vsub.f32 1.5, %v5796_v3 }
 0x9c8   : > { %v7885_v37 = vpop.eup %7884  ;;  %v6166_v5 = vadd.f32 %v12157_v0, %v6130_v2  ;;  %v5745_v26 = vadd.f32 1e-05, %v5713_v38  ;;  %v5632_v7 = vmul.f32 %v12180_v47, %v12180_v47 }
 0x9c9   : > { %v5798_v20 = vmul.f32 %v7883_v13, %v5797_v57  ;;  %v5804_v18 = vmul.f32 %v7885_v37, %v5744_v11  ;;  %vm5810_vm11 = vweird.f32 %v7885_v37 }
 0x9ca   : > { %6198 = vst [vmem:[%s12173_s27 + $0x8] sm:$0xff] %v6166_v5  ;;  %7886 = vrsqrt.f32 %v5745_v26  ;;  %5683 = vadd.xlane.f32.xlu1 %v5632_v7  ;;  %vm5811_vm13 = vmor %vm5809_vm12, %vm5810_vm11  ;;  %vm5819_vm15 = vweird.f32 %v5745_v26 }
 0x9cb   : > { %v5802_v63 = vsel %vm5801_vm10, %v7883_v13, %v5798_v20  ;;  %v5805_v61 = vmul.f32 %v7885_v37, %v5804_v18  ;;  %v5519_v41 = vpop.xlane.xlu0 %5518 }
 0x9cc   : > { %v6095_v59 = vmul.f32 %v5802_v63, %v11981_v29  ;;  %v5569_v58 = vmul.f32 %v11954_v6, %v5519_v41 }
 0x9cd   : > { %v5806_v39 = vmul.f32 0.5, %v5805_v61  ;;  %v5656_v35 = vpop.xlane.xlu2 %5655 }
 0x9ce   : > { %v6131_v44 = vmul.f32 %v12149_v51, %v6095_v59  ;;  %v12191_v24 = vsub.f32 %v12017_v34, %v5569_v58  ;;  %v5714_v56 = vmul.f32 %v5656_v35, %v11954_v6 }
 0x9cf   : > { %v5807_v40 = vsub.f32 1.5, %v5806_v39 }
 0x9d0   : > { %v7887_v54 = vpop.eup %7886  ;;  %v6167_v13 = vadd.f32 %v12157_v0, %v6131_v44  ;;  %v5746_v27 = vadd.f32 1e-05, %v5714_v56  ;;  %v5633_v29 = vmul.f32 %v12191_v24, %v12191_v24 }
 0x9d1   : > { %v5808_v62 = vmul.f32 %v7885_v37, %v5807_v40  ;;  %v5814_v15 = vmul.f32 %v7887_v54, %v5745_v26  ;;  %vm5820_vm14 = vweird.f32 %v7887_v54 }
 0x9d2   : > { %6199 = vst [vmem:[%s12173_s27 + $0x10] sm:$0xff] %v6167_v13  ;;  %7888 = vrsqrt.f32 %v5746_v27  ;;  %5685 = vadd.xlane.f32.xlu2 %v5633_v29  ;;  %vm5821_vm0 = vmor %vm5819_vm15, %vm5820_vm14  ;;  %vm5829_vm2 = vweird.f32 %v5746_v27 }
 0x9d3   : > { %v5812_v34 = vsel %vm5811_vm13, %v7885_v37, %v5808_v62  ;;  %v5815_v36 = vmul.f32 %v7887_v54, %v5814_v15  ;;  %v5521_v45 = vpop.xlane.xlu1 %5520 }
 0x9d4   : > { %v6096_v55 = vmul.f32 %v5812_v34, %v11992_v60  ;;  %v5570_v3 = vmul.f32 %v11954_v6, %v5521_v45 }
 0x9d5   : > { %v5816_v1 = vmul.f32 0.5, %v5815_v36  ;;  %v5658_v2 = vpop.xlane.xlu0 %5657 }
 0x9d6   : > { %v6132_v38 = vmul.f32 %v12149_v51, %v6096_v55  ;;  %v12202_v57 = vsub.f32 %v12028_v17, %v5570_v3  ;;  %v5715_v11 = vmul.f32 %v5658_v2, %v11954_v6 }
 0x9d7   : > { %v5817_v5 = vsub.f32 1.5, %v5816_v1 }
 0x9d8   : > { %v7889_v7 = vpop.eup %7888  ;;  %v6168_v37 = vadd.f32 %v12157_v0, %v6132_v38  ;;  %v5747_v20 = vadd.f32 1e-05, %v5715_v11  ;;  %v5634_v60 = vmul.f32 %v12202_v57, %v12202_v57 }
 0x9d9   : > { %v5818_v18 = vmul.f32 %v7887_v54, %v5817_v5  ;;  %v5824_v63 = vmul.f32 %v7889_v7, %v5746_v27  ;;  %vm5830_vm1 = vweird.f32 %v7889_v7 }
 0x9da   : > { %6200 = vst [vmem:[%s12173_s27 + $0x18] sm:$0xff] %v6168_v37  ;;  %7890 = vrsqrt.f32 %v5747_v20  ;;  %5687 = vadd.xlane.f32.xlu0 %v5634_v60  ;;  %vm5831_vm3 = vmor %vm5829_vm2, %vm5830_vm1  ;;  %vm5839_vm5 = vweird.f32 %v5747_v20 }
 0x9db   : > { %v5822_v17 = vsel %vm5821_vm0, %v7887_v54, %v5818_v18  ;;  %v5825_v61 = vmul.f32 %v7889_v7, %v5824_v63  ;;  %v5523_v41 = vpop.xlane.xlu2 %5522 }
 0x9dc   : > { %v6097_v59 = vmul.f32 %v5822_v17, %v12003_v28  ;;  %v5571_v58 = vmul.f32 %v11954_v6, %v5523_v41 }
 0x9dd   : > { %v5826_v39 = vmul.f32 0.5, %v5825_v61  ;;  %v5660_v35 = vpop.xlane.xlu1 %5659 }
 0x9de   : > { %v6133_v44 = vmul.f32 %v12149_v51, %v6097_v59  ;;  %v12213_v56 = vsub.f32 %v12039_v14, %v5571_v58  ;;  %v5716_v26 = vmul.f32 %v5660_v35, %v11954_v6 }
 0x9df   : > { %v5827_v40 = vsub.f32 1.5, %v5826_v39 }
 0x9e0   : > { %v7891_v13 = vpop.eup %7890  ;;  %v6169_v54 = vadd.f32 %v12157_v0, %v6133_v44  ;;  %v5748_v29 = vadd.f32 1e-05, %v5716_v26  ;;  %v5635_v28 = vmul.f32 %v12213_v56, %v12213_v56 }
 0x9e1   : > { %v5828_v62 = vmul.f32 %v7889_v7, %v5827_v40  ;;  %v5834_v15 = vmul.f32 %v7891_v13, %v5747_v20  ;;  %vm5840_vm4 = vweird.f32 %v7891_v13 }
 0x9e2   : > { %6201 = vst [vmem:[%s12173_s27 + $0x20] sm:$0xff] %v6169_v54  ;;  %7892 = vrsqrt.f32 %v5748_v29  ;;  %5689 = vadd.xlane.f32.xlu1 %v5635_v28  ;;  %vm5841_vm6 = vmor %vm5839_vm5, %vm5840_vm4  ;;  %vm5849_vm8 = vweird.f32 %v5748_v29 }
 0x9e3   : > { %v5832_v14 = vsel %vm5831_vm3, %v7889_v7, %v5828_v62  ;;  %v5835_v34 = vmul.f32 %v7891_v13, %v5834_v15  ;;  %v5525_v36 = vpop.xlane.xlu0 %5524 }
 0x9e4   : > { %v6098_v45 = vmul.f32 %v5832_v14, %v12014_v9  ;;  %v5572_v55 = vmul.f32 %v11954_v6, %v5525_v36 }
 0x9e5   : > { %v5836_v3 = vmul.f32 0.5, %v5835_v34  ;;  %v5662_v1 = vpop.xlane.xlu2 %5661 }
 0x9e6   : > { %v6134_v2 = vmul.f32 %v12149_v51, %v6098_v45  ;;  %v12224_v38 = vsub.f32 %v12050_v50, %v5572_v55  ;;  %v5717_v27 = vmul.f32 %v5662_v1, %v11954_v6 }
 0x9e7   : > { %v5837_v11 = vsub.f32 1.5, %v5836_v3 }
 0x9e8   : > { %v7893_v5 = vpop.eup %7892  ;;  %v6170_v7 = vadd.f32 %v12157_v0, %v6134_v2  ;;  %v5749_v37 = vadd.f32 1e-05, %v5717_v27  ;;  %v5636_v9 = vmul.f32 %v12224_v38, %v12224_v38 }
 0x9e9   : > { %v5838_v60 = vmul.f32 %v7891_v13, %v5837_v11  ;;  %v5844_v18 = vmul.f32 %v7893_v5, %v5748_v29  ;;  %vm5850_vm7 = vweird.f32 %v7893_v5 }
 0x9ea   : > { %6202 = vst [vmem:[%s12173_s27 + $0x28] sm:$0xff] %v6170_v7  ;;  %7894 = vrsqrt.f32 %v5749_v37  ;;  %5691 = vadd.xlane.f32.xlu2 %v5636_v9  ;;  %vm5851_vm9 = vmor %vm5849_vm8, %vm5850_vm7  ;;  %vm5859_vm11 = vweird.f32 %v5749_v37 }
 0x9eb   : > { %v5842_v50 = vsel %vm5841_vm6, %v7891_v13, %v5838_v60  ;;  %v5845_v63 = vmul.f32 %v7893_v5, %v5844_v18  ;;  %v5527_v17 = vpop.xlane.xlu1 %5526 }
 0x9ec   : > { %v6099_v61 = vmul.f32 %v5842_v50, %v12025_v22  ;;  %v5573_v41 = vmul.f32 %v11954_v6, %v5527_v17 }
 0x9ed   : > { %v5846_v59 = vmul.f32 0.5, %v5845_v63  ;;  %v5664_v58 = vpop.xlane.xlu0 %5663 }
 0x9ee   : > { %v6135_v39 = vmul.f32 %v12149_v51, %v6099_v61  ;;  %v12235_v35 = vsub.f32 %v12061_v23, %v5573_v41  ;;  %v5718_v20 = vmul.f32 %v5664_v58, %v11954_v6 }
 0x9ef   : > { %v5847_v44 = vsub.f32 1.5, %v5846_v59 }
 0x9f0   : > { %v7895_v26 = vpop.eup %7894  ;;  %v6171_v40 = vadd.f32 %v12157_v0, %v6135_v39  ;;  %v5750_v13 = vadd.f32 1e-05, %v5718_v20  ;;  %v5637_v22 = vmul.f32 %v12235_v35, %v12235_v35 }
 0x9f1   : > { %v5848_v54 = vmul.f32 %v7893_v5, %v5847_v44  ;;  %v5854_v28 = vmul.f32 %v7895_v26, %v5749_v37  ;;  %vm5860_vm10 = vweird.f32 %v7895_v26 }
 0x9f2   : > { %6203 = vst [vmem:[%s12173_s27 + $0x30] sm:$0xff] %v6171_v40  ;;  %7896 = vrsqrt.f32 %v5750_v13  ;;  %5693 = vadd.xlane.f32.xlu0 %v5637_v22  ;;  %vm5861_vm12 = vmor %vm5859_vm11, %vm5860_vm10  ;;  %vm5869_vm14 = vweird.f32 %v5750_v13 }
 0x9f3   : > { %v5852_v23 = vsel %vm5851_vm9, %v7893_v5, %v5848_v54  ;;  %v5855_v62 = vmul.f32 %v7895_v26, %v5854_v28  ;;  %v5529_v15 = vpop.xlane.xlu2 %5528 }
 0x9f4   : > { %v6100_v14 = vmul.f32 %v5852_v23, %v12036_v21  ;;  %v5574_v34 = vmul.f32 %v11954_v6, %v5529_v15 }
 0x9f5   : > { %v5856_v36 = vmul.f32 0.5, %v5855_v62  ;;  %v5666_v45 = vpop.xlane.xlu1 %5665 }
 0x9f6   : > { %v6136_v55 = vmul.f32 %v12149_v51, %v6100_v14  ;;  %v12246_v3 = vsub.f32 %v12072_v8, %v5574_v34  ;;  %v5719_v29 = vmul.f32 %v5666_v45, %v11954_v6 }
 0x9f7   : > { %v5857_v1 = vsub.f32 1.5, %v5856_v36 }
 0x9f8   : > { %v7897_v2 = vpop.eup %7896  ;;  %v6172_v27 = vadd.f32 %v12157_v0, %v6136_v55  ;;  %v5751_v11 = vadd.f32 1e-05, %v5719_v29  ;;  %v5638_v21 = vmul.f32 %v12246_v3, %v12246_v3 }
 0x9f9   : > { %v5858_v5 = vmul.f32 %v7895_v26, %v5857_v1  ;;  %v5864_v7 = vmul.f32 %v7897_v2, %v5750_v13  ;;  %vm5870_vm13 = vweird.f32 %v7897_v2 }
 0x9fa   : > { %6204 = vst [vmem:[%s12173_s27 + $0x38] sm:$0xff] %v6172_v27  ;;  %7898 = vrsqrt.f32 %v5751_v11  ;;  %5695 = vadd.xlane.f32.xlu1 %v5638_v21  ;;  %vm5871_vm15 = vmor %vm5869_vm14, %vm5870_vm13  ;;  %vm5879_vm1 = vweird.f32 %v5751_v11 }
 0x9fb   : > { %v5862_v8 = vsel %vm5861_vm12, %v7895_v26, %v5858_v5  ;;  %v5865_v9 = vmul.f32 %v7897_v2, %v5864_v7  ;;  %v5531_v60 = vpop.xlane.xlu0 %5530 }
 0x9fc   : > { %v6101_v18 = vmul.f32 %v5862_v8, %v12047_v25  ;;  %v5575_v50 = vmul.f32 %v11954_v6, %v5531_v60 }
 0x9fd   : > { %v5866_v63 = vmul.f32 0.5, %v5865_v9  ;;  %v5668_v17 = vpop.xlane.xlu2 %5667 }
 0x9fe   : > { %v6137_v61 = vmul.f32 %v12149_v51, %v6101_v18  ;;  %v12257_v41 = vsub.f32 %v12083_v16, %v5575_v50  ;;  %v5720_v37 = vmul.f32 %v5668_v17, %v11954_v6 }
 0x9ff   : > { %v5867_v59 = vsub.f32 1.5, %v5866_v63 }
 0xa00   : > { %v7899_v58 = vpop.eup %7898  ;;  %v6173_v39 = vadd.f32 %v12157_v0, %v6137_v61  ;;  %v5752_v20 = vadd.f32 1e-05, %v5720_v37  ;;  %v5639_v25 = vmul.f32 %v12257_v41, %v12257_v41 }
 0xa01   : > { %v5868_v44 = vmul.f32 %v7897_v2, %v5867_v59  ;;  %v5874_v26 = vmul.f32 %v7899_v58, %v5751_v11  ;;  %vm5880_vm0 = vweird.f32 %v7899_v58 }
 0xa02   : > { %6205 = vst [vmem:[%s12173_s27 + $0x40] sm:$0xff] %v6173_v39  ;;  %7900 = vrsqrt.f32 %v5752_v20  ;;  %5697 = vadd.xlane.f32.xlu2 %v5639_v25  ;;  %vm5881_vm2 = vmor %vm5879_vm1, %vm5880_vm0  ;;  %vm5889_vm4 = vweird.f32 %v5752_v20 }
 0xa03   : > { %v5872_v16 = vsel %vm5871_vm15, %v7897_v2, %v5868_v44  ;;  %v5875_v40 = vmul.f32 %v7899_v58, %v5874_v26  ;;  %v5533_v22 = vpop.xlane.xlu1 %5532 }
 0xa04   : > { %v6102_v54 = vmul.f32 %v5872_v16, %v12058_v4  ;;  %v5576_v28 = vmul.f32 %v11954_v6, %v5533_v22 }
 0xa05   : > { %v5876_v23 = vmul.f32 0.5, %v5875_v40  ;;  %v5670_v62 = vpop.xlane.xlu0 %5669 }
 0xa06   : > { %v6138_v15 = vmul.f32 %v12149_v51, %v6102_v54  ;;  %v12268_v14 = vsub.f32 %v12094_v48, %v5576_v28  ;;  %v5721_v13 = vmul.f32 %v5670_v62, %v11954_v6 }
 0xa07   : > { %v5877_v34 = vsub.f32 1.5, %v5876_v23 }
 0xa08   : > { %v7901_v36 = vpop.eup %7900  ;;  %v6174_v45 = vadd.f32 %v12157_v0, %v6138_v15  ;;  %v5753_v55 = vadd.f32 1e-05, %v5721_v13  ;;  %v5640_v4 = vmul.f32 %v12268_v14, %v12268_v14 }
 0xa09   : > { %v5878_v29 = vmul.f32 %v7899_v58, %v5877_v34  ;;  %v5884_v1 = vmul.f32 %v7901_v36, %v5752_v20  ;;  %vm5890_vm3 = vweird.f32 %v7901_v36 }
 0xa0a   : > { %6206 = vst [vmem:[%s12173_s27 + $0x48] sm:$0xff] %v6174_v45  ;;  %7902 = vrsqrt.f32 %v5753_v55  ;;  %5699 = vadd.xlane.f32.xlu0 %v5640_v4  ;;  %vm5891_vm5 = vmor %vm5889_vm4, %vm5890_vm3  ;;  %vm5899_vm7 = vweird.f32 %v5753_v55 }
 0xa0b   : > { %v5882_v48 = vsel %vm5881_vm2, %v7899_v58, %v5878_v29  ;;  %v5885_v2 = vmul.f32 %v7901_v36, %v5884_v1  ;;  %v5535_v27 = vpop.xlane.xlu2 %5534 }
 0xa0c   : > { %v6103_v21 = vmul.f32 %v5882_v48, %v12069_v53  ;;  %v5577_v5 = vmul.f32 %v11954_v6, %v5535_v27 }
 0xa0d   : > { %v5886_v7 = vmul.f32 0.5, %v5885_v2  ;;  %v5672_v8 = vpop.xlane.xlu1 %5671 }
 0xa0e   : > { %v6139_v9 = vmul.f32 %v12149_v51, %v6103_v21  ;;  %v12279_v60 = vsub.f32 %v12105_v12, %v5577_v5  ;;  %v5722_v11 = vmul.f32 %v5672_v8, %v11954_v6 }
 0xa0f   : > { %v5887_v18 = vsub.f32 1.5, %v5886_v7 }
 0xa10   : > { %v7903_v50 = vpop.eup %7902  ;;  %v6175_v63 = vadd.f32 %v12157_v0, %v6139_v9  ;;  %v5754_v17 = vadd.f32 1e-05, %v5722_v11  ;;  %v5641_v53 = vmul.f32 %v12279_v60, %v12279_v60 }
 0xa11   : > { %v5888_v61 = vmul.f32 %v7901_v36, %v5887_v18  ;;  %v5894_v37 = vmul.f32 %v7903_v50, %v5753_v55  ;;  %vm5900_vm6 = vweird.f32 %v7903_v50 }
 0xa12   : > { %6207 = vst [vmem:[%s12173_s27 + $0x50] sm:$0xff] %v6175_v63  ;;  %7904 = vrsqrt.f32 %v5754_v17  ;;  %5701 = vadd.xlane.f32.xlu1 %v5641_v53  ;;  %vm5901_vm8 = vmor %vm5899_vm7, %vm5900_vm6  ;;  %vm5909_vm10 = vweird.f32 %v5754_v17 }
 0xa13   : > { %v5892_v12 = vsel %vm5891_vm5, %v7901_v36, %v5888_v61  ;;  %v5895_v59 = vmul.f32 %v7903_v50, %v5894_v37  ;;  %v5537_v58 = vpop.xlane.xlu0 %5536 }
 0xa14   : > { %v6104_v39 = vmul.f32 %v5892_v12, %v12080_v10  ;;  %v5578_v25 = vmul.f32 %v11954_v6, %v5537_v58 }
 0xa15   : > { %v5896_v44 = vmul.f32 0.5, %v5895_v59 }
 0xa16   : > { %v6140_v26 = vmul.f32 %v12149_v51, %v6104_v39  ;;  %v12290_v16 = vsub.f32 %v12112_v42, %v5578_v25 }
 0xa17   : > { %v5897_v20 = vsub.f32 1.5, %v5896_v44 }
 0xa18   : > { %v7905_v40 = vpop.eup %7904  ;;  %v6176_v22 = vadd.f32 %v12157_v0, %v6140_v26  ;;  %v5642_v54 = vmul.f32 %v12290_v16, %v12290_v16 }
 0xa19   : > { %v5898_v28 = vmul.f32 %v7903_v50, %v5897_v20  ;;  %v5904_v23 = vmul.f32 %v7905_v40, %v5754_v17  ;;  %vm5910_vm9 = vweird.f32 %v7905_v40 }
 0xa1a   : > { %6208 = vst [vmem:[%s12173_s27 + $0x58] sm:$0xff] %v6176_v22  ;;  %5703 = vadd.xlane.f32.xlu2 %v5642_v54  ;;  %vm5911_vm11 = vmor %vm5909_vm10, %vm5910_vm9 }
 0xa1b   : > { %v5902_v10 = vsel %vm5901_vm8, %v7903_v50, %v5898_v28  ;;  %v5905_v62 = vmul.f32 %v7905_v40, %v5904_v23  ;;  %v5539_v15 = vpop.xlane.xlu1 %5538 }
 0xa1c   : > { %v6105_v42 = vmul.f32 %v5902_v10, %v12091_v30  ;;  %v5579_v13 = vmul.f32 %v11954_v6, %v5539_v15 }
 0xa1d   : > { %v5906_v34 = vmul.f32 0.5, %v5905_v62  ;;  %v5676_v36 = vpop.xlane.xlu0 %5675 }
 0xa1e   : > { %v6141_v45 = vmul.f32 %v12149_v51, %v6105_v42  ;;  %v12300_v4 = vsub.f32 %v12122_v46, %v5579_v13  ;;  %v5724_v55 = vmul.f32 %v5676_v36, %v11954_v6 }
 0xa1f   : > { %v5907_v29 = vsub.f32 1.5, %v5906_v34 }
 0xa20   : > { %v6177_v1 = vadd.f32 %v12157_v0, %v6141_v45  ;;  %v5756_v48 = vadd.f32 1e-05, %v5724_v55  ;;  %v5643_v2 = vmul.f32 %v12300_v4, %v12300_v4 }
 0xa21   : > { %v5908_v30 = vmul.f32 %v7905_v40, %v5907_v29 }
 0xa22   : > { %6209 = vst [vmem:[%s12173_s27 + $0x60] sm:$0xff] %v6177_v1  ;;  %7906 = vrsqrt.f32 %v5756_v48  ;;  %5705 = vadd.xlane.f32.xlu0 %v5643_v2  ;;  %vm5929_vm13 = vweird.f32 %v5756_v48 }
 0xa23   : > { %v5912_v27 = vsel %vm5911_vm11, %v7905_v40, %v5908_v30  ;;  %v5541_v46 = vpop.xlane.xlu2 %5540 }
 0xa24   : > { %v6106_v21 = vmul.f32 %v5912_v27, %v12102_v33  ;;  %v5580_v5 = vmul.f32 %v11954_v6, %v5541_v46 }
 0xa25   : > { %v5678_v7 = vpop.xlane.xlu1 %5677 }
 0xa26   : > { %v6142_v8 = vmul.f32 %v12149_v51, %v6106_v21  ;;  %v12311_v9 = vsub.f32 %v12134_v52, %v5580_v5  ;;  %v5725_v11 = vmul.f32 %v5678_v7, %v11954_v6 }
 0xa28   : > { %v7907_v18 = vpop.eup %7906  ;;  %v6178_v50 = vadd.f32 %v12157_v0, %v6142_v8  ;;  %v5757_v63 = vadd.f32 1e-05, %v5725_v11  ;;  %v5644_v17 = vmul.f32 %v12311_v9, %v12311_v9 }
 0xa29   : > { %v5924_v53 = vmul.f32 %v7907_v18, %v5756_v48  ;;  %vm5930_vm12 = vweird.f32 %v7907_v18 }
 0xa2a   : > { %6210 = vst [vmem:[%s12173_s27 + $0x68] sm:$0xff] %v6178_v50  ;;  %7908 = vrsqrt.f32 %v5757_v63  ;;  %5707 = vadd.xlane.f32.xlu1 %v5644_v17  ;;  %vm5931_vm14 = vmor %vm5929_vm13, %vm5930_vm12  ;;  %vm5939_vm0 = vweird.f32 %v5757_v63 }
 0xa2b   : > { %v5925_v33 = vmul.f32 %v7907_v18, %v5924_v53  ;;  %v5674_v61 = vpop.xlane.xlu2 %5673 }
 0xa2c   : > { %v5723_v37 = vmul.f32 %v5674_v61, %v11954_v6 }
 0xa2d   : > { %v5926_v12 = vmul.f32 0.5, %v5925_v33 }
 0xa2e   : > { %v5755_v52 = vadd.f32 1e-05, %v5723_v37 }
 0xa2f   : > { %v5927_v59 = vsub.f32 1.5, %v5926_v12 }
 0xa30   : > { %v7909_v58 = vpop.eup %7908  ;;  %7910 = vrsqrt.f32 %v5755_v52  ;;  %vm5919_vm3 = vweird.f32 %v5755_v52 }
 0xa31   : > { %v5928_v39 = vmul.f32 %v7907_v18, %v5927_v59  ;;  %v5934_v25 = vmul.f32 %v7909_v58, %v5757_v63  ;;  %vm5940_vm15 = vweird.f32 %v7909_v58 }
 0xa32   : > { %vm5941_vm1 = vmor %vm5939_vm0, %vm5940_vm15 }
 0xa33   : > { %v5932_v44 = vsel %vm5931_vm14, %v7907_v18, %v5928_v39  ;;  %v5935_v26 = vmul.f32 %v7909_v58, %v5934_v25  ;;  %v5680_v20 = vpop.xlane.xlu2 %5679 }
 0xa34   : > { %v6108_v40 = vmul.f32 %v5932_v44, %v12118_v49  ;;  %v5726_v22 = vmul.f32 %v5680_v20, %v11954_v6 }
 0xa35   : > { %v5936_v54 = vmul.f32 0.5, %v5935_v26  ;;  %v5682_v28 = vpop.xlane.xlu0 %5681 }
 0xa36   : > { %v7911_v23 = vpop.eup %7910  ;;  %v6144_v10 = vmul.f32 %v12149_v51, %v6108_v40  ;;  %v12322_v62 = vadd.f32 1e-05, %v5726_v22  ;;  %v5727_v15 = vmul.f32 %v5682_v28, %v11954_v6 }
 0xa37   : > { %v5937_v42 = vsub.f32 1.5, %v5936_v54  ;;  %v5914_v13 = vmul.f32 %v7911_v23, %v5755_v52  ;;  %vm5920_vm2 = vweird.f32 %v7911_v23 }
 0xa38   : > { %v6180_v34 = vadd.f32 %v12157_v0, %v6144_v10  ;;  %7912 = vrsqrt.f32 %v12322_v62  ;;  %v12327_v49 = vadd.f32 1e-05, %v5727_v15  ;;  %vm12341_vm4 = vmor %vm5919_vm3, %vm5920_vm2 }
 0xa39   : > { %v5938_v36 = vmul.f32 %v7909_v58, %v5937_v42  ;;  %v5915_v45 = vmul.f32 %v7911_v23, %v5914_v13 }
 0xa3a   : > { %6212 = vst [vmem:[%s12173_s27 + $0x78] sm:$0xff] %v6180_v34  ;;  %7914 = vrsqrt.f32 %v12327_v49 }
 0xa3b   : > { %v5942_v55 = vsel %vm5941_vm1, %v7909_v58, %v5938_v36  ;;  %v5916_v29 = vmul.f32 0.5, %v5915_v45 }
 0xa3c   : > { %v6109_v1 = vmul.f32 %v5942_v55, %v12130_v19 }
 0xa3d   : > { %v5917_v48 = vsub.f32 1.5, %v5916_v29  ;;  %v5684_v2 = vpop.xlane.xlu1 %5683 }
 0xa3e   : > { %v7913_v30 = vpop.eup %7912  ;;  %v6145_v27 = vmul.f32 %v12149_v51, %v6109_v1  ;;  %v5728_v46 = vmul.f32 %v5684_v2, %v11954_v6 }
 0xa3f   : > { %v5918_v21 = vmul.f32 %v7911_v23, %v5917_v48  ;;  %v5944_v5 = vmul.f32 %v7913_v30, %v12322_v62 }
 0xa40   : > { %v7915_v7 = vpop.eup %7914  ;;  %v6181_v19 = vadd.f32 %v12157_v0, %v6145_v27  ;;  %v12345_v11 = vadd.f32 1e-05, %v5728_v46 }
 0xa41   : > { %8184 = shalt.err (!%p8181_p9)
}
 0xa42   : > { %7656 = dma.vmem_to_hbm [thread:$0]  (%p8424_p13), %s6434_s14, 128, %s6436_s26, %s6404_s13   ;;  %v5922_v18 = vsel %vm12341_vm4, %v7911_v23, %v5918_v21  ;;  %v5945_v50 = vmul.f32 %v7913_v30, %v5944_v5  ;;  %v5954_v63 = vmul.f32 %v7915_v7, %v12327_v49  ;;  %6213 = vst [vmem:[%s12173_s27 + $0x80] sm:$0xff] %v6181_v19  ;;  %7916 = vrsqrt.f32 %v12345_v11 }
 0xa43   : > { %v6107_v17 = vmul.f32 %v5922_v18, %v12140_v43  ;;  %vm5950_vm5 = vweird.f32 %v7913_v30  ;;  %vm5949_vm6 = vweird.f32 %v12322_v62  ;;  %vm5960_vm7 = vweird.f32 %v7915_v7  ;;  %s6415_s23 = scalar_lea.hbm %s12496_s8, %s7407_s17  ;;  %s6416_s21 = sshll.u32 %s12173_s27, 4  ;;  %s6417_s21 = int_to_ptr.vmem [resolvable:$true] %s6416_s21 }
 0xa44   : > { %v5946_v53 = vmul.f32 0.5, %v5945_v50  ;;  %v5955_v33 = vmul.f32 %v7915_v7, %v5954_v63  ;;  %vm5951_vm8 = vmor %vm5949_vm6, %vm5950_vm5  ;;  %vm5959_vm9 = vweird.f32 %v12327_v49  ;;  %vm5969_vm12 = vweird.f32 %v12345_v11  ;;  %s6418_s3 = sshll.u32 %s6415_s23, 4  ;;  %s6399_s16 = scalar_lea.sflag [#allocation4], %s8458_s1  ;;  %s6419_s3 = int_to_ptr.hbm [resolvable:$true] %s6418_s3 }
 0xa45   : > { %v6143_v61 = vmul.f32 %v12149_v51, %v6107_v17  ;;  %v5686_v52 = vpop.xlane.xlu2 %5685  ;;  %vm5961_vm10 = vmor %vm5959_vm9, %vm5960_vm7  ;;  %s8199_s25 = sshra.s32 %s6419_s3, 4  ;;  %s8205_s20 = scalar_lea.hbm %s12496_s8, 512  ;;  %s8200_s25 = int_to_ptr.hbm [resolvable:$true] %s8199_s25 }
 0xa46   : > { %v5947_v37 = vsub.f32 1.5, %v5946_v53  ;;  %v5956_v12 = vmul.f32 0.5, %v5955_v33  ;;  %v5729_v58 = vmul.f32 %v5686_v52, %v11954_v6  ;;  %s8201_s28 = scalar_lea.hbm %s8200_s25, 256  ;;  %p8206_p2 = scmp.lt.s32.totalorder %s8200_s25, %s12496_s8 }
 0xa47   : > { %v6179_v59 = vadd.f32 %v12157_v0, %v6143_v61  ;;  %p8202_p10 = scmp.ne.s32.totalorder %s8200_s25, %s8201_s28  ;;  %p8207_p6 = scmp.lt.s32.totalorder %s8205_s20, %s8201_s28 }
 0xa48   : > { %v5948_v39 = vmul.f32 %v7913_v30, %v5947_v37  ;;  %v5957_v25 = vsub.f32 1.5, %v5956_v12  ;;  %v7917_v43 = vpop.eup %7916  ;;  %v5761_v44 = vadd.f32 1e-05, %v5729_v58 }
 0xa49   : > { %6211 = vst [vmem:[%s12173_s27 + $0x70] sm:$0xff] %v6179_v59  ;;  %v5964_v40 = vmul.f32 %v7917_v43, %v12345_v11  ;;  %vm5970_vm11 = vweird.f32 %v7917_v43  ;;  %p8203_p11 = pnand %p8202_p10, %p8424_p13  ;;  %p8208_p1 = por %p8207_p6, %p8206_p2 }
 0xa4a   : > { %v5952_v26 = vsel %vm5951_vm8, %v7913_v30, %v5948_v39  ;;  %v5958_v20 = vmul.f32 %v7915_v7, %v5957_v25  ;;  %7918 = vrsqrt.f32 %v5761_v44  ;;  %vm5971_vm13 = vmor %vm5969_vm12, %vm5970_vm11  ;;  %vm5979_vm15 = vweird.f32 %v5761_v44 }
 0xa4b   : > { %v6110_v22 = vmul.f32 %v5952_v26, %v12152_v31  ;;  %v5965_v28 = vmul.f32 %v7917_v43, %v5964_v40  ;;  %p8204_p0 = pneg %p8203_p11 }
 0xa4c   : > { %v5962_v54 = vsel %vm5961_vm10, %v7915_v7, %v5958_v20 }
 0xa4d   : > { %v6146_v23 = vmul.f32 %v12149_v51, %v6110_v22  ;;  %v6111_v10 = vmul.f32 %v5962_v54, %v12163_v32  ;;  %v5966_v62 = vmul.f32 0.5, %v5965_v28  ;;  %v5688_v15 = vpop.xlane.xlu0 %5687  ;;  %p8209_p3 = pnand %p8208_p1, %p8204_p0 }
 0xa4e   : > { %v5730_v34 = vmul.f32 %v5688_v15, %v11954_v6 }
 0xa4f   : > { %v6182_v42 = vadd.f32 %v12157_v0, %v6146_v23  ;;  %v6147_v13 = vmul.f32 %v12149_v51, %v6111_v10  ;;  %v5967_v49 = vsub.f32 1.5, %v5966_v62 }
 0xa50   : > { %v7919_v31 = vpop.eup %7918  ;;  %v5762_v45 = vadd.f32 1e-05, %v5730_v34 }
 0xa51   : > { %6214 = vst [vmem:[%s12173_s27 + $0x88] sm:$0xff] %v6182_v42  ;;  %v6183_v36 = vadd.f32 %v12157_v0, %v6147_v13  ;;  %v5968_v55 = vmul.f32 %v7917_v43, %v5967_v49  ;;  %v5974_v29 = vmul.f32 %v7919_v31, %v5761_v44  ;;  %vm5980_vm14 = vweird.f32 %v7919_v31 }
 0xa52   : > { %7920 = vrsqrt.f32 %v5762_v45  ;;  %vm5981_vm0 = vmor %vm5979_vm15, %vm5980_vm14  ;;  %vm5989_vm2 = vweird.f32 %v5762_v45 }
 0xa53   : > { %6215 = vst [vmem:[%s12173_s27 + $0x90] sm:$0xff] %v6183_v36  ;;  %v5972_v32 = vsel %vm5971_vm13, %v7917_v43, %v5968_v55  ;;  %v5975_v1 = vmul.f32 %v7919_v31, %v5974_v29 }
 0xa54   : > { %v6112_v48 = vmul.f32 %v5972_v32, %v12180_v47 }
 0xa55   : > { %v5976_v2 = vmul.f32 0.5, %v5975_v1  ;;  %v5690_v30 = vpop.xlane.xlu1 %5689 }
 0xa56   : > { %v6148_v27 = vmul.f32 %v12149_v51, %v6112_v48  ;;  %v5731_v46 = vmul.f32 %v5690_v30, %v11954_v6 }
 0xa57   : > { %v5977_v21 = vsub.f32 1.5, %v5976_v2 }
 0xa58   : > { %v7921_v5 = vpop.eup %7920  ;;  %v6184_v7 = vadd.f32 %v12157_v0, %v6148_v27  ;;  %v5763_v19 = vadd.f32 1e-05, %v5731_v46 }
 0xa59   : > { %v5978_v8 = vmul.f32 %v7919_v31, %v5977_v21  ;;  %v5984_v11 = vmul.f32 %v7921_v5, %v5762_v45  ;;  %vm5990_vm1 = vweird.f32 %v7921_v5 }
 0xa5a   : > { %6216 = vst [vmem:[%s12173_s27 + $0x98] sm:$0xff] %v6184_v7  ;;  %7922 = vrsqrt.f32 %v5763_v19  ;;  %vm5991_vm3 = vmor %vm5989_vm2, %vm5990_vm1  ;;  %vm5999_vm5 = vweird.f32 %v5763_v19 }
 0xa5b   : > { %v5982_v47 = vsel %vm5981_vm0, %v7919_v31, %v5978_v8  ;;  %v5985_v18 = vmul.f32 %v7921_v5, %v5984_v11 }
 0xa5c   : > { %v6113_v50 = vmul.f32 %v5982_v47, %v12191_v24 }
 0xa5d   : > { %v5986_v63 = vmul.f32 0.5, %v5985_v18  ;;  %v5692_v17 = vpop.xlane.xlu2 %5691 }
 0xa5e   : > { %v6149_v53 = vmul.f32 %v12149_v51, %v6113_v50  ;;  %v5732_v33 = vmul.f32 %v5692_v17, %v11954_v6 }
 0xa5f   : > { %v5987_v61 = vsub.f32 1.5, %v5986_v63  ;;  %v12410_v63 = vld [vmem:[%s12494_s6] ss:$0 sm:$0xff] }
 0xa60   : > { %v7923_v37 = vpop.eup %7922  ;;  %v6185_v12 = vadd.f32 %v12157_v0, %v6149_v53  ;;  %v5764_v52 = vadd.f32 1e-05, %v5732_v33 }
 0xa61   : > { %v5988_v59 = vmul.f32 %v7921_v5, %v5987_v61  ;;  %v5994_v58 = vmul.f32 %v7923_v37, %v5763_v19  ;;  %vm6000_vm4 = vweird.f32 %v7923_v37  ;;  %v12417_v61 = vld [vmem:[%s12495_s7] ss:$0 sm:$0xff] }
 0xa62   : > { %6217 = vst [vmem:[%s12173_s27 + $0xa0] sm:$0xff] %v6185_v12  ;;  %7924 = vrsqrt.f32 %v5764_v52  ;;  %vm6001_vm6 = vmor %vm5999_vm5, %vm6000_vm4  ;;  %vm6009_vm8 = vweird.f32 %v5764_v52 }
 0xa63   : > { %v5992_v24 = vsel %vm5991_vm3, %v7921_v5, %v5988_v59  ;;  %v5995_v39 = vmul.f32 %v7923_v37, %v5994_v58 }
 0xa64   : > { %v6114_v25 = vmul.f32 %v5992_v24, %v12202_v57 }
 0xa65   : > { %v5996_v43 = vmul.f32 0.5, %v5995_v39  ;;  %v5694_v44 = vpop.xlane.xlu0 %5693 }
 0xa66   : > { %v6150_v26 = vmul.f32 %v12149_v51, %v6114_v25  ;;  %v5733_v20 = vmul.f32 %v5694_v44, %v11954_v6 }
 0xa67   : > { %v5997_v40 = vsub.f32 1.5, %v5996_v43 }
 0xa68   : > { %v7925_v22 = vpop.eup %7924  ;;  %v6186_v54 = vadd.f32 %v12157_v0, %v6150_v26  ;;  %v5765_v28 = vadd.f32 1e-05, %v5733_v20 }
 0xa69   : > { %v5998_v23 = vmul.f32 %v7923_v37, %v5997_v40  ;;  %v6004_v10 = vmul.f32 %v7925_v22, %v5764_v52  ;;  %vm6010_vm7 = vweird.f32 %v7925_v22 }
 0xa6a   : > { %6218 = vst [vmem:[%s12173_s27 + $0xa8] sm:$0xff] %v6186_v54  ;;  %7926 = vrsqrt.f32 %v5765_v28  ;;  %vm6011_vm9 = vmor %vm6009_vm8, %vm6010_vm7  ;;  %vm6019_vm11 = vweird.f32 %v5765_v28 }
 0xa6b   : > { %v6002_v57 = vsel %vm6001_vm6, %v7923_v37, %v5998_v23  ;;  %v6005_v62 = vmul.f32 %v7925_v22, %v6004_v10 }
 0xa6c   : > { %v6115_v15 = vmul.f32 %v6002_v57, %v12213_v56 }
 0xa6d   : > { %v6006_v42 = vmul.f32 0.5, %v6005_v62  ;;  %v5696_v13 = vpop.xlane.xlu1 %5695 }
 0xa6e   : > { %v6151_v34 = vmul.f32 %v12149_v51, %v6115_v15  ;;  %v5734_v49 = vmul.f32 %v5696_v13, %v11954_v6 }
 0xa6f   : > { %v6007_v31 = vsub.f32 1.5, %v6006_v42 }
 0xa70   : > { %v7927_v36 = vpop.eup %7926  ;;  %v6187_v45 = vadd.f32 %v12157_v0, %v6151_v34  ;;  %v5766_v55 = vadd.f32 1e-05, %v5734_v49 }
 0xa71   : > { %v6008_v29 = vmul.f32 %v7925_v22, %v6007_v31  ;;  %v6014_v32 = vmul.f32 %v7927_v36, %v5765_v28  ;;  %vm6020_vm10 = vweird.f32 %v7927_v36 }
 0xa72   : > { %6219 = vst [vmem:[%s12173_s27 + $0xb0] sm:$0xff] %v6187_v45  ;;  %7928 = vrsqrt.f32 %v5766_v55  ;;  %vm6021_vm12 = vmor %vm6019_vm11, %vm6020_vm10  ;;  %vm6029_vm14 = vweird.f32 %v5766_v55 }
 0xa73   : > { %v6012_v56 = vsel %vm6011_vm9, %v7925_v22, %v6008_v29  ;;  %v6015_v1 = vmul.f32 %v7927_v36, %v6014_v32 }
 0xa74   : > { %v6116_v48 = vmul.f32 %v6012_v56, %v12224_v38 }
 0xa75   : > { %v6016_v2 = vmul.f32 0.5, %v6015_v1  ;;  %v5698_v30 = vpop.xlane.xlu2 %5697 }
 0xa76   : > { %v6152_v27 = vmul.f32 %v12149_v51, %v6116_v48  ;;  %v5735_v46 = vmul.f32 %v5698_v30, %v11954_v6 }
 0xa77   : > { %v6017_v21 = vsub.f32 1.5, %v6016_v2 }
 0xa78   : > { %v7929_v5 = vpop.eup %7928  ;;  %v6188_v7 = vadd.f32 %v12157_v0, %v6152_v27  ;;  %v5767_v19 = vadd.f32 1e-05, %v5735_v46 }
 0xa79   : > { %v6018_v8 = vmul.f32 %v7927_v36, %v6017_v21  ;;  %v6024_v11 = vmul.f32 %v7929_v5, %v5766_v55  ;;  %vm6030_vm13 = vweird.f32 %v7929_v5 }
 0xa7a   : > { %6220 = vst [vmem:[%s12173_s27 + $0xb8] sm:$0xff] %v6188_v7  ;;  %7930 = vrsqrt.f32 %v5767_v19  ;;  %vm6031_vm15 = vmor %vm6029_vm14, %vm6030_vm13  ;;  %vm6039_vm1 = vweird.f32 %v5767_v19 }
 0xa7b   : > { %v6022_v47 = vsel %vm6021_vm12, %v7927_v36, %v6018_v8  ;;  %v6025_v38 = vmul.f32 %v7929_v5, %v6024_v11 }
 0xa7c   : > { %v6117_v18 = vmul.f32 %v6022_v47, %v12235_v35 }
 0xa7d   : > { %v6026_v51 = vmul.f32 0.5, %v6025_v38  ;;  %v5700_v50 = vpop.xlane.xlu0 %5699 }
 0xa7e   : > { %v6153_v0 = vmul.f32 %v12410_v63, %v6117_v18  ;;  %v5736_v17 = vmul.f32 %v5700_v50, %v11954_v6 }
 0xa7f   : > { %v6027_v53 = vsub.f32 1.5, %v6026_v51 }
 0xa80   : > { %v7931_v33 = vpop.eup %7930  ;;  %v6189_v35 = vadd.f32 %v12417_v61, %v6153_v0  ;;  %v5768_v37 = vadd.f32 1e-05, %v5736_v17 }
 0xa81   : > { %v6028_v12 = vmul.f32 %v7929_v5, %v6027_v53  ;;  %v6034_v52 = vmul.f32 %v7931_v33, %v5767_v19  ;;  %vm6040_vm0 = vweird.f32 %v7931_v33 }
 0xa82   : > { %6221 = vst [vmem:[%s12173_s27 + $0xc0] sm:$0xff] %v6189_v35  ;;  %7932 = vrsqrt.f32 %v5768_v37  ;;  %vm6041_vm2 = vmor %vm6039_vm1, %vm6040_vm0  ;;  %vm6049_vm4 = vweird.f32 %v5768_v37 }
 0xa83   : > { %v6032_v59 = vsel %vm6031_vm15, %v7929_v5, %v6028_v12  ;;  %v6035_v58 = vmul.f32 %v7931_v33, %v6034_v52 }
 0xa84   : > { %v6118_v24 = vmul.f32 %v6032_v59, %v12246_v3 }
 0xa85   : > { %v6036_v39 = vmul.f32 0.5, %v6035_v58  ;;  %v5702_v25 = vpop.xlane.xlu1 %5701 }
 0xa86   : > { %v6154_v43 = vmul.f32 %v12410_v63, %v6118_v24  ;;  %v5737_v44 = vmul.f32 %v5702_v25, %v11954_v6 }
 0xa87   : > { %v6037_v26 = vsub.f32 1.5, %v6036_v39 }
 0xa88   : > { %v7933_v20 = vpop.eup %7932  ;;  %v6190_v40 = vadd.f32 %v12417_v61, %v6154_v43  ;;  %v5769_v22 = vadd.f32 1e-05, %v5737_v44 }
 0xa89   : > { %v6038_v54 = vmul.f32 %v7931_v33, %v6037_v26  ;;  %v6044_v28 = vmul.f32 %v7933_v20, %v5768_v37  ;;  %vm6050_vm3 = vweird.f32 %v7933_v20 }
 0xa8a   : > { %6222 = vst [vmem:[%s12173_s27 + $0xc8] sm:$0xff] %v6190_v40  ;;  %7934 = vrsqrt.f32 %v5769_v22  ;;  %vm6051_vm5 = vmor %vm6049_vm4, %vm6050_vm3  ;;  %vm6059_vm7 = vweird.f32 %v5769_v22 }
 0xa8b   : > { %v6042_v3 = vsel %vm6041_vm2, %v7931_v33, %v6038_v54  ;;  %v6045_v23 = vmul.f32 %v7933_v20, %v6044_v28 }
 0xa8c   : > { %v6119_v10 = vmul.f32 %v6042_v3, %v12257_v41 }
 0xa8d   : > { %v6046_v57 = vmul.f32 0.5, %v6045_v23  ;;  %v5704_v62 = vpop.xlane.xlu2 %5703 }
 0xa8e   : > { %v6155_v15 = vmul.f32 %v12410_v63, %v6119_v10  ;;  %v5738_v42 = vmul.f32 %v5704_v62, %v11954_v6 }
 0xa8f   : > { %v6047_v13 = vsub.f32 1.5, %v6046_v57 }
 0xa90   : > { %v7935_v34 = vpop.eup %7934  ;;  %v6191_v49 = vadd.f32 %v12417_v61, %v6155_v15  ;;  %v5770_v31 = vadd.f32 1e-05, %v5738_v42 }
 0xa91   : > { %v6048_v36 = vmul.f32 %v7933_v20, %v6047_v13  ;;  %v6054_v45 = vmul.f32 %v7935_v34, %v5769_v22  ;;  %vm6060_vm6 = vweird.f32 %v7935_v34 }
 0xa92   : > { %6223 = vst [vmem:[%s12173_s27 + $0xd0] sm:$0xff] %v6191_v49  ;;  %7936 = vrsqrt.f32 %v5770_v31  ;;  %vm6061_vm8 = vmor %vm6059_vm7, %vm6060_vm6  ;;  %vm6069_vm10 = vweird.f32 %v5770_v31 }
 0xa93   : > { %v6052_v41 = vsel %vm6051_vm5, %v7933_v20, %v6048_v36  ;;  %v6055_v55 = vmul.f32 %v7935_v34, %v6054_v45 }
 0xa94   : > { %v6120_v29 = vmul.f32 %v6052_v41, %v12268_v14 }
 0xa95   : > { %v6056_v32 = vmul.f32 0.5, %v6055_v55  ;;  %v5706_v56 = vpop.xlane.xlu0 %5705 }
 0xa96   : > { %v6156_v1 = vmul.f32 %v12410_v63, %v6120_v29  ;;  %v5739_v48 = vmul.f32 %v5706_v56, %v11954_v6 }
 0xa97   : > { %v6057_v2 = vsub.f32 1.5, %v6056_v32 }
 0xa98   : > { %v7937_v30 = vpop.eup %7936  ;;  %v6192_v27 = vadd.f32 %v12417_v61, %v6156_v1  ;;  %v5771_v46 = vadd.f32 1e-05, %v5739_v48 }
 0xa99   : > { %v6058_v21 = vmul.f32 %v7935_v34, %v6057_v2  ;;  %v6064_v5 = vmul.f32 %v7937_v30, %v5770_v31  ;;  %vm6070_vm9 = vweird.f32 %v7937_v30 }
 0xa9a   : > { %6224 = vst [vmem:[%s12173_s27 + $0xd8] sm:$0xff] %v6192_v27  ;;  %7938 = vrsqrt.f32 %v5771_v46  ;;  %vm6071_vm11 = vmor %vm6069_vm10, %vm6070_vm9  ;;  %vm6079_vm13 = vweird.f32 %v5771_v46 }
 0xa9b   : > { %v6062_v14 = vsel %vm6061_vm8, %v7935_v34, %v6058_v21  ;;  %v6065_v7 = vmul.f32 %v7937_v30, %v6064_v5 }
 0xa9c   : > { %v6121_v19 = vmul.f32 %v6062_v14, %v12279_v60 }
 0xa9d   : > { %v6066_v8 = vmul.f32 0.5, %v6065_v7  ;;  %v5708_v11 = vpop.xlane.xlu1 %5707 }
 0xa9e   : > { %v6157_v47 = vmul.f32 %v12410_v63, %v6121_v19  ;;  %v5740_v38 = vmul.f32 %v5708_v11, %v11954_v6 }
 0xa9f   : > { %v6067_v18 = vsub.f32 1.5, %v6066_v8 }
 0xaa0   : > { %v7939_v51 = vpop.eup %7938  ;;  %v6193_v50 = vadd.f32 %v12417_v61, %v6157_v47  ;;  %v5772_v0 = vadd.f32 1e-05, %v5740_v38 }
 0xaa1   : > { %v6068_v17 = vmul.f32 %v7937_v30, %v6067_v18  ;;  %v6074_v53 = vmul.f32 %v7939_v51, %v5771_v46  ;;  %vm6080_vm12 = vweird.f32 %v7939_v51 }
 0xaa2   : > { %6225 = vst [vmem:[%s12173_s27 + $0xe0] sm:$0xff] %v6193_v50  ;;  %7940 = vrsqrt.f32 %v5772_v0  ;;  %vm6081_vm14 = vmor %vm6079_vm13, %vm6080_vm12  ;;  %vm6089_vm0 = vweird.f32 %v5772_v0 }
 0xaa3   : > { %v6072_v60 = vsel %vm6071_vm11, %v7937_v30, %v6068_v17  ;;  %v6075_v33 = vmul.f32 %v7939_v51, %v6074_v53 }
 0xaa4   : > { %v6122_v35 = vmul.f32 %v6072_v60, %v12290_v16 }
 0xaa5   : > { %v6076_v37 = vmul.f32 0.5, %v6075_v33 }
 0xaa6   : > { %v6158_v6 = vmul.f32 %v12410_v63, %v6122_v35 }
 0xaa7   : > { %v6077_v12 = vsub.f32 1.5, %v6076_v37 }
 0xaa8   : > { %v7941_v52 = vpop.eup %7940  ;;  %v6194_v59 = vadd.f32 %v12417_v61, %v6158_v6 }
 0xaa9   : > { %v6078_v58 = vmul.f32 %v7939_v51, %v6077_v12  ;;  %v6084_v24 = vmul.f32 %v7941_v52, %v5772_v0  ;;  %vm6090_vm15 = vweird.f32 %v7941_v52 }
 0xaaa   : > { %6226 = vst [vmem:[%s12173_s27 + $0xe8] sm:$0xff] %v6194_v59  ;;  %vm6091_vm1 = vmor %vm6089_vm0, %vm6090_vm15 }
 0xaab   : > { %v6082_v39 = vsel %vm6081_vm14, %v7939_v51, %v6078_v58  ;;  %v6085_v25 = vmul.f32 %v7941_v52, %v6084_v24 }
 0xaac   : > { %v6123_v16 = vmul.f32 %v6082_v39, %v12300_v4 }
 0xaad   : > { %v6086_v43 = vmul.f32 0.5, %v6085_v25 }
 0xaae   : > { %v6159_v44 = vmul.f32 %v12410_v63, %v6123_v16 }
 0xaaf   : > { %v6087_v26 = vsub.f32 1.5, %v6086_v43 }
 0xab0   : > { %v6195_v20 = vadd.f32 %v12417_v61, %v6159_v44 }
 0xab1   : > { %v6088_v40 = vmul.f32 %v7941_v52, %v6087_v26 }
 0xab2   : > { %6227 = vst [vmem:[%s12173_s27 + $0xf0] sm:$0xff] %v6195_v20 }
 0xab3   : > { %v6092_v4 = vsel %vm6091_vm1, %v7941_v52, %v6088_v40 }
 0xab4   : > { %v6124_v22 = vmul.f32 %v6092_v4, %v12311_v9 }
 0xab6   : > { %v6160_v54 = vmul.f32 %v12410_v63, %v6124_v22 }
 0xab8   : > { %v6196_v28 = vadd.f32 %v12417_v61, %v6160_v54 }
 0xaba   : > { %6228 = vst [vmem:[%s12173_s27 + $0xf8] sm:$0xff] %v6196_v28 }
 0xabb   : > { %8212 = shalt.err (!%p8209_p3)
}
 0xabc   : > { %s8283_s1 = smov 128   ;;  %s8284_s27 = smov 8  }
 0xabd   : > { %7655 = dma.vmem_to_hbm [thread:$0]  (%p8424_p13), %s6417_s21, 4096, %s6419_s3, %s6399_s16, %s8283_s1, %s8283_s1, %s8284_s27  }
 0xabe PF: > { %s6447_s26 = sand.u32 1, %s8255_s30   ;;  %p13894_p5 = scmp.ge.s32.totalorder %s8267_s12, 2 }
 0xabf   : > { %s6448_s13 = scalar_lea.sflag [#allocation4], %s6447_s26 }
 0xac0   : > { %p7680_p12 = pnand %p13894_p5, %p8429_p4 }
 0xac2   : > { %p7681_p8 = pneg %p7680_p12 }
 0xac4   : > { %8246 = dma.done.wait (%p7681_p8), %s6448_s13, 4096  }
 0xac5   : > { %8248 = vsyncadd (%p7681_p8), %s6448_s13, 4294963200  ;;  %s6458_s29 = scalar_lea.sflag [#allocation15], %s6447_s26 }
 0xac6   : > { %8250 = dma.done.wait (%p7681_p8), %s6458_s29, 128  }
 0xac7   : > { %8252 = vsyncadd (%p7681_p8), %s6458_s29, 4294967168  ;;  %p29_p13 = scmp.ge.s32.totalorder %s8404_s18, 4   ;;  %s13895_s30 = smov %s8259_s10 }
 0xac8   : > { %s13896_s10 = smov %s8263_s11  ;;  %s13897_s11 = smov %s8416_s24 }
 0xac9   : > { %s13898_s12 = smov %s8404_s18  ;;  %31 = sbr.rel (!%p29_p13) target bundleno = 14 (0xe), region = 134 }
 0xace   :  { %6464 = vsyncpa [#allocation3], 1 }
 0xacf   :  { %6466 = vsyncpa [#allocation3 + $0x1], 1 }
 0xad0   :  { %6467 = vsyncpa [#allocation6], 1 }
 0xad1   :  { %6468 = vsyncpa [#allocation9], 1 }
 0xad2   :  { %6469 = vsyncpa [#allocation12], 1 }
 0xad3   :  { %6470 = vsyncpa [#allocation4], 1 }
 0xad4   :  { %6472 = vsyncpa [#allocation4 + $0x1], 1 }
 0xad5   :  { %6473 = vsyncpa [#allocation15], 1 }
 0xad6   :  { %6475 = vsyncpa [#allocation15 + $0x1], 1 }

</bundles_post_ra>
